<compile_context>
chip_gen: v5e
topology: v5e:2x2
jax: 0.10.0
libtpu: 0.0.40
codegen_flags: <defaults>
</compile_context>

<pallas_src>
import functools

import jax
import jax.numpy as jnp
from jax import lax
from jax.experimental import pallas as pl
from jax.experimental.pallas import tpu as pltpu


# -----------------------------------------------------------------------------
# Model configurations.
# FULL_CONFIG reproduces the exact PyTorch dims (seq lens 1000/1000/1000/1000/100
# so the flattened conv output is 10*(4*996+96)=40800, linears 40800->8192->2048
# ->1024->256->1). SMALL_CONFIG is the same architecture scaled down so the demo
# in __main__ runs in seconds on TPU; the kernels are size-generic and work for
# either config.
# -----------------------------------------------------------------------------
FULL_CONFIG = dict(
    seq_lens=(1000, 1000, 1000, 1000, 100),
    conv_in=(20, 20, 30, 30, 4),
    conv_mid=256,
    conv_out=10,
    linear_sizes=(8192, 2048, 1024, 256, 1),
)

SMALL_CONFIG = dict(
    seq_lens=(68, 68, 68, 68, 36),
    conv_in=(20, 20, 30, 30, 4),
    conv_mid=256,
    conv_out=10,
    linear_sizes=(512, 256, 128, 64, 1),   # flatten = 10*(4*64+32) = 2880
)

_MAX_TN = 1024   # output-feature tile of the linear kernels
_MAX_TK = 2048   # reduction tile of the linear kernels (1024x2048 f32 = 8 MiB)


def _round_up(v, m):
    return ((v + m - 1) // m) * m


def _linear_k_layout(nin):
    """Chunk the reduction dim K into nk chunks of size tk (kp = nk*tk >= nin).

    Keeps per-chunk size <= _MAX_TK, chunk size a multiple of 512 (lane/sublane
    friendly) and padding minimal (e.g. 40800 -> 20 x 2048 = 40960).
    """
    if nin <= _MAX_TK:
        return 1, nin, nin                      # single chunk, no padding
    nk = -(-nin // _MAX_TK)                     # ceil
    tk = _round_up(-(-nin // nk), 512)
    return nk, tk, nk * tk


# -----------------------------------------------------------------------------
# Fused conv-branch kernel:
#   Conv1d(Cin->Cmid,3) -> ReLU -> Conv1d(Cmid->Cout,3) -> ReLU   (valid conv)
# Each conv is ONE MXU matmul: the 3 taps are folded into the contraction by
# pre-reshaping the weight to (Cout, 3*Cin) at init and stacking three shifted
# slices of the input to (3*Cin, L-2) in-kernel.
# Same-shape branches are stacked on a leading "group" axis G; grid = (G, B).
# -----------------------------------------------------------------------------
def _conv_branch_kernel(x_ref, w1_ref, b1_ref, w2_ref, b2_ref, o_ref):
    x = x_ref[0, 0]        # (Cin, L)
    w1 = w1_ref[0]         # (Cmid, 3*Cin)
    b1 = b1_ref[0]         # (Cmid, 1)
    w2 = w2_ref[0]         # (Cout, 3*Cmid)
    b2 = b2_ref[0]         # (Cout, 1)
    L = x.shape[1]
    L1, L2 = L - 2, L - 4

    xk = jnp.concatenate([x[:, 0:L1], x[:, 1:L1 + 1], x[:, 2:L1 + 2]], axis=0)
    h = jnp.dot(w1, xk, preferred_element_type=jnp.float32) + b1
    h = jnp.maximum(h, 0.0)                       # ReLU (dropout = identity)

    hk = jnp.concatenate([h[:, 0:L2], h[:, 1:L2 + 1], h[:, 2:L2 + 2]], axis=0)
    y = jnp.dot(w2, hk, preferred_element_type=jnp.float32) + b2
    y = jnp.maximum(y, 0.0)                       # ReLU

    o_ref[0, 0] = y.astype(o_ref.dtype)


def conv_branches(xs, w1s, b1s, w2s, b2s):
    """xs: (G, B, Cin, L); stacked fused weights -> (G, B, Cout, L-4)."""
    G, B, Cin, L = xs.shape
    Cmid = w1s.shape[1]
    Cout = w2s.shape[1]
    Lout = L - 4
    return pl.pallas_call(
        _conv_branch_kernel,
        out_shape=jax.ShapeDtypeStruct((G, B, Cout, Lout), jnp.float32),
        grid_spec=pltpu.PrefetchScalarGridSpec(
            num_scalar_prefetch=0,
            grid=(G, B),
            in_specs=[
                pl.BlockSpec((1, 1, Cin, L), lambda g, b: (g, b, 0, 0)),
                pl.BlockSpec((1, Cmid, 3 * Cin), lambda g, b: (g, 0, 0)),
                pl.BlockSpec((1, Cmid, 1), lambda g, b: (g, 0, 0)),
                pl.BlockSpec((1, Cout, 3 * Cmid), lambda g, b: (g, 0, 0)),
                pl.BlockSpec((1, Cout, 1), lambda g, b: (g, 0, 0)),
            ],
            out_specs=pl.BlockSpec((1, 1, Cout, Lout), lambda g, b: (g, b, 0, 0)),
        ),
        compiler_params=pltpu.CompilerParams(
            dimension_semantics=("parallel", "parallel")),
    )(xs, w1s, b1s, w2s, b2s)


# -----------------------------------------------------------------------------
# Linear kernel: y = x @ W^T + b (optional ReLU).
#   x is reshaped to (nk, B, tk) and kept fully VMEM-resident (constant
#   index_map -> DMA'd once); the weight streams through HBM in (tn, tk) tiles;
#   an f32 VMEM accumulator is reduced over the K grid axis and the
#   bias/ReLU/store happen at the last K step.
# -----------------------------------------------------------------------------
def _linear_kernel(x_ref, w_ref, b_ref, o_ref, acc_ref, *, apply_relu):
    k = pl.program_id(1)

    @pl.when(k == 0)
    def _():
        acc_ref[...] = jnp.zeros_like(acc_ref)

    # (B, tk) x (tn, tk) contracted on tk -> (B, tn)
    acc_ref[...] += lax.dot_general(
        x_ref[k], w_ref[...], (((1,), (1,)), ((), ())),
        preferred_element_type=jnp.float32)

    @pl.when(k == pl.num_programs(1) - 1)
    def _():
        out = acc_ref[...] + b_ref[...]
        if apply_relu:
            out = jnp.maximum(out, 0.0)
        o_ref[...] = out.astype(o_ref.dtype)


def linear(x, lp, *, apply_relu):
    """x: (B, K); lp['w']: (N, Kp) pre-padded at init; lp['b']: (1, N)."""
    B, K = x.shape
    N, Kp = lp["w"].shape
    nk, tk, kp = _linear_k_layout(K)
    assert kp == Kp, (kp, Kp)
    tn = N if N <= _MAX_TN else _MAX_TN
    if Kp > K:                                     # pad the small activation only
        x = jnp.pad(x, ((0, 0), (0, Kp - K)))
    xr = x.reshape(B, nk, tk).transpose(1, 0, 2)   # (nk, B, tk): K-chunks on axis 0

    return pl.pallas_call(
        functools.partial(_linear_kernel, apply_relu=apply_relu),
        out_shape=jax.ShapeDtypeStruct((B, N), jnp.float32),
        grid_spec=pltpu.PrefetchScalarGridSpec(
            num_scalar_prefetch=0,
            grid=(N // tn, nk),
            in_specs=[
                pl.BlockSpec((nk, B, tk), lambda n, k: (0, 0, 0)),  # resident x
                pl.BlockSpec((tn, tk), lambda n, k: (n, k)),        # streamed W tile
                pl.BlockSpec((1, tn), lambda n, k: (0, n)),
            ],
            out_specs=pl.BlockSpec((B, tn), lambda n, k: (0, n)),
            scratch_shapes=[pltpu.VMEM((B, tn), jnp.float32)],
        ),
        compiler_params=pltpu.CompilerParams(
            dimension_semantics=("parallel", "arbitrary"),
            # 8 MiB weight tile double-buffered (~16 MiB) + resident x + acc;
            # 40 MiB is safe on v5e/v6e (128 MiB VMEM) and v7x (64 MiB/TC).
            vmem_limit_bytes=40 * 1024 * 1024),
    )(xr, lp["w"], lp["b"])


# -----------------------------------------------------------------------------
# Parameter init (PyTorch-default-style U(-1/sqrt(fan_in), +1/sqrt(fan_in))).
# Conv weights are pre-fused to (Cout, 3*Cin); linear weights pre-padded on K.
# -----------------------------------------------------------------------------
def _init_conv_branch(key, cin, cmid, cout, ksz=3):
    k1w, k1b, k2w, k2b = jax.random.split(key, 4)
    bound1 = 1.0 / (cin * ksz) ** 0.5
    w1 = jax.random.uniform(k1w, (cmid, cin, ksz), jnp.float32, -bound1, bound1)
    b1 = jax.random.uniform(k1b, (cmid,), jnp.float32, -bound1, bound1)
    bound2 = 1.0 / (cmid * ksz) ** 0.5
    w2 = jax.random.uniform(k2w, (cout, cmid, ksz), jnp.float32, -bound2, bound2)
    b2 = jax.random.uniform(k2b, (cout,), jnp.float32, -bound2, bound2)
    # Fused tap layout: Wf[o, k*Cin + c] = W[o, c, k]
    w1f = jnp.transpose(w1, (0, 2, 1)).reshape(cmid, ksz * cin)
    w2f = jnp.transpose(w2, (0, 2, 1)).reshape(cout, ksz * cmid)
    return dict(w1=w1f, b1=b1.reshape(cmid, 1), w2=w2f, b2=b2.reshape(cout, 1))


def _init_linear(key, nout, nin):
    assert nout <= _MAX_TN or nout % _MAX_TN == 0, nout
    kw, kb = jax.random.split(key)
    bound = 1.0 / nin ** 0.5
    w = jax.random.uniform(kw, (nout, nin), jnp.float32, -bound, bound)
    b = jax.random.uniform(kb, (nout,), jnp.float32, -bound, bound)
    _, _, kp = _linear_k_layout(nin)
    if kp > nin:
        w = jnp.pad(w, ((0, 0), (0, kp - nin)))    # padded ONCE, at init
    return dict(w=w, b=b.reshape(1, nout))


def init_params(key, cfg):
    cin = cfg["conv_in"]
    cmid, cout = cfg["conv_mid"], cfg["conv_out"]
    keys = jax.random.split(key, 10)
    branch = [_init_conv_branch(keys[i], cin[i], cmid, cout) for i in range(5)]

    def stacked(idx):
        return tuple(jnp.stack([branch[i][name] for i in idx])
                     for name in ("w1", "b1", "w2", "b2"))

    p = {
        "conv12": stacked([0, 1]),   # X_ori / X_mut       (Cin = 20)
        "conv34": stacked([2, 3]),   # X_orihhb / X_muthhb (Cin = 30)
        "conv5": stacked([4]),       # X_na                (Cin = 4)
    }
    in_feat = cout * sum(l - 4 for l in cfg["seq_lens"])
    sizes = (in_feat,) + tuple(cfg["linear_sizes"])
    for i in range(5):
        p[f"linear{i + 1}"] = _init_linear(keys[5 + i], sizes[i + 1], sizes[i])
    return p


# -----------------------------------------------------------------------------
# Forward pass (mirrors CNNRegressor.forward; dropout = identity / eval mode)
# -----------------------------------------------------------------------------
def cnn_regressor_forward(params, X_ori, X_mut, X_orihhb, X_muthhb, X_na):
    # permute(0, 2, 1): (B, L, C) -> (B, C, L)
    xs = [jnp.transpose(X, (0, 2, 1))
          for X in (X_ori, X_mut, X_orihhb, X_muthhb, X_na)]

    c12 = conv_branches(jnp.stack([xs[0], xs[1]]), *params["conv12"])
    c34 = conv_branches(jnp.stack([xs[2], xs[3]]), *params["conv34"])
    c5 = conv_branches(xs[4][None], *params["conv5"])

    out = jnp.concatenate([c12[0], c12[1], c34[0], c34[1], c5[0]], axis=2)
    out = out.reshape(out.shape[0], -1)            # torch.flatten(output, 1, 2)

    out = linear(out, params["linear1"], apply_relu=True)   # + dropout (identity)
    out = linear(out, params["linear2"], apply_relu=True)
    out = linear(out, params["linear3"], apply_relu=True)
    out = linear(out, params["linear4"], apply_relu=True)
    out = linear(out, params["linear5"], apply_relu=False)
    return out                                     # (B, 1)


# -----------------------------------------------------------------------------
# Pure-JAX reference (for a numerical sanity check of the Pallas kernels)
# -----------------------------------------------------------------------------
def _ref_conv_fused(x, wf, b):
    """x (B, Cin, L), wf (Co, 3*Cin), b (Co, 1) -> valid conv (B, Co, L-2)."""
    L1 = x.shape[-1] - 2
    xk = jnp.concatenate([x[:, :, k:k + L1] for k in range(3)], axis=1)
    return jnp.einsum("of,bfl->bol", wf, xk) + b[None]


def reference_forward(params, X_ori, X_mut, X_orihhb, X_muthhb, X_na):
    xs = [jnp.transpose(X, (0, 2, 1))
          for X in (X_ori, X_mut, X_orihhb, X_muthhb, X_na)]
    outs = [None] * 5
    for name, idx in (("conv12", (0, 1)), ("conv34", (2, 3)), ("conv5", (4,))):
        w1s, b1s, w2s, b2s = params[name]
        for g, i in enumerate(idx):
            h = jnp.maximum(_ref_conv_fused(xs[i], w1s[g], b1s[g]), 0.0)
            outs[i] = jnp.maximum(_ref_conv_fused(h, w2s[g], b2s[g]), 0.0)
    out = jnp.concatenate(outs, axis=2).reshape(xs[0].shape[0], -1)
    for i in range(1, 6):
        lp = params[f"linear{i}"]
        w = lp["w"][:, :out.shape[1]]              # drop init-time K padding
        out = out @ w.T + lp["b"]
        if i < 5:
            out = jnp.maximum(out, 0.0)
    return out


if __name__ == "__main__":
    cfg = SMALL_CONFIG   # same architecture, small dims (FULL_CONFIG = exact PyTorch dims)
    B = 2
    key = jax.random.PRNGKey(0)
    ks = jax.random.split(key, 6)
    seq, cin = cfg["seq_lens"], cfg["conv_in"]
    X_ori = jax.random.normal(ks[0], (B, seq[0], cin[0]), jnp.float32)
    X_mut = jax.random.normal(ks[1], (B, seq[1], cin[1]), jnp.float32)
    X_orihhb = jax.random.normal(ks[2], (B, seq[2], cin[2]), jnp.float32)
    X_muthhb = jax.random.normal(ks[3], (B, seq[3], cin[3]), jnp.float32)
    X_na = jax.random.normal(ks[4], (B, seq[4], cin[4]), jnp.float32)

    params = init_params(ks[5], cfg)

    fwd = jax.jit(cnn_regressor_forward)
    out = jax.block_until_ready(fwd(params, X_ori, X_mut, X_orihhb, X_muthhb, X_na))
    assert out.shape == (B, 1), out.shape
    assert bool(jnp.all(jnp.isfinite(out)))

    ref = jax.block_until_ready(
        jax.jit(reference_forward)(params, X_ori, X_mut, X_orihhb, X_muthhb, X_na))
    assert bool(jnp.allclose(out, ref, rtol=5e-3, atol=5e-3)), (out, ref)

    print("KERNEL_OK")
</pallas_src>

<mosaic_0001>
module attributes {stable_mosaic.version = 11 : i64} {
  func.func @_conv_branch_kernel(%arg0: i32, %arg1: i32, %arg2: memref<1x1x30x68xf32, #tpu.memory_space<vmem>>, %arg3: memref<1x256x90xf32, #tpu.memory_space<vmem>>, %arg4: memref<1x256x1xf32, #tpu.memory_space<vmem>>, %arg5: memref<1x10x768xf32, #tpu.memory_space<vmem>>, %arg6: memref<1x10x1xf32, #tpu.memory_space<vmem>>, %arg7: memref<1x1x10x64xf32, #tpu.memory_space<vmem>>) attributes {dimension_semantics = [#tpu.dimension_semantics<parallel>, #tpu.dimension_semantics<parallel>], iteration_bounds = array<i64: 2, 2>, scalar_prefetch = 0 : i64, scratch_operands = 0 : i64, tpu.core_type = #tpu.core_type<tc>, window_params = [{transform_indices = @transform_0, window_bounds = array<i64: 1, 1, 30, 68>}, {transform_indices = @transform_1, window_bounds = array<i64: 1, 256, 90>}, {transform_indices = @transform_2, window_bounds = array<i64: 1, 256, 1>}, {transform_indices = @transform_3, window_bounds = array<i64: 1, 10, 768>}, {transform_indices = @transform_4, window_bounds = array<i64: 1, 10, 1>}, {transform_indices = @transform_5, window_bounds = array<i64: 1, 1, 10, 64>}]} {
    %c0 = arith.constant 0 : index
    %c0_0 = arith.constant 0 : index
    %c0_1 = arith.constant 0 : index
    %c0_2 = arith.constant 0 : index
    %0 = vector.load %arg2[%c0, %c0_0, %c0_1, %c0_2] : memref<1x1x30x68xf32, #tpu.memory_space<vmem>>, vector<1x1x30x68xf32>
    %1 = vector.shape_cast %0 : vector<1x1x30x68xf32> to vector<30x68xf32>
    %c0_3 = arith.constant 0 : index
    %c0_4 = arith.constant 0 : index
    %c0_5 = arith.constant 0 : index
    %2 = vector.load %arg3[%c0_3, %c0_4, %c0_5] : memref<1x256x90xf32, #tpu.memory_space<vmem>>, vector<1x256x90xf32>
    %3 = vector.shape_cast %2 : vector<1x256x90xf32> to vector<256x90xf32>
    %c0_6 = arith.constant 0 : index
    %c0_7 = arith.constant 0 : index
    %c0_8 = arith.constant 0 : index
    %4 = vector.load %arg4[%c0_6, %c0_7, %c0_8] : memref<1x256x1xf32, #tpu.memory_space<vmem>>, vector<1x256x1xf32>
    %5 = vector.shape_cast %4 : vector<1x256x1xf32> to vector<256x1xf32>
    %c0_9 = arith.constant 0 : index
    %c0_10 = arith.constant 0 : index
    %c0_11 = arith.constant 0 : index
    %6 = vector.load %arg5[%c0_9, %c0_10, %c0_11] : memref<1x10x768xf32, #tpu.memory_space<vmem>>, vector<1x10x768xf32>
    %7 = vector.shape_cast %6 : vector<1x10x768xf32> to vector<10x768xf32>
    %c0_12 = arith.constant 0 : index
    %c0_13 = arith.constant 0 : index
    %c0_14 = arith.constant 0 : index
    %8 = vector.load %arg6[%c0_12, %c0_13, %c0_14] : memref<1x10x1xf32, #tpu.memory_space<vmem>>, vector<1x10x1xf32>
    %9 = vector.shape_cast %8 : vector<1x10x1xf32> to vector<10x1xf32>
    %10 = vector.extract_strided_slice %1 {offsets = [0, 0], sizes = [30, 66], strides = [1, 1]} : vector<30x68xf32> to vector<30x66xf32>
    %11 = vector.extract_strided_slice %1 {offsets = [0, 1], sizes = [30, 66], strides = [1, 1]} : vector<30x68xf32> to vector<30x66xf32>
    %12 = vector.extract_strided_slice %1 {offsets = [0, 2], sizes = [30, 66], strides = [1, 1]} : vector<30x68xf32> to vector<30x66xf32>
    %13 = tpu.concatenate %10, %11, %12 in 0 : vector<30x66xf32>, vector<30x66xf32>, vector<30x66xf32> -> vector<90x66xf32>
    %cst = arith.constant dense<0.000000e+00> : vector<256x66xf32>
    %14 = tpu.matmul %3, %13, %cst {dimension_numbers = #tpu.dot_dimension_numbers<[1], [0], [0], [1], [0, 0, 1, 1], [], []>} : vector<256x90xf32>, vector<90x66xf32>, vector<256x66xf32> -> vector<256x66xf32>
    %15 = vector.broadcast %5 : vector<256x1xf32> to vector<256x66xf32>
    %16 = arith.addf %14, %15 : vector<256x66xf32>
    %cst_15 = arith.constant 0.000000e+00 : f32
    %17 = vector.broadcast %cst_15 : f32 to vector<256x66xf32>
    %18 = arith.maximumf %16, %17 : vector<256x66xf32>
    %19 = vector.extract_strided_slice %18 {offsets = [0, 0], sizes = [256, 64], strides = [1, 1]} : vector<256x66xf32> to vector<256x64xf32>
    %20 = vector.extract_strided_slice %18 {offsets = [0, 1], sizes = [256, 64], strides = [1, 1]} : vector<256x66xf32> to vector<256x64xf32>
    %21 = vector.extract_strided_slice %18 {offsets = [0, 2], sizes = [256, 64], strides = [1, 1]} : vector<256x66xf32> to vector<256x64xf32>
    %22 = tpu.concatenate %19, %20, %21 in 0 : vector<256x64xf32>, vector<256x64xf32>, vector<256x64xf32> -> vector<768x64xf32>
    %cst_16 = arith.constant dense<0.000000e+00> : vector<10x64xf32>
    %23 = tpu.matmul %7, %22, %cst_16 {dimension_numbers = #tpu.dot_dimension_numbers<[1], [0], [0], [1], [0, 0, 1, 1], [], []>} : vector<10x768xf32>, vector<768x64xf32>, vector<10x64xf32> -> vector<10x64xf32>
    %24 = vector.broadcast %9 : vector<10x1xf32> to vector<10x64xf32>
    %25 = arith.addf %23, %24 : vector<10x64xf32>
    %cst_17 = arith.constant 0.000000e+00 : f32
    %26 = vector.broadcast %cst_17 : f32 to vector<10x64xf32>
    %27 = arith.maximumf %25, %26 : vector<10x64xf32>
    %c0_18 = arith.constant 0 : index
    %c0_19 = arith.constant 0 : index
    %c0_20 = arith.constant 0 : index
    %c0_21 = arith.constant 0 : index
    %28 = vector.load %arg7[%c0_18, %c0_19, %c0_20, %c0_21] : memref<1x1x10x64xf32, #tpu.memory_space<vmem>>, vector<1x1x10x64xf32>
    %29 = vector.shape_cast %28 : vector<1x1x10x64xf32> to vector<10x64xf32>
    %30 = vector.shape_cast %27 : vector<10x64xf32> to vector<1x1x10x64xf32>
    tpu.vector_store %arg7[%c0_18, %c0_19, %c0_20, %c0_21], %30 {strides = array<i32>} : memref<1x1x10x64xf32, #tpu.memory_space<vmem>>, vector<1x1x10x64xf32>,
    return
  }
  func.func @transform_0(%arg0: i32, %arg1: i32) -> (i32, i32, i32, i32) {
    %c0_i32 = arith.constant 0 : i32
    %c0_i32_0 = arith.constant 0 : i32
    %c0_i32_1 = arith.constant 0 : i32
    return %arg0, %arg1, %c0_i32, %c0_i32_0 : i32, i32, i32, i32
  }
  func.func @transform_1(%arg0: i32, %arg1: i32) -> (i32, i32, i32) {
    %c0_i32 = arith.constant 0 : i32
    %c0_i32_0 = arith.constant 0 : i32
    %c0_i32_1 = arith.constant 0 : i32
    return %arg0, %c0_i32, %c0_i32_0 : i32, i32, i32
  }
  func.func @transform_2(%arg0: i32, %arg1: i32) -> (i32, i32, i32) {
    %c0_i32 = arith.constant 0 : i32
    %c0_i32_0 = arith.constant 0 : i32
    %c0_i32_1 = arith.constant 0 : i32
    return %arg0, %c0_i32, %c0_i32_0 : i32, i32, i32
  }
  func.func @transform_3(%arg0: i32, %arg1: i32) -> (i32, i32, i32) {
    %c0_i32 = arith.constant 0 : i32
    %c0_i32_0 = arith.constant 0 : i32
    %c0_i32_1 = arith.constant 0 : i32
    return %arg0, %c0_i32, %c0_i32_0 : i32, i32, i32
  }
  func.func @transform_4(%arg0: i32, %arg1: i32) -> (i32, i32, i32) {
    %c0_i32 = arith.constant 0 : i32
    %c0_i32_0 = arith.constant 0 : i32
    %c0_i32_1 = arith.constant 0 : i32
    return %arg0, %c0_i32, %c0_i32_0 : i32, i32, i32
  }
  func.func @transform_5(%arg0: i32, %arg1: i32) -> (i32, i32, i32, i32) {
    %c0_i32 = arith.constant 0 : i32
    %c0_i32_0 = arith.constant 0 : i32
    %c0_i32_1 = arith.constant 0 : i32
    return %arg0, %arg1, %c0_i32, %c0_i32_0 : i32, i32, i32, i32
  }
}

module attributes {stable_mosaic.version = 11 : i64} {
  func.func @_conv_branch_kernel(%arg0: i32, %arg1: i32, %arg2: memref<1x1x4x36xf32, #tpu.memory_space<vmem>>, %arg3: memref<1x256x12xf32, #tpu.memory_space<vmem>>, %arg4: memref<1x256x1xf32, #tpu.memory_space<vmem>>, %arg5: memref<1x10x768xf32, #tpu.memory_space<vmem>>, %arg6: memref<1x10x1xf32, #tpu.memory_space<vmem>>, %arg7: memref<1x1x10x32xf32, #tpu.memory_space<vmem>>) attributes {dimension_semantics = [#tpu.dimension_semantics<parallel>, #tpu.dimension_semantics<parallel>], iteration_bounds = array<i64: 1, 2>, scalar_prefetch = 0 : i64, scratch_operands = 0 : i64, tpu.core_type = #tpu.core_type<tc>, window_params = [{transform_indices = @transform_0, window_bounds = array<i64: 1, 1, 4, 36>}, {transform_indices = @transform_1, window_bounds = array<i64: 1, 256, 12>}, {transform_indices = @transform_2, window_bounds = array<i64: 1, 256, 1>}, {transform_indices = @transform_3, window_bounds = array<i64: 1, 10, 768>}, {transform_indices = @transform_4, window_bounds = array<i64: 1, 10, 1>}, {transform_indices = @transform_5, window_bounds = array<i64: 1, 1, 10, 32>}]} {
    %c0 = arith.constant 0 : index
    %c0_0 = arith.constant 0 : index
    %c0_1 = arith.constant 0 : index
    %c0_2 = arith.constant 0 : index
    %0 = vector.load %arg2[%c0, %c0_0, %c0_1, %c0_2] : memref<1x1x4x36xf32, #tpu.memory_space<vmem>>, vector<1x1x4x36xf32>
    %1 = vector.shape_cast %0 : vector<1x1x4x36xf32> to vector<4x36xf32>
    %c0_3 = arith.constant 0 : index
    %c0_4 = arith.constant 0 : index
    %c0_5 = arith.constant 0 : index
    %2 = vector.load %arg3[%c0_3, %c0_4, %c0_5] : memref<1x256x12xf32, #tpu.memory_space<vmem>>, vector<1x256x12xf32>
    %3 = vector.shape_cast %2 : vector<1x256x12xf32> to vector<256x12xf32>
    %c0_6 = arith.constant 0 : index
    %c0_7 = arith.constant 0 : index
    %c0_8 = arith.constant 0 : index
    %4 = vector.load %arg4[%c0_6, %c0_7, %c0_8] : memref<1x256x1xf32, #tpu.memory_space<vmem>>, vector<1x256x1xf32>
    %5 = vector.shape_cast %4 : vector<1x256x1xf32> to vector<256x1xf32>
    %c0_9 = arith.constant 0 : index
    %c0_10 = arith.constant 0 : index
    %c0_11 = arith.constant 0 : index
    %6 = vector.load %arg5[%c0_9, %c0_10, %c0_11] : memref<1x10x768xf32, #tpu.memory_space<vmem>>, vector<1x10x768xf32>
    %7 = vector.shape_cast %6 : vector<1x10x768xf32> to vector<10x768xf32>
    %c0_12 = arith.constant 0 : index
    %c0_13 = arith.constant 0 : index
    %c0_14 = arith.constant 0 : index
    %8 = vector.load %arg6[%c0_12, %c0_13, %c0_14] : memref<1x10x1xf32, #tpu.memory_space<vmem>>, vector<1x10x1xf32>
    %9 = vector.shape_cast %8 : vector<1x10x1xf32> to vector<10x1xf32>
    %10 = vector.extract_strided_slice %1 {offsets = [0, 0], sizes = [4, 34], strides = [1, 1]} : vector<4x36xf32> to vector<4x34xf32>
    %11 = vector.extract_strided_slice %1 {offsets = [0, 1], sizes = [4, 34], strides = [1, 1]} : vector<4x36xf32> to vector<4x34xf32>
    %12 = vector.extract_strided_slice %1 {offsets = [0, 2], sizes = [4, 34], strides = [1, 1]} : vector<4x36xf32> to vector<4x34xf32>
    %13 = tpu.concatenate %10, %11, %12 in 0 : vector<4x34xf32>, vector<4x34xf32>, vector<4x34xf32> -> vector<12x34xf32>
    %cst = arith.constant dense<0.000000e+00> : vector<256x34xf32>
    %14 = tpu.matmul %3, %13, %cst {dimension_numbers = #tpu.dot_dimension_numbers<[1], [0], [0], [1], [0, 0, 1, 1], [], []>} : vector<256x12xf32>, vector<12x34xf32>, vector<256x34xf32> -> vector<256x34xf32>
    %15 = vector.broadcast %5 : vector<256x1xf32> to vector<256x34xf32>
    %16 = arith.addf %14, %15 : vector<256x34xf32>
    %cst_15 = arith.constant 0.000000e+00 : f32
    %17 = vector.broadcast %cst_15 : f32 to vector<256x34xf32>
    %18 = arith.maximumf %16, %17 : vector<256x34xf32>
    %19 = vector.extract_strided_slice %18 {offsets = [0, 0], sizes = [256, 32], strides = [1, 1]} : vector<256x34xf32> to vector<256x32xf32>
    %20 = vector.extract_strided_slice %18 {offsets = [0, 1], sizes = [256, 32], strides = [1, 1]} : vector<256x34xf32> to vector<256x32xf32>
    %21 = vector.extract_strided_slice %18 {offsets = [0, 2], sizes = [256, 32], strides = [1, 1]} : vector<256x34xf32> to vector<256x32xf32>
    %22 = tpu.concatenate %19, %20, %21 in 0 : vector<256x32xf32>, vector<256x32xf32>, vector<256x32xf32> -> vector<768x32xf32>
    %cst_16 = arith.constant dense<0.000000e+00> : vector<10x32xf32>
    %23 = tpu.matmul %7, %22, %cst_16 {dimension_numbers = #tpu.dot_dimension_numbers<[1], [0], [0], [1], [0, 0, 1, 1], [], []>} : vector<10x768xf32>, vector<768x32xf32>, vector<10x32xf32> -> vector<10x32xf32>
    %24 = vector.broadcast %9 : vector<10x1xf32> to vector<10x32xf32>
    %25 = arith.addf %23, %24 : vector<10x32xf32>
    %cst_17 = arith.constant 0.000000e+00 : f32
    %26 = vector.broadcast %cst_17 : f32 to vector<10x32xf32>
    %27 = arith.maximumf %25, %26 : vector<10x32xf32>
    %c0_18 = arith.constant 0 : index
    %c0_19 = arith.constant 0 : index
    %c0_20 = arith.constant 0 : index
    %c0_21 = arith.constant 0 : index
    %28 = vector.load %arg7[%c0_18, %c0_19, %c0_20, %c0_21] : memref<1x1x10x32xf32, #tpu.memory_space<vmem>>, vector<1x1x10x32xf32>
    %29 = vector.shape_cast %28 : vector<1x1x10x32xf32> to vector<10x32xf32>
    %30 = vector.shape_cast %27 : vector<10x32xf32> to vector<1x1x10x32xf32>
    tpu.vector_store %arg7[%c0_18, %c0_19, %c0_20, %c0_21], %30 {strides = array<i32>} : memref<1x1x10x32xf32, #tpu.memory_space<vmem>>, vector<1x1x10x32xf32>,
    return
  }
  func.func @transform_0(%arg0: i32, %arg1: i32) -> (i32, i32, i32, i32) {
    %c0_i32 = arith.constant 0 : i32
    %c0_i32_0 = arith.constant 0 : i32
    %c0_i32_1 = arith.constant 0 : i32
    return %arg0, %arg1, %c0_i32, %c0_i32_0 : i32, i32, i32, i32
  }
  func.func @transform_1(%arg0: i32, %arg1: i32) -> (i32, i32, i32) {
    %c0_i32 = arith.constant 0 : i32
    %c0_i32_0 = arith.constant 0 : i32
    %c0_i32_1 = arith.constant 0 : i32
    return %arg0, %c0_i32, %c0_i32_0 : i32, i32, i32
  }
  func.func @transform_2(%arg0: i32, %arg1: i32) -> (i32, i32, i32) {
    %c0_i32 = arith.constant 0 : i32
    %c0_i32_0 = arith.constant 0 : i32
    %c0_i32_1 = arith.constant 0 : i32
    return %arg0, %c0_i32, %c0_i32_0 : i32, i32, i32
  }
  func.func @transform_3(%arg0: i32, %arg1: i32) -> (i32, i32, i32) {
    %c0_i32 = arith.constant 0 : i32
    %c0_i32_0 = arith.constant 0 : i32
    %c0_i32_1 = arith.constant 0 : i32
    return %arg0, %c0_i32, %c0_i32_0 : i32, i32, i32
  }
  func.func @transform_4(%arg0: i32, %arg1: i32) -> (i32, i32, i32) {
    %c0_i32 = arith.constant 0 : i32
    %c0_i32_0 = arith.constant 0 : i32
    %c0_i32_1 = arith.constant 0 : i32
    return %arg0, %c0_i32, %c0_i32_0 : i32, i32, i32
  }
  func.func @transform_5(%arg0: i32, %arg1: i32) -> (i32, i32, i32, i32) {
    %c0_i32 = arith.constant 0 : i32
    %c0_i32_0 = arith.constant 0 : i32
    %c0_i32_1 = arith.constant 0 : i32
    return %arg0, %arg1, %c0_i32, %c0_i32_0 : i32, i32, i32, i32
  }
}

module attributes {stable_mosaic.version = 11 : i64} {
  func.func @_conv_branch_kernel(%arg0: i32, %arg1: i32, %arg2: memref<1x1x20x68xf32, #tpu.memory_space<vmem>>, %arg3: memref<1x256x60xf32, #tpu.memory_space<vmem>>, %arg4: memref<1x256x1xf32, #tpu.memory_space<vmem>>, %arg5: memref<1x10x768xf32, #tpu.memory_space<vmem>>, %arg6: memref<1x10x1xf32, #tpu.memory_space<vmem>>, %arg7: memref<1x1x10x64xf32, #tpu.memory_space<vmem>>) attributes {dimension_semantics = [#tpu.dimension_semantics<parallel>, #tpu.dimension_semantics<parallel>], iteration_bounds = array<i64: 2, 2>, scalar_prefetch = 0 : i64, scratch_operands = 0 : i64, tpu.core_type = #tpu.core_type<tc>, window_params = [{transform_indices = @transform_0, window_bounds = array<i64: 1, 1, 20, 68>}, {transform_indices = @transform_1, window_bounds = array<i64: 1, 256, 60>}, {transform_indices = @transform_2, window_bounds = array<i64: 1, 256, 1>}, {transform_indices = @transform_3, window_bounds = array<i64: 1, 10, 768>}, {transform_indices = @transform_4, window_bounds = array<i64: 1, 10, 1>}, {transform_indices = @transform_5, window_bounds = array<i64: 1, 1, 10, 64>}]} {
    %c0 = arith.constant 0 : index
    %c0_0 = arith.constant 0 : index
    %c0_1 = arith.constant 0 : index
    %c0_2 = arith.constant 0 : index
    %0 = vector.load %arg2[%c0, %c0_0, %c0_1, %c0_2] : memref<1x1x20x68xf32, #tpu.memory_space<vmem>>, vector<1x1x20x68xf32>
    %1 = vector.shape_cast %0 : vector<1x1x20x68xf32> to vector<20x68xf32>
    %c0_3 = arith.constant 0 : index
    %c0_4 = arith.constant 0 : index
    %c0_5 = arith.constant 0 : index
    %2 = vector.load %arg3[%c0_3, %c0_4, %c0_5] : memref<1x256x60xf32, #tpu.memory_space<vmem>>, vector<1x256x60xf32>
    %3 = vector.shape_cast %2 : vector<1x256x60xf32> to vector<256x60xf32>
    %c0_6 = arith.constant 0 : index
    %c0_7 = arith.constant 0 : index
    %c0_8 = arith.constant 0 : index
    %4 = vector.load %arg4[%c0_6, %c0_7, %c0_8] : memref<1x256x1xf32, #tpu.memory_space<vmem>>, vector<1x256x1xf32>
    %5 = vector.shape_cast %4 : vector<1x256x1xf32> to vector<256x1xf32>
    %c0_9 = arith.constant 0 : index
    %c0_10 = arith.constant 0 : index
    %c0_11 = arith.constant 0 : index
    %6 = vector.load %arg5[%c0_9, %c0_10, %c0_11] : memref<1x10x768xf32, #tpu.memory_space<vmem>>, vector<1x10x768xf32>
    %7 = vector.shape_cast %6 : vector<1x10x768xf32> to vector<10x768xf32>
    %c0_12 = arith.constant 0 : index
    %c0_13 = arith.constant 0 : index
    %c0_14 = arith.constant 0 : index
    %8 = vector.load %arg6[%c0_12, %c0_13, %c0_14] : memref<1x10x1xf32, #tpu.memory_space<vmem>>, vector<1x10x1xf32>
    %9 = vector.shape_cast %8 : vector<1x10x1xf32> to vector<10x1xf32>
    %10 = vector.extract_strided_slice %1 {offsets = [0, 0], sizes = [20, 66], strides = [1, 1]} : vector<20x68xf32> to vector<20x66xf32>
    %11 = vector.extract_strided_slice %1 {offsets = [0, 1], sizes = [20, 66], strides = [1, 1]} : vector<20x68xf32> to vector<20x66xf32>
    %12 = vector.extract_strided_slice %1 {offsets = [0, 2], sizes = [20, 66], strides = [1, 1]} : vector<20x68xf32> to vector<20x66xf32>
    %13 = tpu.concatenate %10, %11, %12 in 0 : vector<20x66xf32>, vector<20x66xf32>, vector<20x66xf32> -> vector<60x66xf32>
    %cst = arith.constant dense<0.000000e+00> : vector<256x66xf32>
    %14 = tpu.matmul %3, %13, %cst {dimension_numbers = #tpu.dot_dimension_numbers<[1], [0], [0], [1], [0, 0, 1, 1], [], []>} : vector<256x60xf32>, vector<60x66xf32>, vector<256x66xf32> -> vector<256x66xf32>
    %15 = vector.broadcast %5 : vector<256x1xf32> to vector<256x66xf32>
    %16 = arith.addf %14, %15 : vector<256x66xf32>
    %cst_15 = arith.constant 0.000000e+00 : f32
    %17 = vector.broadcast %cst_15 : f32 to vector<256x66xf32>
    %18 = arith.maximumf %16, %17 : vector<256x66xf32>
    %19 = vector.extract_strided_slice %18 {offsets = [0, 0], sizes = [256, 64], strides = [1, 1]} : vector<256x66xf32> to vector<256x64xf32>
    %20 = vector.extract_strided_slice %18 {offsets = [0, 1], sizes = [256, 64], strides = [1, 1]} : vector<256x66xf32> to vector<256x64xf32>
    %21 = vector.extract_strided_slice %18 {offsets = [0, 2], sizes = [256, 64], strides = [1, 1]} : vector<256x66xf32> to vector<256x64xf32>
    %22 = tpu.concatenate %19, %20, %21 in 0 : vector<256x64xf32>, vector<256x64xf32>, vector<256x64xf32> -> vector<768x64xf32>
    %cst_16 = arith.constant dense<0.000000e+00> : vector<10x64xf32>
    %23 = tpu.matmul %7, %22, %cst_16 {dimension_numbers = #tpu.dot_dimension_numbers<[1], [0], [0], [1], [0, 0, 1, 1], [], []>} : vector<10x768xf32>, vector<768x64xf32>, vector<10x64xf32> -> vector<10x64xf32>
    %24 = vector.broadcast %9 : vector<10x1xf32> to vector<10x64xf32>
    %25 = arith.addf %23, %24 : vector<10x64xf32>
    %cst_17 = arith.constant 0.000000e+00 : f32
    %26 = vector.broadcast %cst_17 : f32 to vector<10x64xf32>
    %27 = arith.maximumf %25, %26 : vector<10x64xf32>
    %c0_18 = arith.constant 0 : index
    %c0_19 = arith.constant 0 : index
    %c0_20 = arith.constant 0 : index
    %c0_21 = arith.constant 0 : index
    %28 = vector.load %arg7[%c0_18, %c0_19, %c0_20, %c0_21] : memref<1x1x10x64xf32, #tpu.memory_space<vmem>>, vector<1x1x10x64xf32>
    %29 = vector.shape_cast %28 : vector<1x1x10x64xf32> to vector<10x64xf32>
    %30 = vector.shape_cast %27 : vector<10x64xf32> to vector<1x1x10x64xf32>
    tpu.vector_store %arg7[%c0_18, %c0_19, %c0_20, %c0_21], %30 {strides = array<i32>} : memref<1x1x10x64xf32, #tpu.memory_space<vmem>>, vector<1x1x10x64xf32>,
    return
  }
  func.func @transform_0(%arg0: i32, %arg1: i32) -> (i32, i32, i32, i32) {
    %c0_i32 = arith.constant 0 : i32
    %c0_i32_0 = arith.constant 0 : i32
    %c0_i32_1 = arith.constant 0 : i32
    return %arg0, %arg1, %c0_i32, %c0_i32_0 : i32, i32, i32, i32
  }
  func.func @transform_1(%arg0: i32, %arg1: i32) -> (i32, i32, i32) {
    %c0_i32 = arith.constant 0 : i32
    %c0_i32_0 = arith.constant 0 : i32
    %c0_i32_1 = arith.constant 0 : i32
    return %arg0, %c0_i32, %c0_i32_0 : i32, i32, i32
  }
  func.func @transform_2(%arg0: i32, %arg1: i32) -> (i32, i32, i32) {
    %c0_i32 = arith.constant 0 : i32
    %c0_i32_0 = arith.constant 0 : i32
    %c0_i32_1 = arith.constant 0 : i32
    return %arg0, %c0_i32, %c0_i32_0 : i32, i32, i32
  }
  func.func @transform_3(%arg0: i32, %arg1: i32) -> (i32, i32, i32) {
    %c0_i32 = arith.constant 0 : i32
    %c0_i32_0 = arith.constant 0 : i32
    %c0_i32_1 = arith.constant 0 : i32
    return %arg0, %c0_i32, %c0_i32_0 : i32, i32, i32
  }
  func.func @transform_4(%arg0: i32, %arg1: i32) -> (i32, i32, i32) {
    %c0_i32 = arith.constant 0 : i32
    %c0_i32_0 = arith.constant 0 : i32
    %c0_i32_1 = arith.constant 0 : i32
    return %arg0, %c0_i32, %c0_i32_0 : i32, i32, i32
  }
  func.func @transform_5(%arg0: i32, %arg1: i32) -> (i32, i32, i32, i32) {
    %c0_i32 = arith.constant 0 : i32
    %c0_i32_0 = arith.constant 0 : i32
    %c0_i32_1 = arith.constant 0 : i32
    return %arg0, %arg1, %c0_i32, %c0_i32_0 : i32, i32, i32, i32
  }
}

module attributes {stable_mosaic.version = 11 : i64} {
  func.func @_linear_kernel(%arg0: i32, %arg1: i32, %arg2: memref<1x2x512xf32, #tpu.memory_space<vmem>>, %arg3: memref<256x512xf32, #tpu.memory_space<vmem>>, %arg4: memref<1x256xf32, #tpu.memory_space<vmem>>, %arg5: memref<2x256xf32, #tpu.memory_space<vmem>>, %arg6: memref<2x256xf32, #tpu.memory_space<vmem>>) attributes {dimension_semantics = [#tpu.dimension_semantics<parallel>, #tpu.dimension_semantics<arbitrary>], iteration_bounds = array<i64: 1, 1>, scalar_prefetch = 0 : i64, scratch_operands = 1 : i64, tpu.core_type = #tpu.core_type<tc>, window_params = [{pipeline_mode = #tpu.pipeline_mode<synchronous>, transform_indices = @transform_0, window_bounds = array<i64: 1, 2, 512>}, {transform_indices = @transform_1, window_bounds = array<i64: 256, 512>}, {transform_indices = @transform_2, window_bounds = array<i64: 1, 256>}, {transform_indices = @transform_3, window_bounds = array<i64: 2, 256>}]} {
    %c0_i32 = arith.constant 0 : i32
    %0 = arith.cmpi eq, %arg1, %c0_i32 : i32
    %1 = arith.extui %0 : i1 to i32
    %c0_i32_0 = arith.constant 0 : i32
    %2 = arith.cmpi ne, %1, %c0_i32_0 : i32
    scf.if %2 {
      %cst_10 = arith.constant 0.000000e+00 : f32
      %14 = vector.broadcast %cst_10 : f32 to vector<2x256xf32>
      %c0_11 = arith.constant 0 : index
      %c0_12 = arith.constant 0 : index
      %15 = vector.load %arg6[%c0_11, %c0_12] : memref<2x256xf32, #tpu.memory_space<vmem>>, vector<2x256xf32>
      tpu.vector_store %arg6[%c0_11, %c0_12], %14 {strides = array<i32>} : memref<2x256xf32, #tpu.memory_space<vmem>>, vector<2x256xf32>,
    } else {
    }
    %c0 = arith.constant 0 : index
    %c0_1 = arith.constant 0 : index
    %3 = vector.load %arg6[%c0, %c0_1] : memref<2x256xf32, #tpu.memory_space<vmem>>, vector<2x256xf32>
    %4 = arith.index_cast %arg1 : i32 to index
    %c0_2 = arith.constant 0 : index
    %c0_3 = arith.constant 0 : index
    %5 = vector.load %arg2[%4, %c0_2, %c0_3] : memref<1x2x512xf32, #tpu.memory_space<vmem>>, vector<1x2x512xf32>
    %6 = vector.shape_cast %5 : vector<1x2x512xf32> to vector<2x512xf32>
    %c0_4 = arith.constant 0 : index
    %c0_5 = arith.constant 0 : index
    %7 = vector.load %arg3[%c0_4, %c0_5] : memref<256x512xf32, #tpu.memory_space<vmem>>, vector<256x512xf32>
    %cst = arith.constant dense<0.000000e+00> : vector<2x256xf32>
    %8 = tpu.matmul %6, %7, %cst {dimension_numbers = #tpu.dot_dimension_numbers<[1], [1], [0], [0], [0, 0, 1, 0], [], []>} : vector<2x512xf32>, vector<256x512xf32>, vector<2x256xf32> -> vector<2x256xf32>
    %9 = arith.addf %3, %8 : vector<2x256xf32>
    %c0_6 = arith.constant 0 : index
    %c0_7 = arith.constant 0 : index
    %10 = vector.load %arg6[%c0_6, %c0_7] : memref<2x256xf32, #tpu.memory_space<vmem>>, vector<2x256xf32>
    tpu.vector_store %arg6[%c0_6, %c0_7], %9 {strides = array<i32>} : memref<2x256xf32, #tpu.memory_space<vmem>>, vector<2x256xf32>,
    %c0_i32_8 = arith.constant 0 : i32
    %11 = arith.cmpi eq, %arg1, %c0_i32_8 : i32
    %12 = arith.extui %11 : i1 to i32
    %c0_i32_9 = arith.constant 0 : i32
    %13 = arith.cmpi ne, %12, %c0_i32_9 : i32
    scf.if %13 {
      %c0_10 = arith.constant 0 : index
      %c0_11 = arith.constant 0 : index
      %14 = vector.load %arg6[%c0_10, %c0_11] : memref<2x256xf32, #tpu.memory_space<vmem>>, vector<2x256xf32>
      %c0_12 = arith.constant 0 : index
      %c0_13 = arith.constant 0 : index
      %15 = vector.load %arg4[%c0_12, %c0_13] : memref<1x256xf32, #tpu.memory_space<vmem>>, vector<1x256xf32>
      %16 = vector.broadcast %15 : vector<1x256xf32> to vector<2x256xf32>
      %17 = arith.addf %14, %16 : vector<2x256xf32>
      %cst_14 = arith.constant 0.000000e+00 : f32
      %18 = vector.broadcast %cst_14 : f32 to vector<2x256xf32>
      %19 = arith.maximumf %17, %18 : vector<2x256xf32>
      %c0_15 = arith.constant 0 : index
      %c0_16 = arith.constant 0 : index
      %20 = vector.load %arg5[%c0_15, %c0_16] : memref<2x256xf32, #tpu.memory_space<vmem>>, vector<2x256xf32>
      tpu.vector_store %arg5[%c0_15, %c0_16], %19 {strides = array<i32>} : memref<2x256xf32, #tpu.memory_space<vmem>>, vector<2x256xf32>,
    } else {
    }
    return
  }
  func.func @transform_0(%arg0: i32, %arg1: i32) -> (i32, i32, i32) {
    %c0_i32 = arith.constant 0 : i32
    %c0_i32_0 = arith.constant 0 : i32
    %c0_i32_1 = arith.constant 0 : i32
    %c0_i32_2 = arith.constant 0 : i32
    return %c0_i32, %c0_i32_0, %c0_i32_1 : i32, i32, i32
  }
  func.func @transform_1(%arg0: i32, %arg1: i32) -> (i32, i32) {
    %c0_i32 = arith.constant 0 : i32
    return %arg0, %arg1 : i32, i32
  }
  func.func @transform_2(%arg0: i32, %arg1: i32) -> (i32, i32) {
    %c0_i32 = arith.constant 0 : i32
    %c0_i32_0 = arith.constant 0 : i32
    return %c0_i32, %arg0 : i32, i32
  }
  func.func @transform_3(%arg0: i32, %arg1: i32) -> (i32, i32) {
    %c0_i32 = arith.constant 0 : i32
    %c0_i32_0 = arith.constant 0 : i32
    return %c0_i32, %arg0 : i32, i32
  }
}

module attributes {stable_mosaic.version = 11 : i64} {
  func.func @_linear_kernel(%arg0: i32, %arg1: i32, %arg2: memref<1x2x256xf32, #tpu.memory_space<vmem>>, %arg3: memref<128x256xf32, #tpu.memory_space<vmem>>, %arg4: memref<1x128xf32, #tpu.memory_space<vmem>>, %arg5: memref<2x128xf32, #tpu.memory_space<vmem>>, %arg6: memref<2x128xf32, #tpu.memory_space<vmem>>) attributes {dimension_semantics = [#tpu.dimension_semantics<parallel>, #tpu.dimension_semantics<arbitrary>], iteration_bounds = array<i64: 1, 1>, scalar_prefetch = 0 : i64, scratch_operands = 1 : i64, tpu.core_type = #tpu.core_type<tc>, window_params = [{pipeline_mode = #tpu.pipeline_mode<synchronous>, transform_indices = @transform_0, window_bounds = array<i64: 1, 2, 256>}, {transform_indices = @transform_1, window_bounds = array<i64: 128, 256>}, {transform_indices = @transform_2, window_bounds = array<i64: 1, 128>}, {transform_indices = @transform_3, window_bounds = array<i64: 2, 128>}]} {
    %c0_i32 = arith.constant 0 : i32
    %0 = arith.cmpi eq, %arg1, %c0_i32 : i32
    %1 = arith.extui %0 : i1 to i32
    %c0_i32_0 = arith.constant 0 : i32
    %2 = arith.cmpi ne, %1, %c0_i32_0 : i32
    scf.if %2 {
      %cst_10 = arith.constant 0.000000e+00 : f32
      %14 = vector.broadcast %cst_10 : f32 to vector<2x128xf32>
      %c0_11 = arith.constant 0 : index
      %c0_12 = arith.constant 0 : index
      %15 = vector.load %arg6[%c0_11, %c0_12] : memref<2x128xf32, #tpu.memory_space<vmem>>, vector<2x128xf32>
      tpu.vector_store %arg6[%c0_11, %c0_12], %14 {strides = array<i32>} : memref<2x128xf32, #tpu.memory_space<vmem>>, vector<2x128xf32>,
    } else {
    }
    %c0 = arith.constant 0 : index
    %c0_1 = arith.constant 0 : index
    %3 = vector.load %arg6[%c0, %c0_1] : memref<2x128xf32, #tpu.memory_space<vmem>>, vector<2x128xf32>
    %4 = arith.index_cast %arg1 : i32 to index
    %c0_2 = arith.constant 0 : index
    %c0_3 = arith.constant 0 : index
    %5 = vector.load %arg2[%4, %c0_2, %c0_3] : memref<1x2x256xf32, #tpu.memory_space<vmem>>, vector<1x2x256xf32>
    %6 = vector.shape_cast %5 : vector<1x2x256xf32> to vector<2x256xf32>
    %c0_4 = arith.constant 0 : index
    %c0_5 = arith.constant 0 : index
    %7 = vector.load %arg3[%c0_4, %c0_5] : memref<128x256xf32, #tpu.memory_space<vmem>>, vector<128x256xf32>
    %cst = arith.constant dense<0.000000e+00> : vector<2x128xf32>
    %8 = tpu.matmul %6, %7, %cst {dimension_numbers = #tpu.dot_dimension_numbers<[1], [1], [0], [0], [0, 0, 1, 0], [], []>} : vector<2x256xf32>, vector<128x256xf32>, vector<2x128xf32> -> vector<2x128xf32>
    %9 = arith.addf %3, %8 : vector<2x128xf32>
    %c0_6 = arith.constant 0 : index
    %c0_7 = arith.constant 0 : index
    %10 = vector.load %arg6[%c0_6, %c0_7] : memref<2x128xf32, #tpu.memory_space<vmem>>, vector<2x128xf32>
    tpu.vector_store %arg6[%c0_6, %c0_7], %9 {strides = array<i32>} : memref<2x128xf32, #tpu.memory_space<vmem>>, vector<2x128xf32>,
    %c0_i32_8 = arith.constant 0 : i32
    %11 = arith.cmpi eq, %arg1, %c0_i32_8 : i32
    %12 = arith.extui %11 : i1 to i32
    %c0_i32_9 = arith.constant 0 : i32
    %13 = arith.cmpi ne, %12, %c0_i32_9 : i32
    scf.if %13 {
      %c0_10 = arith.constant 0 : index
      %c0_11 = arith.constant 0 : index
      %14 = vector.load %arg6[%c0_10, %c0_11] : memref<2x128xf32, #tpu.memory_space<vmem>>, vector<2x128xf32>
      %c0_12 = arith.constant 0 : index
      %c0_13 = arith.constant 0 : index
      %15 = vector.load %arg4[%c0_12, %c0_13] : memref<1x128xf32, #tpu.memory_space<vmem>>, vector<1x128xf32>
      %16 = vector.broadcast %15 : vector<1x128xf32> to vector<2x128xf32>
      %17 = arith.addf %14, %16 : vector<2x128xf32>
      %cst_14 = arith.constant 0.000000e+00 : f32
      %18 = vector.broadcast %cst_14 : f32 to vector<2x128xf32>
      %19 = arith.maximumf %17, %18 : vector<2x128xf32>
      %c0_15 = arith.constant 0 : index
      %c0_16 = arith.constant 0 : index
      %20 = vector.load %arg5[%c0_15, %c0_16] : memref<2x128xf32, #tpu.memory_space<vmem>>, vector<2x128xf32>
      tpu.vector_store %arg5[%c0_15, %c0_16], %19 {strides = array<i32>} : memref<2x128xf32, #tpu.memory_space<vmem>>, vector<2x128xf32>,
    } else {
    }
    return
  }
  func.func @transform_0(%arg0: i32, %arg1: i32) -> (i32, i32, i32) {
    %c0_i32 = arith.constant 0 : i32
    %c0_i32_0 = arith.constant 0 : i32
    %c0_i32_1 = arith.constant 0 : i32
    %c0_i32_2 = arith.constant 0 : i32
    return %c0_i32, %c0_i32_0, %c0_i32_1 : i32, i32, i32
  }
  func.func @transform_1(%arg0: i32, %arg1: i32) -> (i32, i32) {
    %c0_i32 = arith.constant 0 : i32
    return %arg0, %arg1 : i32, i32
  }
  func.func @transform_2(%arg0: i32, %arg1: i32) -> (i32, i32) {
    %c0_i32 = arith.constant 0 : i32
    %c0_i32_0 = arith.constant 0 : i32
    return %c0_i32, %arg0 : i32, i32
  }
  func.func @transform_3(%arg0: i32, %arg1: i32) -> (i32, i32) {
    %c0_i32 = arith.constant 0 : i32
    %c0_i32_0 = arith.constant 0 : i32
    return %c0_i32, %arg0 : i32, i32
  }
}

module attributes {stable_mosaic.version = 11 : i64} {
  func.func @_linear_kernel(%arg0: i32, %arg1: i32, %arg2: memref<2x2x1536xf32, #tpu.memory_space<vmem>>, %arg3: memref<512x1536xf32, #tpu.memory_space<vmem>>, %arg4: memref<1x512xf32, #tpu.memory_space<vmem>>, %arg5: memref<2x512xf32, #tpu.memory_space<vmem>>, %arg6: memref<2x512xf32, #tpu.memory_space<vmem>>) attributes {dimension_semantics = [#tpu.dimension_semantics<parallel>, #tpu.dimension_semantics<arbitrary>], iteration_bounds = array<i64: 1, 2>, scalar_prefetch = 0 : i64, scratch_operands = 1 : i64, tpu.core_type = #tpu.core_type<tc>, window_params = [{pipeline_mode = #tpu.pipeline_mode<synchronous>, transform_indices = @transform_0, window_bounds = array<i64: 2, 2, 1536>}, {transform_indices = @transform_1, window_bounds = array<i64: 512, 1536>}, {transform_indices = @transform_2, window_bounds = array<i64: 1, 512>}, {transform_indices = @transform_3, window_bounds = array<i64: 2, 512>}]} {
    %c0_i32 = arith.constant 0 : i32
    %0 = arith.cmpi eq, %arg1, %c0_i32 : i32
    %1 = arith.extui %0 : i1 to i32
    %c0_i32_0 = arith.constant 0 : i32
    %2 = arith.cmpi ne, %1, %c0_i32_0 : i32
    scf.if %2 {
      %cst_9 = arith.constant 0.000000e+00 : f32
      %14 = vector.broadcast %cst_9 : f32 to vector<2x512xf32>
      %c0_10 = arith.constant 0 : index
      %c0_11 = arith.constant 0 : index
      %15 = vector.load %arg6[%c0_10, %c0_11] : memref<2x512xf32, #tpu.memory_space<vmem>>, vector<2x512xf32>
      tpu.vector_store %arg6[%c0_10, %c0_11], %14 {strides = array<i32>} : memref<2x512xf32, #tpu.memory_space<vmem>>, vector<2x512xf32>,
    } else {
    }
    %c0 = arith.constant 0 : index
    %c0_1 = arith.constant 0 : index
    %3 = vector.load %arg6[%c0, %c0_1] : memref<2x512xf32, #tpu.memory_space<vmem>>, vector<2x512xf32>
    %4 = arith.index_cast %arg1 : i32 to index
    %c0_2 = arith.constant 0 : index
    %c0_3 = arith.constant 0 : index
    %5 = vector.load %arg2[%4, %c0_2, %c0_3] : memref<2x2x1536xf32, #tpu.memory_space<vmem>>, vector<1x2x1536xf32>
    %6 = vector.shape_cast %5 : vector<1x2x1536xf32> to vector<2x1536xf32>
    %c0_4 = arith.constant 0 : index
    %c0_5 = arith.constant 0 : index
    %7 = vector.load %arg3[%c0_4, %c0_5] : memref<512x1536xf32, #tpu.memory_space<vmem>>, vector<512x1536xf32>
    %cst = arith.constant dense<0.000000e+00> : vector<2x512xf32>
    %8 = tpu.matmul %6, %7, %cst {dimension_numbers = #tpu.dot_dimension_numbers<[1], [1], [0], [0], [0, 0, 1, 0], [], []>} : vector<2x1536xf32>, vector<512x1536xf32>, vector<2x512xf32> -> vector<2x512xf32>
    %9 = arith.addf %3, %8 : vector<2x512xf32>
    %c0_6 = arith.constant 0 : index
    %c0_7 = arith.constant 0 : index
    %10 = vector.load %arg6[%c0_6, %c0_7] : memref<2x512xf32, #tpu.memory_space<vmem>>, vector<2x512xf32>
    tpu.vector_store %arg6[%c0_6, %c0_7], %9 {strides = array<i32>} : memref<2x512xf32, #tpu.memory_space<vmem>>, vector<2x512xf32>,
    %c1_i32 = arith.constant 1 : i32
    %11 = arith.cmpi eq, %arg1, %c1_i32 : i32
    %12 = arith.extui %11 : i1 to i32
    %c0_i32_8 = arith.constant 0 : i32
    %13 = arith.cmpi ne, %12, %c0_i32_8 : i32
    scf.if %13 {
      %c0_9 = arith.constant 0 : index
      %c0_10 = arith.constant 0 : index
      %14 = vector.load %arg6[%c0_9, %c0_10] : memref<2x512xf32, #tpu.memory_space<vmem>>, vector<2x512xf32>
      %c0_11 = arith.constant 0 : index
      %c0_12 = arith.constant 0 : index
      %15 = vector.load %arg4[%c0_11, %c0_12] : memref<1x512xf32, #tpu.memory_space<vmem>>, vector<1x512xf32>
      %16 = vector.broadcast %15 : vector<1x512xf32> to vector<2x512xf32>
      %17 = arith.addf %14, %16 : vector<2x512xf32>
      %cst_13 = arith.constant 0.000000e+00 : f32
      %18 = vector.broadcast %cst_13 : f32 to vector<2x512xf32>
      %19 = arith.maximumf %17, %18 : vector<2x512xf32>
      %c0_14 = arith.constant 0 : index
      %c0_15 = arith.constant 0 : index
      %20 = vector.load %arg5[%c0_14, %c0_15] : memref<2x512xf32, #tpu.memory_space<vmem>>, vector<2x512xf32>
      tpu.vector_store %arg5[%c0_14, %c0_15], %19 {strides = array<i32>} : memref<2x512xf32, #tpu.memory_space<vmem>>, vector<2x512xf32>,
    } else {
    }
    return
  }
  func.func @transform_0(%arg0: i32, %arg1: i32) -> (i32, i32, i32) {
    %c0_i32 = arith.constant 0 : i32
    %c0_i32_0 = arith.constant 0 : i32
    %c0_i32_1 = arith.constant 0 : i32
    %c0_i32_2 = arith.constant 0 : i32
    return %c0_i32, %c0_i32_0, %c0_i32_1 : i32, i32, i32
  }
  func.func @transform_1(%arg0: i32, %arg1: i32) -> (i32, i32) {
    %c0_i32 = arith.constant 0 : i32
    return %arg0, %arg1 : i32, i32
  }
  func.func @transform_2(%arg0: i32, %arg1: i32) -> (i32, i32) {
    %c0_i32 = arith.constant 0 : i32
    %c0_i32_0 = arith.constant 0 : i32
    return %c0_i32, %arg0 : i32, i32
  }
  func.func @transform_3(%arg0: i32, %arg1: i32) -> (i32, i32) {
    %c0_i32 = arith.constant 0 : i32
    %c0_i32_0 = arith.constant 0 : i32
    return %c0_i32, %arg0 : i32, i32
  }
}

module attributes {stable_mosaic.version = 11 : i64} {
  func.func @_linear_kernel(%arg0: i32, %arg1: i32, %arg2: memref<1x2x128xf32, #tpu.memory_space<vmem>>, %arg3: memref<64x128xf32, #tpu.memory_space<vmem>>, %arg4: memref<1x64xf32, #tpu.memory_space<vmem>>, %arg5: memref<2x64xf32, #tpu.memory_space<vmem>>, %arg6: memref<2x64xf32, #tpu.memory_space<vmem>>) attributes {dimension_semantics = [#tpu.dimension_semantics<parallel>, #tpu.dimension_semantics<arbitrary>], iteration_bounds = array<i64: 1, 1>, scalar_prefetch = 0 : i64, scratch_operands = 1 : i64, tpu.core_type = #tpu.core_type<tc>, window_params = [{pipeline_mode = #tpu.pipeline_mode<synchronous>, transform_indices = @transform_0, window_bounds = array<i64: 1, 2, 128>}, {transform_indices = @transform_1, window_bounds = array<i64: 64, 128>}, {transform_indices = @transform_2, window_bounds = array<i64: 1, 64>}, {transform_indices = @transform_3, window_bounds = array<i64: 2, 64>}]} {
    %c0_i32 = arith.constant 0 : i32
    %0 = arith.cmpi eq, %arg1, %c0_i32 : i32
    %1 = arith.extui %0 : i1 to i32
    %c0_i32_0 = arith.constant 0 : i32
    %2 = arith.cmpi ne, %1, %c0_i32_0 : i32
    scf.if %2 {
      %cst_10 = arith.constant 0.000000e+00 : f32
      %14 = vector.broadcast %cst_10 : f32 to vector<2x64xf32>
      %c0_11 = arith.constant 0 : index
      %c0_12 = arith.constant 0 : index
      %15 = vector.load %arg6[%c0_11, %c0_12] : memref<2x64xf32, #tpu.memory_space<vmem>>, vector<2x64xf32>
      tpu.vector_store %arg6[%c0_11, %c0_12], %14 {strides = array<i32>} : memref<2x64xf32, #tpu.memory_space<vmem>>, vector<2x64xf32>,
    } else {
    }
    %c0 = arith.constant 0 : index
    %c0_1 = arith.constant 0 : index
    %3 = vector.load %arg6[%c0, %c0_1] : memref<2x64xf32, #tpu.memory_space<vmem>>, vector<2x64xf32>
    %4 = arith.index_cast %arg1 : i32 to index
    %c0_2 = arith.constant 0 : index
    %c0_3 = arith.constant 0 : index
    %5 = vector.load %arg2[%4, %c0_2, %c0_3] : memref<1x2x128xf32, #tpu.memory_space<vmem>>, vector<1x2x128xf32>
    %6 = vector.shape_cast %5 : vector<1x2x128xf32> to vector<2x128xf32>
    %c0_4 = arith.constant 0 : index
    %c0_5 = arith.constant 0 : index
    %7 = vector.load %arg3[%c0_4, %c0_5] : memref<64x128xf32, #tpu.memory_space<vmem>>, vector<64x128xf32>
    %cst = arith.constant dense<0.000000e+00> : vector<2x64xf32>
    %8 = tpu.matmul %6, %7, %cst {dimension_numbers = #tpu.dot_dimension_numbers<[1], [1], [0], [0], [0, 0, 1, 0], [], []>} : vector<2x128xf32>, vector<64x128xf32>, vector<2x64xf32> -> vector<2x64xf32>
    %9 = arith.addf %3, %8 : vector<2x64xf32>
    %c0_6 = arith.constant 0 : index
    %c0_7 = arith.constant 0 : index
    %10 = vector.load %arg6[%c0_6, %c0_7] : memref<2x64xf32, #tpu.memory_space<vmem>>, vector<2x64xf32>
    tpu.vector_store %arg6[%c0_6, %c0_7], %9 {strides = array<i32>} : memref<2x64xf32, #tpu.memory_space<vmem>>, vector<2x64xf32>,
    %c0_i32_8 = arith.constant 0 : i32
    %11 = arith.cmpi eq, %arg1, %c0_i32_8 : i32
    %12 = arith.extui %11 : i1 to i32
    %c0_i32_9 = arith.constant 0 : i32
    %13 = arith.cmpi ne, %12, %c0_i32_9 : i32
    scf.if %13 {
      %c0_10 = arith.constant 0 : index
      %c0_11 = arith.constant 0 : index
      %14 = vector.load %arg6[%c0_10, %c0_11] : memref<2x64xf32, #tpu.memory_space<vmem>>, vector<2x64xf32>
      %c0_12 = arith.constant 0 : index
      %c0_13 = arith.constant 0 : index
      %15 = vector.load %arg4[%c0_12, %c0_13] : memref<1x64xf32, #tpu.memory_space<vmem>>, vector<1x64xf32>
      %16 = vector.broadcast %15 : vector<1x64xf32> to vector<2x64xf32>
      %17 = arith.addf %14, %16 : vector<2x64xf32>
      %cst_14 = arith.constant 0.000000e+00 : f32
      %18 = vector.broadcast %cst_14 : f32 to vector<2x64xf32>
      %19 = arith.maximumf %17, %18 : vector<2x64xf32>
      %c0_15 = arith.constant 0 : index
      %c0_16 = arith.constant 0 : index
      %20 = vector.load %arg5[%c0_15, %c0_16] : memref<2x64xf32, #tpu.memory_space<vmem>>, vector<2x64xf32>
      tpu.vector_store %arg5[%c0_15, %c0_16], %19 {strides = array<i32>} : memref<2x64xf32, #tpu.memory_space<vmem>>, vector<2x64xf32>,
    } else {
    }
    return
  }
  func.func @transform_0(%arg0: i32, %arg1: i32) -> (i32, i32, i32) {
    %c0_i32 = arith.constant 0 : i32
    %c0_i32_0 = arith.constant 0 : i32
    %c0_i32_1 = arith.constant 0 : i32
    %c0_i32_2 = arith.constant 0 : i32
    return %c0_i32, %c0_i32_0, %c0_i32_1 : i32, i32, i32
  }
  func.func @transform_1(%arg0: i32, %arg1: i32) -> (i32, i32) {
    %c0_i32 = arith.constant 0 : i32
    return %arg0, %arg1 : i32, i32
  }
  func.func @transform_2(%arg0: i32, %arg1: i32) -> (i32, i32) {
    %c0_i32 = arith.constant 0 : i32
    %c0_i32_0 = arith.constant 0 : i32
    return %c0_i32, %arg0 : i32, i32
  }
  func.func @transform_3(%arg0: i32, %arg1: i32) -> (i32, i32) {
    %c0_i32 = arith.constant 0 : i32
    %c0_i32_0 = arith.constant 0 : i32
    return %c0_i32, %arg0 : i32, i32
  }
}

module attributes {stable_mosaic.version = 11 : i64} {
  func.func @_linear_kernel(%arg0: i32, %arg1: i32, %arg2: memref<1x2x64xf32, #tpu.memory_space<vmem>>, %arg3: memref<1x64xf32, #tpu.memory_space<vmem>>, %arg4: memref<1x1xf32, #tpu.memory_space<vmem>>, %arg5: memref<2x1xf32, #tpu.memory_space<vmem>>, %arg6: memref<2x1xf32, #tpu.memory_space<vmem>>) attributes {dimension_semantics = [#tpu.dimension_semantics<parallel>, #tpu.dimension_semantics<arbitrary>], iteration_bounds = array<i64: 1, 1>, scalar_prefetch = 0 : i64, scratch_operands = 1 : i64, tpu.core_type = #tpu.core_type<tc>, window_params = [{pipeline_mode = #tpu.pipeline_mode<synchronous>, transform_indices = @transform_0, window_bounds = array<i64: 1, 2, 64>}, {transform_indices = @transform_1, window_bounds = array<i64: 1, 64>}, {transform_indices = @transform_2, window_bounds = array<i64: 1, 1>}, {transform_indices = @transform_3, window_bounds = array<i64: 2, 1>}]} {
    %c0_i32 = arith.constant 0 : i32
    %0 = arith.cmpi eq, %arg1, %c0_i32 : i32
    %1 = arith.extui %0 : i1 to i32
    %c0_i32_0 = arith.constant 0 : i32
    %2 = arith.cmpi ne, %1, %c0_i32_0 : i32
    scf.if %2 {
      %cst_10 = arith.constant 0.000000e+00 : f32
      %14 = vector.broadcast %cst_10 : f32 to vector<2x1xf32>
      %c0_11 = arith.constant 0 : index
      %c0_12 = arith.constant 0 : index
      %15 = vector.load %arg6[%c0_11, %c0_12] : memref<2x1xf32, #tpu.memory_space<vmem>>, vector<2x1xf32>
      tpu.vector_store %arg6[%c0_11, %c0_12], %14 {strides = array<i32>} : memref<2x1xf32, #tpu.memory_space<vmem>>, vector<2x1xf32>,
    } else {
    }
    %c0 = arith.constant 0 : index
    %c0_1 = arith.constant 0 : index
    %3 = vector.load %arg6[%c0, %c0_1] : memref<2x1xf32, #tpu.memory_space<vmem>>, vector<2x1xf32>
    %4 = arith.index_cast %arg1 : i32 to index
    %c0_2 = arith.constant 0 : index
    %c0_3 = arith.constant 0 : index
    %5 = vector.load %arg2[%4, %c0_2, %c0_3] : memref<1x2x64xf32, #tpu.memory_space<vmem>>, vector<1x2x64xf32>
    %6 = vector.shape_cast %5 : vector<1x2x64xf32> to vector<2x64xf32>
    %c0_4 = arith.constant 0 : index
    %c0_5 = arith.constant 0 : index
    %7 = vector.load %arg3[%c0_4, %c0_5] : memref<1x64xf32, #tpu.memory_space<vmem>>, vector<1x64xf32>
    %cst = arith.constant dense<0.000000e+00> : vector<2x1xf32>
    %8 = tpu.matmul %6, %7, %cst {dimension_numbers = #tpu.dot_dimension_numbers<[1], [1], [0], [0], [0, 0, 1, 0], [], []>} : vector<2x64xf32>, vector<1x64xf32>, vector<2x1xf32> -> vector<2x1xf32>
    %9 = arith.addf %3, %8 : vector<2x1xf32>
    %c0_6 = arith.constant 0 : index
    %c0_7 = arith.constant 0 : index
    %10 = vector.load %arg6[%c0_6, %c0_7] : memref<2x1xf32, #tpu.memory_space<vmem>>, vector<2x1xf32>
    tpu.vector_store %arg6[%c0_6, %c0_7], %9 {strides = array<i32>} : memref<2x1xf32, #tpu.memory_space<vmem>>, vector<2x1xf32>,
    %c0_i32_8 = arith.constant 0 : i32
    %11 = arith.cmpi eq, %arg1, %c0_i32_8 : i32
    %12 = arith.extui %11 : i1 to i32
    %c0_i32_9 = arith.constant 0 : i32
    %13 = arith.cmpi ne, %12, %c0_i32_9 : i32
    scf.if %13 {
      %c0_10 = arith.constant 0 : index
      %c0_11 = arith.constant 0 : index
      %14 = vector.load %arg6[%c0_10, %c0_11] : memref<2x1xf32, #tpu.memory_space<vmem>>, vector<2x1xf32>
      %c0_12 = arith.constant 0 : index
      %c0_13 = arith.constant 0 : index
      %15 = vector.load %arg4[%c0_12, %c0_13] : memref<1x1xf32, #tpu.memory_space<vmem>>, vector<1x1xf32>
      %16 = vector.broadcast %15 : vector<1x1xf32> to vector<2x1xf32>
      %17 = arith.addf %14, %16 : vector<2x1xf32>
      %c0_14 = arith.constant 0 : index
      %c0_15 = arith.constant 0 : index
      %18 = vector.load %arg5[%c0_14, %c0_15] : memref<2x1xf32, #tpu.memory_space<vmem>>, vector<2x1xf32>
      tpu.vector_store %arg5[%c0_14, %c0_15], %17 {strides = array<i32>} : memref<2x1xf32, #tpu.memory_space<vmem>>, vector<2x1xf32>,
    } else {
    }
    return
  }
  func.func @transform_0(%arg0: i32, %arg1: i32) -> (i32, i32, i32) {
    %c0_i32 = arith.constant 0 : i32
    %c0_i32_0 = arith.constant 0 : i32
    %c0_i32_1 = arith.constant 0 : i32
    %c0_i32_2 = arith.constant 0 : i32
    return %c0_i32, %c0_i32_0, %c0_i32_1 : i32, i32, i32
  }
  func.func @transform_1(%arg0: i32, %arg1: i32) -> (i32, i32) {
    %c0_i32 = arith.constant 0 : i32
    return %arg0, %arg1 : i32, i32
  }
  func.func @transform_2(%arg0: i32, %arg1: i32) -> (i32, i32) {
    %c0_i32 = arith.constant 0 : i32
    %c0_i32_0 = arith.constant 0 : i32
    return %c0_i32, %arg0 : i32, i32
  }
  func.func @transform_3(%arg0: i32, %arg1: i32) -> (i32, i32) {
    %c0_i32 = arith.constant 0 : i32
    %c0_i32_0 = arith.constant 0 : i32
    return %c0_i32, %arg0 : i32, i32
  }
}

</mosaic_0001>

<bundles_post_ra>
// kernel: cnn_regressor_forward.10
= control target key start
LH: loop header
LB: loop body
LE: loop exit
PB: predicated region body
PF: predicated region fallthrough
CT: control target
= control target key end

     0   :  { %10 = vsyncpa [#allocation3], 0  ;;  %s2422_s0 = inlined_call_operand.hbm [shape: f32[1,2,4,36], index: 0, kind: input, shape index: {}]   ;;  %s2423_s1 = inlined_call_operand.vmem [shape: f32[1,256,12], index: 1, kind: input, shape index: {}]   ;;  %s2424_s2 = inlined_call_operand.vmem [shape: f32[1,256,1], index: 2, kind: input, shape index: {}]   ;;  %s2425_s3 = inlined_call_operand.vmem [shape: f32[1,10,768], index: 3, kind: input, shape index: {}]   ;;  %s2426_s4 = inlined_call_operand.vmem [shape: f32[1,10,1], index: 4, kind: input, shape index: {}]   ;;  %s2427_s5 = inlined_call_operand.vmem [shape: f32[1,2,10,32], index: 5, kind: output, shape index: {}]  }
   0x1   :  { %12 = vsyncpa [#allocation3 + $0x1], 0  ;;  %s1767_s18 = smov 0   ;;  %s1769_s19 = smov 0  }
   0x2   :  { %s1771_s20 = smov 0   ;;  %s1773_s21 = smov 0  }
   0x3   :  { %s1775_s22 = smov 0   ;;  %s1777_s23 = smov 0  }
   0x4 LB: > { %s1377_s24 = sadd.s32 4294967295, %s1732_s23   ;;  %s27_s25 = sadd.s32 1, %s1728_s22  ;;  %s1732_s23 = sphi %s1777_s23, %s18_s23   ;;  %s1728_s22 = sphi %s1775_s22, %s2434_s22   ;;  %s1724_s21 = sphi %s1773_s21, %s2433_s21   ;;  %s1720_s20 = sphi %s1771_s20, %s2432_s20   ;;  %s1716_s19 = sphi %s1769_s19, %s2431_s19   ;;  %s1712_s18 = sphi %s1767_s18, %s2430_s18  }
   0x5   : > { %p28_p0 = scmp.ge.s32.totalorder %s27_s25, 2  ;;  %s39_s26 = sadd.s32 1, %s1720_s20 }
   0x6   : > { %p46_p1 = scmp.ne.s32.totalorder %s1720_s20, %s1716_s19  ;;  %p47_p2 = scmp.eq.s32.totalorder %s1732_s23, 0 }
   0x7   : > { %s2436_s25 = smov (%p28_p0, %s27_s25), 0  ;;  %p52_p4 = scmp.ne.s32.totalorder %s1716_s19, %s1712_s18 }
   0x8   : > { %p1803_p3 = por %p47_p2, %p46_p1  ;;  %s35_s28 = ssub.s32 %s1728_s22, %s2436_s25 }
   0x9   : > { %p53_p5 = scmp.eq.s32.totalorder %s1377_s24, 0  ;;  %p37_p6 = scmp.eq.s32.totalorder %s35_s28, 0 }
   0xa   : > { %p1437_p8 = scmp.lt.s32.totalorder %s1732_s23, 2  ;;  %s240_s6 = sand.u32 1, %s1720_s20  }
   0xb   : > { %p1810_p7 = por %p53_p5, %p52_p4  ;;  %s1386_s7 = sshll.u32 %s1728_s22, 2 }
   0xc   : > { %s1816_s30 = scalar_select %p37_p6, %s1720_s20, %s39_s26  }
   0xd   : > { %s1385_s8 = sshll.u32 %s240_s6, 2  ;;  %s250_s11 = scalar_lea.hbm %s2422_s0, %s1386_s7 }
   0xe   : > { %s252_s12 = sshll.u32 %s250_s11, 4  ;;  %s244_s13 = scalar_lea.vmem [#allocation2], %s1385_s8  ;;  %s253_s12 = int_to_ptr.hbm [resolvable:$true] %s252_s12 }
   0xf   : > { %s254_s14 = sshll.u32 %s244_s13, 4  ;;  %p1434_p9 = pnand %p1437_p8, %p1803_p3  ;;  %s255_s14 = int_to_ptr.vmem [resolvable:$true] %s254_s14 }
  0x10   : > { %p1387_p10 = scmp.ge.s32.totalorder %s1732_s23, 1  ;;  %p259_p11 = scmp.lt.s32.totalorder %s1732_s23, 3 }
  0x11   : > { %s241_s15 = scalar_lea.sflag [#allocation3], %s240_s6 }
  0x12   : > { %1436 = dma.hbm_to_vmem [thread:$0]  (!%p1434_p9), %s253_s12, 64, %s255_s14, %s241_s15  }
  0x13   : > { %p260_p12 = pnand %p1387_p10, %p259_p11 }
  0x14   : > { %s265_s16 = sand.u32 (!%p260_p12), 1, %s1716_s19  }
  0x15   : > { %263 = sbr.rel (%p260_p12) target bundleno = 713 (0x2c9), region = 40  ;;  %s1388_s17 = sshll.u32 (!%p260_p12), %s265_s16, 2 }
  0x16   : > { %s266_s18 = scalar_lea.sflag (!%p260_p12), [#allocation3], %s265_s16  ;;  %s269_s24 = scalar_lea.vmem (!%p260_p12), [#allocation2], %s1388_s17 }
  0x1a   : > { %1707 = dma.done.wait (%p1810_p7), %s266_s18, 64  }
  0x1b   : > { %1709 = vsyncadd (%p1810_p7), %s266_s18, 4294967232  ;;  %v1734_v0 = vmov 0   ;;  %v1832_v1 = vld [vmem:[%s269_s24] sm:$0xf]  ;;  %s1735_s28 = smov 126   ;;  %v385_v3 = vld [vmem:[%s2424_s2 + $0x10] sm:$0xff] }
  0x1c   : > { %1489 = vset.pattern.permute.xlu1 %v1734_v0  ;;  %1490 = vset.pattern.permute.xlu2 %v1734_v0  ;;  %v383_v2 = vld [vmem:[%s2424_s2] sm:$0xff]  ;;  %v430_v4 = vrot.slane %v1832_v1, 4  ;;  %v384_v5 = vld [vmem:[%s2424_s2 + $0x8] sm:$0xff]  ;;  %v386_v6 = vld [vmem:[%s2424_s2 + $0x18] sm:$0xff]  ;;  %s1736_s11 = smov 127   ;;  %vm436_vm0 = vcmask 1043456  }
  0x1d   : > { %1491 = vset.pattern.permute.xlu0 %v1734_v0  ;;  %440 = vperm.xlu1 %1489, %v383_v2   ;;  %v388_v7 = vld [vmem:[%s2424_s2 + $0x28] sm:$0xff]  ;;  %v387_v8 = vld [vmem:[%s2424_s2 + $0x20] sm:$0xff]  ;;  %v389_v9 = vld [vmem:[%s2424_s2 + $0x30] sm:$0xff]  ;;  %vm598_vm1 = vcmask 97280   ;;  %p343_p13 = scmp.lt.s32.totalorder %s1724_s21, 1  ;;  %vm1216_vm2 = vcmask 261120  }
  0x1e   : > { %434 = vrot.lane.b32.xlu0 %v1832_v1, %s1735_s28  ;;  %450 = vperm.xlu2 %1490, %v385_v3   ;;  %v390_v10 = vld [vmem:[%s2424_s2 + $0x38] sm:$0xff]  ;;  %v392_v11 = vld [vmem:[%s2424_s2 + $0x48] sm:$0xff]  ;;  %v393_v12 = vld [vmem:[%s2424_s2 + $0x50] sm:$0xff]  ;;  %vm1218_vm3 = vcmask 254976  }
  0x1f   : > { %v395_v13 = vld [vmem:[%s2424_s2 + $0x60] sm:$0xff]  ;;  %v396_v14 = vld [vmem:[%s2424_s2 + $0x68] sm:$0xff]  ;;  %v398_v17 = vld [vmem:[%s2424_s2 + $0x78] sm:$0xff]  ;;  %s2438_s21 = smov (!%p343_p13, %s1724_s21), 1 }
  0x20   : > { %v391_v15 = vld [vmem:[%s2424_s2 + $0x40] sm:$0xff]  ;;  %v394_v18 = vld [vmem:[%s2424_s2 + $0x58] sm:$0xff]  ;;  %v401_v20 = vld [vmem:[%s2424_s2 + $0x90] sm:$0xff]  ;;  %s1426_s14 = sshll.u32 %s2438_s21, 4 }
  0x21   : > { %v399_v16 = vld [vmem:[%s2424_s2 + $0x80] sm:$0xff]  ;;  %v402_v19 = vld [vmem:[%s2424_s2 + $0x98] sm:$0xff]  ;;  %v397_v21 = vld [vmem:[%s2424_s2 + $0x70] sm:$0xff] }
  0x22   : > { %v405_v22 = vld [vmem:[%s2424_s2 + $0xb0] sm:$0xff]  ;;  %v404_v23 = vld [vmem:[%s2424_s2 + $0xa8] sm:$0xff]  ;;  %v414_v26 = vld [vmem:[%s2424_s2 + $0xf8] sm:$0xff] }
  0x23   : > { %v400_v24 = vld [vmem:[%s2424_s2 + $0x88] sm:$0xff]  ;;  %v413_v25 = vld [vmem:[%s2424_s2 + $0xf0] sm:$0xff]  ;;  %v403_v28 = vld [vmem:[%s2424_s2 + $0xa0] sm:$0xff] }
  0x24   : > { %v410_v29 = vld [vmem:[%s2424_s2 + $0xd8] sm:$0xff]  ;;  %v411_v30 = vld [vmem:[%s2424_s2 + $0xe0] sm:$0xff]  ;;  %v408_v38 = vld [vmem:[%s2424_s2 + $0xc8] sm:$0xff] }
  0x25   : > { %445 = vperm.xlu1 %1489, %v384_v5   ;;  %v351_v32 = vld [vmem:[%s2423_s1] sm:$0xff]  ;;  %v366_v34 = vld [vmem:[%s2423_s1 + $0x78] sm:$0xff]  ;;  %v352_v39 = vld [vmem:[%s2423_s1 + $0x8] sm:$0xff] }
  0x26   : > { %431 = vrot.lane.b32.xlu0 %v430_v4, %s1736_s11  ;;  %455 = vperm.xlu2 %1490, %v386_v6   ;;  %v374_v35 = vld [vmem:[%s2423_s1 + $0xb8] sm:$0xff]  ;;  %v407_v37 = vld [vmem:[%s2424_s2 + $0xc0] sm:$0xff]  ;;  %v412_v42 = vld [vmem:[%s2424_s2 + $0xe8] sm:$0xff] }
  0x27   : > { %v406_v36 = vld [vmem:[%s2424_s2 + $0xb8] sm:$0xff]  ;;  %v367_v40 = vld [vmem:[%s2423_s1 + $0x80] sm:$0xff]  ;;  %v353_v43 = vld [vmem:[%s2423_s1 + $0x10] sm:$0xff] }
  0x28   : > { %v375_v41 = vld [vmem:[%s2423_s1 + $0xc0] sm:$0xff]  ;;  %v368_v44 = vld [vmem:[%s2423_s1 + $0x88] sm:$0xff]  ;;  %v409_v46 = vld [vmem:[%s2424_s2 + $0xd0] sm:$0xff] }
  0x29   : > { %v376_v45 = vld [vmem:[%s2423_s1 + $0xc8] sm:$0xff]  ;;  %v354_v47 = vld [vmem:[%s2423_s1 + $0x18] sm:$0xff]  ;;  %v369_v48 = vld [vmem:[%s2423_s1 + $0x90] sm:$0xff] }
  0x2a   : > { %v377_v49 = vld [vmem:[%s2423_s1 + $0xd0] sm:$0xff]  ;;  %v355_v50 = vld [vmem:[%s2423_s1 + $0x20] sm:$0xff]  ;;  %v370_v51 = vld [vmem:[%s2423_s1 + $0x98] sm:$0xff] }
  0x2b   : > { %v378_v52 = vld [vmem:[%s2423_s1 + $0xd8] sm:$0xff]  ;;  %v356_v53 = vld [vmem:[%s2423_s1 + $0x28] sm:$0xff]  ;;  %v371_v54 = vld [vmem:[%s2423_s1 + $0xa0] sm:$0xff] }
  0x2c   : > { %v379_v55 = vld [vmem:[%s2423_s1 + $0xe0] sm:$0xff]  ;;  %v357_v56 = vld [vmem:[%s2423_s1 + $0x30] sm:$0xff]  ;;  %v372_v57 = vld [vmem:[%s2423_s1 + $0xa8] sm:$0xff] }
  0x2d   : > { %465 = vperm.xlu1 %1489, %v388_v7   ;;  %v380_v58 = vld [vmem:[%s2423_s1 + $0xe8] sm:$0xff]  ;;  %v358_v59 = vld [vmem:[%s2423_s1 + $0x38] sm:$0xff]  ;;  %v373_v60 = vld [vmem:[%s2423_s1 + $0xb0] sm:$0xff] }
  0x2e   : > { %460 = vperm.xlu0 %1491, %v387_v8   ;;  %470 = vperm.xlu2 %1490, %v389_v9   ;;  %v381_v61 = vld [vmem:[%s2423_s1 + $0xf0] sm:$0xff]  ;;  %v359_v62 = vld [vmem:[%s2423_s1 + $0x40] sm:$0xff]  ;;  %v382_v63 = vld [vmem:[%s2423_s1 + $0xf8] sm:$0xff] }
  0x2f   : > { %v360_v0 = vld [vmem:[%s2423_s1 + $0x48] sm:$0xff]  ;;  %v362_v2 = vld [vmem:[%s2423_s1 + $0x58] sm:$0xff]  ;;  %v363_v4 = vld [vmem:[%s2423_s1 + $0x60] sm:$0xff] }
  0x30   : > { %v364_v8 = vld [vmem:[%s2423_s1 + $0x68] sm:$0xff] }
  0x35   : > { %475 = vperm.xlu1 %1489, %v390_v10  }
  0x36   : > { %485 = vperm.xlu0 %1491, %v392_v11   ;;  %480 = vperm.xlu2 %1490, %v391_v15  }
  0x3d   : > { %490 = vperm.xlu1 %1489, %v393_v12   ;;  %v365_v12 = vld [vmem:[%s2423_s1 + $0x70] sm:$0xff] }
  0x3e   : > { %500 = vperm.xlu0 %1491, %v395_v13   ;;  %495 = vperm.xlu2 %1490, %v394_v18  }
  0x45   : > { %505 = vperm.xlu1 %1489, %v396_v14  }
  0x46   : > { %515 = vperm.xlu0 %1491, %v398_v17   ;;  %510 = vperm.xlu2 %1490, %v397_v21  }
  0x4d   : > { %520 = vperm.xlu1 %1489, %v399_v16  }
  0x4e   : > { %530 = vperm.xlu0 %1491, %v401_v20   ;;  %525 = vperm.xlu2 %1490, %v400_v24  }
  0x55   : > { %535 = vperm.xlu1 %1489, %v402_v19  }
  0x56   : > { %545 = vperm.xlu0 %1491, %v404_v23   ;;  %540 = vperm.xlu2 %1490, %v403_v28  }
  0x5d   : > { %550 = vperm.xlu1 %1489, %v405_v22  }
  0x5e   : > { %595 = vperm.xlu0 %1491, %v414_v26   ;;  %555 = vperm.xlu2 %1490, %v406_v36  }
  0x65   : > { %590 = vperm.xlu1 %1489, %v413_v25  }
  0x66   : > { %580 = vperm.xlu0 %1491, %v411_v30   ;;  %585 = vperm.xlu2 %1490, %v412_v42  }
  0x6d   : > { %575 = vperm.xlu1 %1489, %v410_v29  }
  0x6e   : > { %565 = vperm.xlu0 %1491, %v408_v38   ;;  %570 = vperm.xlu2 %1490, %v409_v46  }
  0x75   : > { %560 = vperm.xlu1 %1489, %v407_v37  }
  0x78   : > { %v451_v3 = vpop.permute.xlu2 %450 }
  0x80   : > { %v456_v7 = vpop.permute.xlu2 %455 }
  0x88   : > { %v2065_v11 = vpop.permute.xlu2 %470 }
  0x8f   : > { %v441_v5 = vpop.permute.xlu1 %440 }
  0x90   : > { %v435_v27 = vpop.permute.xlu0 %434  ;;  %v2075_v15 = vpop.permute.xlu2 %480 }
  0x91   : > { %1391 = vmatpush.msk.msra.mxu0 %vm436_vm0, %v435_v27  ;;  %1427 = vmatpush.msk.msra.mxu1 %vm436_vm0, %v435_v27 }
  0x92   : > { %1428 = vmatpush.msk.msra.mxu2 %vm436_vm0, %v435_v27 }
  0x97   : > { %v2061_v9 = vpop.permute.xlu1 %445 }
  0x98   : > { %v432_v31 = vpop.permute.xlu0 %431  ;;  %v2079_v21 = vpop.permute.xlu2 %495 }
  0x99   : > { %v437_v33 = vsel %vm436_vm0, %v1832_v1, %v432_v31  ;;  %v361_v1 = vld [vmem:[%s2423_s1 + $0x50] sm:$0xff] }
  0x9a   : > { %712 = vmatpush.msra.mxu0 %v437_v33  ;;  %1429 = vmatpush.msra.mxu1 %v437_v33 }
  0x9b   : > { %1430 = vmatpush.msra.mxu2 %v437_v33  ;;  %1392 = vmatmul.msk.f32.vlgmr.msra.gmra.mxu0 %vm598_vm1, %v351_v32 }
  0x9c   : > { %1407 = vmatmul.msk.f32.vlgmr.msra.gmra.mxu1 %vm598_vm1, %v366_v34  ;;  %1415 = vmatmul.msk.f32.vlgmr.msra.gmra.mxu2 %vm598_vm1, %v374_v35 }
  0x9f   : > { %v2071_v13 = vpop.permute.xlu1 %465 }
  0xa0   : > { %v2054_v6 = vpop.permute.xlu0 %460  ;;  %v2092_v27 = vpop.permute.xlu2 %510 }
  0xa3   : > { %1393 = vmatmul.msk.f32.gmra.mxu0 %vm598_vm1, %v352_v39 }
  0xa4   : > { %1408 = vmatmul.msk.f32.gmra.mxu1 %vm598_vm1, %v367_v40  ;;  %1416 = vmatmul.msk.f32.gmra.mxu2 %vm598_vm1, %v375_v41 }
  0xa7   : > { %v476_v16 = vpop.permute.xlu1 %475 }
  0xa8   : > { %v2063_v10 = vpop.permute.xlu0 %485  ;;  %v2102_v34 = vpop.permute.xlu2 %525 }
  0xab   : > { %1394 = vmatmul.msk.f32.gmra.mxu0 %vm598_vm1, %v353_v43 }
  0xac   : > { %1409 = vmatmul.msk.f32.gmra.mxu1 %vm598_vm1, %v368_v44  ;;  %1417 = vmatmul.msk.f32.gmra.mxu2 %vm598_vm1, %v376_v45 }
  0xaf   : > { %v2090_v26 = vpop.permute.xlu1 %490 }
  0xb0   : > { %v2073_v14 = vpop.permute.xlu0 %500  ;;  %v2116_v46 = vpop.permute.xlu2 %540 }
  0xb3   : > { %1395 = vmatmul.msk.f32.gmra.mxu0 %vm598_vm1, %v354_v47 }
  0xb4   : > { %1410 = vmatmul.msk.f32.gmra.mxu1 %vm598_vm1, %v369_v48  ;;  %1418 = vmatmul.msk.f32.gmra.mxu2 %vm598_vm1, %v377_v49 }
  0xb7   : > { %v2098_v32 = vpop.permute.xlu1 %505 }
  0xb8   : > { %v516_v18 = vpop.permute.xlu0 %515 }
  0xbb   : > { %1396 = vmatmul.msk.f32.gmra.mxu0 %vm598_vm1, %v355_v50 }
  0xbc   : > { %1411 = vmatmul.msk.f32.gmra.mxu1 %vm598_vm1, %v370_v51  ;;  %1419 = vmatmul.msk.f32.gmra.mxu2 %vm598_vm1, %v378_v52  ;;  %v2120_v51 = vpop.permute.xlu2 %555 }
  0xbf   : > { %v2110_v42 = vpop.permute.xlu1 %520 }
  0xc0   : > { %v531_v30 = vpop.permute.xlu0 %530 }
  0xc3   : > { %1397 = vmatmul.msk.f32.gmra.mxu0 %vm598_vm1, %v356_v53 }
  0xc4   : > { %1412 = vmatmul.msk.f32.gmra.mxu1 %vm598_vm1, %v371_v54  ;;  %1420 = vmatmul.msk.f32.gmra.mxu2 %vm598_vm1, %v379_v55 }
  0xc7   : > { %v2118_v49 = vpop.permute.xlu1 %535 }
  0xc8   : > { %v2104_v39 = vpop.permute.xlu0 %545 }
  0xcb   : > { %1398 = vmatmul.msk.f32.gmra.mxu0 %vm598_vm1, %v357_v56 }
  0xcc   : > { %1413 = vmatmul.msk.f32.gmra.mxu1 %vm598_vm1, %v372_v57  ;;  %1421 = vmatmul.msk.f32.gmra.mxu2 %vm598_vm1, %v380_v58 }
  0xcf   : > { %v2122_v57 = vpop.permute.xlu1 %550 }
  0xd0   : > { %v596_v47 = vpop.permute.xlu0 %595 }
  0xd3   : > { %1399 = vmatmul.msk.f32.gmra.mxu0 %vm598_vm1, %v358_v59 }
  0xd4   : > { %1414 = vmatmul.msk.f32.gmra.mxu1 %vm598_vm1, %v373_v60  ;;  %1422 = vmatmul.msk.f32.gmra.mxu2 %vm598_vm1, %v381_v61  ;;  %v586_v61 = vpop.permute.xlu2 %585 }
  0xd8   : > { %v581_v53 = vpop.permute.xlu0 %580 }
  0xdb   : > { %1400 = vmatmul.msk.f32.gmra.mxu0 %vm598_vm1, %v359_v62 }
  0xdc   : > { %1423 = vmatmul.msk.f32.gmra.mxu2 %vm598_vm1, %v382_v63 }
  0xe3   : > { %1401 = vmatmul.msk.f32.gmra.mxu0 %vm598_vm1, %v360_v0 }
  0xeb   : > { %1402 = vmatmul.msk.f32.gmra.mxu0 %vm598_vm1, %v361_v1 }
  0xf3   : > { %1403 = vmatmul.msk.f32.gmra.mxu0 %vm598_vm1, %v362_v2 }
  0xfb   : > { %1404 = vmatmul.msk.f32.gmra.mxu0 %vm598_vm1, %v363_v4 }
 0x103   : > { %1405 = vmatmul.msk.f32.gmra.mxu0 %vm598_vm1, %v364_v8 }
 0x10b   : > { %1406 = vmatmul.msk.f32.gmra.mxu0 %vm598_vm1, %v365_v12 }
 0x118   : > { %v714_v17 = vpop.f32.mrf.mxu0 }
 0x119   : > { %v759_v19 = vpop.f32.mrf.mxu1  ;;  %v715_v35 = vadd.f32 %v714_v17, %v441_v5  ;;  %v591_v5 = vpop.permute.xlu1 %590 }
 0x11a   : > { %v2077_v20 = vadd.f32 %v759_v19, %v516_v18 }
 0x11b   : > { %v2106_v40 = vmax.f32 %v715_v35, 0.0 }
 0x11c   : > { %v825_v22 = vmax.f32 %v2077_v20, 0.0 }
 0x11e   : > { %1076 = vmatpush.msrb.mxu1 %v825_v22 }
 0x11f   : > { %v2084_v23 = vpop.f32.mrf.mxu2 }
 0x120   : > { %v2086_v24 = vpop.f32.mrf.mxu0 }
 0x121   : > { %v2088_v25 = vpop.f32.mrf.mxu1 }
 0x127   : > { %v2094_v28 = vpop.f32.mrf.mxu2 }
 0x128   : > { %v720_v29 = vpop.f32.mrf.mxu0 }
 0x129   : > { %v2096_v31 = vpop.f32.mrf.mxu1  ;;  %v721_v52 = vadd.f32 %v720_v29, %v451_v3 }
 0x12b   : > { %v2124_v58 = vmax.f32 %v721_v52, 0.0 }
 0x12f   : > { %v2100_v33 = vpop.f32.mrf.mxu2 }
 0x130   : > { %v723_v36 = vpop.f32.mrf.mxu0 }
 0x131   : > { %v768_v37 = vpop.f32.mrf.mxu1  ;;  %v724_v62 = vadd.f32 %v723_v36, %v456_v7 }
 0x132   : > { %v769_v38 = vadd.f32 %v768_v37, %v531_v30 }
 0x133   : > { %v2133_v3 = vmax.f32 %v724_v62, 0.0 }
 0x134   : > { %v2108_v41 = vmax.f32 %v769_v38, 0.0 }
 0x136   : > { %v1637_v43 = vpack.i.bf16 %v2106_v40, %v2108_v41 }
 0x137   : > { %v2114_v44 = vpop.f32.mrf.mxu2 }
 0x138   : > { %v726_v45 = vpop.f32.mrf.mxu0 }
 0x139   : > { %v2131_v63 = vpop.f32.mrf.mxu1  ;;  %v727_v17 = vadd.f32 %v726_v45, %v2054_v6 }
 0x13b   : > { %v2144_v36 = vmax.f32 %v727_v17, 0.0 }
 0x13f   : > { %v795_v48 = vpop.f32.mrf.mxu2 }
 0x140   : > { %v729_v50 = vpop.f32.mrf.mxu0 }
 0x141   : > { %v774_v35 = vpop.f32.mrf.mxu1  ;;  %v730_v45 = vadd.f32 %v729_v50, %v2071_v13 }
 0x147   : > { %v798_v54 = vpop.f32.mrf.mxu2 }
 0x148   : > { %v799_v55 = vadd.f32 %v798_v54, %v581_v53  ;;  %v732_v56 = vpop.f32.mrf.mxu0 }
 0x149   : > { %v733_v7 = vadd.f32 %v732_v56, %v2065_v11  ;;  %v576_v11 = vpop.permute.xlu1 %575 }
 0x14a   : > { %v2126_v59 = vmax.f32 %v799_v55, 0.0  ;;  %v796_v52 = vadd.f32 %v795_v48, %v576_v11  ;;  %v571_v48 = vpop.permute.xlu2 %570 }
 0x14b   : > { %v2146_v37 = vmax.f32 %v733_v7, 0.0 }
 0x14c   : > { %v1492_v60 = vpack.i.bf16 %v2124_v58, %v2126_v59 }
 0x14e   : > { %1493 = vrot.lane.b32.xlu0 %v1492_v60, %s1736_s11 }
 0x14f   : > { %v801_v0 = vpop.f32.mrf.mxu2 }
 0x150   : > { %v802_v1 = vadd.f32 %v801_v0, %v586_v61  ;;  %v735_v2 = vpop.f32.mrf.mxu0  ;;  %v2159_v61 = vmax.f32 %v730_v45, 0.0  ;;  %v2163_v0 = vmax.f32 %v796_v52, 0.0 }
 0x151   : > { %v736_v8 = vadd.f32 %v735_v2, %v476_v16  ;;  %v566_v2 = vpop.permute.xlu0 %565 }
 0x152   : > { %v2135_v4 = vmax.f32 %v802_v1, 0.0  ;;  %v777_v1 = vpop.f32.mrf.mxu1  ;;  %v790_v7 = vadd.f32 %v2100_v33, %v566_v2 }
 0x153   : > { %v2142_v19 = vmax.f32 %v736_v8, 0.0 }
 0x154   : > { %v1497_v12 = vpack.i.bf16 %v2133_v3, %v2135_v4 }
 0x155   : > { %v1502_v38 = vpack.i.bf16 %v2146_v37, %v2142_v19 }
 0x156   : > { %1498 = vrot.lane.b32.xlu1 %v1497_v12, %s1736_s11  ;;  %v561_v12 = vpop.permute.xlu1 %560 }
 0x157   : > { %v804_v18 = vpop.f32.mrf.mxu2 }
 0x158   : > { %v805_v29 = vadd.f32 %v804_v18, %v591_v5  ;;  %v738_v30 = vpop.f32.mrf.mxu0  ;;  %v793_v5 = vadd.f32 %v2114_v44, %v571_v48 }
 0x159   : > { %v739_v53 = vadd.f32 %v738_v30, %v2075_v15 }
 0x15a   : > { %v2148_v16 = vmax.f32 %v805_v29, 0.0  ;;  %v787_v29 = vadd.f32 %v2094_v28, %v561_v12  ;;  %v2188_v30 = vmax.f32 %v793_v5, 0.0 }
 0x15b   : > { %v2165_v13 = vmax.f32 %v739_v53, 0.0 }
 0x15c   : > { %v1507_v6 = vpack.i.bf16 %v2144_v36, %v2148_v16  ;;  %v2199_v33 = vmax.f32 %v787_v29, 0.0 }
 0x15e   : > { %1503 = vrot.lane.b32.xlu1 %v1502_v38, %s1736_s11  ;;  %1508 = vrot.lane.b32.xlu2 %v1507_v6, %s1736_s11  ;;  %v780_v38 = vpop.f32.mrf.mxu1  ;;  %v784_v6 = vadd.f32 %v2084_v23, %v2120_v51  ;;  %v775_v51 = vadd.f32 %v774_v35, %v2116_v46  ;;  %v1587_v2 = vpack.i.bf16 %v2146_v37, %v2199_v33 }
 0x15f   : > { %v807_v54 = vpop.f32.mrf.mxu2  ;;  %v781_v28 = vadd.f32 %v780_v38, %v2122_v57 }
 0x160   : > { %v808_v55 = vadd.f32 %v807_v54, %v596_v47  ;;  %v741_v56 = vpop.f32.mrf.mxu0  ;;  %v2204_v52 = vmax.f32 %v784_v6, 0.0 }
 0x161   : > { %v742_v60 = vadd.f32 %v741_v56, %v2063_v10  ;;  %v2209_v53 = vmax.f32 %v781_v28, 0.0  ;;  %v2234_v56 = vadd.f32 %v2088_v25, %v2110_v42  ;;  %v1572_v42 = vpack.i.bf16 %v2106_v40, %v2188_v30 }
 0x162   : > { %v2161_v62 = vmax.f32 %v808_v55, 0.0 }
 0x163   : > { %v2167_v50 = vmax.f32 %v742_v60, 0.0  ;;  %v1607_v20 = vpack.i.bf16 %v2144_v36, %v2209_v53 }
 0x164   : > { %1099 = vmatpush.msrb.mxu2 %v2161_v62  ;;  %v1512_v15 = vpack.i.bf16 %v2159_v61, %v2161_v62 }
 0x165   : > { %v1522_v47 = vpack.i.bf16 %v2167_v50, %v2163_v0  ;;  %v1517_v10 = vpack.i.bf16 %v2165_v13, %v2167_v50 }
 0x166   : > { %1100 = vmatpush.msrb.mxu2 %v2148_v16  ;;  %1513 = vrot.lane.b32.xlu0 %v1512_v15, %s1736_s11 }
 0x167   : > { %1523 = vrot.lane.b32.xlu1 %v1522_v47, %s1735_s28  ;;  %1518 = vrot.lane.b32.xlu2 %v1517_v10, %s1736_s11  ;;  %v416_v47 = vld [vmem:[%s2425_s3 + $0x8] sm:$0xff] }
 0x168   : > { %1101 = vmatpush.msrb.mxu2 %v2135_v4  ;;  %v744_v8 = vpop.f32.mrf.mxu0 }
 0x169   : > { %v745_v17 = vadd.f32 %v744_v8, %v2090_v26  ;;  %v2195_v26 = vmax.f32 %v790_v7, 0.0  ;;  %v1567_v8 = vpack.i.bf16 %v2165_v13, %v2188_v30 }
 0x16a   : > { %1102 = vmatpush.msrb.mxu2 %v2126_v59 }
 0x16b   : > { %v2185_v18 = vmax.f32 %v745_v17, 0.0  ;;  %v1582_v17 = vpack.i.bf16 %v2199_v33, %v2195_v26 }
 0x16c   : > { %1103 = vmatpush.msrb.mxu2 %v2163_v0 }
 0x16d   : > { %v1527_v44 = vpack.i.bf16 %v2185_v18, %v2126_v59  ;;  %v778_v59 = vadd.f32 %v777_v1, %v2104_v39  ;;  %v2221_v39 = vmax.f32 %v775_v51, 0.0 }
 0x16e   : > { %1104 = vmatpush.msrb.mxu2 %v2188_v30 }
 0x16f   : > { %1528 = vrot.lane.b32.xlu2 %v1527_v44, %s1735_s28  ;;  %v2216_v55 = vmax.f32 %v778_v59, 0.0 }
 0x170   : > { %1105 = vmatpush.msrb.mxu2 %v2195_v26  ;;  %v747_v11 = vpop.f32.mrf.mxu0 }
 0x171   : > { %v748_v45 = vadd.f32 %v747_v11, %v2079_v21  ;;  %v772_v21 = vadd.f32 %v2131_v63, %v2118_v49 }
 0x172   : > { %1106 = vmatpush.msrb.mxu2 %v2199_v33 }
 0x173   : > { %v821_v23 = vmax.f32 %v748_v45, 0.0  ;;  %v2229_v49 = vmax.f32 %v772_v21, 0.0 }
 0x174   : > { %1107 = vmatpush.msrb.mxu2 %v2204_v52 }
 0x175   : > { %v1532_v57 = vpack.i.bf16 %v2185_v18, %v821_v23  ;;  %v1537_v54 = vpack.i.bf16 %v821_v23, %v2135_v4  ;;  %v2227_v4 = vadd.f32 %v2096_v31, %v2102_v34 }
 0x176   : > { %1108 = vmatpush.msrb.mxu2 %v2209_v53 }
 0x177   : > { %1533 = vrot.lane.b32.xlu1 %v1532_v57, %s1736_s11  ;;  %1538 = vrot.lane.b32.xlu0 %v1537_v54, %s1735_s28  ;;  %v827_v1 = vmax.f32 %v2227_v4, 0.0 }
 0x178   : > { %1109 = vmatpush.msrb.mxu2 %v2216_v55  ;;  %v750_v46 = vpop.f32.mrf.mxu0 }
 0x179   : > { %v751_v35 = vadd.f32 %v750_v46, %v2073_v14  ;;  %v826_v14 = vmax.f32 %v2234_v56, 0.0 }
 0x17a   : > { %1110 = vmatpush.msrb.mxu2 %v2221_v39 }
 0x17b   : > { %v822_v63 = vmax.f32 %v751_v35, 0.0 }
 0x17c   : > { %1111 = vmatpush.msrb.mxu2 %v2229_v49 }
 0x17d   : > { %v1542_v60 = vpack.i.bf16 %v822_v63, %v2148_v16 }
 0x17e   : > { %1112 = vmatpush.msrb.mxu2 %v2108_v41 }
 0x17f   : > { %1543 = vrot.lane.b32.xlu1 %v1542_v60, %s1735_s28 }
 0x180   : > { %1113 = vmatpush.msrb.mxu2 %v827_v1  ;;  %v753_v31 = vpop.f32.mrf.mxu0 }
 0x181   : > { %v754_v34 = vadd.f32 %v753_v31, %v2098_v32 }
 0x182   : > { %1114 = vmatpush.msrb.mxu2 %v826_v14 }
 0x183   : > { %v823_v25 = vmax.f32 %v754_v34, 0.0  ;;  %1115 = vmatmul.f32.vlgmr.msrb.gmra.mxu2 %v416_v47 }
 0x185   : > { %v1552_v16 = vpack.i.bf16 %v823_v25, %v2161_v62  ;;  %v1547_v15 = vpack.i.bf16 %v822_v63, %v823_v25  ;;  %v422_v62 = vld [vmem:[%s2425_s3 + $0x38] sm:$0x3] }
 0x187   : > { %1573 = vrot.lane.b32.xlu1 %v1572_v42, %s1736_s11  ;;  %1553 = vrot.lane.b32.xlu2 %v1552_v16, %s1735_s28 }
 0x188   : > { %1548 = vrot.lane.b32.xlu0 %v1547_v15, %s1736_s11  ;;  %v756_v32 = vpop.f32.mrf.mxu0 }
 0x189   : > { %v757_v10 = vadd.f32 %v756_v32, %v2092_v27  ;;  %v718_v27 = vadd.f32 %v2086_v24, %v2061_v9  ;;  %v1622_v9 = vpack.i.bf16 %v2124_v58, %v2221_v39  ;;  %v1577_v24 = vpack.i.bf16 %v2142_v19, %v2195_v26 }
 0x18b   : > { %v824_v48 = vmax.f32 %v757_v10, 0.0  ;;  %1118 = vmatmul.f32.gmra.mxu2 %v422_v62  ;;  %v811_v12 = vmax.f32 %v718_v27, 0.0 }
 0x18d   : > { %1077 = vmatpush.msrb.mxu1 %v824_v48  ;;  %v1557_v5 = vpack.i.bf16 %v824_v48, %v825_v22  ;;  %v1562_v22 = vpack.i.bf16 %v811_v12, %v2163_v0  ;;  %v421_v0 = vld [vmem:[%s2425_s3 + $0x30] sm:$0x3] }
 0x18f   : > { %1588 = vrot.lane.b32.xlu1 %v1587_v2, %s1735_s28  ;;  %1078 = vmatpush.msrb.mxu1 %v823_v25 }
 0x190   : > { %1558 = vrot.lane.b32.xlu2 %v1557_v5, %s1736_s11  ;;  %1568 = vrot.lane.b32.xlu0 %v1567_v8, %s1735_s28 }
 0x191   : > { %1079 = vmatpush.msrb.mxu1 %v822_v63 }
 0x193   : > { %1080 = vmatpush.msrb.mxu1 %v821_v23 }
 0x195   : > { %1081 = vmatpush.msrb.mxu1 %v2185_v18 }
 0x197   : > { %1608 = vrot.lane.b32.xlu1 %v1607_v20, %s1735_s28  ;;  %1082 = vmatpush.msrb.mxu1 %v2167_v50  ;;  %v428_v50 = vld [vmem:[%s2426_s4 + $0x8] sm:$0x3]  ;;  %v417_v20 = vld [vmem:[%s2425_s3 + $0x10] sm:$0xff] }
 0x198   : > { %1563 = vrot.lane.b32.xlu2 %v1562_v22, %s1736_s11  ;;  %1583 = vrot.lane.b32.xlu0 %v1582_v17, %s1736_s11 }
 0x199   : > { %1083 = vmatpush.msrb.mxu1 %v2165_v13  ;;  %v1627_v13 = vpack.i.bf16 %v811_v12, %v2229_v49 }
 0x19b   : > { %1084 = vmatpush.msrb.mxu1 %v2142_v19  ;;  %v1592_v19 = vpack.i.bf16 %v2159_v61, %v2204_v52 }
 0x19d   : > { %1085 = vmatpush.msrb.mxu1 %v2146_v37  ;;  %v1602_v37 = vpack.i.bf16 %v2209_v53, %v2204_v52 }
 0x19f   : > { %1623 = vrot.lane.b32.xlu1 %v1622_v9, %s1735_s28  ;;  %1086 = vmatpush.msrb.mxu1 %v2159_v61  ;;  %v1617_v61 = vpack.i.bf16 %v2221_v39, %v2216_v55 }
 0x1a0   : > { %1598 = vrot.lane.b32.xlu0 %v1557_v5, %s1735_s28  ;;  %1578 = vrot.lane.b32.xlu2 %v1577_v24, %s1735_s28 }
 0x1a1   : > { %1087 = vmatpush.msrb.mxu1 %v2144_v36  ;;  %v415_v36 = vld [vmem:[%s2425_s3] sm:$0xff] }
 0x1a3   : > { %1088 = vmatpush.msrb.mxu1 %v2133_v3 }
 0x1a5   : > { %1089 = vmatpush.msrb.mxu1 %v2124_v58  ;;  %v427_v58 = vld [vmem:[%s2426_s4] sm:$0xff] }
 0x1a7   : > { %1090 = vmatpush.msrb.mxu1 %v811_v12  ;;  %1638 = vrot.lane.b32.xlu1 %v1637_v43, %s1735_s28  ;;  %v1612_v43 = vpack.i.bf16 %v2133_v3, %v2216_v55  ;;  %v1647_v3 = vpack.i.bf16 %v826_v14, %v827_v1 }
 0x1a8   : > { %1603 = vrot.lane.b32.xlu0 %v1602_v37, %s1736_s11  ;;  %1593 = vrot.lane.b32.xlu2 %v1592_v19, %s1735_s28 }
 0x1a9   : > { %1091 = vmatpush.msrb.mxu1 %v2106_v40  ;;  %v1632_v40 = vpack.i.bf16 %v2108_v41, %v2229_v49 }
 0x1aa   : > { %1092 = vmatmul.f32.vlgmr.msrb.gmra.mxu1 %v415_v36 }
 0x1af   : > { %1068 = vperm.xlu1 %1489, %v427_v58  }
 0x1b0   : > { %1618 = vrot.lane.b32.xlu0 %v1617_v61, %s1736_s11  ;;  %1613 = vrot.lane.b32.xlu2 %v1612_v43, %s1735_s28 }
 0x1b2   : > { %1095 = vmatmul.f32.gmra.mxu1 %v421_v0 }
 0x1b8   : > { %1633 = vrot.lane.b32.xlu0 %v1632_v40, %s1736_s11  ;;  %1628 = vrot.lane.b32.xlu2 %v1627_v13, %s1735_s28  ;;  %v1509_v41 = vpop.permute.xlu2 %1508  ;;  %v423_v13 = vld [vmem:[%s2425_s3 + $0x40] sm:$0x3] }
 0x1b9   : > { %v1510_v26 = vunpack.i.l.bf16 %v1509_v41  ;;  %v1511_v47 = vunpack.i.h.bf16 %v1509_v41 }
 0x1c0   : > { %1648 = vrot.lane.b32.xlu0 %v1647_v3, %s1736_s11  ;;  %1643 = vrot.lane.b32.xlu2 %v1647_v3, %s1735_s28  ;;  %v2335_v29 = vpop.permute.xlu0 %1493  ;;  %s349_s11 = scalar_lea.vmem %s2427_s5, %s1426_s14 }
 0x1c1   : > { %v1519_v7 = vpop.permute.xlu2 %1518  ;;  %v1495_v28 = vunpack.i.l.bf16 %v2335_v29  ;;  %v1496_v48 = vunpack.i.h.bf16 %v2335_v29 }
 0x1c2   : > { %v1520_v60 = vunpack.i.l.bf16 %v1519_v7  ;;  %v1521_v1 = vunpack.i.h.bf16 %v1519_v7 }
 0x1c8   : > { %1073 = vperm.xlu2 %1490, %v428_v50   ;;  %v1499_v18 = vpop.permute.xlu1 %1498 }
 0x1c9   : > { %v2337_v38 = vpop.permute.xlu2 %1528  ;;  %v1500_v33 = vunpack.i.l.bf16 %v1499_v18  ;;  %v1501_v32 = vunpack.i.h.bf16 %v1499_v18 }
 0x1ca   : > { %v1530_v40 = vunpack.i.l.bf16 %v2337_v38  ;;  %v1531_v3 = vunpack.i.h.bf16 %v2337_v38 }
 0x1d0   : > { %v1504_v44 = vpop.permute.xlu1 %1503 }
 0x1d1   : > { %v1505_v14 = vunpack.i.l.bf16 %v1504_v44  ;;  %v1506_v34 = vunpack.i.h.bf16 %v1504_v44 }
 0x1d8   : > { %v1514_v30 = vpop.permute.xlu0 %1513 }
 0x1d9   : > { %v1515_v6 = vunpack.i.l.bf16 %v1514_v30  ;;  %v2340_v11 = vpop.permute.xlu1 %1523  ;;  %v1516_v16 = vunpack.i.h.bf16 %v1514_v30 }
 0x1da   : > { %v1525_v50 = vunpack.i.l.bf16 %v2340_v11  ;;  %v1526_v41 = vunpack.i.h.bf16 %v2340_v11 }
 0x1db   : > { %1145 = vmatpush.msra.mxu1 %v1515_v6 }
 0x1dd   : > { %1146 = vmatpush.msra.mxu1 %v1510_v26 }
 0x1df   : > { %1147 = vmatpush.msra.mxu1 %v1500_v33 }
 0x1e1   : > { %1148 = vmatpush.msra.mxu1 %v1495_v28  ;;  %v2342_v45 = vpop.permute.xlu2 %1553 }
 0x1e2   : > { %v1556_v22 = vunpack.i.h.bf16 %v2342_v45  ;;  %v1555_v17 = vunpack.i.l.bf16 %v2342_v45 }
 0x1e9   : > { %v1534_v52 = vpop.permute.xlu1 %1533  ;;  %v2346_v57 = vpop.permute.xlu0 %1538 }
 0x1ea   : > { %v1559_v59 = vpop.permute.xlu2 %1558  ;;  %v1535_v49 = vunpack.i.l.bf16 %v1534_v52  ;;  %v1536_v63 = vunpack.i.h.bf16 %v1534_v52  ;;  %v1540_v58 = vunpack.i.l.bf16 %v2346_v57  ;;  %v1541_v61 = vunpack.i.h.bf16 %v2346_v57 }
 0x1eb   : > { %v1560_v23 = vunpack.i.l.bf16 %v1559_v59  ;;  %v1561_v51 = vunpack.i.h.bf16 %v1559_v59 }
 0x1ed   : > { %1122 = vmatpush.msra.mxu3 %v1560_v23 }
 0x1ef   : > { %1123 = vmatpush.msra.mxu3 %v1561_v51 }
 0x1f1   : > { %v2344_v53 = vpop.permute.xlu1 %1543 }
 0x1f2   : > { %v1564_v54 = vpop.permute.xlu2 %1563  ;;  %v1546_v9 = vunpack.i.h.bf16 %v2344_v53  ;;  %v1545_v24 = vunpack.i.l.bf16 %v2344_v53 }
 0x1f3   : > { %v1565_v21 = vunpack.i.l.bf16 %v1564_v54  ;;  %v1566_v8 = vunpack.i.h.bf16 %v1564_v54 }
 0x1f5   : > { %1149 = vmatpush.msra.mxu1 %v1565_v21 }
 0x1f9   : > { %v1574_v55 = vpop.permute.xlu1 %1573 }
 0x1fa   : > { %v1575_v39 = vunpack.i.l.bf16 %v1574_v55  ;;  %v1549_v46 = vpop.permute.xlu0 %1548  ;;  %v2350_v31 = vpop.permute.xlu2 %1578  ;;  %v1576_v12 = vunpack.i.h.bf16 %v1574_v55 }
 0x1fb   : > { %v1550_v35 = vunpack.i.l.bf16 %v1549_v46  ;;  %v1551_v4 = vunpack.i.h.bf16 %v1549_v46  ;;  %v1580_v38 = vunpack.i.l.bf16 %v2350_v31  ;;  %v1581_v44 = vunpack.i.h.bf16 %v2350_v31 }
 0x1fc   : > { %1150 = vmatpush.msra.mxu1 %v1575_v39 }
 0x1fd   : > { %1124 = vmatpush.msra.mxu3 %v1550_v35 }
 0x1ff   : > { %1125 = vmatpush.msra.mxu3 %v1551_v4 }
 0x201   : > { %1126 = vmatpush.msra.mxu3 %v1535_v49  ;;  %v2352_v10 = vpop.permute.xlu1 %1588 }
 0x202   : > { %v2348_v56 = vpop.permute.xlu0 %1568  ;;  %v2355_v62 = vpop.permute.xlu2 %1593  ;;  %v1590_v33 = vunpack.i.l.bf16 %v2352_v10  ;;  %v1591_v28 = vunpack.i.h.bf16 %v2352_v10 }
 0x203   : > { %1127 = vmatpush.msra.mxu3 %v1536_v63  ;;  %v1570_v7 = vunpack.i.l.bf16 %v2348_v56  ;;  %v1571_v18 = vunpack.i.h.bf16 %v2348_v56  ;;  %v1595_v45 = vunpack.i.l.bf16 %v2355_v62  ;;  %v1596_v52 = vunpack.i.h.bf16 %v2355_v62 }
 0x205   : > { %1128 = vmatpush.msra.mxu3 %v1520_v60 }
 0x207   : > { %1129 = vmatpush.msra.mxu3 %v1521_v1  ;;  %v419_v1 = vld [vmem:[%s2425_s3 + $0x20] sm:$0xff] }
 0x209   : > { %1130 = vmatpush.msra.mxu3 %v1505_v14  ;;  %v1609_v37 = vpop.permute.xlu1 %1608 }
 0x20a   : > { %v1584_v25 = vpop.permute.xlu0 %1583  ;;  %v1614_v43 = vpop.permute.xlu2 %1613  ;;  %v1610_v59 = vunpack.i.l.bf16 %v1609_v37  ;;  %v1611_v23 = vunpack.i.h.bf16 %v1609_v37 }
 0x20b   : > { %v1585_v42 = vunpack.i.l.bf16 %v1584_v25  ;;  %1131 = vmatpush.msra.mxu3 %v1506_v34  ;;  %v1586_v15 = vunpack.i.h.bf16 %v1584_v25  ;;  %v1615_v57 = vunpack.i.l.bf16 %v1614_v43  ;;  %v1616_v54 = vunpack.i.h.bf16 %v1614_v43  ;;  %v420_v25 = vld [vmem:[%s2425_s3 + $0x28] sm:$0xff] }
 0x20d   : > { %1132 = vmatpush.msra.mxu3 %v1516_v16  ;;  %1151 = vmatpush.msra.mxu1 %v1585_v42  ;;  %v418_v16 = vld [vmem:[%s2425_s3 + $0x18] sm:$0xff] }
 0x20f   : > { %1133 = vmatpush.msra.mxu3 %v1511_v47  ;;  %1152 = vmatpush.msra.mxu1 %v1586_v15  ;;  %v425_v15 = vld [vmem:[%s2425_s3 + $0x50] sm:$0x3]  ;;  %v426_v47 = vld [vmem:[%s2425_s3 + $0x58] sm:$0x3] }
 0x211   : > { %1134 = vmatpush.msra.mxu3 %v1501_v32  ;;  %v1624_v6 = vpop.permute.xlu1 %1623  ;;  %v424_v32 = vld [vmem:[%s2425_s3 + $0x48] sm:$0x3] }
 0x212   : > { %v1599_v2 = vpop.permute.xlu0 %1598  ;;  %v1629_v11 = vpop.permute.xlu2 %1628  ;;  %v1625_v55 = vunpack.i.l.bf16 %v1624_v6  ;;  %v1626_v39 = vunpack.i.h.bf16 %v1624_v6 }
 0x213   : > { %v1600_v5 = vunpack.i.l.bf16 %v1599_v2  ;;  %1135 = vmatpush.msra.mxu3 %v1496_v48  ;;  %v1601_v27 = vunpack.i.h.bf16 %v1599_v2  ;;  %v1630_v35 = vunpack.i.l.bf16 %v1629_v11  ;;  %v1631_v4 = vunpack.i.h.bf16 %v1629_v11  ;;  %v1116_v48 = vpop.f32.mrf.mxu2 }
 0x215   : > { %1136 = vmatpush.msra.mxu3 %v1566_v8  ;;  %1168 = vmatpush.msra.mxu2 %v1600_v5 }
 0x217   : > { %1137 = vmatpush.msra.mxu3 %v1576_v12  ;;  %1169 = vmatpush.msra.mxu2 %v1601_v27 }
 0x218   : > { %1138 = vmatmul.f32.vlgmr.msra.gmra.mxu3 %v417_v20 }
 0x219   : > { %1191 = vmatpush.msrb.mxu3 %v1555_v17  ;;  %1170 = vmatpush.msra.mxu2 %v1556_v22  ;;  %v1639_v46 = vpop.permute.xlu1 %1638 }
 0x21a   : > { %v1604_v19 = vpop.permute.xlu0 %1603  ;;  %v1644_v49 = vpop.permute.xlu2 %1643  ;;  %v1640_v63 = vunpack.i.l.bf16 %v1639_v46  ;;  %v1641_v56 = vunpack.i.h.bf16 %v1639_v46 }
 0x21b   : > { %v1605_v36 = vunpack.i.l.bf16 %v1604_v19  ;;  %1192 = vmatpush.msrb.mxu3 %v1545_v24  ;;  %1171 = vmatpush.msra.mxu2 %v1546_v9  ;;  %v1606_v0 = vunpack.i.h.bf16 %v1604_v19  ;;  %v1645_v31 = vunpack.i.l.bf16 %v1644_v49  ;;  %v1646_v34 = vunpack.i.h.bf16 %v1644_v49  ;;  %v1119_v27 = vpop.f32.mrf.mxu2 }
 0x21d   : > { %1193 = vmatpush.msrb.mxu3 %v1540_v58  ;;  %1153 = vmatpush.msra.mxu1 %v1605_v36 }
 0x21e   : > { %1172 = vmatpush.msra.mxu2 %v1541_v61 }
 0x21f   : > { %1194 = vmatpush.msrb.mxu3 %v1530_v40  ;;  %1154 = vmatpush.msra.mxu1 %v1606_v0 }
 0x220   : > { %1173 = vmatpush.msra.mxu2 %v1531_v3  ;;  %1141 = vmatmul.f32.gmra.mxu3 %v423_v13 }
 0x221   : > { %1195 = vmatpush.msrb.mxu3 %v1525_v50  ;;  %v1069_v2 = vpop.permute.xlu1 %1068 }
 0x222   : > { %1174 = vmatpush.msra.mxu2 %v1526_v41  ;;  %v1619_v29 = vpop.permute.xlu0 %1618  ;;  %v1074_v17 = vpop.permute.xlu2 %1073 }
 0x223   : > { %v1620_v30 = vunpack.i.l.bf16 %v1619_v29  ;;  %1196 = vmatpush.msrb.mxu3 %v1570_v7  ;;  %v1621_v26 = vunpack.i.h.bf16 %v1619_v29 }
 0x224   : > { %1175 = vmatpush.msra.mxu2 %v1571_v18 }
 0x225   : > { %1197 = vmatpush.msrb.mxu3 %v1580_v38  ;;  %1155 = vmatpush.msra.mxu1 %v1620_v30 }
 0x226   : > { %1176 = vmatpush.msra.mxu2 %v1581_v44 }
 0x227   : > { %1198 = vmatpush.msrb.mxu3 %v1590_v33  ;;  %1156 = vmatpush.msra.mxu1 %v1621_v26  ;;  %v1093_v10 = vpop.f32.mrf.mxu1 }
 0x228   : > { %1177 = vmatpush.msra.mxu2 %v1591_v28  ;;  %v1094_v8 = vadd.f32 %v1093_v10, %v1069_v2 }
 0x229   : > { %1199 = vmatpush.msrb.mxu3 %v1595_v45 }
 0x22a   : > { %1178 = vmatpush.msra.mxu2 %v1596_v52  ;;  %v1634_v51 = vpop.permute.xlu0 %1633  ;;  %v1117_v12 = vadd.f32 %v1116_v48, %v1094_v8 }
 0x22b   : > { %v1635_v53 = vunpack.i.l.bf16 %v1634_v51  ;;  %1200 = vmatpush.msrb.mxu3 %v1610_v59  ;;  %v1636_v21 = vunpack.i.h.bf16 %v1634_v51 }
 0x22c   : > { %1179 = vmatpush.msra.mxu2 %v1611_v23 }
 0x22d   : > { %1201 = vmatpush.msrb.mxu3 %v1615_v57  ;;  %1157 = vmatpush.msra.mxu1 %v1635_v53 }
 0x22e   : > { %1180 = vmatpush.msra.mxu2 %v1616_v54 }
 0x22f   : > { %1202 = vmatpush.msrb.mxu3 %v1625_v55  ;;  %1158 = vmatpush.msra.mxu1 %v1636_v21  ;;  %v1096_v5 = vpop.f32.mrf.mxu1 }
 0x230   : > { %1181 = vmatpush.msra.mxu2 %v1626_v39  ;;  %v1097_v24 = vadd.f32 %v1096_v5, %v1074_v17 }
 0x231   : > { %1203 = vmatpush.msrb.mxu3 %v1630_v35 }
 0x232   : > { %1182 = vmatpush.msra.mxu2 %v1631_v4  ;;  %v1649_v60 = vpop.permute.xlu0 %1648  ;;  %v1120_v58 = vadd.f32 %v1119_v27, %v1097_v24 }
 0x233   : > { %v1650_v14 = vunpack.i.l.bf16 %v1649_v60  ;;  %1204 = vmatpush.msrb.mxu3 %v1640_v63  ;;  %v1651_v42 = vunpack.i.h.bf16 %v1649_v60 }
 0x234   : > { %1183 = vmatpush.msra.mxu2 %v1641_v56 }
 0x235   : > { %1184 = vmatmul.f32.vlgmr.msra.gmra.mxu2 %v419_v1  ;;  %1205 = vmatpush.msrb.mxu3 %v1645_v31 }
 0x236   : > { %1159 = vmatpush.msra.mxu1 %v1650_v14 }
 0x237   : > { %1206 = vmatpush.msrb.mxu3 %v1646_v34 }
 0x238   : > { %1160 = vmatpush.msra.mxu1 %v1651_v42  ;;  %1207 = vmatmul.f32.vlgmr.msrb.gmra.mxu3 %v420_v25 }
 0x239   : > { %1161 = vmatmul.f32.vlgmr.msra.gmra.mxu1 %v418_v16 }
 0x23d   : > { %1187 = vmatmul.f32.gmra.mxu2 %v425_v15 }
 0x240   : > { %1210 = vmatmul.f32.gmra.mxu3 %v426_v47 }
 0x241   : > { %1164 = vmatmul.f32.gmra.mxu1 %v424_v32 }
 0x29b   : > { %v1139_v62 = vpop.f32.mrf.mxu3 }
 0x29c   : > { %v1140_v22 = vadd.f32 %v1139_v62, %v1117_v12 }
 0x2a3   : > { %v1142_v20 = vpop.f32.mrf.mxu3 }
 0x2a4   : > { %v1143_v0 = vadd.f32 %v1142_v20, %v1120_v58 }
 0x2b6   : > { %v1162_v9 = vpop.f32.mrf.mxu1 }
 0x2b7   : > { %v1163_v37 = vadd.f32 %v1162_v9, %v1140_v22 }
 0x2b8   : > { %v1185_v19 = vpop.f32.mrf.mxu2 }
 0x2b9   : > { %v1186_v36 = vadd.f32 %v1185_v19, %v1163_v37 }
 0x2bb   : > { %v1208_v61 = vpop.f32.mrf.mxu3 }
 0x2bc   : > { %v1209_v43 = vadd.f32 %v1208_v61, %v1186_v36 }
 0x2be   : > { %v1214_v40 = vmax.f32 %v1209_v43, 0.0  ;;  %v1165_v13 = vpop.f32.mrf.mxu1 }
 0x2bf   : > { %v1166_v3 = vadd.f32 %v1165_v13, %v1143_v0 }
 0x2c0   : > { %1217 = vst.msk [vmem:[%s349_s11] sm:$0xff] %vm1216_vm2, %v1214_v40  ;;  %v1188_v50 = vpop.f32.mrf.mxu2 }
 0x2c1   : > { %v1189_v41 = vadd.f32 %v1188_v50, %v1166_v3 }
 0x2c3   : > { %v1211_v7 = vpop.f32.mrf.mxu3 }
 0x2c4   : > { %v1212_v18 = vadd.f32 %v1211_v7, %v1189_v41 }
 0x2c6   : > { %v1215_v29 = vmax.f32 %v1212_v18, 0.0 }
 0x2c8   : > { %1219 = vst.msk [vmem:[%s349_s11 + $0x8] sm:$0x3] %vm1218_vm3, %v1215_v29 }
 0x2c9 PF: > { %s18_s23 = sadd.s32 1, %s1732_s23   ;;  %s2430_s18 = smov %s1716_s19 }
 0x2ca   : > { %p15_p0 = scmp.ge.s32.totalorder %s18_s23, 4   ;;  %s2431_s19 = smov %s1720_s20 }
 0x2cb   : > { %s2432_s20 = smov %s1816_s30  ;;  %s2433_s21 = smov %s1728_s22 }
 0x2cc   : > { %s2434_s22 = smov %s2436_s25  ;;  %17 = sbr.rel (!%p15_p0) target bundleno = 4 (0x4), region = 92 }
 0x2d1   :  { %1249 = vsyncpa [#allocation3], 1 }
 0x2d2   :  { %1251 = vsyncpa [#allocation3 + $0x1], 1 }

// kernel: cnn_regressor_forward.9
= control target key start
LH: loop header
LB: loop body
LE: loop exit
PB: predicated region body
PF: predicated region fallthrough
CT: control target
= control target key end

     0   :  { %s1792_s18 = smov 0   ;;  %s1794_s19 = smov 0   ;;  %s2339_s0 = inlined_call_operand.vmem [shape: f32[2,2,30,68], index: 0, kind: input, shape index: {}]   ;;  %s2340_s1 = inlined_call_operand.vmem [shape: f32[2,256,90], index: 1, kind: input, shape index: {}]   ;;  %s2341_s2 = inlined_call_operand.vmem [shape: f32[2,256,1], index: 2, kind: input, shape index: {}]   ;;  %s2342_s3 = inlined_call_operand.vmem [shape: f32[2,10,768], index: 3, kind: input, shape index: {}]   ;;  %s2343_s4 = inlined_call_operand.vmem [shape: f32[2,10,1], index: 4, kind: input, shape index: {}]   ;;  %s2344_s5 = inlined_call_operand.vmem [shape: f32[2,2,10,64], index: 5, kind: output, shape index: {}]  }
   0x1   :  { %s1796_s20 = smov 0   ;;  %s1798_s21 = smov 0  }
   0x2   :  { %s1800_s22 = smov 0  }
   0x3 LB: > { %s24_s23 = sadd.s32 1, %s1749_s20  ;;  %s27_s24 = sadd.s32 1, %s1753_s21  ;;  %s1757_s22 = sphi %s1800_s22, %s15_s22   ;;  %s1753_s21 = sphi %s1798_s21, %s2348_s21   ;;  %s1749_s20 = sphi %s1796_s20, %s2347_s20   ;;  %s1745_s19 = sphi %s1794_s19, %s2346_s19   ;;  %s1741_s18 = sphi %s1792_s18, %s2345_s18  }
   0x4   : > { %p25_p0 = scmp.ge.s32.totalorder %s24_s23, 2  ;;  %p1404_p1 = scmp.ge.s32.totalorder %s1757_s22, 1 }
   0x5   : > { %p247_p2 = scmp.lt.s32.totalorder %s1757_s22, 5 }
   0x6   : > { %s2350_s23 = smov (%p25_p0, %s24_s23), 0  ;;  %s2352_s24 = smov (!%p25_p0, %s27_s24), %s1753_s21 }
   0x7   : > { %p248_p3 = pnand %p1404_p1, %p247_p2  ;;  %p29_p4 = scmp.ge.s32.totalorder %s2352_s24, 2 }
   0x8   : > { %p303_p5 = scmp.lt.s32.totalorder (!%p248_p3), %s1745_s19, 1  ;;  %p305_p6 = scmp.lt.s32.totalorder (!%p248_p3), %s1741_s18, 1 }
   0x9   : > { %s2354_s24 = smov (%p29_p4, %s2352_s24), 0  ;;  %251 = sbr.rel (%p248_p3) target bundleno = 718 (0x2ce), region = 40 }
   0xa   : > { %s1760_s7 = smov (!%p248_p3), 126   ;;  %s1761_s8 = smov (!%p248_p3), 127  }
   0xe   : > { %v1759_v0 = vmov 0   ;;  %s2356_s19 = smov (!%p303_p5, %s1745_s19), 1  ;;  %s2358_s18 = smov (!%p305_p6, %s1741_s18), 1  ;;  %vm450_vm0 = vcmask 1043456   ;;  %vm427_vm1 = vcmask 1045504   ;;  %vm731_vm2 = vcmask 1041408  }
   0xf   : > { %1557 = vset.pattern.permute.xlu1 %v1759_v0  ;;  %1558 = vset.pattern.permute.xlu2 %v1759_v0  ;;  %s1406_s25 = sshll.u32 %s2356_s19, 3  ;;  %s1405_s26 = sshll.u32 %s2358_s18, 2  ;;  %vm634_vm3 = vcmask 736256   ;;  %vm1253_vm4 = vcmask 523264   ;;  %vm1255_vm5 = vcmask 517120  }
  0x10   : > { %1556 = vset.pattern.permute.xlu0 %v1759_v0  ;;  %s309_s27 = sadd.s32 %s1406_s25, %s1405_s26  ;;  %s1453_s9 = sshll.u32 %s2356_s19, 8 }
  0x11   : > { %s1407_s28 = sshll.u32 %s309_s27, 3  ;;  %s1864_s12 = scalar_lea.vmem %s2341_s2, %s1453_s9 }
  0x12   : > { %s311_s6 = scalar_lea.vmem %s2339_s0, %s1407_s28  ;;  %v377_v23 = vld [vmem:[%s1864_s12] sm:$0xff]  ;;  %v378_v24 = vld [vmem:[%s1864_s12 + $0x8] sm:$0xff]  ;;  %v379_v25 = vld [vmem:[%s1864_s12 + $0x10] sm:$0xff]  ;;  %s1898_s15 = scalar_lea.vmem %s2340_s1, %s1453_s9 }
  0x13   : > { %v1831_v1 = vld [vmem:[%s311_s6 + $0x18] sm:$0x3f]  ;;  %v1833_v2 = vld [vmem:[%s311_s6] sm:$0xff]  ;;  %v1835_v3 = vld [vmem:[%s311_s6 + $0x8] sm:$0xff]  ;;  %s1492_s16 = smul.u32 96, %s2356_s19  ;;  %s1455_s27 = sshll.u32 %s2356_s19, 4 }
  0x14   : > { %v456_v4 = vrot.slane %v1831_v1, 4  ;;  %v1838_v5 = vld [vmem:[%s311_s6 + $0x10] sm:$0xff]  ;;  %v451_v6 = vrot.slane %v1833_v2, 4  ;;  %v452_v7 = vrot.slane %v1835_v3, 4  ;;  %v428_v9 = vrot.slane %v1833_v2, 2  ;;  %v380_v26 = vld [vmem:[%s1864_s12 + $0x18] sm:$0xff]  ;;  %s331_s30 = scalar_lea.vmem %s2343_s4, %s1455_s27 }
  0x15   : > { %v454_v8 = vrot.slane %v1838_v5, 4  ;;  %v429_v10 = vrot.slane %v1835_v3, 2  ;;  %v431_v12 = vrot.slane %v1838_v5, 2  ;;  %v433_v13 = vrot.slane %v1831_v1, 2  ;;  %v381_v27 = vld [vmem:[%s1864_s12 + $0x20] sm:$0xff]  ;;  %v383_v28 = vld [vmem:[%s1864_s12 + $0x30] sm:$0xff]  ;;  %s2156_s26 = scalar_lea.vmem %s2342_s3, %s1492_s16 }
  0x16   : > { %466 = vrot.lane.b32.xlu0 %v456_v4, %s1760_s7  ;;  %v453_v11 = vsel %vm450_vm0, %v451_v6, %v452_v7  ;;  %v386_v29 = vld [vmem:[%s1864_s12 + $0x48] sm:$0xff]  ;;  %v389_v30 = vld [vmem:[%s1864_s12 + $0x60] sm:$0xff]  ;;  %v384_v31 = vld [vmem:[%s1864_s12 + $0x38] sm:$0xff]  ;;  %s1415_s6 = sshll.u32 %s2358_s18, 1 }
  0x17   : > { %v1541_v14 = vpack.i.bf16 %v451_v6, %v453_v11  ;;  %v455_v15 = vsel %vm450_vm0, %v452_v7, %v454_v8  ;;  %v457_v16 = vsel %vm450_vm0, %v454_v8, %v456_v4  ;;  %v430_v17 = vsel %vm427_vm1, %v428_v9, %v429_v10  ;;  %v382_v32 = vld [vmem:[%s1864_s12 + $0x28] sm:$0xff]  ;;  %v392_v33 = vld [vmem:[%s1864_s12 + $0x78] sm:$0xff]  ;;  %v387_v34 = vld [vmem:[%s1864_s12 + $0x50] sm:$0xff] }
  0x18   : > { %v432_v18 = vsel %vm427_vm1, %v429_v10, %v431_v12  ;;  %v1536_v20 = vpack.i.bf16 %v455_v15, %v457_v16  ;;  %v434_v21 = vsel %vm427_vm1, %v431_v12, %v433_v13  ;;  %v385_v35 = vld [vmem:[%s1864_s12 + $0x40] sm:$0xff]  ;;  %v395_v36 = vld [vmem:[%s1864_s12 + $0x90] sm:$0xff]  ;;  %v390_v37 = vld [vmem:[%s1864_s12 + $0x68] sm:$0xff] }
  0x19   : > { %1542 = vrot.lane.b32.xlu1 %v1541_v14, %s1760_s7  ;;  %v1551_v19 = vpack.i.bf16 %v430_v17, %v432_v18  ;;  %v1546_v22 = vpack.i.bf16 %v434_v21, %v433_v13  ;;  %v388_v38 = vld [vmem:[%s1864_s12 + $0x58] sm:$0xff]  ;;  %v398_v39 = vld [vmem:[%s1864_s12 + $0xa8] sm:$0xff]  ;;  %v393_v40 = vld [vmem:[%s1864_s12 + $0x80] sm:$0xff] }
  0x1a   : > { %v391_v41 = vld [vmem:[%s1864_s12 + $0x70] sm:$0xff]  ;;  %v408_v42 = vld [vmem:[%s1864_s12 + $0xf8] sm:$0xff]  ;;  %v394_v45 = vld [vmem:[%s1864_s12 + $0x88] sm:$0xff] }
  0x1b   : > { %1552 = vrot.lane.b32.xlu2 %v1551_v19, %s1761_s8  ;;  %v396_v44 = vld [vmem:[%s1864_s12 + $0x98] sm:$0xff]  ;;  %v405_v46 = vld [vmem:[%s1864_s12 + $0xe0] sm:$0xff]  ;;  %v358_v63 = vld [vmem:[%s1898_s15 + $0x68] sm:$0xff] }
  0x1c   : > { %v345_v62 = vld [vmem:[%s1898_s15] sm:$0xff]  ;;  %v359_v6 = vld [vmem:[%s1898_s15 + $0x70] sm:$0xff]  ;;  %v366_v7 = vld [vmem:[%s1898_s15 + $0xa8] sm:$0xff] }
  0x1d   : > { %v365_v0 = vld [vmem:[%s1898_s15 + $0xa0] sm:$0xff]  ;;  %v400_v10 = vld [vmem:[%s1864_s12 + $0xb8] sm:$0xff]  ;;  %v347_v11 = vld [vmem:[%s1898_s15 + $0x10] sm:$0xff] }
  0x1e   : > { %1537 = vrot.lane.b32.xlu0 %v1536_v20, %s1760_s7  ;;  %v397_v4 = vld [vmem:[%s1864_s12 + $0xa0] sm:$0xff]  ;;  %v360_v12 = vld [vmem:[%s1898_s15 + $0x78] sm:$0xff]  ;;  %v367_v13 = vld [vmem:[%s1898_s15 + $0xb0] sm:$0xff] }
  0x1f   : > { %v373_v8 = vld [vmem:[%s1898_s15 + $0xe0] sm:$0xff]  ;;  %v374_v14 = vld [vmem:[%s1898_s15 + $0xe8] sm:$0xff]  ;;  %v404_v15 = vld [vmem:[%s1864_s12 + $0xd8] sm:$0xff] }
  0x20   : > { %v406_v16 = vld [vmem:[%s1864_s12 + $0xe8] sm:$0xff]  ;;  %v348_v17 = vld [vmem:[%s1898_s15 + $0x18] sm:$0xff]  ;;  %v361_v18 = vld [vmem:[%s1898_s15 + $0x80] sm:$0xff] }
  0x21   : > { %1547 = vrot.lane.b32.xlu1 %v1546_v22, %s1761_s8  ;;  %v368_v19 = vld [vmem:[%s1898_s15 + $0xb8] sm:$0xff]  ;;  %v375_v20 = vld [vmem:[%s1898_s15 + $0xf0] sm:$0xff]  ;;  %v401_v21 = vld [vmem:[%s1864_s12 + $0xc0] sm:$0xff] }
  0x22   : > { %v403_v22 = vld [vmem:[%s1864_s12 + $0xd0] sm:$0xff] }
  0x23   : > { %435 = vrot.lane.b32.xlu2 %v428_v9, %s1761_s8  ;;  %v407_v9 = vld [vmem:[%s1864_s12 + $0xf0] sm:$0xff] }
  0x26   : > { %476 = vperm.xlu0 %1556, %v377_v23   ;;  %v349_v23 = vld [vmem:[%s1898_s15 + $0x20] sm:$0xff] }
  0x29   : > { %481 = vperm.xlu1 %1557, %v378_v24   ;;  %v362_v24 = vld [vmem:[%s1898_s15 + $0x88] sm:$0xff] }
  0x2b   : > { %486 = vperm.xlu2 %1558, %v379_v25   ;;  %v369_v25 = vld [vmem:[%s1898_s15 + $0xc0] sm:$0xff] }
  0x2e   : > { %501 = vperm.xlu0 %1556, %v382_v32   ;;  %v364_v32 = vld [vmem:[%s1898_s15 + $0x98] sm:$0xff] }
  0x31   : > { %491 = vperm.xlu1 %1557, %v380_v26   ;;  %v376_v26 = vld [vmem:[%s1898_s15 + $0xf8] sm:$0xff] }
  0x33   : > { %496 = vperm.xlu2 %1558, %v381_v27   ;;  %v350_v27 = vld [vmem:[%s1898_s15 + $0x28] sm:$0xff] }
  0x36   : > { %516 = vperm.xlu0 %1556, %v385_v35   ;;  %v352_v35 = vld [vmem:[%s1898_s15 + $0x38] sm:$0xff] }
  0x39   : > { %506 = vperm.xlu1 %1557, %v383_v28   ;;  %v363_v28 = vld [vmem:[%s1898_s15 + $0x90] sm:$0xff] }
  0x3b   : > { %511 = vperm.xlu2 %1558, %v384_v31   ;;  %v351_v31 = vld [vmem:[%s1898_s15 + $0x30] sm:$0xff] }
  0x3e   : > { %531 = vperm.xlu0 %1556, %v388_v38   ;;  %v353_v38 = vld [vmem:[%s1898_s15 + $0x40] sm:$0xff] }
  0x41   : > { %521 = vperm.xlu1 %1557, %v386_v29   ;;  %v370_v29 = vld [vmem:[%s1898_s15 + $0xc8] sm:$0xff] }
  0x43   : > { %526 = vperm.xlu2 %1558, %v387_v34  }
  0x46   : > { %546 = vperm.xlu0 %1556, %v391_v41   ;;  %v354_v41 = vld [vmem:[%s1898_s15 + $0x48] sm:$0xff] }
  0x49   : > { %536 = vperm.xlu1 %1557, %v389_v30  }
  0x4b   : > { %541 = vperm.xlu2 %1558, %v390_v37  }
  0x4e   : > { %561 = vperm.xlu0 %1556, %v394_v45  }
  0x51   : > { %551 = vperm.xlu1 %1557, %v392_v33   ;;  %v371_v33 = vld [vmem:[%s1898_s15 + $0xd0] sm:$0xff] }
  0x53   : > { %556 = vperm.xlu2 %1558, %v393_v40  }
  0x56   : > { %576 = vperm.xlu0 %1556, %v397_v4  }
  0x59   : > { %566 = vperm.xlu1 %1557, %v395_v36  }
  0x5b   : > { %571 = vperm.xlu2 %1558, %v396_v44   ;;  %v355_v44 = vld [vmem:[%s1898_s15 + $0x50] sm:$0xff] }
  0x5e   : > { %591 = vperm.xlu0 %1556, %v400_v10  }
  0x61   : > { %581 = vperm.xlu1 %1557, %v398_v39  }
  0x66   : > { %621 = vperm.xlu0 %1556, %v406_v16  }
  0x69   : > { %631 = vperm.xlu1 %1557, %v408_v42  }
  0x6e   : > { %606 = vperm.xlu0 %1556, %v403_v22  }
  0x71   : > { %616 = vperm.xlu1 %1557, %v405_v46  }
  0x75   : > { %v1553_v50 = vpop.permute.xlu2 %1552 }
  0x76   : > { %v1554_v58 = vunpack.i.l.bf16 %v1553_v50  ;;  %v1555_v60 = vunpack.i.h.bf16 %v1553_v50 }
  0x7d   : > { %v436_v59 = vpop.permute.xlu2 %435 }
  0x7e   : > { %v472_v61 = vsel %vm427_vm1, %v1831_v1, %v436_v59  ;;  %v372_v1 = vld [vmem:[%s1898_s15 + $0xd8] sm:$0xff] }
  0x85   : > { %v1967_v30 = vpop.permute.xlu2 %486 }
  0x88   : > { %v467_v43 = vpop.permute.xlu0 %466 }
  0x89   : > { %1418 = vmatpush.msk.msra.mxu0 %vm731_vm2, %v467_v43  ;;  %1456 = vmatpush.msk.msra.mxu1 %vm731_vm2, %v467_v43 }
  0x8a   : > { %1457 = vmatpush.msk.msra.mxu2 %vm731_vm2, %v467_v43  ;;  %1458 = vmatpush.msk.msra.mxu3 %vm731_vm2, %v467_v43 }
  0x8b   : > { %v1543_v47 = vpop.permute.xlu1 %1542 }
  0x8c   : > { %v1544_v54 = vunpack.i.l.bf16 %v1543_v47  ;;  %v1545_v55 = vunpack.i.h.bf16 %v1543_v47  ;;  %v356_v47 = vld [vmem:[%s1898_s15 + $0x58] sm:$0xff] }
  0x8d   : > { %v1975_v34 = vpop.permute.xlu2 %496 }
  0x90   : > { %v1538_v48 = vpop.permute.xlu0 %1537 }
  0x91   : > { %v1539_v49 = vunpack.i.l.bf16 %v1538_v48  ;;  %v1540_v51 = vunpack.i.h.bf16 %v1538_v48 }
  0x93   : > { %739 = vmatpush.msra.mxu0 %v1539_v49  ;;  %1459 = vmatpush.msra.mxu1 %v1539_v49  ;;  %v1548_v52 = vpop.permute.xlu1 %1547 }
  0x94   : > { %1460 = vmatpush.msra.mxu2 %v1539_v49  ;;  %1461 = vmatpush.msra.mxu3 %v1539_v49  ;;  %v1549_v53 = vunpack.i.l.bf16 %v1548_v52  ;;  %v1550_v57 = vunpack.i.h.bf16 %v1548_v52 }
  0x95   : > { %740 = vmatpush.msra.mxu0 %v1540_v51  ;;  %1462 = vmatpush.msra.mxu1 %v1540_v51  ;;  %v1979_v37 = vpop.permute.xlu2 %511 }
  0x96   : > { %1463 = vmatpush.msra.mxu2 %v1540_v51  ;;  %1464 = vmatpush.msra.mxu3 %v1540_v51  ;;  %v473_v56 = vsel %vm450_vm0, %v1549_v53, %v1545_v55  ;;  %v357_v51 = vld [vmem:[%s1898_s15 + $0x60] sm:$0xff] }
  0x97   : > { %741 = vmatpush.msra.mxu0 %v1544_v54  ;;  %1465 = vmatpush.msra.mxu1 %v1544_v54 }
  0x98   : > { %1466 = vmatpush.msra.mxu2 %v1544_v54  ;;  %1467 = vmatpush.msra.mxu3 %v1544_v54  ;;  %v1985_v40 = vpop.permute.xlu0 %476 }
  0x99   : > { %742 = vmatpush.msra.mxu0 %v473_v56  ;;  %1468 = vmatpush.msra.mxu1 %v473_v56 }
  0x9a   : > { %1469 = vmatpush.msra.mxu2 %v473_v56  ;;  %1470 = vmatpush.msra.mxu3 %v473_v56 }
  0x9b   : > { %743 = vmatpush.msra.mxu0 %v1550_v57  ;;  %1471 = vmatpush.msra.mxu1 %v1550_v57  ;;  %v482_v36 = vpop.permute.xlu1 %481 }
  0x9c   : > { %1472 = vmatpush.msra.mxu2 %v1550_v57  ;;  %1473 = vmatpush.msra.mxu3 %v1550_v57 }
  0x9d   : > { %744 = vmatpush.msra.mxu0 %v1554_v58  ;;  %1474 = vmatpush.msra.mxu1 %v1554_v58  ;;  %v1988_v42 = vpop.permute.xlu2 %526 }
  0x9e   : > { %1475 = vmatpush.msra.mxu2 %v1554_v58  ;;  %1476 = vmatpush.msra.mxu3 %v1554_v58 }
  0x9f   : > { %745 = vmatpush.msra.mxu0 %v1555_v60  ;;  %1477 = vmatpush.msra.mxu1 %v1555_v60 }
  0xa0   : > { %1478 = vmatpush.msra.mxu2 %v1555_v60  ;;  %1479 = vmatpush.msra.mxu3 %v1555_v60  ;;  %v1994_v45 = vpop.permute.xlu0 %501 }
  0xa1   : > { %746 = vmatpush.msra.mxu0 %v472_v61  ;;  %1480 = vmatpush.msra.mxu1 %v472_v61 }
  0xa2   : > { %1481 = vmatpush.msra.mxu2 %v472_v61  ;;  %1482 = vmatpush.msra.mxu3 %v472_v61 }
  0xa3   : > { %747 = vmatpush.msra.mxu0 %v1838_v5  ;;  %1483 = vmatpush.msra.mxu1 %v1838_v5  ;;  %v1983_v39 = vpop.permute.xlu1 %491 }
  0xa4   : > { %1484 = vmatpush.msra.mxu2 %v1838_v5  ;;  %1485 = vmatpush.msra.mxu3 %v1838_v5  ;;  %v402_v5 = vld [vmem:[%s1864_s12 + $0xc8] sm:$0xff] }
  0xa5   : > { %748 = vmatpush.msra.mxu0 %v1835_v3  ;;  %1486 = vmatpush.msra.mxu1 %v1835_v3  ;;  %v542_v46 = vpop.permute.xlu2 %541 }
  0xa6   : > { %1487 = vmatpush.msra.mxu2 %v1835_v3  ;;  %1488 = vmatpush.msra.mxu3 %v1835_v3  ;;  %v399_v3 = vld [vmem:[%s1864_s12 + $0xb0] sm:$0xff] }
  0xa7   : > { %749 = vmatpush.msra.mxu0 %v1833_v2  ;;  %1489 = vmatpush.msra.mxu1 %v1833_v2 }
  0xa8   : > { %1490 = vmatpush.msra.mxu2 %v1833_v2  ;;  %1491 = vmatpush.msra.mxu3 %v1833_v2  ;;  %v346_v2 = vld [vmem:[%s1898_s15 + $0x8] sm:$0xff]  ;;  %v2000_v49 = vpop.permute.xlu0 %516 }
  0xa9   : > { %1419 = vmatmul.msk.f32.vlgmr.msra.gmra.mxu0 %vm634_vm3, %v345_v62  ;;  %1432 = vmatmul.msk.f32.vlgmr.msra.gmra.mxu1 %vm634_vm3, %v358_v63 }
  0xaa   : > { %1439 = vmatmul.msk.f32.vlgmr.msra.gmra.mxu2 %vm634_vm3, %v365_v0  ;;  %1446 = vmatmul.msk.f32.vlgmr.msra.gmra.mxu3 %vm634_vm3, %v372_v1 }
  0xab   : > { %586 = vperm.xlu2 %1558, %v399_v3   ;;  %601 = vperm.xlu1 %1557, %v402_v5   ;;  %v1991_v43 = vpop.permute.xlu1 %506 }
  0xad   : > { %v557_v50 = vpop.permute.xlu2 %556 }
  0xb0   : > { %v2007_v53 = vpop.permute.xlu0 %531 }
  0xb1   : > { %1420 = vmatmul.msk.f32.gmra.mxu0 %vm634_vm3, %v346_v2  ;;  %1433 = vmatmul.msk.f32.gmra.mxu1 %vm634_vm3, %v359_v6 }
  0xb2   : > { %1440 = vmatmul.msk.f32.gmra.mxu2 %vm634_vm3, %v366_v7  ;;  %1447 = vmatmul.msk.f32.gmra.mxu3 %vm634_vm3, %v373_v8 }
  0xb3   : > { %626 = vperm.xlu2 %1558, %v407_v9   ;;  %v1998_v48 = vpop.permute.xlu1 %521 }
  0xb5   : > { %v2009_v54 = vpop.permute.xlu2 %571 }
  0xb8   : > { %v547_v56 = vpop.permute.xlu0 %546 }
  0xb9   : > { %1421 = vmatmul.msk.f32.gmra.mxu0 %vm634_vm3, %v347_v11  ;;  %1434 = vmatmul.msk.f32.gmra.mxu1 %vm634_vm3, %v360_v12 }
  0xba   : > { %1441 = vmatmul.msk.f32.gmra.mxu2 %vm634_vm3, %v367_v13  ;;  %1448 = vmatmul.msk.f32.gmra.mxu3 %vm634_vm3, %v374_v14 }
  0xbb   : > { %611 = vperm.xlu2 %1558, %v404_v15   ;;  %v2005_v52 = vpop.permute.xlu1 %536 }
  0xc0   : > { %v562_v59 = vpop.permute.xlu0 %561 }
  0xc1   : > { %1422 = vmatmul.msk.f32.gmra.mxu0 %vm634_vm3, %v348_v17  ;;  %1435 = vmatmul.msk.f32.gmra.mxu1 %vm634_vm3, %v361_v18 }
  0xc2   : > { %1442 = vmatmul.msk.f32.gmra.mxu2 %vm634_vm3, %v368_v19  ;;  %1449 = vmatmul.msk.f32.gmra.mxu3 %vm634_vm3, %v375_v20 }
  0xc3   : > { %596 = vperm.xlu2 %1558, %v401_v21   ;;  %v552_v55 = vpop.permute.xlu1 %551 }
  0xc8   : > { %v2019_v0 = vpop.permute.xlu0 %576 }
  0xc9   : > { %1423 = vmatmul.msk.f32.gmra.mxu0 %vm634_vm3, %v349_v23  ;;  %1436 = vmatmul.msk.f32.gmra.mxu1 %vm634_vm3, %v362_v24 }
  0xca   : > { %1443 = vmatmul.msk.f32.gmra.mxu2 %vm634_vm3, %v369_v25  ;;  %1450 = vmatmul.msk.f32.gmra.mxu3 %vm634_vm3, %v376_v26 }
  0xcb   : > { %v2013_v58 = vpop.permute.xlu1 %566 }
  0xd0   : > { %v2027_v11 = vpop.permute.xlu0 %591 }
  0xd1   : > { %1424 = vmatmul.msk.f32.gmra.mxu0 %vm634_vm3, %v350_v27  ;;  %1437 = vmatmul.msk.f32.gmra.mxu1 %vm634_vm3, %v363_v28 }
  0xd2   : > { %1444 = vmatmul.msk.f32.gmra.mxu2 %vm634_vm3, %v370_v29 }
  0xd3   : > { %v2017_v63 = vpop.permute.xlu1 %581 }
  0xd8   : > { %v622_v25 = vpop.permute.xlu0 %621 }
  0xd9   : > { %1425 = vmatmul.msk.f32.gmra.mxu0 %vm634_vm3, %v351_v31  ;;  %1438 = vmatmul.msk.f32.gmra.mxu1 %vm634_vm3, %v364_v32 }
  0xda   : > { %1445 = vmatmul.msk.f32.gmra.mxu2 %vm634_vm3, %v371_v33 }
  0xdb   : > { %v632_v10 = vpop.permute.xlu1 %631 }
  0xe1   : > { %1426 = vmatmul.msk.f32.gmra.mxu0 %vm634_vm3, %v352_v35 }
  0xe3   : > { %v617_v24 = vpop.permute.xlu1 %616 }
  0xe9   : > { %1427 = vmatmul.msk.f32.gmra.mxu0 %vm634_vm3, %v353_v38 }
  0xf1   : > { %1428 = vmatmul.msk.f32.gmra.mxu0 %vm634_vm3, %v354_v41 }
  0xf9   : > { %1429 = vmatmul.msk.f32.gmra.mxu0 %vm634_vm3, %v355_v44 }
 0x101   : > { %1430 = vmatmul.msk.f32.gmra.mxu0 %vm634_vm3, %v356_v47 }
 0x105   : > { %v2011_v57 = vpop.permute.xlu2 %586 }
 0x109   : > { %1431 = vmatmul.msk.f32.gmra.mxu0 %vm634_vm3, %v357_v51 }
 0x10d   : > { %v627_v60 = vpop.permute.xlu2 %626 }
 0x115   : > { %v612_v1 = vpop.permute.xlu2 %611 }
 0x126   : > { %v2015_v61 = vpop.f32.mrf.mxu0  ;;  %v790_v62 = vpop.f32.mrf.mxu1 }
 0x127   : > { %v791_v20 = vadd.f32 %v790_v62, %v542_v46 }
 0x129   : > { %v2035_v26 = vmax.f32 %v791_v20, 0.0 }
 0x12d   : > { %v2021_v3 = vpop.f32.mrf.mxu2  ;;  %v832_v4 = vpop.f32.mrf.mxu3 }
 0x12e   : > { %v833_v5 = vadd.f32 %v832_v4, %v612_v1  ;;  %v754_v2 = vpop.f32.mrf.mxu0  ;;  %v793_v6 = vpop.f32.mrf.mxu1 }
 0x12f   : > { %v755_v7 = vadd.f32 %v754_v2, %v482_v36  ;;  %v794_v12 = vadd.f32 %v793_v6, %v547_v56 }
 0x130   : > { %v2023_v8 = vmax.f32 %v833_v5, 0.0 }
 0x131   : > { %v2025_v9 = vmax.f32 %v755_v7, 0.0  ;;  %v861_v18 = vmax.f32 %v794_v12, 0.0 }
 0x133   : > { %v1559_v13 = vpack.i.bf16 %v2025_v9, %v2023_v8 }
 0x135   : > { %v2031_v14 = vpop.f32.mrf.mxu2  ;;  %v835_v15 = vpop.f32.mrf.mxu3  ;;  %1560 = vrot.lane.b32.xlu0 %v1559_v13, %s1761_s8 }
 0x136   : > { %v757_v16 = vpop.f32.mrf.mxu0  ;;  %v796_v17 = vpop.f32.mrf.mxu1  ;;  %v836_v27 = vadd.f32 %v835_v15, %v617_v24 }
 0x137   : > { %v797_v19 = vadd.f32 %v796_v17, %v552_v55  ;;  %v758_v22 = vadd.f32 %v757_v16, %v1967_v30 }
 0x138   : > { %v2047_v38 = vmax.f32 %v836_v27, 0.0 }
 0x139   : > { %v862_v21 = vmax.f32 %v797_v19, 0.0  ;;  %v2041_v35 = vmax.f32 %v758_v22, 0.0 }
 0x13b   : > { %1113 = vmatpush.msrb.mxu1 %v862_v21  ;;  %v1569_v23 = vpack.i.bf16 %v861_v18, %v862_v21  ;;  %v1574_v46 = vpack.i.bf16 %v2041_v35, %v2047_v38 }
 0x13d   : > { %v2037_v28 = vpop.f32.mrf.mxu2  ;;  %v838_v29 = vpop.f32.mrf.mxu3  ;;  %1570 = vrot.lane.b32.xlu1 %v1569_v23, %s1760_s7  ;;  %1114 = vmatpush.msrb.mxu1 %v861_v18 }
 0x13e   : > { %v839_v31 = vadd.f32 %v838_v29, %v622_v25  ;;  %1565 = vrot.lane.b32.xlu0 %v1569_v23, %s1761_s8  ;;  %v760_v32 = vpop.f32.mrf.mxu0  ;;  %v799_v33 = vpop.f32.mrf.mxu1 }
 0x13f   : > { %v761_v30 = vadd.f32 %v760_v32, %v1983_v39  ;;  %1115 = vmatpush.msrb.mxu1 %v2035_v26  ;;  %v2055_v47 = vadd.f32 %v799_v33, %v557_v50  ;;  %v602_v29 = vpop.permute.xlu1 %601 }
 0x140   : > { %v2045_v36 = vmax.f32 %v839_v31, 0.0  ;;  %v607_v31 = vpop.permute.xlu0 %606 }
 0x141   : > { %v2049_v41 = vmax.f32 %v761_v30, 0.0  ;;  %v863_v5 = vmax.f32 %v2055_v47, 0.0 }
 0x143   : > { %v1579_v44 = vpack.i.bf16 %v2049_v41, %v2045_v36 }
 0x145   : > { %v820_v51 = vpop.f32.mrf.mxu2  ;;  %v841_v55 = vpop.f32.mrf.mxu3  ;;  %1580 = vrot.lane.b32.xlu2 %v1579_v44, %s1761_s8  ;;  %1575 = vrot.lane.b32.xlu1 %v1574_v46, %s1761_s8 }
 0x146   : > { %v842_v39 = vadd.f32 %v841_v55, %v627_v60  ;;  %v763_v56 = vpop.f32.mrf.mxu0  ;;  %v802_v62 = vpop.f32.mrf.mxu1 }
 0x147   : > { %v764_v1 = vadd.f32 %v763_v56, %v1975_v34  ;;  %v2060_v4 = vadd.f32 %v802_v62, %v562_v59  ;;  %v752_v34 = vadd.f32 %v2015_v61, %v1985_v40  ;;  %v597_v55 = vpop.permute.xlu2 %596 }
 0x148   : > { %v2063_v2 = vmax.f32 %v842_v39, 0.0 }
 0x149   : > { %v2065_v6 = vmax.f32 %v764_v1, 0.0  ;;  %v864_v50 = vmax.f32 %v2060_v4, 0.0  ;;  %v2081_v20 = vmax.f32 %v752_v34, 0.0  ;;  %v410_v4 = vld [vmem:[%s2156_s26 + $0x8] sm:$0xff] }
 0x14b   : > { %v1584_v7 = vpack.i.bf16 %v2065_v6, %v2063_v2  ;;  %v2074_v60 = vpack.i.bf16 %v863_v5, %v864_v50 }
 0x14d   : > { %v823_v59 = vpop.f32.mrf.mxu2  ;;  %v844_v12 = vpop.f32.mrf.mxu3  ;;  %1585 = vrot.lane.b32.xlu0 %v1584_v7, %s1761_s8  ;;  %v821_v7 = vadd.f32 %v820_v51, %v2027_v11 }
 0x14e   : > { %v845_v13 = vadd.f32 %v844_v12, %v632_v10  ;;  %v766_v15 = vpop.f32.mrf.mxu0  ;;  %v805_v16 = vpop.f32.mrf.mxu1  ;;  %v824_v39 = vadd.f32 %v823_v59, %v597_v55  ;;  %v818_v12 = vadd.f32 %v2037_v28, %v2011_v57  ;;  %v815_v59 = vadd.f32 %v2031_v14, %v2017_v63 }
 0x14f   : > { %v767_v17 = vadd.f32 %v766_v15, %v1994_v45  ;;  %v806_v18 = vadd.f32 %v805_v16, %v2013_v58  ;;  %v2124_v11 = vmax.f32 %v821_v7, 0.0 }
 0x150   : > { %v878_v19 = vmax.f32 %v845_v13, 0.0  ;;  %v812_v13 = vadd.f32 %v2021_v3, %v2019_v0  ;;  %v2129_v15 = vmax.f32 %v818_v12, 0.0  ;;  %v2132_v57 = vmax.f32 %v815_v59, 0.0 }
 0x151   : > { %v2083_v21 = vmax.f32 %v767_v17, 0.0  ;;  %v2085_v22 = vmax.f32 %v806_v18, 0.0 }
 0x152   : > { %1136 = vmatpush.msrb.mxu2 %v878_v19  ;;  %v1589_v61 = vpack.i.bf16 %v2035_v26, %v878_v19  ;;  %v2135_v28 = vmax.f32 %v812_v13, 0.0 }
 0x153   : > { %v1594_v40 = vpack.i.bf16 %v2083_v21, %v878_v19  ;;  %v1704_v10 = vpack.i.bf16 %v2081_v20, %v2085_v22 }
 0x154   : > { %1137 = vmatpush.msrb.mxu2 %v2063_v2 }
 0x155   : > { %v826_v45 = vpop.f32.mrf.mxu2  ;;  %1595 = vrot.lane.b32.xlu1 %v1594_v40, %s1761_s8  ;;  %1590 = vrot.lane.b32.xlu0 %v1589_v61, %s1760_s7 }
 0x156   : > { %1138 = vmatpush.msrb.mxu2 %v2045_v36  ;;  %v769_v58 = vpop.f32.mrf.mxu0  ;;  %v808_v23 = vpop.f32.mrf.mxu1  ;;  %v827_v30 = vadd.f32 %v826_v45, %v602_v29 }
 0x157   : > { %v809_v24 = vadd.f32 %v808_v23, %v2009_v54  ;;  %v770_v32 = vadd.f32 %v769_v58, %v1991_v43  ;;  %v416_v58 = vld [vmem:[%s2156_s26 + $0x38] sm:$0x3] }
 0x158   : > { %1139 = vmatpush.msrb.mxu2 %v2047_v38  ;;  %v2111_v34 = vmax.f32 %v827_v30, 0.0  ;;  %v1664_v30 = vpack.i.bf16 %v2129_v15, %v2124_v11 }
 0x159   : > { %v2097_v25 = vmax.f32 %v809_v24, 0.0  ;;  %v2106_v62 = vmax.f32 %v770_v32, 0.0 }
 0x15a   : > { %1140 = vmatpush.msrb.mxu2 %v2023_v8 }
 0x15b   : > { %v1699_v27 = vpack.i.bf16 %v2085_v22, %v2097_v25  ;;  %v1694_v32 = vpack.i.bf16 %v2025_v9, %v2097_v25 }
 0x15d   : > { %v829_v33 = vpop.f32.mrf.mxu2 }
 0x15e   : > { %v830_v44 = vadd.f32 %v829_v33, %v607_v31  ;;  %v772_v46 = vpop.f32.mrf.mxu0 }
 0x15f   : > { %v773_v54 = vadd.f32 %v772_v46, %v1979_v37  ;;  %v2118_v37 = vmax.f32 %v824_v39, 0.0  ;;  %v422_v46 = vld [vmem:[%s331_s30 + $0x8] sm:$0x3] }
 0x160   : > { %v2104_v56 = vmax.f32 %v830_v44, 0.0  ;;  %v1684_v44 = vpack.i.bf16 %v2135_v28, %v2132_v57 }
 0x161   : > { %v2108_v1 = vmax.f32 %v773_v54, 0.0  ;;  %v1654_v29 = vpack.i.bf16 %v2106_v62, %v2118_v37  ;;  %v1649_v31 = vpack.i.bf16 %v2118_v37, %v2111_v34 }
 0x162   : > { %1141 = vmatpush.msrb.mxu2 %v2104_v56  ;;  %v1639_v24 = vpack.i.bf16 %v2081_v20, %v2104_v56 }
 0x163   : > { %v1599_v43 = vpack.i.bf16 %v2106_v62, %v2108_v1 }
 0x164   : > { %1142 = vmatpush.msrb.mxu2 %v2111_v34 }
 0x165   : > { %1600 = vrot.lane.b32.xlu2 %v1599_v43, %s1761_s8 }
 0x166   : > { %1143 = vmatpush.msrb.mxu2 %v2118_v37  ;;  %v775_v51 = vpop.f32.mrf.mxu0 }
 0x167   : > { %v776_v63 = vadd.f32 %v775_v51, %v2000_v49 }
 0x168   : > { %1144 = vmatpush.msrb.mxu2 %v2124_v11 }
 0x169   : > { %v855_v3 = vmax.f32 %v776_v63, 0.0 }
 0x16a   : > { %1145 = vmatpush.msrb.mxu2 %v2129_v15 }
 0x16c   : > { %1146 = vmatpush.msrb.mxu2 %v2132_v57 }
 0x16e   : > { %1147 = vmatpush.msrb.mxu2 %v2135_v28  ;;  %v778_v14 = vpop.f32.mrf.mxu0 }
 0x16f   : > { %v779_v0 = vadd.f32 %v778_v14, %v1998_v48 }
 0x170   : > { %1148 = vmatpush.msrb.mxu2 %v2097_v25 }
 0x171   : > { %v856_v16 = vmax.f32 %v779_v0, 0.0 }
 0x172   : > { %1149 = vmatpush.msrb.mxu2 %v2085_v22 }
 0x173   : > { %v1609_v17 = vpack.i.bf16 %v856_v16, %v2023_v8  ;;  %v1604_v18 = vpack.i.bf16 %v855_v3, %v856_v16 }
 0x174   : > { %1150 = vmatpush.msrb.mxu2 %v864_v50 }
 0x175   : > { %1610 = vrot.lane.b32.xlu2 %v1609_v17, %s1760_s7  ;;  %1605 = vrot.lane.b32.xlu0 %v1604_v18, %s1761_s8 }
 0x176   : > { %1151 = vmatpush.msrb.mxu2 %v863_v5  ;;  %v781_v48 = vpop.f32.mrf.mxu0 }
 0x177   : > { %v782_v49 = vadd.f32 %v781_v48, %v1988_v42  ;;  %1152 = vmatmul.f32.vlgmr.msrb.gmra.mxu2 %v410_v4 }
 0x179   : > { %v857_v19 = vmax.f32 %v782_v49, 0.0 }
 0x17b   : > { %v1614_v40 = vpack.i.bf16 %v857_v19, %v2047_v38  ;;  %v1644_v38 = vpack.i.bf16 %v2108_v1, %v2111_v34 }
 0x17d   : > { %1615 = vrot.lane.b32.xlu0 %v1614_v40, %s1760_s7 }
 0x17e   : > { %v784_v8 = vpop.f32.mrf.mxu0 }
 0x17f   : > { %v785_v47 = vadd.f32 %v784_v8, %v2007_v53  ;;  %1155 = vmatmul.f32.gmra.mxu2 %v416_v58 }
 0x181   : > { %v858_v5 = vmax.f32 %v785_v47, 0.0 }
 0x183   : > { %v1619_v42 = vpack.i.bf16 %v857_v19, %v858_v5  ;;  %v1624_v50 = vpack.i.bf16 %v858_v5, %v2045_v36  ;;  %v1659_v36 = vpack.i.bf16 %v2083_v21, %v2124_v11 }
 0x185   : > { %1620 = vrot.lane.b32.xlu2 %v1619_v42, %s1761_s8  ;;  %1625 = vrot.lane.b32.xlu1 %v1624_v50, %s1760_s7 }
 0x186   : > { %1645 = vrot.lane.b32.xlu0 %v1644_v38, %s1760_s7  ;;  %v787_v61 = vpop.f32.mrf.mxu0 }
 0x187   : > { %v788_v45 = vadd.f32 %v787_v61, %v2005_v52  ;;  %v1634_v52 = vpack.i.bf16 %v855_v3, %v2104_v56 }
 0x189   : > { %v859_v53 = vmax.f32 %v788_v45, 0.0 }
 0x18b   : > { %1116 = vmatpush.msrb.mxu1 %v859_v53  ;;  %v1629_v23 = vpack.i.bf16 %v859_v53, %v2035_v26  ;;  %v1679_v26 = vpack.i.bf16 %v2049_v41, %v2132_v57  ;;  %v1669_v33 = vpack.i.bf16 %v859_v53, %v2063_v2 }
 0x18d   : > { %1117 = vmatpush.msrb.mxu1 %v858_v5  ;;  %1630 = vrot.lane.b32.xlu1 %v1629_v23, %s1761_s8 }
 0x18e   : > { %1660 = vrot.lane.b32.xlu0 %v1659_v36, %s1760_s7  ;;  %1640 = vrot.lane.b32.xlu2 %v1639_v24, %s1761_s8 }
 0x18f   : > { %1118 = vmatpush.msrb.mxu1 %v857_v19 }
 0x191   : > { %1119 = vmatpush.msrb.mxu1 %v856_v16 }
 0x193   : > { %1120 = vmatpush.msrb.mxu1 %v855_v3 }
 0x195   : > { %1121 = vmatpush.msrb.mxu1 %v2108_v1  ;;  %1635 = vrot.lane.b32.xlu1 %v1634_v52, %s1760_s7 }
 0x196   : > { %1680 = vrot.lane.b32.xlu0 %v1679_v26, %s1760_s7  ;;  %1655 = vrot.lane.b32.xlu2 %v1654_v29, %s1760_s7 }
 0x197   : > { %1122 = vmatpush.msrb.mxu1 %v2106_v62 }
 0x199   : > { %1123 = vmatpush.msrb.mxu1 %v2083_v21  ;;  %v409_v21 = vld [vmem:[%s2156_s26] sm:$0xff] }
 0x19b   : > { %1124 = vmatpush.msrb.mxu1 %v2065_v6 }
 0x19d   : > { %1125 = vmatpush.msrb.mxu1 %v2049_v41  ;;  %1650 = vrot.lane.b32.xlu1 %v1649_v31, %s1761_s8  ;;  %v1674_v41 = vpack.i.bf16 %v2065_v6, %v2129_v15  ;;  %v1689_v6 = vpack.i.bf16 %v2041_v35, %v2135_v28 }
 0x19e   : > { %1695 = vrot.lane.b32.xlu0 %v1694_v32, %s1760_s7  ;;  %1670 = vrot.lane.b32.xlu2 %v1669_v33, %s1760_s7 }
 0x19f   : > { %1126 = vmatpush.msrb.mxu1 %v2041_v35  ;;  %v421_v35 = vld [vmem:[%s331_s30] sm:$0xff]  ;;  %v2237_v43 = vpop.permute.xlu2 %1580 }
 0x1a1   : > { %1127 = vmatpush.msrb.mxu1 %v2025_v9  ;;  %v415_v9 = vld [vmem:[%s2156_s26 + $0x30] sm:$0x3] }
 0x1a3   : > { %1128 = vmatpush.msrb.mxu1 %v2081_v20 }
 0x1a4   : > { %1129 = vmatmul.f32.vlgmr.msrb.gmra.mxu1 %v409_v21 }
 0x1a5   : > { %1665 = vrot.lane.b32.xlu1 %v1664_v30, %s1761_s8 }
 0x1a6   : > { %1710 = vrot.lane.b32.xlu0 %v2074_v60, %s1760_s7  ;;  %1675 = vrot.lane.b32.xlu2 %v1674_v41, %s1760_s7 }
 0x1a7   : > { %v2211_v2 = vpop.permute.xlu0 %1560 }
 0x1a8   : > { %v1562_v59 = vunpack.i.l.bf16 %v2211_v2 }
 0x1ac   : > { %1132 = vmatmul.f32.gmra.mxu1 %v415_v9  ;;  %v1583_v9 = vunpack.i.h.bf16 %v2237_v43 }
 0x1ad   : > { %1685 = vrot.lane.b32.xlu1 %v1684_v44, %s1761_s8 }
 0x1ae   : > { %1110 = vperm.xlu0 %1556, %v422_v46   ;;  %1690 = vrot.lane.b32.xlu2 %v1689_v6, %s1760_s7 }
 0x1af   : > { %v1571_v55 = vpop.permute.xlu1 %1570 }
 0x1b0   : > { %v1572_v54 = vunpack.i.l.bf16 %v1571_v55  ;;  %v1566_v39 = vpop.permute.xlu0 %1565  ;;  %v1573_v62 = vunpack.i.h.bf16 %v1571_v55 }
 0x1b1   : > { %v1567_v56 = vunpack.i.l.bf16 %v1566_v39  ;;  %v1568_v1 = vunpack.i.h.bf16 %v1566_v39 }
 0x1b2   : > { %1205 = vmatpush.msra.mxu2 %v1572_v54 }
 0x1b3   : > { %1159 = vmatpush.msrb.mxu3 %v1567_v56  ;;  %v1563_v56 = vunpack.i.h.bf16 %v2211_v2 }
 0x1b4   : > { %1206 = vmatpush.msra.mxu2 %v1573_v62 }
 0x1b5   : > { %1160 = vmatpush.msrb.mxu3 %v1568_v1  ;;  %1700 = vrot.lane.b32.xlu1 %v1699_v27, %s1761_s8 }
 0x1b6   : > { %1705 = vrot.lane.b32.xlu2 %v1704_v10, %s1760_s7  ;;  %s1416_s7 = sshll.u32 %s2356_s19, 2 }
 0x1b7   : > { %v2233_v7 = vpop.permute.xlu1 %1575 }
 0x1b8   : > { %v1577_v10 = vunpack.i.l.bf16 %v2233_v7  ;;  %v1578_v6 = vunpack.i.h.bf16 %v2233_v7 }
 0x1bd   : > { %1715 = vrot.lane.b32.xlu1 %v2074_v60, %s1761_s8  ;;  %v1582_v60 = vunpack.i.l.bf16 %v2237_v43  ;;  %v413_v43 = vld [vmem:[%s2156_s26 + $0x20] sm:$0xff]  ;;  %s338_s8 = sadd.s32 %s1416_s7, %s1415_s6 }
 0x1be   : > { %1105 = vperm.xlu2 %1558, %v421_v35   ;;  %s1417_s9 = sshll.u32 %s338_s8, 3 }
 0x1bf   : > { %v2235_v34 = vpop.permute.xlu0 %1585  ;;  %v1601_v37 = vpop.permute.xlu2 %1600  ;;  %s340_s12 = scalar_lea.vmem %s2344_s5, %s1417_s9 }
 0x1c0   : > { %v1587_v22 = vunpack.i.l.bf16 %v2235_v34  ;;  %v1602_v36 = vunpack.i.l.bf16 %v1601_v37  ;;  %v1603_v52 = vunpack.i.h.bf16 %v1601_v37  ;;  %v1588_v21 = vunpack.i.h.bf16 %v2235_v34  ;;  %v411_v34 = vld [vmem:[%s2156_s26 + $0x10] sm:$0xff] }
 0x1c7   : > { %v2239_v12 = vpop.permute.xlu1 %1595  ;;  %v2241_v25 = vpop.permute.xlu0 %1590 }
 0x1c8   : > { %v1597_v27 = vunpack.i.l.bf16 %v2239_v12  ;;  %v1593_v20 = vunpack.i.h.bf16 %v2241_v25  ;;  %v1598_v31 = vunpack.i.h.bf16 %v2239_v12  ;;  %v1592_v7 = vunpack.i.l.bf16 %v2241_v25  ;;  %v419_v25 = vld [vmem:[%s2156_s26 + $0x50] sm:$0x3] }
 0x1ca   : > { %1182 = vmatpush.msra.mxu1 %v1597_v27  ;;  %1207 = vmatpush.msra.mxu2 %v1593_v20 }
 0x1cc   : > { %1183 = vmatpush.msra.mxu1 %v1587_v22 }
 0x1ce   : > { %1184 = vmatpush.msra.mxu1 %v1582_v60 }
 0x1cf   : > { %v2249_v11 = vpop.permute.xlu2 %1610 }
 0x1d0   : > { %1185 = vmatpush.msra.mxu1 %v1577_v10  ;;  %v1613_v48 = vunpack.i.h.bf16 %v2249_v11  ;;  %v417_v10 = vld [vmem:[%s2156_s26 + $0x40] sm:$0x3]  ;;  %v1612_v37 = vunpack.i.l.bf16 %v2249_v11 }
 0x1d2   : > { %1186 = vmatpush.msra.mxu1 %v1562_v59 }
 0x1df   : > { %v1621_v51 = vpop.permute.xlu2 %1620 }
 0x1e0   : > { %v1622_v4 = vunpack.i.l.bf16 %v1621_v51  ;;  %v1623_v5 = vunpack.i.h.bf16 %v1621_v51 }
 0x1e7   : > { %v1606_v13 = vpop.permute.xlu0 %1605 }
 0x1e8   : > { %v2251_v15 = vpop.permute.xlu2 %1640  ;;  %v1607_v38 = vunpack.i.l.bf16 %v1606_v13  ;;  %v1608_v58 = vunpack.i.h.bf16 %v1606_v13 }
 0x1e9   : > { %v1642_v57 = vunpack.i.l.bf16 %v2251_v15  ;;  %v1643_v35 = vunpack.i.h.bf16 %v2251_v15 }
 0x1eb   : > { %1187 = vmatpush.msra.mxu1 %v1642_v57 }
 0x1ef   : > { %v2254_v28 = vpop.permute.xlu0 %1615 }
 0x1f0   : > { %v2256_v63 = vpop.permute.xlu2 %1655  ;;  %v1618_v18 = vunpack.i.h.bf16 %v2254_v28  ;;  %v1617_v22 = vunpack.i.l.bf16 %v2254_v28 }
 0x1f1   : > { %v1658_v53 = vunpack.i.h.bf16 %v2256_v63  ;;  %v1657_v57 = vunpack.i.l.bf16 %v2256_v63 }
 0x1f7   : > { %v2258_v14 = vpop.permute.xlu1 %1625 }
 0x1f8   : > { %v2260_v0 = vpop.permute.xlu0 %1645  ;;  %v2262_v3 = vpop.permute.xlu2 %1670  ;;  %v1628_v17 = vunpack.i.h.bf16 %v2258_v14  ;;  %v1627_v27 = vunpack.i.l.bf16 %v2258_v14 }
 0x1f9   : > { %v1673_v16 = vunpack.i.h.bf16 %v2262_v3  ;;  %v1648_v61 = vunpack.i.h.bf16 %v2260_v0  ;;  %v1672_v2 = vunpack.i.l.bf16 %v2262_v3  ;;  %v1647_v13 = vunpack.i.l.bf16 %v2260_v0 }
 0x1fb   : > { %1208 = vmatpush.msra.mxu2 %v1673_v16 }
 0x1fd   : > { %1209 = vmatpush.msra.mxu2 %v1628_v17 }
 0x1ff   : > { %1210 = vmatpush.msra.mxu2 %v1618_v18  ;;  %v1631_v49 = vpop.permute.xlu1 %1630  ;;  %v412_v18 = vld [vmem:[%s2156_s26 + $0x18] sm:$0xff] }
 0x200   : > { %v2268_v19 = vpop.permute.xlu0 %1660  ;;  %v1632_v40 = vunpack.i.l.bf16 %v1631_v49  ;;  %v2270_v8 = vpop.permute.xlu2 %1675  ;;  %v1633_v47 = vunpack.i.h.bf16 %v1631_v49 }
 0x201   : > { %1211 = vmatpush.msra.mxu2 %v1613_v48  ;;  %v1663_v24 = vunpack.i.h.bf16 %v2268_v19  ;;  %v1678_v32 = vunpack.i.h.bf16 %v2270_v8  ;;  %v1662_v11 = vunpack.i.l.bf16 %v2268_v19  ;;  %v1677_v14 = vunpack.i.l.bf16 %v2270_v8 }
 0x202   : > { %1161 = vmatpush.msrb.mxu3 %v1632_v40 }
 0x204   : > { %1162 = vmatpush.msrb.mxu3 %v1633_v47  ;;  %v414_v47 = vld [vmem:[%s2156_s26 + $0x28] sm:$0xff] }
 0x206   : > { %1163 = vmatpush.msrb.mxu3 %v1622_v4  ;;  %v418_v4 = vld [vmem:[%s2156_s26 + $0x48] sm:$0x3] }
 0x207   : > { %v2272_v42 = vpop.permute.xlu1 %1635 }
 0x208   : > { %v1638_v50 = vunpack.i.h.bf16 %v2272_v42  ;;  %1164 = vmatpush.msrb.mxu3 %v1623_v5  ;;  %v2276_v45 = vpop.permute.xlu0 %1680  ;;  %v2279_v23 = vpop.permute.xlu2 %1690  ;;  %v1637_v59 = vunpack.i.l.bf16 %v2272_v42  ;;  %v420_v5 = vld [vmem:[%s2156_s26 + $0x58] sm:$0x3] }
 0x209   : > { %v1683_v30 = vunpack.i.h.bf16 %v2276_v45  ;;  %v1693_v44 = vunpack.i.h.bf16 %v2279_v23  ;;  %v1682_v16 = vunpack.i.l.bf16 %v2276_v45  ;;  %v1692_v0 = vunpack.i.l.bf16 %v2279_v23 }
 0x20a   : > { %1165 = vmatpush.msrb.mxu3 %v1607_v38  ;;  %1212 = vmatpush.msra.mxu2 %v1638_v50  ;;  %v1153_v50 = vpop.f32.mrf.mxu2 }
 0x20c   : > { %1166 = vmatpush.msrb.mxu3 %v1608_v58  ;;  %1213 = vmatpush.msra.mxu2 %v1648_v61 }
 0x20e   : > { %1167 = vmatpush.msrb.mxu3 %v1602_v36  ;;  %1214 = vmatpush.msra.mxu2 %v1658_v53 }
 0x20f   : > { %v1651_v26 = vpop.permute.xlu1 %1650 }
 0x210   : > { %v1652_v29 = vunpack.i.l.bf16 %v1651_v26  ;;  %1168 = vmatpush.msrb.mxu3 %v1603_v52  ;;  %1215 = vmatpush.msra.mxu2 %v1663_v24  ;;  %v1653_v33 = vunpack.i.h.bf16 %v1651_v26  ;;  %v2286_v41 = vpop.permute.xlu0 %1695  ;;  %v2290_v46 = vpop.permute.xlu2 %1705 }
 0x211   : > { %v1698_v55 = vunpack.i.h.bf16 %v2286_v41  ;;  %v1708_v62 = vunpack.i.h.bf16 %v2290_v46  ;;  %v1697_v48 = vunpack.i.l.bf16 %v2286_v41  ;;  %v1707_v19 = vunpack.i.l.bf16 %v2290_v46 }
 0x212   : > { %1169 = vmatpush.msrb.mxu3 %v1598_v31  ;;  %1188 = vmatpush.msra.mxu1 %v1652_v29  ;;  %v1156_v58 = vpop.f32.mrf.mxu2 }
 0x213   : > { %1216 = vmatpush.msra.mxu2 %v1678_v32 }
 0x214   : > { %1170 = vmatpush.msrb.mxu3 %v1588_v21  ;;  %1189 = vmatpush.msra.mxu1 %v1653_v33 }
 0x215   : > { %1217 = vmatpush.msra.mxu2 %v1683_v30 }
 0x216   : > { %1171 = vmatpush.msrb.mxu3 %v1583_v9 }
 0x217   : > { %1218 = vmatpush.msra.mxu2 %v1693_v44  ;;  %v1666_v54 = vpop.permute.xlu1 %1665 }
 0x218   : > { %v1667_v39 = vunpack.i.l.bf16 %v1666_v54  ;;  %1172 = vmatpush.msrb.mxu3 %v1578_v6  ;;  %v1668_v1 = vunpack.i.h.bf16 %v1666_v54  ;;  %v1711_v49 = vpop.permute.xlu0 %1710  ;;  %v1106_v45 = vpop.permute.xlu2 %1105 }
 0x219   : > { %1219 = vmatpush.msra.mxu2 %v1698_v55  ;;  %v1712_v40 = vunpack.i.l.bf16 %v1711_v49  ;;  %v1713_v8 = vunpack.i.h.bf16 %v1711_v49 }
 0x21a   : > { %1173 = vmatpush.msrb.mxu3 %v1563_v56  ;;  %1190 = vmatpush.msra.mxu1 %v1667_v39 }
 0x21b   : > { %1220 = vmatpush.msra.mxu2 %v1708_v62 }
 0x21c   : > { %1174 = vmatpush.msrb.mxu3 %v1643_v35  ;;  %1191 = vmatpush.msra.mxu1 %v1668_v1 }
 0x21d   : > { %1175 = vmatmul.f32.vlgmr.msrb.gmra.mxu3 %v411_v34  ;;  %1221 = vmatmul.f32.vlgmr.msra.gmra.mxu2 %v413_v43 }
 0x21e   : > { %1228 = vmatpush.msra.mxu3 %v1592_v7 }
 0x21f   : > { %v1686_v12 = vpop.permute.xlu1 %1685 }
 0x220   : > { %v1687_v20 = vunpack.i.l.bf16 %v1686_v12  ;;  %1229 = vmatpush.msra.mxu3 %v1672_v2  ;;  %v1688_v60 = vunpack.i.h.bf16 %v1686_v12  ;;  %v1111_v26 = vpop.permute.xlu0 %1110 }
 0x221   : > { %v1130_v42 = vpop.f32.mrf.mxu1 }
 0x222   : > { %1230 = vmatpush.msra.mxu3 %v1627_v27  ;;  %1192 = vmatpush.msra.mxu1 %v1687_v20  ;;  %v1131_v53 = vadd.f32 %v1130_v42, %v1106_v45 }
 0x224   : > { %1231 = vmatpush.msra.mxu3 %v1617_v22  ;;  %1193 = vmatpush.msra.mxu1 %v1688_v60  ;;  %v1154_v36 = vadd.f32 %v1153_v50, %v1131_v53 }
 0x225   : > { %1178 = vmatmul.f32.gmra.mxu3 %v417_v10  ;;  %1224 = vmatmul.f32.gmra.mxu2 %v419_v25 }
 0x226   : > { %1232 = vmatpush.msra.mxu3 %v1612_v37 }
 0x227   : > { %v1701_v51 = vpop.permute.xlu1 %1700 }
 0x228   : > { %v1702_v15 = vunpack.i.l.bf16 %v1701_v51  ;;  %1233 = vmatpush.msra.mxu3 %v1637_v59  ;;  %v1703_v28 = vunpack.i.h.bf16 %v1701_v51 }
 0x229   : > { %v1133_v38 = vpop.f32.mrf.mxu1 }
 0x22a   : > { %1234 = vmatpush.msra.mxu3 %v1647_v13  ;;  %1194 = vmatpush.msra.mxu1 %v1702_v15  ;;  %v1134_v31 = vadd.f32 %v1133_v38, %v1111_v26 }
 0x22c   : > { %1235 = vmatpush.msra.mxu3 %v1657_v57  ;;  %1195 = vmatpush.msra.mxu1 %v1703_v28  ;;  %v1157_v33 = vadd.f32 %v1156_v58, %v1134_v31 }
 0x22e   : > { %1236 = vmatpush.msra.mxu3 %v1662_v11 }
 0x22f   : > { %v1716_v3 = vpop.permute.xlu1 %1715 }
 0x230   : > { %v1717_v17 = vunpack.i.l.bf16 %v1716_v3  ;;  %1237 = vmatpush.msra.mxu3 %v1677_v14  ;;  %v1718_v63 = vunpack.i.h.bf16 %v1716_v3 }
 0x232   : > { %1238 = vmatpush.msra.mxu3 %v1682_v16  ;;  %1196 = vmatpush.msra.mxu1 %v1717_v17 }
 0x234   : > { %1239 = vmatpush.msra.mxu3 %v1692_v0  ;;  %1197 = vmatpush.msra.mxu1 %v1718_v63 }
 0x235   : > { %1198 = vmatmul.f32.vlgmr.msra.gmra.mxu1 %v412_v18 }
 0x236   : > { %1240 = vmatpush.msra.mxu3 %v1697_v48 }
 0x238   : > { %1241 = vmatpush.msra.mxu3 %v1707_v19 }
 0x23a   : > { %1242 = vmatpush.msra.mxu3 %v1712_v40 }
 0x23c   : > { %1243 = vmatpush.msra.mxu3 %v1713_v8 }
 0x23d   : > { %1244 = vmatmul.f32.vlgmr.msra.gmra.mxu3 %v414_v47  ;;  %1201 = vmatmul.f32.gmra.mxu1 %v418_v4 }
 0x245   : > { %1247 = vmatmul.f32.gmra.mxu3 %v420_v5 }
 0x2a0   : > { %v1176_v61 = vpop.f32.mrf.mxu3  ;;  %v1222_v29 = vpop.f32.mrf.mxu2 }
 0x2a1   : > { %v1177_v52 = vadd.f32 %v1176_v61, %v1154_v36 }
 0x2a8   : > { %v1179_v24 = vpop.f32.mrf.mxu3  ;;  %v1225_v55 = vpop.f32.mrf.mxu2 }
 0x2a9   : > { %v1180_v9 = vadd.f32 %v1179_v24, %v1157_v33 }
 0x2b2   : > { %v1199_v23 = vpop.f32.mrf.mxu1 }
 0x2b3   : > { %v1200_v32 = vadd.f32 %v1199_v23, %v1177_v52 }
 0x2b5   : > { %v1223_v21 = vadd.f32 %v1222_v29, %v1200_v32 }
 0x2ba   : > { %v1202_v30 = vpop.f32.mrf.mxu1 }
 0x2bb   : > { %v1203_v46 = vadd.f32 %v1202_v30, %v1180_v9 }
 0x2bd   : > { %v1226_v54 = vadd.f32 %v1225_v55, %v1203_v46 }
 0x2c0   : > { %v1245_v41 = vpop.f32.mrf.mxu3 }
 0x2c1   : > { %v1246_v44 = vadd.f32 %v1245_v41, %v1223_v21 }
 0x2c3   : > { %v1251_v6 = vmax.f32 %v1246_v44, 0.0 }
 0x2c5   : > { %1254 = vst.msk [vmem:[%s340_s12] sm:$0xff] %vm1253_vm4, %v1251_v6 }
 0x2c8   : > { %v1248_v39 = vpop.f32.mrf.mxu3 }
 0x2c9   : > { %v1249_v56 = vadd.f32 %v1248_v39, %v1226_v54 }
 0x2cb   : > { %v1252_v62 = vmax.f32 %v1249_v56, 0.0 }
 0x2cd   : > { %1256 = vst.msk [vmem:[%s340_s12 + $0x8] sm:$0x3] %vm1255_vm5, %v1252_v62 }
 0x2ce PF: > { %s15_s22 = sadd.s32 1, %s1757_s22   ;;  %s2345_s18 = smov %s1749_s20 }
 0x2cf   : > { %p12_p7 = scmp.ge.s32.totalorder %s15_s22, 6   ;;  %s2346_s19 = smov %s1753_s21 }
 0x2d0   : > { %s2347_s20 = smov %s2350_s23  ;;  %s2348_s21 = smov %s2354_s24 }
 0x2d1   :  { %14 = sbr.rel (!%p12_p7) target bundleno = 3 (0x3), region = 82 }

// kernel: cnn_regressor_forward.8
= control target key start
LH: loop header
LB: loop body
LE: loop exit
PB: predicated region body
PF: predicated region fallthrough
CT: control target
= control target key end

     0   :  { %s1744_s18 = smov 0   ;;  %s1746_s19 = smov 0   ;;  %s2218_s0 = inlined_call_operand.vmem [shape: f32[2,2,20,68], index: 0, kind: input, shape index: {}]   ;;  %s2219_s1 = inlined_call_operand.vmem [shape: f32[2,256,60], index: 1, kind: input, shape index: {}]   ;;  %s2220_s2 = inlined_call_operand.vmem [shape: f32[2,256,1], index: 2, kind: input, shape index: {}]   ;;  %s2221_s3 = inlined_call_operand.vmem [shape: f32[2,10,768], index: 3, kind: input, shape index: {}]   ;;  %s2222_s4 = inlined_call_operand.vmem [shape: f32[2,10,1], index: 4, kind: input, shape index: {}]   ;;  %s2223_s5 = inlined_call_operand.vmem [shape: f32[2,2,10,64], index: 5, kind: output, shape index: {}]  }
   0x1   :  { %s1748_s20 = smov 0   ;;  %s1750_s21 = smov 0  }
   0x2   :  { %s1752_s22 = smov 0  }
   0x3 LB: > { %s24_s23 = sadd.s32 1, %s1701_s20  ;;  %s27_s24 = sadd.s32 1, %s1705_s21  ;;  %s1709_s22 = sphi %s1752_s22, %s15_s22   ;;  %s1705_s21 = sphi %s1750_s21, %s2227_s21   ;;  %s1701_s20 = sphi %s1748_s20, %s2226_s20   ;;  %s1697_s19 = sphi %s1746_s19, %s2225_s19   ;;  %s1693_s18 = sphi %s1744_s18, %s2224_s18  }
   0x4   : > { %p25_p0 = scmp.ge.s32.totalorder %s24_s23, 2  ;;  %p1378_p1 = scmp.ge.s32.totalorder %s1709_s22, 1 }
   0x5   : > { %p247_p2 = scmp.lt.s32.totalorder %s1709_s22, 5 }
   0x6   : > { %s2229_s23 = smov (%p25_p0, %s24_s23), 0  ;;  %s2231_s24 = smov (!%p25_p0, %s27_s24), %s1705_s21 }
   0x7   : > { %p248_p3 = pnand %p1378_p1, %p247_p2  ;;  %p29_p4 = scmp.ge.s32.totalorder %s2231_s24, 2 }
   0x8   : > { %p303_p5 = scmp.lt.s32.totalorder (!%p248_p3), %s1697_s19, 1  ;;  %p305_p6 = scmp.lt.s32.totalorder (!%p248_p3), %s1693_s18, 1 }
   0x9   : > { %s2233_s24 = smov (%p29_p4, %s2231_s24), 0  ;;  %251 = sbr.rel (%p248_p3) target bundleno = 699 (0x2bb), region = 40 }
   0xa   : > { %s1712_s11 = smov (!%p248_p3), 126   ;;  %s1713_s12 = smov (!%p248_p3), 127  }
   0xe   : > { %v1711_v0 = vmov 0   ;;  %s2235_s19 = smov (!%p303_p5, %s1697_s19), 1  ;;  %s2237_s18 = smov (!%p305_p6, %s1693_s18), 1  ;;  %vm425_vm0 = vcmask 1043456   ;;  %vm609_vm1 = vcmask 490496   ;;  %vm1227_vm2 = vcmask 523264  }
   0xf   : > { %1510 = vset.pattern.permute.xlu1 %v1711_v0  ;;  %1509 = vset.pattern.permute.xlu0 %v1711_v0  ;;  %s1453_s25 = smul.u32 6, %s2235_s19  ;;  %s1425_s26 = sshll.u32 %s2235_s19, 8  ;;  %vm1229_vm3 = vcmask 517120  }
  0x10   : > { %1508 = vset.pattern.permute.xlu2 %v1711_v0  ;;  %s1452_s27 = smul.u32 3, %s2237_s18  ;;  %s1786_s6 = scalar_lea.vmem %s2220_s2, %s1425_s26 }
  0x11   : > { %v376_v1 = vld [vmem:[%s1786_s6] sm:$0xff]  ;;  %v377_v12 = vld [vmem:[%s1786_s6 + $0x8] sm:$0xff]  ;;  %v378_v13 = vld [vmem:[%s1786_s6 + $0x10] sm:$0xff]  ;;  %s1849_s15 = scalar_lea.vmem %s2219_s1, %s1425_s26  ;;  %s1454_s16 = smul.u32 96, %s2235_s19 }
  0x12   : > { %s309_s28 = sadd.s32 %s1453_s25, %s1452_s27  ;;  %451 = vperm.xlu2 %1508, %v376_v1   ;;  %v380_v14 = vld [vmem:[%s1786_s6 + $0x20] sm:$0xff]  ;;  %v379_v15 = vld [vmem:[%s1786_s6 + $0x18] sm:$0xff]  ;;  %v382_v17 = vld [vmem:[%s1786_s6 + $0x30] sm:$0xff]  ;;  %s1427_s27 = sshll.u32 %s2235_s19, 4 }
  0x13   : > { %s1379_s7 = sshll.u32 %s309_s28, 3  ;;  %v383_v16 = vld [vmem:[%s1786_s6 + $0x38] sm:$0xff]  ;;  %v381_v18 = vld [vmem:[%s1786_s6 + $0x28] sm:$0xff]  ;;  %v386_v19 = vld [vmem:[%s1786_s6 + $0x50] sm:$0xff]  ;;  %s2096_s26 = scalar_lea.vmem %s2221_s3, %s1454_s16 }
  0x14   : > { %s311_s10 = scalar_lea.vmem %s2218_s0, %s1379_s7  ;;  %v384_v20 = vld [vmem:[%s1786_s6 + $0x40] sm:$0xff]  ;;  %v389_v21 = vld [vmem:[%s1786_s6 + $0x68] sm:$0xff]  ;;  %v387_v22 = vld [vmem:[%s1786_s6 + $0x58] sm:$0xff]  ;;  %s331_s30 = scalar_lea.vmem %s2222_s4, %s1427_s27 }
  0x15   : > { %v1792_v2 = vld [vmem:[%s311_s10 + $0x10] sm:$0xf]  ;;  %v1794_v3 = vld [vmem:[%s311_s10] sm:$0xff]  ;;  %v1796_v4 = vld [vmem:[%s311_s10 + $0x8] sm:$0xff]  ;;  %s1388_s7 = sshll.u32 %s2235_s19, 2 }
  0x16   : > { %444 = vrot.lane.b32.xlu0 %v1792_v2, %s1712_s11  ;;  %v429_v5 = vrot.slane %v1792_v2, 4  ;;  %v426_v6 = vrot.slane %v1794_v3, 4  ;;  %v427_v7 = vrot.slane %v1796_v4, 4  ;;  %v1498_v11 = vpack.i.bf16 %v1794_v3, %v1796_v4  ;;  %v390_v23 = vld [vmem:[%s1786_s6 + $0x70] sm:$0xff]  ;;  %v392_v24 = vld [vmem:[%s1786_s6 + $0x80] sm:$0xff]  ;;  %v393_v25 = vld [vmem:[%s1786_s6 + $0x88] sm:$0xff] }
  0x17   : > { %v385_v26 = vld [vmem:[%s1786_s6 + $0x48] sm:$0xff]  ;;  %v395_v27 = vld [vmem:[%s1786_s6 + $0x98] sm:$0xff]  ;;  %v396_v28 = vld [vmem:[%s1786_s6 + $0xa0] sm:$0xff] }
  0x18   : > { %v428_v8 = vsel %vm425_vm0, %v426_v6, %v427_v7  ;;  %v430_v9 = vsel %vm425_vm0, %v427_v7, %v429_v5  ;;  %v388_v29 = vld [vmem:[%s1786_s6 + $0x60] sm:$0xff]  ;;  %v398_v30 = vld [vmem:[%s1786_s6 + $0xb0] sm:$0xff]  ;;  %v399_v31 = vld [vmem:[%s1786_s6 + $0xb8] sm:$0xff] }
  0x19   : > { %v1503_v10 = vpack.i.bf16 %v428_v8, %v430_v9  ;;  %v391_v32 = vld [vmem:[%s1786_s6 + $0x78] sm:$0xff]  ;;  %v406_v33 = vld [vmem:[%s1786_s6 + $0xf0] sm:$0xff]  ;;  %v405_v34 = vld [vmem:[%s1786_s6 + $0xe8] sm:$0xff] }
  0x1a   : > { %456 = vperm.xlu2 %1508, %v377_v12   ;;  %v394_v35 = vld [vmem:[%s1786_s6 + $0x90] sm:$0xff]  ;;  %v403_v36 = vld [vmem:[%s1786_s6 + $0xd8] sm:$0xff]  ;;  %v397_v39 = vld [vmem:[%s1786_s6 + $0xa8] sm:$0xff] }
  0x1b   : > { %1504 = vrot.lane.b32.xlu1 %v1503_v10, %s1713_s12  ;;  %v402_v38 = vld [vmem:[%s1786_s6 + $0xd0] sm:$0xff]  ;;  %v400_v41 = vld [vmem:[%s1786_s6 + $0xc0] sm:$0xff]  ;;  %v365_v51 = vld [vmem:[%s1849_s15 + $0xa8] sm:$0xff] }
  0x1c   : > { %v344_v49 = vld [vmem:[%s1849_s15] sm:$0xff]  ;;  %v358_v50 = vld [vmem:[%s1849_s15 + $0x70] sm:$0xff]  ;;  %v369_v52 = vld [vmem:[%s1849_s15 + $0xc8] sm:$0xff] }
  0x1d   : > { %v407_v53 = vld [vmem:[%s1786_s6 + $0xf8] sm:$0xff]  ;;  %v345_v54 = vld [vmem:[%s1849_s15 + $0x8] sm:$0xff]  ;;  %v366_v56 = vld [vmem:[%s1849_s15 + $0xb0] sm:$0xff] }
  0x1e   : > { %1499 = vrot.lane.b32.xlu0 %v1498_v11, %s1712_s11  ;;  %v359_v55 = vld [vmem:[%s1849_s15 + $0x78] sm:$0xff]  ;;  %v370_v57 = vld [vmem:[%s1849_s15 + $0xd0] sm:$0xff]  ;;  %v404_v58 = vld [vmem:[%s1786_s6 + $0xe0] sm:$0xff] }
  0x1f   : > { %v346_v59 = vld [vmem:[%s1849_s15 + $0x10] sm:$0xff]  ;;  %v360_v60 = vld [vmem:[%s1849_s15 + $0x80] sm:$0xff]  ;;  %v367_v61 = vld [vmem:[%s1849_s15 + $0xb8] sm:$0xff] }
  0x20   : > { %v371_v62 = vld [vmem:[%s1849_s15 + $0xd8] sm:$0xff]  ;;  %v401_v63 = vld [vmem:[%s1786_s6 + $0xc8] sm:$0xff]  ;;  %v362_v5 = vld [vmem:[%s1849_s15 + $0x90] sm:$0xff]  ;;  %s1387_s6 = sshll.u32 %s2237_s18, 1 }
  0x21   : > { %v347_v0 = vld [vmem:[%s1849_s15 + $0x18] sm:$0xff]  ;;  %v361_v1 = vld [vmem:[%s1849_s15 + $0x88] sm:$0xff]  ;;  %v374_v9 = vld [vmem:[%s1849_s15 + $0xf0] sm:$0xff]  ;;  %s338_s8 = sadd.s32 %s1388_s7, %s1387_s6 }
  0x22   : > { %471 = vperm.xlu2 %1508, %v380_v14   ;;  %v349_v7 = vld [vmem:[%s1849_s15 + $0x28] sm:$0xff]  ;;  %v363_v8 = vld [vmem:[%s1849_s15 + $0x98] sm:$0xff]  ;;  %v350_v10 = vld [vmem:[%s1849_s15 + $0x30] sm:$0xff]  ;;  %s1389_s9 = sshll.u32 %s338_s8, 3 }
  0x23   : > { %431 = vrot.lane.b32.xlu1 %v426_v6, %s1713_s12  ;;  %v373_v6 = vld [vmem:[%s1849_s15 + $0xe8] sm:$0xff]  ;;  %v364_v11 = vld [vmem:[%s1849_s15 + $0xa0] sm:$0xff]  ;;  %v375_v12 = vld [vmem:[%s1849_s15 + $0xf8] sm:$0xff] }
  0x26   : > { %461 = vperm.xlu0 %1509, %v378_v13   ;;  %v351_v13 = vld [vmem:[%s1849_s15 + $0x38] sm:$0xff] }
  0x2a   : > { %481 = vperm.xlu2 %1508, %v382_v17  }
  0x2b   : > { %466 = vperm.xlu1 %1510, %v379_v15   ;;  %v352_v15 = vld [vmem:[%s1849_s15 + $0x40] sm:$0xff] }
  0x2e   : > { %486 = vperm.xlu0 %1509, %v383_v16  }
  0x32   : > { %496 = vperm.xlu2 %1508, %v385_v26   ;;  %v356_v26 = vld [vmem:[%s1849_s15 + $0x60] sm:$0xff] }
  0x33   : > { %476 = vperm.xlu1 %1510, %v381_v18   ;;  %v353_v18 = vld [vmem:[%s1849_s15 + $0x48] sm:$0xff] }
  0x36   : > { %501 = vperm.xlu0 %1509, %v386_v19  }
  0x3a   : > { %511 = vperm.xlu2 %1508, %v388_v29  }
  0x3b   : > { %491 = vperm.xlu1 %1510, %v384_v20   ;;  %v354_v20 = vld [vmem:[%s1849_s15 + $0x50] sm:$0xff] }
  0x3e   : > { %516 = vperm.xlu0 %1509, %v389_v21  }
  0x42   : > { %526 = vperm.xlu2 %1508, %v391_v32  }
  0x43   : > { %506 = vperm.xlu1 %1510, %v387_v22  }
  0x46   : > { %531 = vperm.xlu0 %1509, %v392_v24  }
  0x4a   : > { %541 = vperm.xlu2 %1508, %v394_v35  }
  0x4b   : > { %521 = vperm.xlu1 %1510, %v390_v23   ;;  %v355_v23 = vld [vmem:[%s1849_s15 + $0x58] sm:$0xff] }
  0x4e   : > { %546 = vperm.xlu0 %1509, %v395_v27  }
  0x52   : > { %556 = vperm.xlu2 %1508, %v397_v39  }
  0x53   : > { %536 = vperm.xlu1 %1510, %v393_v25  }
  0x56   : > { %561 = vperm.xlu0 %1509, %v398_v30   ;;  %v357_v30 = vld [vmem:[%s1849_s15 + $0x68] sm:$0xff] }
  0x5a   : > { %606 = vperm.xlu2 %1508, %v407_v53  }
  0x5b   : > { %551 = vperm.xlu1 %1510, %v396_v28  }
  0x5e   : > { %601 = vperm.xlu0 %1509, %v406_v33  }
  0x62   : > { %591 = vperm.xlu2 %1508, %v404_v58  }
  0x63   : > { %566 = vperm.xlu1 %1510, %v399_v31  }
  0x66   : > { %586 = vperm.xlu0 %1509, %v403_v36  }
  0x6a   : > { %576 = vperm.xlu2 %1508, %v401_v63  }
  0x6b   : > { %596 = vperm.xlu1 %1510, %v405_v34  }
  0x6c   : > { %v1913_v14 = vpop.permute.xlu2 %451 }
  0x6e   : > { %571 = vperm.xlu0 %1509, %v400_v41  }
  0x73   : > { %581 = vperm.xlu1 %1510, %v402_v38  }
  0x74   : > { %v457_v16 = vpop.permute.xlu2 %456 }
  0x7c   : > { %v1922_v19 = vpop.permute.xlu2 %471 }
  0x84   : > { %v1931_v24 = vpop.permute.xlu2 %481 }
  0x88   : > { %v445_v37 = vpop.permute.xlu0 %444 }
  0x89   : > { %1390 = vmatpush.msk.msra.mxu0 %vm425_vm0, %v445_v37  ;;  %1428 = vmatpush.msk.msra.mxu1 %vm425_vm0, %v445_v37 }
  0x8a   : > { %1429 = vmatpush.msk.msra.mxu2 %vm425_vm0, %v445_v37  ;;  %1430 = vmatpush.msk.msra.mxu3 %vm425_vm0, %v445_v37 }
  0x8c   : > { %v1939_v28 = vpop.permute.xlu2 %496 }
  0x8d   : > { %v1505_v40 = vpop.permute.xlu1 %1504 }
  0x8e   : > { %v1506_v45 = vunpack.i.l.bf16 %v1505_v40  ;;  %v1507_v47 = vunpack.i.h.bf16 %v1505_v40 }
  0x90   : > { %v1500_v42 = vpop.permute.xlu0 %1499 }
  0x91   : > { %v1501_v43 = vunpack.i.l.bf16 %v1500_v42  ;;  %v1502_v44 = vunpack.i.h.bf16 %v1500_v42 }
  0x93   : > { %717 = vmatpush.msra.mxu0 %v1501_v43  ;;  %1431 = vmatpush.msra.mxu1 %v1501_v43 }
  0x94   : > { %1432 = vmatpush.msra.mxu2 %v1501_v43  ;;  %1433 = vmatpush.msra.mxu3 %v1501_v43  ;;  %v1948_v32 = vpop.permute.xlu2 %511 }
  0x95   : > { %718 = vmatpush.msra.mxu0 %v1502_v44  ;;  %1434 = vmatpush.msra.mxu1 %v1502_v44  ;;  %v432_v46 = vpop.permute.xlu1 %431 }
  0x96   : > { %1435 = vmatpush.msra.mxu2 %v1502_v44  ;;  %1436 = vmatpush.msra.mxu3 %v1502_v44  ;;  %v448_v48 = vsel %vm425_vm0, %v1792_v2, %v432_v46  ;;  %v368_v2 = vld [vmem:[%s1849_s15 + $0xc0] sm:$0xff] }
  0x97   : > { %719 = vmatpush.msra.mxu0 %v1506_v45  ;;  %1437 = vmatpush.msra.mxu1 %v1506_v45 }
  0x98   : > { %1438 = vmatpush.msra.mxu2 %v1506_v45  ;;  %1439 = vmatpush.msra.mxu3 %v1506_v45  ;;  %v1918_v17 = vpop.permute.xlu0 %461 }
  0x99   : > { %720 = vmatpush.msra.mxu0 %v1507_v47  ;;  %1440 = vmatpush.msra.mxu1 %v1507_v47 }
  0x9a   : > { %1441 = vmatpush.msra.mxu2 %v1507_v47  ;;  %1442 = vmatpush.msra.mxu3 %v1507_v47 }
  0x9b   : > { %721 = vmatpush.msra.mxu0 %v448_v48  ;;  %1443 = vmatpush.msra.mxu1 %v448_v48 }
  0x9c   : > { %1444 = vmatpush.msra.mxu2 %v448_v48  ;;  %1445 = vmatpush.msra.mxu3 %v448_v48  ;;  %v527_v35 = vpop.permute.xlu2 %526 }
  0x9d   : > { %722 = vmatpush.msra.mxu0 %v1796_v4  ;;  %1446 = vmatpush.msra.mxu1 %v1796_v4  ;;  %v1928_v22 = vpop.permute.xlu1 %466 }
  0x9e   : > { %1447 = vmatpush.msra.mxu2 %v1796_v4  ;;  %1448 = vmatpush.msra.mxu3 %v1796_v4  ;;  %v348_v4 = vld [vmem:[%s1849_s15 + $0x20] sm:$0xff] }
  0x9f   : > { %723 = vmatpush.msra.mxu0 %v1794_v3  ;;  %1449 = vmatpush.msra.mxu1 %v1794_v3 }
  0xa0   : > { %1450 = vmatpush.msra.mxu2 %v1794_v3  ;;  %1451 = vmatpush.msra.mxu3 %v1794_v3  ;;  %v372_v3 = vld [vmem:[%s1849_s15 + $0xe0] sm:$0xff]  ;;  %v1925_v21 = vpop.permute.xlu0 %486 }
  0xa1   : > { %1391 = vmatmul.msk.f32.vlgmr.msra.gmra.mxu0 %vm609_vm1, %v344_v49  ;;  %1405 = vmatmul.msk.f32.vlgmr.msra.gmra.mxu1 %vm609_vm1, %v358_v50 }
  0xa2   : > { %1412 = vmatmul.msk.f32.vlgmr.msra.gmra.mxu2 %vm609_vm1, %v365_v51  ;;  %1416 = vmatmul.msk.f32.vlgmr.msra.gmra.mxu3 %vm609_vm1, %v369_v52 }
  0xa4   : > { %v542_v40 = vpop.permute.xlu2 %541 }
  0xa5   : > { %v1937_v27 = vpop.permute.xlu1 %476 }
  0xa8   : > { %v1933_v25 = vpop.permute.xlu0 %501 }
  0xa9   : > { %1392 = vmatmul.msk.f32.gmra.mxu0 %vm609_vm1, %v345_v54  ;;  %1406 = vmatmul.msk.f32.gmra.mxu1 %vm609_vm1, %v359_v55 }
  0xaa   : > { %1413 = vmatmul.msk.f32.gmra.mxu2 %vm609_vm1, %v366_v56  ;;  %1417 = vmatmul.msk.f32.gmra.mxu3 %vm609_vm1, %v370_v57 }
  0xac   : > { %v1958_v48 = vpop.permute.xlu2 %556 }
  0xad   : > { %v1945_v31 = vpop.permute.xlu1 %491 }
  0xb0   : > { %v1942_v29 = vpop.permute.xlu0 %516 }
  0xb1   : > { %1393 = vmatmul.msk.f32.gmra.mxu0 %vm609_vm1, %v346_v59  ;;  %1407 = vmatmul.msk.f32.gmra.mxu1 %vm609_vm1, %v360_v60 }
  0xb2   : > { %1414 = vmatmul.msk.f32.gmra.mxu2 %vm609_vm1, %v367_v61  ;;  %1418 = vmatmul.msk.f32.gmra.mxu3 %vm609_vm1, %v371_v62 }
  0xb4   : > { %v607_v57 = vpop.permute.xlu2 %606 }
  0xb5   : > { %v1950_v34 = vpop.permute.xlu1 %506 }
  0xb8   : > { %v532_v33 = vpop.permute.xlu0 %531 }
  0xb9   : > { %1394 = vmatmul.msk.f32.gmra.mxu0 %vm609_vm1, %v347_v0  ;;  %1408 = vmatmul.msk.f32.gmra.mxu1 %vm609_vm1, %v361_v1 }
  0xba   : > { %1415 = vmatmul.msk.f32.gmra.mxu2 %vm609_vm1, %v368_v2  ;;  %1419 = vmatmul.msk.f32.gmra.mxu3 %vm609_vm1, %v372_v3 }
  0xbd   : > { %v522_v37 = vpop.permute.xlu1 %521 }
  0xc0   : > { %v547_v36 = vpop.permute.xlu0 %546 }
  0xc1   : > { %1395 = vmatmul.msk.f32.gmra.mxu0 %vm609_vm1, %v348_v4  ;;  %1409 = vmatmul.msk.f32.gmra.mxu1 %vm609_vm1, %v362_v5 }
  0xc2   : > { %1420 = vmatmul.msk.f32.gmra.mxu3 %vm609_vm1, %v373_v6 }
  0xc5   : > { %v537_v46 = vpop.permute.xlu1 %536 }
  0xc8   : > { %v1954_v41 = vpop.permute.xlu0 %561 }
  0xc9   : > { %1396 = vmatmul.msk.f32.gmra.mxu0 %vm609_vm1, %v349_v7  ;;  %1410 = vmatmul.msk.f32.gmra.mxu1 %vm609_vm1, %v363_v8 }
  0xca   : > { %1421 = vmatmul.msk.f32.gmra.mxu3 %vm609_vm1, %v374_v9 }
  0xcd   : > { %v1964_v56 = vpop.permute.xlu1 %551 }
  0xd0   : > { %v602_v51 = vpop.permute.xlu0 %601 }
  0xd1   : > { %1397 = vmatmul.msk.f32.gmra.mxu0 %vm609_vm1, %v350_v10  ;;  %1411 = vmatmul.msk.f32.gmra.mxu1 %vm609_vm1, %v364_v11  ;;  %v592_v10 = vpop.permute.xlu2 %591 }
  0xd2   : > { %1422 = vmatmul.msk.f32.gmra.mxu3 %vm609_vm1, %v375_v12 }
  0xd5   : > { %v1978_v7 = vpop.permute.xlu1 %566 }
  0xd8   : > { %v587_v59 = vpop.permute.xlu0 %586 }
  0xd9   : > { %1398 = vmatmul.msk.f32.gmra.mxu0 %vm609_vm1, %v351_v13 }
  0xe1   : > { %1399 = vmatmul.msk.f32.gmra.mxu0 %vm609_vm1, %v352_v15 }
  0xe9   : > { %1400 = vmatmul.msk.f32.gmra.mxu0 %vm609_vm1, %v353_v18 }
  0xf1   : > { %1401 = vmatmul.msk.f32.gmra.mxu0 %vm609_vm1, %v354_v20 }
  0xf9   : > { %1402 = vmatmul.msk.f32.gmra.mxu0 %vm609_vm1, %v355_v23 }
 0x101   : > { %1403 = vmatmul.msk.f32.gmra.mxu0 %vm609_vm1, %v356_v26 }
 0x109   : > { %1404 = vmatmul.msk.f32.gmra.mxu0 %vm609_vm1, %v357_v30 }
 0x11e   : > { %v1952_v38 = vpop.f32.mrf.mxu0  ;;  %v767_v39 = vpop.f32.mrf.mxu1 }
 0x11f   : > { %v768_v42 = vadd.f32 %v767_v39, %v522_v37 }
 0x121   : > { %v835_v49 = vmax.f32 %v768_v42, 0.0 }
 0x125   : > { %v1956_v43 = vpop.f32.mrf.mxu3  ;;  %v1992_v20 = vpop.f32.mrf.mxu2 }
 0x126   : > { %v728_v44 = vpop.f32.mrf.mxu0  ;;  %v770_v45 = vpop.f32.mrf.mxu1 }
 0x127   : > { %v771_v47 = vadd.f32 %v770_v45, %v527_v35  ;;  %v729_v58 = vadd.f32 %v728_v44, %v457_v16 }
 0x129   : > { %v836_v50 = vmax.f32 %v771_v47, 0.0  ;;  %v1970_v2 = vmax.f32 %v729_v58, 0.0 }
 0x12b   : > { %1087 = vmatpush.msrb.mxu1 %v836_v50  ;;  %v1516_v52 = vpack.i.bf16 %v835_v49, %v836_v50 }
 0x12d   : > { %v1960_v53 = vpop.f32.mrf.mxu3  ;;  %1517 = vrot.lane.b32.xlu2 %v1516_v52, %s1712_s11  ;;  %1512 = vrot.lane.b32.xlu1 %v1516_v52, %s1713_s12 }
 0x12e   : > { %1088 = vmatpush.msrb.mxu1 %v835_v49  ;;  %v731_v54 = vpop.f32.mrf.mxu0  ;;  %v773_v55 = vpop.f32.mrf.mxu1 }
 0x12f   : > { %v1966_v60 = vadd.f32 %v773_v55, %v532_v33  ;;  %v732_v9 = vadd.f32 %v731_v54, %v1918_v17  ;;  %v597_v17 = vpop.permute.xlu1 %596  ;;  %v791_v49 = vpop.f32.mrf.mxu2 }
 0x131   : > { %v837_v4 = vmax.f32 %v1966_v60, 0.0  ;;  %v1988_v16 = vmax.f32 %v732_v9, 0.0 }
 0x135   : > { %v806_v61 = vpop.f32.mrf.mxu3 }
 0x136   : > { %v807_v62 = vadd.f32 %v806_v61, %v587_v59  ;;  %v734_v63 = vpop.f32.mrf.mxu0  ;;  %v776_v0 = vpop.f32.mrf.mxu1 }
 0x137   : > { %v1968_v1 = vadd.f32 %v776_v0, %v537_v46  ;;  %v735_v26 = vadd.f32 %v734_v63, %v1928_v22 }
 0x138   : > { %v1972_v3 = vmax.f32 %v807_v62, 0.0  ;;  %v794_v62 = vpop.f32.mrf.mxu2 }
 0x139   : > { %v838_v5 = vmax.f32 %v1968_v1, 0.0  ;;  %v1998_v44 = vmax.f32 %v735_v26, 0.0 }
 0x13a   : > { %v1521_v6 = vpack.i.bf16 %v1970_v2, %v1972_v3 }
 0x13b   : > { %v1984_v8 = vpack.i.bf16 %v837_v4, %v838_v5 }
 0x13c   : > { %1522 = vrot.lane.b32.xlu1 %v1521_v6, %s1713_s12 }
 0x13d   : > { %v809_v11 = vpop.f32.mrf.mxu3 }
 0x13e   : > { %v810_v12 = vadd.f32 %v809_v11, %v592_v10  ;;  %v737_v13 = vpop.f32.mrf.mxu0  ;;  %v779_v15 = vpop.f32.mrf.mxu1 }
 0x13f   : > { %v780_v30 = vadd.f32 %v779_v15, %v542_v40  ;;  %v738_v50 = vadd.f32 %v737_v13, %v1922_v19  ;;  %v577_v15 = vpop.permute.xlu2 %576 }
 0x140   : > { %v1990_v18 = vmax.f32 %v810_v12, 0.0  ;;  %v801_v26 = vadd.f32 %v1956_v43, %v577_v15 }
 0x141   : > { %v2002_v46 = vmax.f32 %v780_v30, 0.0  ;;  %v2012_v55 = vmax.f32 %v738_v50, 0.0 }
 0x142   : > { %v1526_v23 = vpack.i.bf16 %v1988_v16, %v1990_v18 }
 0x144   : > { %1527 = vrot.lane.b32.xlu2 %v1526_v23, %s1713_s12  ;;  %v797_v23 = vpop.f32.mrf.mxu2 }
 0x145   : > { %v812_v33 = vpop.f32.mrf.mxu3 }
 0x146   : > { %v813_v35 = vadd.f32 %v812_v33, %v597_v17  ;;  %v740_v37 = vpop.f32.mrf.mxu0  ;;  %v782_v39 = vpop.f32.mrf.mxu1 }
 0x147   : > { %v783_v42 = vadd.f32 %v782_v39, %v547_v36  ;;  %v741_v61 = vadd.f32 %v740_v37, %v1937_v27  ;;  %v572_v17 = vpop.permute.xlu0 %571  ;;  %v795_v37 = vadd.f32 %v794_v62, %v1978_v7  ;;  %v792_v39 = vadd.f32 %v791_v49, %v1954_v41 }
 0x148   : > { %v2000_v45 = vmax.f32 %v813_v35, 0.0  ;;  %v798_v33 = vadd.f32 %v797_v23, %v572_v17  ;;  %v2045_v35 = vmax.f32 %v801_v26, 0.0 }
 0x149   : > { %v2004_v47 = vmax.f32 %v783_v42, 0.0  ;;  %v2022_v9 = vmax.f32 %v741_v61, 0.0 }
 0x14a   : > { %v1531_v22 = vpack.i.bf16 %v1998_v44, %v2000_v45  ;;  %v2051_v42 = vmax.f32 %v798_v33, 0.0 }
 0x14b   : > { %v1651_v40 = vpack.i.bf16 %v2002_v46, %v2004_v47 }
 0x14c   : > { %1532 = vrot.lane.b32.xlu0 %v1531_v22, %s1713_s12 }
 0x14d   : > { %v815_v36 = vpop.f32.mrf.mxu3 }
 0x14e   : > { %v816_v52 = vadd.f32 %v815_v36, %v602_v51  ;;  %v743_v54 = vpop.f32.mrf.mxu0  ;;  %v785_v22 = vpop.f32.mrf.mxu1  ;;  %v789_v36 = vadd.f32 %v1992_v20, %v1958_v48 }
 0x14f   : > { %v744_v63 = vadd.f32 %v743_v54, %v1931_v24  ;;  %v2062_v54 = vmax.f32 %v792_v39, 0.0  ;;  %v786_v41 = vadd.f32 %v785_v22, %v1964_v56  ;;  %v420_v39 = vld [vmem:[%s331_s30] sm:$0xff] }
 0x150   : > { %v2014_v58 = vmax.f32 %v816_v52, 0.0  ;;  %v2057_v52 = vmax.f32 %v795_v37, 0.0 }
 0x151   : > { %v2026_v11 = vmax.f32 %v744_v63, 0.0  ;;  %v2073_v48 = vmax.f32 %v786_v41, 0.0  ;;  %v1626_v17 = vpack.i.bf16 %v2012_v55, %v2062_v54 }
 0x152   : > { %v1536_v59 = vpack.i.bf16 %v2012_v55, %v2014_v58 }
 0x153   : > { %v1641_v33 = vpack.i.bf16 %v1988_v16, %v2073_v48 }
 0x154   : > { %1537 = vrot.lane.b32.xlu1 %v1536_v59, %s1713_s12  ;;  %v2068_v59 = vmax.f32 %v789_v36, 0.0 }
 0x155   : > { %v818_v19 = vpop.f32.mrf.mxu3 }
 0x156   : > { %v819_v0 = vadd.f32 %v818_v19, %v607_v57  ;;  %v746_v6 = vpop.f32.mrf.mxu0  ;;  %v1631_v26 = vpack.i.bf16 %v1998_v44, %v2068_v59 }
 0x157   : > { %v747_v51 = vadd.f32 %v746_v6, %v1925_v21  ;;  %v582_v21 = vpop.permute.xlu1 %581 }
 0x158   : > { %v2024_v10 = vmax.f32 %v819_v0, 0.0  ;;  %v804_v57 = vadd.f32 %v1960_v53, %v582_v21  ;;  %v415_v21 = vld [vmem:[%s2096_s26 + $0x38] sm:$0x3] }
 0x159   : > { %v2028_v12 = vmax.f32 %v747_v51, 0.0 }
 0x15a   : > { %1110 = vmatpush.msrb.mxu2 %v2024_v10  ;;  %v1541_v27 = vpack.i.bf16 %v2022_v9, %v2024_v10  ;;  %v2042_v30 = vmax.f32 %v804_v57, 0.0 }
 0x15b   : > { %v1546_v24 = vpack.i.bf16 %v2026_v11, %v2028_v12 }
 0x15c   : > { %1111 = vmatpush.msrb.mxu2 %v2014_v58  ;;  %1542 = vrot.lane.b32.xlu2 %v1541_v27, %s1713_s12 }
 0x15d   : > { %1547 = vrot.lane.b32.xlu0 %v1546_v24, %s1713_s12 }
 0x15e   : > { %1112 = vmatpush.msrb.mxu2 %v2000_v45  ;;  %v749_v13 = vpop.f32.mrf.mxu0 }
 0x15f   : > { %v750_v53 = vadd.f32 %v749_v13, %v1945_v31 }
 0x160   : > { %1113 = vmatpush.msrb.mxu2 %v1990_v18 }
 0x161   : > { %v2060_v7 = vmax.f32 %v750_v53, 0.0  ;;  %v414_v53 = vld [vmem:[%s2096_s26 + $0x30] sm:$0x3] }
 0x162   : > { %1114 = vmatpush.msrb.mxu2 %v1972_v3 }
 0x164   : > { %1115 = vmatpush.msrb.mxu2 %v2042_v30 }
 0x166   : > { %1116 = vmatpush.msrb.mxu2 %v2045_v35  ;;  %v752_v43 = vpop.f32.mrf.mxu0 }
 0x167   : > { %v753_v50 = vadd.f32 %v752_v43, %v1939_v28 }
 0x168   : > { %1117 = vmatpush.msrb.mxu2 %v2051_v42 }
 0x169   : > { %v830_v31 = vmax.f32 %v753_v50, 0.0 }
 0x16a   : > { %1118 = vmatpush.msrb.mxu2 %v2057_v52 }
 0x16b   : > { %v1556_v49 = vpack.i.bf16 %v830_v31, %v1972_v3  ;;  %v1551_v28 = vpack.i.bf16 %v2060_v7, %v830_v31 }
 0x16c   : > { %1119 = vmatpush.msrb.mxu2 %v2062_v54 }
 0x16d   : > { %1557 = vrot.lane.b32.xlu0 %v1556_v49, %s1712_s11  ;;  %1552 = vrot.lane.b32.xlu1 %v1551_v28, %s1713_s12 }
 0x16e   : > { %1120 = vmatpush.msrb.mxu2 %v2068_v59  ;;  %v755_v56 = vpop.f32.mrf.mxu0 }
 0x16f   : > { %v756_v20 = vadd.f32 %v755_v56, %v1933_v25 }
 0x170   : > { %1121 = vmatpush.msrb.mxu2 %v2073_v48 }
 0x171   : > { %v831_v3 = vmax.f32 %v756_v20, 0.0 }
 0x172   : > { %1122 = vmatpush.msrb.mxu2 %v2004_v47 }
 0x173   : > { %v1561_v61 = vpack.i.bf16 %v831_v3, %v1990_v18  ;;  %v1596_v18 = vpack.i.bf16 %v2028_v12, %v2045_v35 }
 0x174   : > { %1123 = vmatpush.msrb.mxu2 %v2002_v46 }
 0x175   : > { %1562 = vrot.lane.b32.xlu1 %v1561_v61, %s1712_s11 }
 0x176   : > { %1124 = vmatpush.msrb.mxu2 %v838_v5  ;;  %v758_v62 = vpop.f32.mrf.mxu0 }
 0x177   : > { %v759_v63 = vadd.f32 %v758_v62, %v1950_v34 }
 0x178   : > { %1125 = vmatpush.msrb.mxu2 %v837_v4  ;;  %v409_v4 = vld [vmem:[%s2096_s26 + $0x8] sm:$0xff] }
 0x179   : > { %v832_v25 = vmax.f32 %v759_v63, 0.0  ;;  %1126 = vmatmul.f32.vlgmr.msrb.gmra.mxu2 %v409_v4 }
 0x17b   : > { %v1566_v19 = vpack.i.bf16 %v831_v3, %v832_v25  ;;  %v1571_v0 = vpack.i.bf16 %v832_v25, %v2000_v45  ;;  %v726_v45 = vadd.f32 %v1952_v38, %v1913_v14  ;;  %v1586_v14 = vpack.i.bf16 %v2060_v7, %v2042_v30 }
 0x17c   : > { %v1606_v38 = vpack.i.bf16 %v2026_v11, %v2051_v42 }
 0x17d   : > { %1567 = vrot.lane.b32.xlu0 %v1566_v19, %s1713_s12  ;;  %1572 = vrot.lane.b32.xlu2 %v1571_v0, %s1712_s11  ;;  %v821_v13 = vmax.f32 %v726_v45, 0.0 }
 0x17e   : > { %1597 = vrot.lane.b32.xlu1 %v1596_v18, %s1712_s11  ;;  %v761_v34 = vpop.f32.mrf.mxu0 }
 0x17f   : > { %v762_v60 = vadd.f32 %v761_v34, %v1948_v32  ;;  %v1656_v37 = vpack.i.bf16 %v821_v13, %v2002_v46 }
 0x181   : > { %v833_v1 = vmax.f32 %v762_v60, 0.0  ;;  %1129 = vmatmul.f32.gmra.mxu2 %v415_v21 }
 0x183   : > { %v1576_v5 = vpack.i.bf16 %v833_v1, %v2014_v58  ;;  %v1591_v58 = vpack.i.bf16 %v821_v13, %v2042_v30  ;;  %v1646_v30 = vpack.i.bf16 %v1970_v2, %v2004_v47 }
 0x185   : > { %1577 = vrot.lane.b32.xlu0 %v1576_v5, %s1712_s11 }
 0x186   : > { %v764_v6 = vpop.f32.mrf.mxu0 }
 0x187   : > { %v765_v51 = vadd.f32 %v764_v6, %v1942_v29  ;;  %v1518_v27 = vpop.permute.xlu2 %1517  ;;  %v1616_v29 = vpack.i.bf16 %v2022_v9, %v2057_v52 }
 0x188   : > { %v1519_v24 = vunpack.i.l.bf16 %v1518_v27  ;;  %v1520_v15 = vunpack.i.h.bf16 %v1518_v27 }
 0x189   : > { %v834_v57 = vmax.f32 %v765_v51, 0.0 }
 0x18a   : > { %1179 = vmatpush.msra.mxu2 %v1519_v24 }
 0x18b   : > { %1089 = vmatpush.msrb.mxu1 %v834_v57  ;;  %v1581_v32 = vpack.i.bf16 %v833_v1, %v834_v57  ;;  %v1611_v23 = vpack.i.bf16 %v834_v57, %v2024_v10  ;;  %v1601_v10 = vpack.i.bf16 %v2051_v42, %v2045_v35  ;;  %v1636_v35 = vpack.i.bf16 %v2073_v48, %v2068_v59 }
 0x18c   : > { %1180 = vmatpush.msra.mxu2 %v1520_v15 }
 0x18d   : > { %1090 = vmatpush.msrb.mxu1 %v833_v1  ;;  %1582 = vrot.lane.b32.xlu2 %v1581_v32, %s1713_s12 }
 0x18e   : > { %1612 = vrot.lane.b32.xlu1 %v1611_v23, %s1712_s11  ;;  %1592 = vrot.lane.b32.xlu0 %v1591_v58, %s1713_s12 }
 0x18f   : > { %1091 = vmatpush.msrb.mxu1 %v832_v25 }
 0x191   : > { %1092 = vmatpush.msrb.mxu1 %v831_v3 }
 0x193   : > { %1093 = vmatpush.msrb.mxu1 %v830_v31 }
 0x195   : > { %1094 = vmatpush.msrb.mxu1 %v2060_v7  ;;  %1587 = vrot.lane.b32.xlu2 %v1586_v14, %s1712_s11 }
 0x196   : > { %1617 = vrot.lane.b32.xlu1 %v1616_v29, %s1712_s11  ;;  %1607 = vrot.lane.b32.xlu0 %v1606_v38, %s1712_s11  ;;  %v410_v29 = vld [vmem:[%s2096_s26 + $0x10] sm:$0xff] }
 0x197   : > { %1095 = vmatpush.msrb.mxu1 %v2028_v12 }
 0x199   : > { %1096 = vmatpush.msrb.mxu1 %v2026_v11 }
 0x19b   : > { %1097 = vmatpush.msrb.mxu1 %v2022_v9 }
 0x19d   : > { %1098 = vmatpush.msrb.mxu1 %v2012_v55  ;;  %1602 = vrot.lane.b32.xlu2 %v1601_v10, %s1713_s12  ;;  %v1621_v55 = vpack.i.bf16 %v2062_v54, %v2057_v52 }
 0x19e   : > { %1632 = vrot.lane.b32.xlu1 %v1631_v26, %s1712_s11  ;;  %1627 = vrot.lane.b32.xlu0 %v1626_v17, %s1712_s11 }
 0x19f   : > { %v1513_v11 = vpop.permute.xlu1 %1512  ;;  %1099 = vmatpush.msrb.mxu1 %v1998_v44  ;;  %v408_v44 = vld [vmem:[%s2096_s26] sm:$0xff] }
 0x1a0   : > { %v1514_v9 = vunpack.i.l.bf16 %v1513_v11  ;;  %v1515_v12 = vunpack.i.h.bf16 %v1513_v11 }
 0x1a1   : > { %1100 = vmatpush.msrb.mxu1 %v1988_v16  ;;  %v421_v16 = vld [vmem:[%s331_s30 + $0x8] sm:$0x3] }
 0x1a2   : > { %1133 = vmatpush.msrb.mxu3 %v1514_v9 }
 0x1a3   : > { %1101 = vmatpush.msrb.mxu1 %v1970_v2  ;;  %v2154_v2 = vpop.permute.xlu2 %1527 }
 0x1a4   : > { %1134 = vmatpush.msrb.mxu3 %v1515_v12  ;;  %v1529_v31 = vunpack.i.l.bf16 %v2154_v2  ;;  %v1530_v27 = vunpack.i.h.bf16 %v2154_v2 }
 0x1a5   : > { %1622 = vrot.lane.b32.xlu2 %v1621_v55, %s1713_s12  ;;  %1102 = vmatpush.msrb.mxu1 %v821_v13 }
 0x1a6   : > { %1647 = vrot.lane.b32.xlu1 %v1646_v30, %s1712_s11  ;;  %1642 = vrot.lane.b32.xlu0 %v1641_v33, %s1712_s11 }
 0x1a7   : > { %1103 = vmatmul.f32.vlgmr.msrb.gmra.mxu1 %v408_v44 }
 0x1ad   : > { %1637 = vrot.lane.b32.xlu2 %v1636_v35, %s1713_s12 }
 0x1ae   : > { %1662 = vrot.lane.b32.xlu1 %v1984_v8, %s1712_s11  ;;  %1657 = vrot.lane.b32.xlu0 %v1656_v37, %s1712_s11  ;;  %v1523_v22 = vpop.permute.xlu1 %1522 }
 0x1af   : > { %1106 = vmatmul.f32.gmra.mxu1 %v414_v53  ;;  %v1524_v54 = vunpack.i.l.bf16 %v1523_v22  ;;  %v1525_v57 = vunpack.i.h.bf16 %v1523_v22  ;;  %v416_v53 = vld [vmem:[%s2096_s26 + $0x40] sm:$0x3] }
 0x1b5   : > { %1652 = vrot.lane.b32.xlu2 %v1651_v40, %s1713_s12 }
 0x1b6   : > { %v1543_v42 = vpop.permute.xlu2 %1542  ;;  %1084 = vperm.xlu1 %1510, %v421_v16   ;;  %1079 = vperm.xlu0 %1509, %v420_v39  }
 0x1b7   : > { %v1544_v43 = vunpack.i.l.bf16 %v1543_v42  ;;  %v1545_v34 = vunpack.i.h.bf16 %v1543_v42 }
 0x1b9   : > { %1156 = vmatpush.msra.mxu1 %v1544_v43 }
 0x1bd   : > { %1667 = vrot.lane.b32.xlu2 %v1984_v8, %s1713_s12  ;;  %s340_s12 = scalar_lea.vmem %s2223_s5, %s1389_s9 }
 0x1be   : > { %v1533_v50 = vpop.permute.xlu0 %1532 }
 0x1bf   : > { %v1534_v7 = vunpack.i.l.bf16 %v1533_v50  ;;  %v1535_v45 = vunpack.i.h.bf16 %v1533_v50 }
 0x1c6   : > { %v1538_v36 = vpop.permute.xlu1 %1537 }
 0x1c7   : > { %v1539_v52 = vunpack.i.l.bf16 %v1538_v36  ;;  %v1540_v60 = vunpack.i.h.bf16 %v1538_v36 }
 0x1c9   : > { %1157 = vmatpush.msra.mxu1 %v1539_v52 }
 0x1cb   : > { %1158 = vmatpush.msra.mxu1 %v1534_v7 }
 0x1cd   : > { %1159 = vmatpush.msra.mxu1 %v1529_v31 }
 0x1cf   : > { %1160 = vmatpush.msra.mxu1 %v1524_v54  ;;  %v1548_v46 = vpop.permute.xlu0 %1547 }
 0x1d0   : > { %v1549_v0 = vunpack.i.l.bf16 %v1548_v46  ;;  %v1550_v18 = vunpack.i.h.bf16 %v1548_v46 }
 0x1d7   : > { %v2169_v47 = vpop.permute.xlu2 %1572 }
 0x1d8   : > { %v1575_v13 = vunpack.i.h.bf16 %v2169_v47  ;;  %v1574_v30 = vunpack.i.l.bf16 %v2169_v47 }
 0x1df   : > { %v1553_v40 = vpop.permute.xlu1 %1552  ;;  %v2171_v41 = vpop.permute.xlu0 %1557 }
 0x1e0   : > { %v1554_v61 = vunpack.i.l.bf16 %v1553_v40  ;;  %v1555_v62 = vunpack.i.h.bf16 %v1553_v40  ;;  %v1560_v11 = vunpack.i.h.bf16 %v2171_v41  ;;  %v1559_v43 = vunpack.i.l.bf16 %v2171_v41 }
 0x1e7   : > { %v1583_v49 = vpop.permute.xlu2 %1582  ;;  %v2173_v59 = vpop.permute.xlu1 %1562 }
 0x1e8   : > { %v1584_v8 = vunpack.i.l.bf16 %v1583_v49  ;;  %v1585_v28 = vunpack.i.h.bf16 %v1583_v49  ;;  %v1565_v23 = vunpack.i.h.bf16 %v2173_v59  ;;  %v1564_v35 = vunpack.i.l.bf16 %v2173_v59 }
 0x1ea   : > { %1135 = vmatpush.msrb.mxu3 %v1584_v8 }
 0x1ec   : > { %1136 = vmatpush.msrb.mxu3 %v1585_v28 }
 0x1ef   : > { %v1568_v48 = vpop.permute.xlu0 %1567  ;;  %v2175_v56 = vpop.permute.xlu2 %1587 }
 0x1f0   : > { %v1569_v20 = vunpack.i.l.bf16 %v1568_v48  ;;  %v1570_v3 = vunpack.i.h.bf16 %v1568_v48  ;;  %v2177_v19 = vpop.permute.xlu1 %1597  ;;  %v1590_v55 = vunpack.i.h.bf16 %v2175_v56  ;;  %v1589_v50 = vunpack.i.l.bf16 %v2175_v56  ;;  %v411_v56 = vld [vmem:[%s2096_s26 + $0x18] sm:$0xff] }
 0x1f1   : > { %v1600_v44 = vunpack.i.h.bf16 %v2177_v19  ;;  %v1599_v7 = vunpack.i.l.bf16 %v2177_v19  ;;  %v412_v19 = vld [vmem:[%s2096_s26 + $0x20] sm:$0xff] }
 0x1f2   : > { %1137 = vmatpush.msrb.mxu3 %v1569_v20 }
 0x1f4   : > { %1138 = vmatpush.msrb.mxu3 %v1570_v3 }
 0x1f6   : > { %1139 = vmatpush.msrb.mxu3 %v1554_v61 }
 0x1f7   : > { %v1578_v63 = vpop.permute.xlu0 %1577  ;;  %v1603_v25 = vpop.permute.xlu2 %1602 }
 0x1f8   : > { %1140 = vmatpush.msrb.mxu3 %v1555_v62  ;;  %v1580_v24 = vunpack.i.h.bf16 %v1578_v63  ;;  %v1604_v21 = vunpack.i.l.bf16 %v1603_v25  ;;  %v1605_v15 = vunpack.i.h.bf16 %v1603_v25  ;;  %v1579_v9 = vunpack.i.l.bf16 %v1578_v63 }
 0x1fa   : > { %1141 = vmatpush.msrb.mxu3 %v1549_v0 }
 0x1fc   : > { %1142 = vmatpush.msrb.mxu3 %v1550_v18  ;;  %v417_v18 = vld [vmem:[%s2096_s26 + $0x48] sm:$0x3] }
 0x1fe   : > { %1143 = vmatpush.msrb.mxu3 %v1545_v34 }
 0x1ff   : > { %v1623_v1 = vpop.permute.xlu2 %1622 }
 0x200   : > { %v1613_v4 = vpop.permute.xlu1 %1612  ;;  %v1593_v5 = vpop.permute.xlu0 %1592  ;;  %1144 = vmatpush.msrb.mxu3 %v1540_v60  ;;  %v1624_v58 = vunpack.i.l.bf16 %v1623_v1  ;;  %v1625_v26 = vunpack.i.h.bf16 %v1623_v1  ;;  %v413_v1 = vld [vmem:[%s2096_s26 + $0x28] sm:$0xff] }
 0x201   : > { %v1615_v6 = vunpack.i.h.bf16 %v1613_v4  ;;  %v1594_v51 = vunpack.i.l.bf16 %v1593_v5  ;;  %v1595_v32 = vunpack.i.h.bf16 %v1593_v5  ;;  %v1614_v17 = vunpack.i.l.bf16 %v1613_v4  ;;  %v418_v4 = vld [vmem:[%s2096_s26 + $0x50] sm:$0x3]  ;;  %v419_v5 = vld [vmem:[%s2096_s26 + $0x58] sm:$0x3] }
 0x202   : > { %1145 = vmatpush.msrb.mxu3 %v1535_v45 }
 0x203   : > { %1161 = vmatpush.msra.mxu1 %v1594_v51  ;;  %1181 = vmatpush.msra.mxu2 %v1615_v6  ;;  %v1127_v6 = vpop.f32.mrf.mxu2 }
 0x204   : > { %1146 = vmatpush.msrb.mxu3 %v1530_v27 }
 0x205   : > { %1162 = vmatpush.msra.mxu1 %v1604_v21  ;;  %1182 = vmatpush.msra.mxu2 %v1580_v24 }
 0x206   : > { %1147 = vmatpush.msrb.mxu3 %v1525_v57 }
 0x207   : > { %1163 = vmatpush.msra.mxu1 %v1605_v15  ;;  %1183 = vmatpush.msra.mxu2 %v1575_v13  ;;  %v1638_v14 = vpop.permute.xlu2 %1637 }
 0x208   : > { %v1618_v38 = vpop.permute.xlu1 %1617  ;;  %v1608_v10 = vpop.permute.xlu0 %1607  ;;  %1148 = vmatpush.msrb.mxu3 %v1595_v32  ;;  %v1639_v12 = vunpack.i.l.bf16 %v1638_v14  ;;  %v1640_v33 = vunpack.i.h.bf16 %v1638_v14 }
 0x209   : > { %1164 = vmatpush.msra.mxu1 %v1624_v58  ;;  %1184 = vmatpush.msra.mxu2 %v1565_v23  ;;  %v1610_v2 = vunpack.i.h.bf16 %v1608_v10  ;;  %v1620_v22 = vunpack.i.h.bf16 %v1618_v38  ;;  %v1609_v54 = vunpack.i.l.bf16 %v1608_v10  ;;  %v1619_v49 = vunpack.i.l.bf16 %v1618_v38 }
 0x20a   : > { %1149 = vmatmul.f32.vlgmr.msrb.gmra.mxu3 %v410_v29 }
 0x20b   : > { %1202 = vmatpush.msra.mxu3 %v1614_v17  ;;  %1165 = vmatpush.msra.mxu1 %v1625_v26  ;;  %v1130_v21 = vpop.f32.mrf.mxu2 }
 0x20c   : > { %1185 = vmatpush.msra.mxu2 %v1560_v11 }
 0x20d   : > { %1203 = vmatpush.msra.mxu3 %v1579_v9  ;;  %1166 = vmatpush.msra.mxu1 %v1639_v12 }
 0x20e   : > { %1186 = vmatpush.msra.mxu2 %v1590_v55 }
 0x20f   : > { %1204 = vmatpush.msra.mxu3 %v1574_v30  ;;  %1167 = vmatpush.msra.mxu1 %v1640_v33  ;;  %v1653_v37 = vpop.permute.xlu2 %1652 }
 0x210   : > { %1187 = vmatpush.msra.mxu2 %v1600_v44  ;;  %v1654_v16 = vunpack.i.l.bf16 %v1653_v37  ;;  %v1633_v39 = vpop.permute.xlu1 %1632  ;;  %v1628_v42 = vpop.permute.xlu0 %1627  ;;  %v1655_v36 = vunpack.i.h.bf16 %v1653_v37 }
 0x211   : > { %1205 = vmatpush.msra.mxu3 %v1564_v35  ;;  %v1630_v52 = vunpack.i.h.bf16 %v1628_v42  ;;  %v1635_v31 = vunpack.i.h.bf16 %v1633_v39  ;;  %v1629_v59 = vunpack.i.l.bf16 %v1628_v42  ;;  %v1634_v20 = vunpack.i.l.bf16 %v1633_v39 }
 0x212   : > { %1188 = vmatpush.msra.mxu2 %v1610_v2  ;;  %1152 = vmatmul.f32.gmra.mxu3 %v416_v53 }
 0x213   : > { %1206 = vmatpush.msra.mxu3 %v1559_v43  ;;  %1168 = vmatpush.msra.mxu1 %v1654_v16 }
 0x214   : > { %1189 = vmatpush.msra.mxu2 %v1620_v22 }
 0x215   : > { %1207 = vmatpush.msra.mxu3 %v1589_v50  ;;  %1169 = vmatpush.msra.mxu1 %v1655_v36 }
 0x216   : > { %1190 = vmatpush.msra.mxu2 %v1630_v52 }
 0x217   : > { %1208 = vmatpush.msra.mxu3 %v1599_v7  ;;  %v1668_v46 = vpop.permute.xlu2 %1667 }
 0x218   : > { %1191 = vmatpush.msra.mxu2 %v1635_v31  ;;  %v1669_v47 = vunpack.i.l.bf16 %v1668_v46  ;;  %v1648_v40 = vpop.permute.xlu1 %1647  ;;  %v1643_v41 = vpop.permute.xlu0 %1642  ;;  %v1670_v28 = vunpack.i.h.bf16 %v1668_v46 }
 0x219   : > { %v1645_v8 = vunpack.i.h.bf16 %v1643_v41  ;;  %1209 = vmatpush.msra.mxu3 %v1609_v54  ;;  %v1650_v48 = vunpack.i.h.bf16 %v1648_v40  ;;  %v1644_v3 = vunpack.i.l.bf16 %v1643_v41  ;;  %v1649_v62 = vunpack.i.l.bf16 %v1648_v40 }
 0x21a   : > { %1170 = vmatpush.msra.mxu1 %v1669_v47 }
 0x21b   : > { %1210 = vmatpush.msra.mxu3 %v1619_v49  ;;  %1192 = vmatpush.msra.mxu2 %v1645_v8 }
 0x21c   : > { %1171 = vmatpush.msra.mxu1 %v1670_v28 }
 0x21d   : > { %1211 = vmatpush.msra.mxu3 %v1629_v59  ;;  %1193 = vmatpush.msra.mxu2 %v1650_v48 }
 0x21e   : > { %1172 = vmatmul.f32.vlgmr.msra.gmra.mxu1 %v411_v56 }
 0x21f   : > { %1212 = vmatpush.msra.mxu3 %v1634_v20 }
 0x220   : > { %v1658_v61 = vpop.permute.xlu0 %1657  ;;  %v1663_v0 = vpop.permute.xlu1 %1662 }
 0x221   : > { %v1660_v63 = vunpack.i.h.bf16 %v1658_v61  ;;  %v1659_v25 = vunpack.i.l.bf16 %v1658_v61  ;;  %1213 = vmatpush.msra.mxu3 %v1644_v3  ;;  %v1664_v34 = vunpack.i.l.bf16 %v1663_v0  ;;  %v1665_v60 = vunpack.i.h.bf16 %v1663_v0 }
 0x223   : > { %1214 = vmatpush.msra.mxu3 %v1649_v62  ;;  %1194 = vmatpush.msra.mxu2 %v1660_v63 }
 0x224   : > { %1195 = vmatmul.f32.vlgmr.msra.gmra.mxu2 %v412_v19  ;;  %v1104_v45 = vpop.f32.mrf.mxu1 }
 0x225   : > { %1215 = vmatpush.msra.mxu3 %v1659_v25 }
 0x226   : > { %1175 = vmatmul.f32.gmra.mxu1 %v417_v18 }
 0x227   : > { %1216 = vmatpush.msra.mxu3 %v1664_v34 }
 0x228   : > { %v1080_v24 = vpop.permute.xlu0 %1079  ;;  %v1085_v14 = vpop.permute.xlu1 %1084 }
 0x229   : > { %1217 = vmatpush.msra.mxu3 %v1665_v60  ;;  %v1105_v57 = vadd.f32 %v1104_v45, %v1080_v24 }
 0x22a   : > { %1218 = vmatmul.f32.vlgmr.msra.gmra.mxu3 %v413_v1 }
 0x22b   : > { %v1128_v32 = vadd.f32 %v1127_v6, %v1105_v57 }
 0x22c   : > { %1198 = vmatmul.f32.gmra.mxu2 %v418_v4  ;;  %v1107_v27 = vpop.f32.mrf.mxu1 }
 0x22d   : > { %v1108_v29 = vadd.f32 %v1107_v27, %v1085_v14 }
 0x22f   : > { %v1131_v17 = vadd.f32 %v1130_v21, %v1108_v29 }
 0x232   : > { %1221 = vmatmul.f32.gmra.mxu3 %v419_v5 }
 0x28d   : > { %v1150_v51 = vpop.f32.mrf.mxu3 }
 0x28e   : > { %v1151_v58 = vadd.f32 %v1150_v51, %v1128_v32 }
 0x295   : > { %v1153_v13 = vpop.f32.mrf.mxu3 }
 0x296   : > { %v1154_v12 = vadd.f32 %v1153_v13, %v1131_v17 }
 0x29b   : > { %v1173_v15 = vpop.f32.mrf.mxu1 }
 0x29c   : > { %v1174_v38 = vadd.f32 %v1173_v15, %v1151_v58 }
 0x2a3   : > { %v1176_v9 = vpop.f32.mrf.mxu1 }
 0x2a4   : > { %v1177_v33 = vadd.f32 %v1176_v9, %v1154_v12 }
 0x2a7   : > { %v1196_v23 = vpop.f32.mrf.mxu2 }
 0x2a8   : > { %v1197_v10 = vadd.f32 %v1196_v23, %v1174_v38 }
 0x2ad   : > { %v1219_v26 = vpop.f32.mrf.mxu3 }
 0x2ae   : > { %v1220_v11 = vadd.f32 %v1219_v26, %v1197_v10 }
 0x2af   : > { %v1199_v30 = vpop.f32.mrf.mxu2 }
 0x2b0   : > { %v1225_v55 = vmax.f32 %v1220_v11, 0.0  ;;  %v1200_v44 = vadd.f32 %v1199_v30, %v1177_v33 }
 0x2b2   : > { %1228 = vst.msk [vmem:[%s340_s12] sm:$0xff] %vm1227_vm2, %v1225_v55 }
 0x2b5   : > { %v1222_v35 = vpop.f32.mrf.mxu3 }
 0x2b6   : > { %v1223_v37 = vadd.f32 %v1222_v35, %v1200_v44 }
 0x2b8   : > { %v1226_v53 = vmax.f32 %v1223_v37, 0.0 }
 0x2ba   : > { %1230 = vst.msk [vmem:[%s340_s12 + $0x8] sm:$0x3] %vm1229_vm3, %v1226_v53 }
 0x2bb PF: > { %s15_s22 = sadd.s32 1, %s1709_s22   ;;  %s2224_s18 = smov %s1701_s20 }
 0x2bc   : > { %p12_p7 = scmp.ge.s32.totalorder %s15_s22, 6   ;;  %s2225_s19 = smov %s1705_s21 }
 0x2bd   : > { %s2226_s20 = smov %s2229_s23  ;;  %s2227_s21 = smov %s2233_s24 }
 0x2be   :  { %14 = sbr.rel (!%p12_p7) target bundleno = 3 (0x3), region = 82 }

// kernel: cnn_regressor_forward.13
= control target key start
LH: loop header
LB: loop body
LE: loop exit
PB: predicated region body
PF: predicated region fallthrough
CT: control target
= control target key end

     0   :  { %8 = vsyncpa [#allocation4], 0  ;;  %s246_s0 = inlined_call_operand.vmem [shape: f32[1,2,256], index: 0, kind: input, shape index: {}]   ;;  %s247_s1 = inlined_call_operand.hbm [shape: f32[128,256], index: 1, kind: input, shape index: {}]   ;;  %s248_s2 = inlined_call_operand.hbm [shape: f32[1,128], index: 2, kind: input, shape index: {}]   ;;  %s249_s3 = inlined_call_operand.vmem [shape: f32[2,128], index: 3, kind: output, shape index: {}]  }
   0x1   :  { %s16_s14 = sshll.u32 %s247_s1, 4  ;;  %s17_s14 = int_to_ptr.hbm [resolvable:$true] %s16_s14 }
   0x2   :  { %9 = vsyncpa [#allocation6], 0  ;;  %s209_s15 = smov [#allocation3]   ;;  %s30_s19 = sshll.u32 %s248_s2, 4  ;;  %s31_s19 = int_to_ptr.hbm [resolvable:$true] %s30_s19 }
   0x3   :  { %s18_s16 = sshll.u32 %s209_s15, 4  ;;  %s210_s20 = smov 256   ;;  %s19_s16 = int_to_ptr.vmem [resolvable:$true] %s18_s16 }
   0x4   :  { %s211_s21 = smov 16   ;;  %s212_s22 = smov [#allocation5]  }
   0x5   :  { %24 = dma.hbm_to_vmem [thread:$0]  %s17_s14, 4096, %s19_s16, [#allocation4], %s210_s20, %s210_s20, %s211_s21  }
   0x6   :  { %s32_s23 = sshll.u32 %s212_s22, 4  ;;  %s33_s23 = int_to_ptr.vmem [resolvable:$true] %s32_s23 }
   0x7   :  { %35 = dma.hbm_to_vmem [thread:$0]  %s31_s19, 16, %s33_s23, [#allocation6]  }
   0x8   :  { %205 = dma.done.wait [#allocation4], 4096  }
   0x9   :  { %206 = vsyncadd [#allocation4], 4294963200 }
   0xa   :  { %207 = dma.done.wait [#allocation6], 16  }
   0xb   :  { %208 = vsyncadd [#allocation6], 4294967280  ;;  %v84_v0 = vld [vmem:[#allocation3 + $0xf0] sm:$0xff]  ;;  %v85_v1 = vld [vmem:[#allocation3 + $0xf8] sm:$0xff]  ;;  %v213_v35 = vmov 0.0  }
   0xc   :  { %92 = vmatpush.xpose.msra.mxu0 %v84_v0  ;;  %112 = vmatpush.xpose.msra.mxu1 %v85_v1  ;;  %v82_v2 = vld [vmem:[#allocation3 + $0xe0] sm:$0xff]  ;;  %v83_v3 = vld [vmem:[#allocation3 + $0xe8] sm:$0xff]  ;;  %v80_v4 = vld [vmem:[#allocation3 + $0xd0] sm:$0xff]  ;;  %48 = vst [vmem:[#allocation2] sm:$0x3] %v213_v35 }
   0xd   :  { %v81_v5 = vld [vmem:[#allocation3 + $0xd8] sm:$0xff]  ;;  %v78_v6 = vld [vmem:[#allocation3 + $0xc0] sm:$0xff]  ;;  %v79_v7 = vld [vmem:[#allocation3 + $0xc8] sm:$0xff] }
   0xe   :  { %v76_v8 = vld [vmem:[#allocation3 + $0xb0] sm:$0xff]  ;;  %v77_v9 = vld [vmem:[#allocation3 + $0xb8] sm:$0xff]  ;;  %v74_v10 = vld [vmem:[#allocation3 + $0xa0] sm:$0xff] }
   0xf   :  { %v75_v11 = vld [vmem:[#allocation3 + $0xa8] sm:$0xff]  ;;  %v72_v12 = vld [vmem:[#allocation3 + $0x90] sm:$0xff]  ;;  %v73_v13 = vld [vmem:[#allocation3 + $0x98] sm:$0xff] }
  0x10   :  { %93 = vmatpush.xpose.msra.mxu0 %v82_v2  ;;  %113 = vmatpush.xpose.msra.mxu1 %v83_v3  ;;  %v53_v14 = vld [vmem:[%s246_s0] sm:$0xf]  ;;  %v70_v15 = vld [vmem:[#allocation3 + $0x80] sm:$0xff]  ;;  %v71_v16 = vld [vmem:[#allocation3 + $0x88] sm:$0xff] }
  0x11   :  { %87 = vst [vmem:[#allocation1] ss:$4 sm:$0xff] %v53_v14  ;;  %v68_v17 = vld [vmem:[#allocation3 + $0x70] sm:$0xff]  ;;  %v69_v18 = vld [vmem:[#allocation3 + $0x78] sm:$0xff]  ;;  %v66_v19 = vld [vmem:[#allocation3 + $0x60] sm:$0xff] }
  0x12   :  { %v67_v20 = vld [vmem:[#allocation3 + $0x68] sm:$0xff]  ;;  %v64_v21 = vld [vmem:[#allocation3 + $0x50] sm:$0xff]  ;;  %v65_v22 = vld [vmem:[#allocation3 + $0x58] sm:$0xff] }
  0x13   :  { %v62_v23 = vld [vmem:[#allocation3 + $0x40] sm:$0xff]  ;;  %v63_v24 = vld [vmem:[#allocation3 + $0x48] sm:$0xff]  ;;  %v60_v25 = vld [vmem:[#allocation3 + $0x30] sm:$0xff] }
  0x14   :  { %94 = vmatpush.xpose.msra.mxu0 %v80_v4  ;;  %114 = vmatpush.xpose.msra.mxu1 %v81_v5  ;;  %v61_v26 = vld [vmem:[#allocation3 + $0x38] sm:$0xff]  ;;  %v58_v27 = vld [vmem:[#allocation3 + $0x20] sm:$0xff]  ;;  %v59_v28 = vld [vmem:[#allocation3 + $0x28] sm:$0xff] }
  0x15   :  { %v56_v29 = vld [vmem:[#allocation3 + $0x10] sm:$0xff]  ;;  %v57_v30 = vld [vmem:[#allocation3 + $0x18] sm:$0xff]  ;;  %v54_v31 = vld [vmem:[#allocation3] sm:$0xff] }
  0x16   :  { %v55_v32 = vld [vmem:[#allocation3 + $0x8] sm:$0xff]  ;;  %v49_v37 = vld [vmem:[#allocation2] sm:$0x3]  ;;  %v156_v41 = vld [vmem:[#allocation5] ss:$0 sm:$0xff] }
  0x18   :  { %95 = vmatpush.xpose.msra.mxu0 %v78_v6  ;;  %115 = vmatpush.xpose.msra.mxu1 %v79_v7  ;;  %v88_v33 = vld.sshfl [vmem:[#allocation1] sm:$0xff pattern:$0x73625140]  ;;  %v89_v34 = vld.sshfl [vmem:[#allocation1 + $0x8] sm:$0xff pattern:$0x73625140] }
  0x1c   :  { %96 = vmatpush.xpose.msra.mxu0 %v76_v8  ;;  %116 = vmatpush.xpose.msra.mxu1 %v77_v9 }
  0x20   :  { %97 = vmatpush.xpose.msra.mxu0 %v74_v10  ;;  %117 = vmatpush.xpose.msra.mxu1 %v75_v11 }
  0x24   :  { %98 = vmatpush.xpose.msra.mxu0 %v72_v12  ;;  %118 = vmatpush.xpose.msra.mxu1 %v73_v13 }
  0x28   :  { %99 = vmatpush.xpose.msra.mxu0 %v70_v15  ;;  %119 = vmatpush.xpose.msra.mxu1 %v71_v16 }
  0x2c   :  { %100 = vmatpush.xpose.msra.mxu0 %v68_v17  ;;  %120 = vmatpush.xpose.msra.mxu1 %v69_v18 }
  0x30   :  { %101 = vmatpush.xpose.msra.mxu0 %v66_v19  ;;  %121 = vmatpush.xpose.msra.mxu1 %v67_v20 }
  0x34   :  { %102 = vmatpush.xpose.msra.mxu0 %v64_v21  ;;  %122 = vmatpush.xpose.msra.mxu1 %v65_v22 }
  0x38   :  { %103 = vmatpush.xpose.msra.mxu0 %v62_v23  ;;  %123 = vmatpush.xpose.msra.mxu1 %v63_v24 }
  0x3c   :  { %104 = vmatpush.xpose.msra.mxu0 %v60_v25  ;;  %124 = vmatpush.xpose.msra.mxu1 %v61_v26 }
  0x40   :  { %105 = vmatpush.xpose.msra.mxu0 %v58_v27  ;;  %125 = vmatpush.xpose.msra.mxu1 %v59_v28 }
  0x44   :  { %106 = vmatpush.xpose.msra.mxu0 %v56_v29  ;;  %126 = vmatpush.xpose.msra.mxu1 %v57_v30 }
  0x48   :  { %107 = vmatpush.xpose.msra.mxu0 %v54_v31  ;;  %127 = vmatpush.xpose.msra.mxu1 %v55_v32 }
  0x4b   :  { %108 = vmatmul.f32.vlgmr.msra.gmra.mxu0 %v88_v33  ;;  %128 = vmatmul.f32.vlgmr.msra.gmra.mxu1 %v89_v34 }
  0xc8   :  { %v109_v36 = vpop.f32.mrf.mxu0  ;;  %v129_v38 = vpop.f32.mrf.mxu1 }
  0xc9   :  { %v130_v39 = vadd.f32 %v129_v38, %v109_v36 }
  0xcb   :  { %v132_v40 = vadd.f32 %v130_v39, %v49_v37 }
  0xcd   :  { %133 = vst [vmem:[#allocation2] sm:$0x3] %v132_v40 }
  0xd4   :  { %v137_v42 = vld [vmem:[#allocation2] sm:$0x3] }
  0xd5   :  { %v142_v43 = vadd.f32 %v156_v41, %v137_v42 }
  0xd7   :  { %v143_v44 = vmax.f32 %v142_v43, 0.0 }
  0xd9   :  { %144 = vst [vmem:[%s249_s3] sm:$0x3] %v143_v44 }
  0xda   :  { %149 = vsyncpa [#allocation4], 1 }
  0xdb   :  { %150 = vsyncpa [#allocation6], 1 }

// kernel: cnn_regressor_forward.12
= control target key start
LH: loop header
LB: loop body
LE: loop exit
PB: predicated region body
PF: predicated region fallthrough
CT: control target
= control target key end

     0   :  { %8 = vsyncpa [#allocation4], 0  ;;  %s490_s0 = inlined_call_operand.vmem [shape: f32[1,2,512], index: 0, kind: input, shape index: {}]   ;;  %s491_s1 = inlined_call_operand.hbm [shape: f32[256,512], index: 1, kind: input, shape index: {}]   ;;  %s492_s2 = inlined_call_operand.hbm [shape: f32[1,256], index: 2, kind: input, shape index: {}]   ;;  %s493_s3 = inlined_call_operand.vmem [shape: f32[2,256], index: 3, kind: output, shape index: {}]  }
   0x1   :  { %s16_s14 = sshll.u32 %s491_s1, 4  ;;  %s17_s14 = int_to_ptr.hbm [resolvable:$true] %s16_s14 }
   0x2   :  { %9 = vsyncpa [#allocation6], 0  ;;  %s437_s15 = smov [#allocation3]   ;;  %s30_s19 = sshll.u32 %s492_s2, 4  ;;  %s31_s19 = int_to_ptr.hbm [resolvable:$true] %s30_s19 }
   0x3   :  { %s18_s16 = sshll.u32 %s437_s15, 4  ;;  %s438_s20 = smov 512   ;;  %s19_s16 = int_to_ptr.vmem [resolvable:$true] %s18_s16 }
   0x4   :  { %s439_s21 = smov 32   ;;  %s440_s22 = smov [#allocation5]  }
   0x5   :  { %24 = dma.hbm_to_vmem [thread:$0]  %s17_s14, 16384, %s19_s16, [#allocation4], %s438_s20, %s438_s20, %s439_s21  }
   0x6   :  { %s32_s23 = sshll.u32 %s440_s22, 4  ;;  %s33_s23 = int_to_ptr.vmem [resolvable:$true] %s32_s23 }
   0x7   :  { %35 = dma.hbm_to_vmem [thread:$0]  %s31_s19, 32, %s33_s23, [#allocation6]  }
   0x8   :  { %433 = dma.done.wait [#allocation4], 16384  }
   0x9   :  { %434 = vsyncadd [#allocation4], 4294950912 }
   0xa   :  { %435 = dma.done.wait [#allocation6], 32  }
   0xb   :  { %436 = vsyncadd [#allocation6], 4294967264  ;;  %v116_v0 = vld [vmem:[#allocation3 + $0x1f0] sm:$0xff]  ;;  %v117_v1 = vld [vmem:[#allocation3 + $0x1f8] sm:$0xff]  ;;  %vm355_vm0 = vcmask 1041408  }
   0xc   :  { %v114_v2 = vld [vmem:[#allocation3 + $0x1e0] sm:$0xff]  ;;  %232 = vmatpush.xpose.msra.mxu2 %v116_v0  ;;  %252 = vmatpush.xpose.msra.mxu3 %v117_v1  ;;  %v115_v3 = vld [vmem:[#allocation3 + $0x1e8] sm:$0xff]  ;;  %v112_v4 = vld [vmem:[#allocation3 + $0x1d0] sm:$0xff] }
   0xd   :  { %192 = vmatpush.xpose.msra.mxu0 %v114_v2  ;;  %212 = vmatpush.xpose.msra.mxu1 %v115_v3  ;;  %v113_v5 = vld [vmem:[#allocation3 + $0x1d8] sm:$0xff]  ;;  %v110_v6 = vld [vmem:[#allocation3 + $0x1c0] sm:$0xff]  ;;  %v111_v7 = vld [vmem:[#allocation3 + $0x1c8] sm:$0xff] }
   0xe   :  { %v108_v8 = vld [vmem:[#allocation3 + $0x1b0] sm:$0xff]  ;;  %v109_v9 = vld [vmem:[#allocation3 + $0x1b8] sm:$0xff]  ;;  %v106_v10 = vld [vmem:[#allocation3 + $0x1a0] sm:$0xff] }
   0xf   :  { %v107_v11 = vld [vmem:[#allocation3 + $0x1a8] sm:$0xff]  ;;  %v104_v12 = vld [vmem:[#allocation3 + $0x190] sm:$0xff]  ;;  %v105_v13 = vld [vmem:[#allocation3 + $0x198] sm:$0xff] }
  0x10   :  { %233 = vmatpush.xpose.msra.mxu2 %v112_v4  ;;  %253 = vmatpush.xpose.msra.mxu3 %v113_v5  ;;  %v102_v14 = vld [vmem:[#allocation3 + $0x180] sm:$0xff]  ;;  %v103_v15 = vld [vmem:[#allocation3 + $0x188] sm:$0xff]  ;;  %v100_v16 = vld [vmem:[#allocation3 + $0x170] sm:$0xff] }
  0x11   :  { %193 = vmatpush.xpose.msra.mxu0 %v110_v6  ;;  %213 = vmatpush.xpose.msra.mxu1 %v111_v7  ;;  %v101_v17 = vld [vmem:[#allocation3 + $0x178] sm:$0xff]  ;;  %v98_v18 = vld [vmem:[#allocation3 + $0x160] sm:$0xff]  ;;  %v99_v19 = vld [vmem:[#allocation3 + $0x168] sm:$0xff] }
  0x12   :  { %v96_v20 = vld [vmem:[#allocation3 + $0x150] sm:$0xff]  ;;  %v97_v21 = vld [vmem:[#allocation3 + $0x158] sm:$0xff]  ;;  %v94_v22 = vld [vmem:[#allocation3 + $0x140] sm:$0xff] }
  0x13   :  { %v95_v23 = vld [vmem:[#allocation3 + $0x148] sm:$0xff]  ;;  %v92_v24 = vld [vmem:[#allocation3 + $0x130] sm:$0xff]  ;;  %v93_v25 = vld [vmem:[#allocation3 + $0x138] sm:$0xff] }
  0x14   :  { %234 = vmatpush.xpose.msra.mxu2 %v108_v8  ;;  %254 = vmatpush.xpose.msra.mxu3 %v109_v9  ;;  %v90_v26 = vld [vmem:[#allocation3 + $0x120] sm:$0xff]  ;;  %v91_v27 = vld [vmem:[#allocation3 + $0x128] sm:$0xff]  ;;  %v88_v28 = vld [vmem:[#allocation3 + $0x110] sm:$0xff] }
  0x15   :  { %194 = vmatpush.xpose.msra.mxu0 %v106_v10  ;;  %214 = vmatpush.xpose.msra.mxu1 %v107_v11  ;;  %v89_v29 = vld [vmem:[#allocation3 + $0x118] sm:$0xff]  ;;  %v86_v30 = vld [vmem:[#allocation3 + $0x100] sm:$0xff]  ;;  %v87_v31 = vld [vmem:[#allocation3 + $0x108] sm:$0xff] }
  0x16   :  { %v84_v32 = vld [vmem:[#allocation3 + $0xf0] sm:$0xff]  ;;  %v85_v33 = vld [vmem:[#allocation3 + $0xf8] sm:$0xff]  ;;  %v82_v34 = vld [vmem:[#allocation3 + $0xe0] sm:$0xff] }
  0x17   :  { %v83_v35 = vld [vmem:[#allocation3 + $0xe8] sm:$0xff]  ;;  %v80_v36 = vld [vmem:[#allocation3 + $0xd0] sm:$0xff]  ;;  %v81_v37 = vld [vmem:[#allocation3 + $0xd8] sm:$0xff] }
  0x18   :  { %235 = vmatpush.xpose.msra.mxu2 %v104_v12  ;;  %255 = vmatpush.xpose.msra.mxu3 %v105_v13  ;;  %v78_v38 = vld [vmem:[#allocation3 + $0xc0] sm:$0xff]  ;;  %v79_v39 = vld [vmem:[#allocation3 + $0xc8] sm:$0xff]  ;;  %v76_v40 = vld [vmem:[#allocation3 + $0xb0] sm:$0xff] }
  0x19   :  { %195 = vmatpush.xpose.msra.mxu0 %v102_v14  ;;  %215 = vmatpush.xpose.msra.mxu1 %v103_v15  ;;  %v77_v41 = vld [vmem:[#allocation3 + $0xb8] sm:$0xff]  ;;  %v74_v42 = vld [vmem:[#allocation3 + $0xa0] sm:$0xff]  ;;  %v75_v43 = vld [vmem:[#allocation3 + $0xa8] sm:$0xff] }
  0x1a   :  { %v72_v44 = vld [vmem:[#allocation3 + $0x90] sm:$0xff]  ;;  %v73_v45 = vld [vmem:[#allocation3 + $0x98] sm:$0xff]  ;;  %v70_v46 = vld [vmem:[#allocation3 + $0x80] sm:$0xff] }
  0x1b   :  { %v71_v47 = vld [vmem:[#allocation3 + $0x88] sm:$0xff]  ;;  %v68_v48 = vld [vmem:[#allocation3 + $0x70] sm:$0xff]  ;;  %v69_v49 = vld [vmem:[#allocation3 + $0x78] sm:$0xff] }
  0x1c   :  { %236 = vmatpush.xpose.msra.mxu2 %v100_v16  ;;  %256 = vmatpush.xpose.msra.mxu3 %v101_v17  ;;  %v66_v50 = vld [vmem:[#allocation3 + $0x60] sm:$0xff]  ;;  %v67_v51 = vld [vmem:[#allocation3 + $0x68] sm:$0xff]  ;;  %v64_v52 = vld [vmem:[#allocation3 + $0x50] sm:$0xff] }
  0x1d   :  { %196 = vmatpush.xpose.msra.mxu0 %v98_v18  ;;  %216 = vmatpush.xpose.msra.mxu1 %v99_v19  ;;  %v65_v53 = vld [vmem:[#allocation3 + $0x58] sm:$0xff]  ;;  %v62_v54 = vld [vmem:[#allocation3 + $0x40] sm:$0xff]  ;;  %v63_v55 = vld [vmem:[#allocation3 + $0x48] sm:$0xff] }
  0x1e   :  { %v60_v56 = vld [vmem:[#allocation3 + $0x30] sm:$0xff]  ;;  %v61_v57 = vld [vmem:[#allocation3 + $0x38] sm:$0xff]  ;;  %v58_v58 = vld [vmem:[#allocation3 + $0x20] sm:$0xff] }
  0x1f   :  { %v59_v59 = vld [vmem:[#allocation3 + $0x28] sm:$0xff]  ;;  %v56_v60 = vld [vmem:[#allocation3 + $0x10] sm:$0xff]  ;;  %v57_v61 = vld [vmem:[#allocation3 + $0x18] sm:$0xff] }
  0x20   :  { %237 = vmatpush.xpose.msra.mxu2 %v96_v20  ;;  %257 = vmatpush.xpose.msra.mxu3 %v97_v21  ;;  %v180_v62 = vld [vmem:[#allocation3 + $0x3f0] sm:$0xff]  ;;  %v181_v63 = vld [vmem:[#allocation3 + $0x3f8] sm:$0xff]  ;;  %v54_v0 = vld [vmem:[#allocation3] sm:$0xff] }
  0x21   :  { %197 = vmatpush.xpose.msra.mxu0 %v94_v22  ;;  %217 = vmatpush.xpose.msra.mxu1 %v95_v23  ;;  %v55_v1 = vld [vmem:[#allocation3 + $0x8] sm:$0xff]  ;;  %v178_v2 = vld [vmem:[#allocation3 + $0x3e0] sm:$0xff]  ;;  %v176_v4 = vld [vmem:[#allocation3 + $0x3d0] sm:$0xff] }
  0x22   :  { %v179_v3 = vld [vmem:[#allocation3 + $0x3e8] sm:$0xff]  ;;  %v177_v5 = vld [vmem:[#allocation3 + $0x3d8] sm:$0xff]  ;;  %v174_v6 = vld [vmem:[#allocation3 + $0x3c0] sm:$0xff] }
  0x23   :  { %v175_v7 = vld [vmem:[#allocation3 + $0x3c8] sm:$0xff]  ;;  %v172_v8 = vld [vmem:[#allocation3 + $0x3b0] sm:$0xff]  ;;  %v173_v9 = vld [vmem:[#allocation3 + $0x3b8] sm:$0xff] }
  0x24   :  { %238 = vmatpush.xpose.msra.mxu2 %v92_v24  ;;  %258 = vmatpush.xpose.msra.mxu3 %v93_v25  ;;  %v170_v10 = vld [vmem:[#allocation3 + $0x3a0] sm:$0xff]  ;;  %v171_v11 = vld [vmem:[#allocation3 + $0x3a8] sm:$0xff]  ;;  %v168_v12 = vld [vmem:[#allocation3 + $0x390] sm:$0xff] }
  0x25   :  { %198 = vmatpush.xpose.msra.mxu0 %v90_v26  ;;  %218 = vmatpush.xpose.msra.mxu1 %v91_v27  ;;  %v169_v13 = vld [vmem:[#allocation3 + $0x398] sm:$0xff]  ;;  %v166_v14 = vld [vmem:[#allocation3 + $0x380] sm:$0xff]  ;;  %v167_v15 = vld [vmem:[#allocation3 + $0x388] sm:$0xff] }
  0x26   :  { %v164_v16 = vld [vmem:[#allocation3 + $0x370] sm:$0xff]  ;;  %v165_v17 = vld [vmem:[#allocation3 + $0x378] sm:$0xff]  ;;  %v162_v19 = vld [vmem:[#allocation3 + $0x360] sm:$0xff] }
  0x27   :  { %v53_v18 = vld [vmem:[%s490_s0] sm:$0xff]  ;;  %v163_v20 = vld [vmem:[#allocation3 + $0x368] sm:$0xff]  ;;  %v158_v23 = vld [vmem:[#allocation3 + $0x340] sm:$0xff] }
  0x28   :  { %239 = vmatpush.xpose.msra.mxu2 %v88_v28  ;;  %259 = vmatpush.xpose.msra.mxu3 %v89_v29  ;;  %183 = vst [vmem:[#allocation1] ss:$4 sm:$0xff] %v53_v18  ;;  %v160_v21 = vld [vmem:[#allocation3 + $0x350] sm:$0xff]  ;;  %v161_v22 = vld [vmem:[#allocation3 + $0x358] sm:$0xff]  ;;  %v159_v24 = vld [vmem:[#allocation3 + $0x348] sm:$0xff] }
  0x29   :  { %199 = vmatpush.xpose.msra.mxu0 %v86_v30  ;;  %219 = vmatpush.xpose.msra.mxu1 %v87_v31  ;;  %v156_v25 = vld [vmem:[#allocation3 + $0x330] sm:$0xff]  ;;  %v157_v26 = vld [vmem:[#allocation3 + $0x338] sm:$0xff]  ;;  %v154_v28 = vld [vmem:[#allocation3 + $0x320] sm:$0xff] }
  0x2a   :  { %v155_v29 = vld [vmem:[#allocation3 + $0x328] sm:$0xff]  ;;  %v152_v30 = vld [vmem:[#allocation3 + $0x310] sm:$0xff]  ;;  %v153_v31 = vld [vmem:[#allocation3 + $0x318] sm:$0xff] }
  0x2c   :  { %240 = vmatpush.xpose.msra.mxu2 %v84_v32  ;;  %260 = vmatpush.xpose.msra.mxu3 %v85_v33 }
  0x2d   :  { %200 = vmatpush.xpose.msra.mxu0 %v82_v34  ;;  %220 = vmatpush.xpose.msra.mxu1 %v83_v35  ;;  %v150_v35 = vld [vmem:[#allocation3 + $0x300] sm:$0xff] }
  0x2f   :  { %v471_v27 = vld.sshfl [vmem:[#allocation1 + $0x10] sm:$0xff pattern:$0x73625140]  ;;  %v474_v32 = vld.sshfl [vmem:[#allocation1 + $0x18] sm:$0xff pattern:$0x73625140] }
  0x30   :  { %241 = vmatpush.xpose.msra.mxu2 %v80_v36  ;;  %261 = vmatpush.xpose.msra.mxu3 %v81_v37  ;;  %v477_v33 = vld.sshfl [vmem:[#allocation1] sm:$0xff pattern:$0x73625140]  ;;  %v479_v34 = vld.sshfl [vmem:[#allocation1 + $0x8] sm:$0xff pattern:$0x73625140] }
  0x31   :  { %201 = vmatpush.xpose.msra.mxu0 %v78_v38  ;;  %221 = vmatpush.xpose.msra.mxu1 %v79_v39  ;;  %v151_v36 = vld [vmem:[#allocation3 + $0x308] sm:$0xff]  ;;  %v148_v37 = vld [vmem:[#allocation3 + $0x2f0] sm:$0xff]  ;;  %v149_v38 = vld [vmem:[#allocation3 + $0x2f8] sm:$0xff] }
  0x32   :  { %v146_v39 = vld [vmem:[#allocation3 + $0x2e0] sm:$0xff] }
  0x34   :  { %242 = vmatpush.xpose.msra.mxu2 %v76_v40  ;;  %262 = vmatpush.xpose.msra.mxu3 %v77_v41  ;;  %v147_v40 = vld [vmem:[#allocation3 + $0x2e8] sm:$0xff]  ;;  %v144_v41 = vld [vmem:[#allocation3 + $0x2d0] sm:$0xff] }
  0x35   :  { %202 = vmatpush.xpose.msra.mxu0 %v74_v42  ;;  %222 = vmatpush.xpose.msra.mxu1 %v75_v43  ;;  %v145_v42 = vld [vmem:[#allocation3 + $0x2d8] sm:$0xff]  ;;  %v142_v43 = vld [vmem:[#allocation3 + $0x2c0] sm:$0xff] }
  0x38   :  { %243 = vmatpush.xpose.msra.mxu2 %v72_v44  ;;  %263 = vmatpush.xpose.msra.mxu3 %v73_v45  ;;  %v143_v44 = vld [vmem:[#allocation3 + $0x2c8] sm:$0xff]  ;;  %v140_v45 = vld [vmem:[#allocation3 + $0x2b0] sm:$0xff] }
  0x39   :  { %203 = vmatpush.xpose.msra.mxu0 %v70_v46  ;;  %223 = vmatpush.xpose.msra.mxu1 %v71_v47  ;;  %v141_v46 = vld [vmem:[#allocation3 + $0x2b8] sm:$0xff]  ;;  %v138_v47 = vld [vmem:[#allocation3 + $0x2a0] sm:$0xff] }
  0x3c   :  { %244 = vmatpush.xpose.msra.mxu2 %v68_v48  ;;  %264 = vmatpush.xpose.msra.mxu3 %v69_v49  ;;  %v139_v48 = vld [vmem:[#allocation3 + $0x2a8] sm:$0xff]  ;;  %v136_v49 = vld [vmem:[#allocation3 + $0x290] sm:$0xff] }
  0x3d   :  { %204 = vmatpush.xpose.msra.mxu0 %v66_v50  ;;  %224 = vmatpush.xpose.msra.mxu1 %v67_v51  ;;  %v137_v50 = vld [vmem:[#allocation3 + $0x298] sm:$0xff]  ;;  %v134_v51 = vld [vmem:[#allocation3 + $0x280] sm:$0xff] }
  0x40   :  { %245 = vmatpush.xpose.msra.mxu2 %v64_v52  ;;  %265 = vmatpush.xpose.msra.mxu3 %v65_v53  ;;  %v135_v52 = vld [vmem:[#allocation3 + $0x288] sm:$0xff]  ;;  %v132_v53 = vld [vmem:[#allocation3 + $0x270] sm:$0xff] }
  0x41   :  { %205 = vmatpush.xpose.msra.mxu0 %v62_v54  ;;  %225 = vmatpush.xpose.msra.mxu1 %v63_v55  ;;  %v133_v54 = vld [vmem:[#allocation3 + $0x278] sm:$0xff]  ;;  %v130_v55 = vld [vmem:[#allocation3 + $0x260] sm:$0xff] }
  0x44   :  { %246 = vmatpush.xpose.msra.mxu2 %v60_v56  ;;  %266 = vmatpush.xpose.msra.mxu3 %v61_v57  ;;  %v131_v56 = vld [vmem:[#allocation3 + $0x268] sm:$0xff]  ;;  %v128_v57 = vld [vmem:[#allocation3 + $0x250] sm:$0xff] }
  0x45   :  { %206 = vmatpush.xpose.msra.mxu0 %v58_v58  ;;  %226 = vmatpush.xpose.msra.mxu1 %v59_v59  ;;  %v129_v58 = vld [vmem:[#allocation3 + $0x258] sm:$0xff]  ;;  %v126_v59 = vld [vmem:[#allocation3 + $0x240] sm:$0xff] }
  0x48   :  { %247 = vmatpush.xpose.msra.mxu2 %v56_v60  ;;  %267 = vmatpush.xpose.msra.mxu3 %v57_v61  ;;  %v127_v60 = vld [vmem:[#allocation3 + $0x248] sm:$0xff]  ;;  %v124_v61 = vld [vmem:[#allocation3 + $0x230] sm:$0xff] }
  0x49   :  { %207 = vmatpush.xpose.msra.mxu0 %v54_v0  ;;  %227 = vmatpush.xpose.msra.mxu1 %v55_v1  ;;  %v123_v0 = vld [vmem:[#allocation3 + $0x228] sm:$0xff]  ;;  %v120_v1 = vld [vmem:[#allocation3 + $0x210] sm:$0xff] }
  0x4b   :  { %248 = vmatmul.f32.vlgmr.msra.gmra.mxu2 %v471_v27  ;;  %268 = vmatmul.f32.vlgmr.msra.gmra.mxu3 %v474_v32 }
  0x4c   :  { %312 = vmatpush.xpose.msrb.mxu2 %v180_v62  ;;  %332 = vmatpush.xpose.msrb.mxu3 %v181_v63  ;;  %v125_v62 = vld [vmem:[#allocation3 + $0x238] sm:$0xff]  ;;  %v122_v63 = vld [vmem:[#allocation3 + $0x220] sm:$0xff] }
  0x4d   :  { %272 = vmatpush.xpose.msrb.mxu0 %v178_v2  ;;  %292 = vmatpush.xpose.msrb.mxu1 %v179_v3  ;;  %v121_v2 = vld [vmem:[#allocation3 + $0x218] sm:$0xff]  ;;  %v118_v3 = vld [vmem:[#allocation3 + $0x200] sm:$0xff] }
  0x4e   :  { %208 = vmatmul.f32.vlgmr.msra.gmra.mxu0 %v477_v33  ;;  %228 = vmatmul.f32.vlgmr.msra.gmra.mxu1 %v479_v34 }
  0x50   :  { %313 = vmatpush.xpose.msrb.mxu2 %v176_v4  ;;  %333 = vmatpush.xpose.msrb.mxu3 %v177_v5  ;;  %v119_v4 = vld [vmem:[#allocation3 + $0x208] sm:$0xff]  ;;  %v441_v5 = vmov 0.0  }
  0x51   :  { %273 = vmatpush.xpose.msrb.mxu0 %v174_v6  ;;  %293 = vmatpush.xpose.msrb.mxu1 %v175_v7  ;;  %48 = vst [vmem:[#allocation2] sm:$0xf] %v441_v5 }
  0x54   :  { %314 = vmatpush.xpose.msrb.mxu2 %v172_v8  ;;  %334 = vmatpush.xpose.msrb.mxu3 %v173_v9 }
  0x55   :  { %274 = vmatpush.xpose.msrb.mxu0 %v170_v10  ;;  %294 = vmatpush.xpose.msrb.mxu1 %v171_v11 }
  0x58   :  { %315 = vmatpush.xpose.msrb.mxu2 %v168_v12  ;;  %335 = vmatpush.xpose.msrb.mxu3 %v169_v13 }
  0x59   :  { %275 = vmatpush.xpose.msrb.mxu0 %v166_v14  ;;  %295 = vmatpush.xpose.msrb.mxu1 %v167_v15 }
  0x5c   :  { %316 = vmatpush.xpose.msrb.mxu2 %v164_v16  ;;  %336 = vmatpush.xpose.msrb.mxu3 %v165_v17 }
  0x5d   :  { %276 = vmatpush.xpose.msrb.mxu0 %v162_v19  ;;  %296 = vmatpush.xpose.msrb.mxu1 %v163_v20  ;;  %v364_v19 = vld [vmem:[#allocation5] sm:$0x3] }
  0x60   :  { %317 = vmatpush.xpose.msrb.mxu2 %v160_v21  ;;  %337 = vmatpush.xpose.msrb.mxu3 %v161_v22  ;;  %v49_v21 = vld [vmem:[#allocation2] sm:$0xf] }
  0x61   :  { %277 = vmatpush.xpose.msrb.mxu0 %v158_v23  ;;  %297 = vmatpush.xpose.msrb.mxu1 %v159_v24  ;;  %v367_v24 = vperm.slane %v364_v19, 1 }
  0x64   :  { %318 = vmatpush.xpose.msrb.mxu2 %v156_v25  ;;  %338 = vmatpush.xpose.msrb.mxu3 %v157_v26  ;;  %v366_v26 = vperm.slane %v364_v19, 0 }
  0x65   :  { %278 = vmatpush.xpose.msrb.mxu0 %v154_v28  ;;  %298 = vmatpush.xpose.msrb.mxu1 %v155_v29 }
  0x68   :  { %319 = vmatpush.xpose.msrb.mxu2 %v152_v30  ;;  %339 = vmatpush.xpose.msrb.mxu3 %v153_v31 }
  0x69   :  { %279 = vmatpush.xpose.msrb.mxu0 %v150_v35  ;;  %299 = vmatpush.xpose.msrb.mxu1 %v151_v36 }
  0x6c   :  { %320 = vmatpush.xpose.msrb.mxu2 %v148_v37  ;;  %340 = vmatpush.xpose.msrb.mxu3 %v149_v38 }
  0x6d   :  { %280 = vmatpush.xpose.msrb.mxu0 %v146_v39  ;;  %300 = vmatpush.xpose.msrb.mxu1 %v147_v40 }
  0x70   :  { %321 = vmatpush.xpose.msrb.mxu2 %v144_v41  ;;  %341 = vmatpush.xpose.msrb.mxu3 %v145_v42 }
  0x71   :  { %281 = vmatpush.xpose.msrb.mxu0 %v142_v43  ;;  %301 = vmatpush.xpose.msrb.mxu1 %v143_v44 }
  0x74   :  { %322 = vmatpush.xpose.msrb.mxu2 %v140_v45  ;;  %342 = vmatpush.xpose.msrb.mxu3 %v141_v46 }
  0x75   :  { %282 = vmatpush.xpose.msrb.mxu0 %v138_v47  ;;  %302 = vmatpush.xpose.msrb.mxu1 %v139_v48 }
  0x78   :  { %323 = vmatpush.xpose.msrb.mxu2 %v136_v49  ;;  %343 = vmatpush.xpose.msrb.mxu3 %v137_v50 }
  0x79   :  { %283 = vmatpush.xpose.msrb.mxu0 %v134_v51  ;;  %303 = vmatpush.xpose.msrb.mxu1 %v135_v52 }
  0x7c   :  { %324 = vmatpush.xpose.msrb.mxu2 %v132_v53  ;;  %344 = vmatpush.xpose.msrb.mxu3 %v133_v54 }
  0x7d   :  { %284 = vmatpush.xpose.msrb.mxu0 %v130_v55  ;;  %304 = vmatpush.xpose.msrb.mxu1 %v131_v56 }
  0x80   :  { %325 = vmatpush.xpose.msrb.mxu2 %v128_v57  ;;  %345 = vmatpush.xpose.msrb.mxu3 %v129_v58 }
  0x81   :  { %285 = vmatpush.xpose.msrb.mxu0 %v126_v59  ;;  %305 = vmatpush.xpose.msrb.mxu1 %v127_v60 }
  0x84   :  { %326 = vmatpush.xpose.msrb.mxu2 %v124_v61  ;;  %346 = vmatpush.xpose.msrb.mxu3 %v125_v62 }
  0x85   :  { %286 = vmatpush.xpose.msrb.mxu0 %v122_v63  ;;  %306 = vmatpush.xpose.msrb.mxu1 %v123_v0 }
  0x88   :  { %327 = vmatpush.xpose.msrb.mxu2 %v120_v1  ;;  %347 = vmatpush.xpose.msrb.mxu3 %v121_v2 }
  0x89   :  { %287 = vmatpush.xpose.msrb.mxu0 %v118_v3  ;;  %307 = vmatpush.xpose.msrb.mxu1 %v119_v4 }
  0x8b   :  { %328 = vmatmul.f32.vlgmr.msrb.gmra.mxu2 %v471_v27  ;;  %348 = vmatmul.f32.vlgmr.msrb.gmra.mxu3 %v474_v32  ;;  %v368_v27 = vrot.slane %v367_v24, 6 }
  0x8c   :  { %288 = vmatmul.f32.vlgmr.msrb.gmra.mxu0 %v477_v33  ;;  %308 = vmatmul.f32.vlgmr.msrb.gmra.mxu1 %v479_v34 }
  0x8d   :  { %v369_v28 = vsel %vm355_vm0, %v366_v26, %v368_v27 }
  0xcb   :  { %v209_v6 = vpop.f32.mrf.mxu0  ;;  %v229_v7 = vpop.f32.mrf.mxu1 }
  0xcc   :  { %v230_v12 = vadd.f32 %v229_v7, %v209_v6 }
  0xce   :  { %v249_v8 = vpop.f32.mrf.mxu2  ;;  %v269_v9 = vpop.f32.mrf.mxu3 }
  0xcf   :  { %v250_v16 = vadd.f32 %v249_v8, %v230_v12 }
  0xd1   :  { %v270_v20 = vadd.f32 %v269_v9, %v250_v16 }
 0x109   :  { %v289_v10 = vpop.f32.mrf.mxu0  ;;  %v309_v11 = vpop.f32.mrf.mxu1 }
 0x10a   :  { %v310_v13 = vadd.f32 %v309_v11, %v289_v10 }
 0x10e   :  { %v329_v14 = vpop.f32.mrf.mxu2  ;;  %v349_v15 = vpop.f32.mrf.mxu3 }
 0x10f   :  { %v330_v17 = vadd.f32 %v329_v14, %v310_v13 }
 0x111   :  { %v350_v18 = vadd.f32 %v349_v15, %v330_v17 }
 0x113   :  { %v354_v22 = vrot.slane %v350_v18, 6 }
 0x115   :  { %v356_v23 = vsel %vm355_vm0, %v270_v20, %v354_v22 }
 0x116   :  { %v358_v25 = vadd.f32 %v356_v23, %v49_v21 }
 0x118   :  { %359 = vst [vmem:[#allocation2] sm:$0xf] %v358_v25 }
 0x11f   :  { %v363_v29 = vld [vmem:[#allocation2] sm:$0xf] }
 0x120   :  { %v371_v30 = vadd.f32 %v369_v28, %v363_v29 }
 0x122   :  { %v372_v31 = vmax.f32 %v371_v30, 0.0 }
 0x124   :  { %373 = vst [vmem:[%s493_s3] sm:$0xf] %v372_v31 }
 0x125   :  { %378 = vsyncpa [#allocation4], 1 }
 0x126   :  { %379 = vsyncpa [#allocation6], 1 }

// kernel: cnn_regressor_forward.14
= control target key start
LH: loop header
LB: loop body
LE: loop exit
PB: predicated region body
PF: predicated region fallthrough
CT: control target
= control target key end

     0   :  { %8 = vsyncpa [#allocation4], 0  ;;  %s200_s0 = inlined_call_operand.vmem [shape: f32[1,2,128], index: 0, kind: input, shape index: {}]   ;;  %s201_s1 = inlined_call_operand.hbm [shape: f32[64,128], index: 1, kind: input, shape index: {}]   ;;  %s202_s2 = inlined_call_operand.hbm [shape: f32[1,64], index: 2, kind: input, shape index: {}]   ;;  %s203_s3 = inlined_call_operand.vmem [shape: f32[2,64], index: 3, kind: output, shape index: {}]  }
   0x1   :  { %s16_s14 = sshll.u32 %s201_s1, 4  ;;  %s17_s14 = int_to_ptr.hbm [resolvable:$true] %s16_s14 }
   0x2   :  { %9 = vsyncpa [#allocation6], 0  ;;  %s160_s15 = smov [#allocation3]   ;;  %s30_s19 = sshll.u32 %s202_s2, 4  ;;  %s31_s19 = int_to_ptr.hbm [resolvable:$true] %s30_s19 }
   0x3   :  { %s18_s16 = sshll.u32 %s160_s15, 4  ;;  %s161_s20 = smov 128   ;;  %s19_s16 = int_to_ptr.vmem [resolvable:$true] %s18_s16 }
   0x4   :  { %s162_s21 = smov 8   ;;  %s163_s22 = smov [#allocation5]  }
   0x5   :  { %24 = dma.hbm_to_vmem [thread:$0]  %s17_s14, 1024, %s19_s16, [#allocation4], %s161_s20, %s161_s20, %s162_s21  }
   0x6   :  { %s32_s23 = sshll.u32 %s163_s22, 4  ;;  %s33_s23 = int_to_ptr.vmem [resolvable:$true] %s32_s23 }
   0x7   :  { %35 = dma.hbm_to_vmem [thread:$0]  %s31_s19, 16, %s33_s23, [#allocation6]  }
   0x8   :  { %156 = dma.done.wait [#allocation4], 1024  }
   0x9   :  { %157 = vsyncadd [#allocation4], 4294966272 }
   0xa   :  { %158 = dma.done.wait [#allocation6], 16  }
   0xb   :  { %159 = vsyncadd [#allocation6], 4294967280  ;;  %v61_v0 = vld [vmem:[#allocation3 + $0x38] sm:$0xff]  ;;  %vm48_vm0 = vcmask 517120   ;;  %v164_v1 = vmov 0.0   ;;  %v60_v2 = vld [vmem:[#allocation3 + $0x30] sm:$0xff] }
   0xc   :  { %70 = vmatpush.xpose.msra.mxu0 %v61_v0  ;;  %49 = vst.msk [vmem:[#allocation2] sm:$0x3] %vm48_vm0, %v164_v1  ;;  %v59_v3 = vld [vmem:[#allocation3 + $0x28] sm:$0xff]  ;;  %v58_v4 = vld [vmem:[#allocation3 + $0x20] sm:$0xff]  ;;  %v57_v5 = vld [vmem:[#allocation3 + $0x18] sm:$0xff] }
   0xd   :  { %v56_v6 = vld [vmem:[#allocation3 + $0x10] sm:$0xff]  ;;  %v55_v7 = vld [vmem:[#allocation3 + $0x8] sm:$0xff]  ;;  %v54_v8 = vld [vmem:[#allocation3] sm:$0xff] }
   0xe   :  { %v53_v9 = vld [vmem:[%s200_s0] sm:$0x3]  ;;  %v107_v13 = vld [vmem:[#allocation5] ss:$0 sm:$0xff] }
  0x10   :  { %71 = vmatpush.xpose.msra.mxu0 %v60_v2 }
  0x13   :  { %v50_v10 = vld [vmem:[#allocation2] sm:$0x3] }
  0x14   :  { %72 = vmatpush.xpose.msra.mxu0 %v59_v3 }
  0x18   :  { %73 = vmatpush.xpose.msra.mxu0 %v58_v4 }
  0x1c   :  { %74 = vmatpush.xpose.msra.mxu0 %v57_v5 }
  0x20   :  { %75 = vmatpush.xpose.msra.mxu0 %v56_v6 }
  0x24   :  { %76 = vmatpush.xpose.msra.mxu0 %v55_v7 }
  0x28   :  { %77 = vmatpush.xpose.msra.mxu0 %v54_v8 }
  0x2b   :  { %78 = vmatmul.f32.vlgmr.msra.gmra.mxu0 %v53_v9 }
  0xa8   :  { %v79_v11 = vpop.f32.mrf.mxu0 }
  0xa9   :  { %v82_v12 = vadd.f32 %v79_v11, %v50_v10 }
  0xab   :  { %84 = vst.msk [vmem:[#allocation2] sm:$0x3] %vm48_vm0, %v82_v12 }
  0xb2   :  { %v88_v14 = vld [vmem:[#allocation2] sm:$0x3] }
  0xb3   :  { %v93_v15 = vadd.f32 %v107_v13, %v88_v14 }
  0xb5   :  { %v94_v16 = vmax.f32 %v93_v15, 0.0 }
  0xb7   :  { %95 = vst.msk [vmem:[%s203_s3] sm:$0x3] %vm48_vm0, %v94_v16 }
  0xb8   :  { %100 = vsyncpa [#allocation4], 1 }
  0xb9   :  { %101 = vsyncpa [#allocation6], 1 }

// kernel: cnn_regressor_forward.15
= control target key start
LH: loop header
LB: loop body
LE: loop exit
PB: predicated region body
PF: predicated region fallthrough
CT: control target
= control target key end

     0   :  { %s134_s0 = inlined_call_operand.vmem [shape: f32[1,2,64], index: 0, kind: input, shape index: {}]   ;;  %s135_s1 = inlined_call_operand.hbm [shape: f32[1,64], index: 1, kind: input, shape index: {}]   ;;  %s136_s2 = inlined_call_operand.<no memory space> [shape: f32[1,1], index: 2, kind: input, shape index: {}]   ;;  %s137_s3 = inlined_call_operand.vmem [shape: f32[2,1], index: 3, kind: output, shape index: {}]  }
   0x1   :  { %v8_v0 = vstv %s136_s2 }
   0x2   :  { %9 = vst [vmem:[#allocation3] sm:$0x1] %v8_v0 }
   0x3   :  { %10 = vsyncpa [#allocation5], 0  ;;  %s18_s16 = sshll.u32 %s135_s1, 4  ;;  %s97_s17 = smov [#allocation4]   ;;  %s19_s16 = int_to_ptr.hbm [resolvable:$true] %s18_s16 }
   0x4   :  { %s20_s18 = sshll.u32 %s97_s17, 4  ;;  %s21_s18 = int_to_ptr.vmem [resolvable:$true] %s20_s18 }
   0x5   :  { %23 = dma.hbm_to_vmem [thread:$0]  %s19_s16, 16, %s21_s18, [#allocation5]  }
   0x6   :  { %95 = dma.done.wait [#allocation5], 16  }
   0x7   :  { %96 = vsyncadd [#allocation5], 4294967280  ;;  %vm34_vm0 = vcmask 1024   ;;  %v98_v1 = vmov 0.0   ;;  %v39_v2 = vld [vmem:[%s134_s0] sm:$0x3] }
   0x8   :  { %35 = vst.msk [vmem:[#allocation2] sm:$0x3] %vm34_vm0, %v98_v1  ;;  %v69_v3 = vld [vmem:[#allocation4] ss:$0 sm:$0xff]  ;;  %vm45_vm1 = vcmask 517120  }
   0x9   :  { %v44_v4 = vmul.f32 %v69_v3, %v39_v2  ;;  %v70_v9 = vld [vmem:[#allocation3] ss:$0 sm:$0xff] }
   0xb   :  { %v46_v5 = vsel %vm45_vm1, %v44_v4, 0.0 }
   0xc   :  { %47 = vadd.xlane.f32.xlu0 %v46_v5 }
   0xf   :  { %v36_v6 = vld [vmem:[#allocation2] sm:$0x3] }
  0x7f   :  { %v48_v7 = vpop.xlane.xlu0 %47 }
  0x80   :  { %v49_v8 = vadd.f32 %v48_v7, %v36_v6 }
  0x82   :  { %51 = vst.msk [vmem:[#allocation2] sm:$0x3] %vm34_vm0, %v49_v8 }
  0x89   :  { %v55_v10 = vld [vmem:[#allocation2] sm:$0x3] }
  0x8a   :  { %v60_v11 = vadd.f32 %v70_v9, %v55_v10 }
  0x8c   :  { %61 = vst.msk [vmem:[%s137_s3] sm:$0x3] %vm34_vm0, %v60_v11 }
  0x8d   :  { %66 = vsyncpa [#allocation5], 1 }

// kernel: cnn_regressor_forward.11
= control target key start
LH: loop header
LB: loop body
LE: loop exit
PB: predicated region body
PF: predicated region fallthrough
CT: control target
= control target key end

     0   :  { %8 = vsyncpa [#allocation4], 0  ;;  %s3378_s0 = inlined_call_operand.vmem [shape: f32[2,2,1536], index: 0, kind: input, shape index: {}]   ;;  %s3379_s1 = inlined_call_operand.hbm [shape: f32[512,3072], index: 1, kind: input, shape index: {}]   ;;  %s3380_s2 = inlined_call_operand.hbm [shape: f32[1,512], index: 2, kind: input, shape index: {}]   ;;  %s3381_s3 = inlined_call_operand.vmem [shape: f32[2,512], index: 3, kind: output, shape index: {}]  }
   0x1   :  { %10 = vsyncpa [#allocation4 + $0x1], 0 }
   0x2   :  { %11 = vsyncpa [#allocation6], 0  ;;  %s2371_s12 = smov 0   ;;  %s2373_s13 = smov 0  }
   0x3   :  { %s2375_s14 = smov 0   ;;  %s2377_s15 = smov 0  }
   0x4   :  { %s2379_s16 = smov 0   ;;  %s2381_s17 = smov 0  }
   0x5 LB: > { %s2134_s18 = sadd.s32 4294967295, %s2344_s17   ;;  %s59_s19 = sadd.s32 1, %s2332_s14  ;;  %s2344_s17 = sphi %s2381_s17, %s17_s17   ;;  %s2340_s16 = sphi %s2379_s16, %s3391_s16   ;;  %s2336_s15 = sphi %s2377_s15, %s3390_s15   ;;  %s2332_s14 = sphi %s2375_s14, %s3389_s14   ;;  %s2328_s13 = sphi %s2373_s13, %s3388_s13   ;;  %s2324_s12 = sphi %s2371_s12, %s3387_s12  }
   0x6   : > { %p66_p0 = scmp.ne.s32.totalorder %s2332_s14, %s2328_s13  ;;  %p67_p1 = scmp.eq.s32.totalorder %s2344_s17, 0 }
   0x7   : > { %p72_p2 = scmp.ne.s32.totalorder %s2328_s13, %s2324_s12  ;;  %p2405_p3 = scmp.eq.s32.totalorder %s2134_s18, 0 }
   0x8   : > { %p2409_p4 = por %p67_p1, %p66_p0  ;;  %p2135_p5 = scmp.ge.s32.totalorder %s2344_s17, 1 }
   0x9   : > { %p2416_p6 = por %p2405_p3, %p72_p2  ;;  %p135_p7 = scmp.lt.s32.totalorder %s2344_s17, 3 }
   0xa   : > { %s152_s25 = sshll.u32 %s3380_s2, 4  ;;  %s2346_s27 = smov [#allocation5]   ;;  %s153_s25 = int_to_ptr.hbm [resolvable:$true] %s152_s25 }
   0xb   : > { %p2424_p8 = pnand %p2135_p5, %p135_p7  ;;  %s154_s28 = sshll.u32 %s2346_s27, 4  ;;  %s155_s28 = int_to_ptr.vmem [resolvable:$true] %s154_s28 }
   0xc   : > { %p2167_p10 = scmp.lt.s32.totalorder %s2344_s17, 2  ;;  %s26_s30 = sadd.s32 1, %s2340_s16 }
   0xd   : > { %p2158_p9 = pneg %p2424_p8  ;;  %p27_p13 = scmp.ge.s32.totalorder %s26_s30, 2 }
   0xe   : > { %p2435_p12 = pnand %p2167_p10, %p2409_p4  ;;  %s165_s4 = sand.u32 1, %s2332_s14  }
   0xf   : > { %p2159_p11 = pnand %p2158_p9, %p2405_p3  ;;  %s2148_s5 = smul.u32 96, %s2340_s16 }
  0x10   : > { %s3393_s30 = smov (%p27_p13, %s26_s30), 0  ;;  %s2150_s6 = smul.u32 6144, %s165_s4 }
  0x11   : > { %2161 = dma.hbm_to_vmem [thread:$0]  (!%p2159_p11), %s153_s25, 64, %s155_s28, [#allocation6]  }
  0x12   : > { %s55_s7 = ssub.s32 %s2340_s16, %s3393_s30  ;;  %s177_s10 = scalar_lea.hbm %s3379_s1, %s2148_s5 }
  0x13   : > { %p57_p0 = scmp.eq.s32.totalorder %s55_s7, 0  ;;  %s178_s11 = sshll.u32 %s177_s10, 4  ;;  %s179_s11 = int_to_ptr.hbm [resolvable:$true] %s178_s11 }
  0x14   : > { %s169_s12 = scalar_lea.vmem [#allocation3], %s2150_s6  ;;  %s166_s23 = scalar_lea.sflag [#allocation4], %s165_s4 }
  0x15   : > { %s180_s18 = sshll.u32 %s169_s12, 4  ;;  %s2347_s24 = smov 3072   ;;  %s181_s18 = int_to_ptr.vmem [resolvable:$true] %s180_s18 }
  0x16   : > { %s2452_s21 = scalar_select %p57_p0, %s2332_s14, %s59_s19  }
  0x17   : > { %s2348_s25 = smov 1536   ;;  %s2349_s27 = smov 96  }
  0x18   : > { %2165 = dma.hbm_to_vmem [thread:$0]  (!%p2435_p12), %s179_s11, 98304, %s181_s18, %s166_s23, %s2347_s24, %s2348_s25, %s2349_s27  }
  0x19   : > { %192 = sbr.rel (%p2424_p8) target bundleno = 965 (0x3c5), region = 32  ;;  %s194_s28 = sand.u32 (!%p2424_p8), 1, %s2328_s13  }
  0x1a   : > { %s2151_s5 = smul.u32 (!%p2424_p8), 6144, %s194_s28  ;;  %s195_s6 = scalar_lea.sflag (!%p2424_p8), [#allocation4], %s194_s28 }
  0x1c   : > { %s2459_s7 = scalar_lea.vmem (!%p2424_p8), [#allocation3], %s2151_s5 }
  0x1e   : > { %2315 = dma.done.wait (%p2416_p6), %s195_s6, 98304  }
  0x1f   : > { %2317 = vsyncadd (%p2416_p6), %s195_s6, 4294868992 }
  0x20   : > { %2319 = dma.done.wait (%p2405_p3), [#allocation6], 64  }
  0x21   : > { %2321 = vsyncadd (%p2405_p3), [#allocation6], 4294967232  ;;  %p2141_p1 = scmp.ne.s32.totalorder %s2336_s15, 0 }
  0x23   : > { %239 = sbr.rel (%p2141_p1) target bundleno = 42 (0x2a), region = 44 }
  0x28   : > { %v2350_v0 = vmov 0.0  }
  0x29   : > { %240 = vst [vmem:[#allocation2] sm:$0xff] %v2350_v0 }
  0x2a PF: > { %v428_v1 = vld [vmem:[%s2459_s7 + $0x5a0] sm:$0xff]  ;;  %v430_v2 = vld [vmem:[%s2459_s7 + $0x5b0] sm:$0xff]  ;;  %v429_v3 = vld [vmem:[%s2459_s7 + $0x5a8] sm:$0xff]  ;;  %s2149_s19 = smul.u32 24, %s2336_s15  ;;  %vm2014_vm0 = vcmask 1041408   ;;  %vm2016_vm1 = vcmask 1045508  }
  0x2b   : > { %1047 = vmatpush.xpose.msra.mxu0 %v428_v1  ;;  %1087 = vmatpush.xpose.msra.mxu2 %v430_v2  ;;  %v431_v4 = vld [vmem:[%s2459_s7 + $0x5b8] sm:$0xff]  ;;  %v416_v5 = vld [vmem:[%s2459_s7 + $0x540] sm:$0xff]  ;;  %v418_v6 = vld [vmem:[%s2459_s7 + $0x550] sm:$0xff]  ;;  %vm2018_vm2 = vcmask 1043456   ;;  %p2143_p2 = scmp.ne.s32.totalorder %s2336_s15, 1 }
  0x2c   : > { %1067 = vmatpush.xpose.msra.mxu1 %v429_v3  ;;  %1107 = vmatpush.xpose.msra.mxu3 %v431_v4  ;;  %v417_v7 = vld [vmem:[%s2459_s7 + $0x548] sm:$0xff]  ;;  %v419_v8 = vld [vmem:[%s2459_s7 + $0x558] sm:$0xff]  ;;  %v404_v9 = vld [vmem:[%s2459_s7 + $0x4e0] sm:$0xff]  ;;  %s2558_s26 = scalar_lea.vmem %s3378_s0, %s2149_s19 }
  0x2d   : > { %v406_v10 = vld [vmem:[%s2459_s7 + $0x4f0] sm:$0xff]  ;;  %v405_v11 = vld [vmem:[%s2459_s7 + $0x4e8] sm:$0xff]  ;;  %v407_v12 = vld [vmem:[%s2459_s7 + $0x4f8] sm:$0xff] }
  0x2e   : > { %v392_v13 = vld [vmem:[%s2459_s7 + $0x480] sm:$0xff]  ;;  %v394_v14 = vld [vmem:[%s2459_s7 + $0x490] sm:$0xff]  ;;  %v393_v15 = vld [vmem:[%s2459_s7 + $0x488] sm:$0xff] }
  0x2f   : > { %1048 = vmatpush.xpose.msra.mxu0 %v416_v5  ;;  %1088 = vmatpush.xpose.msra.mxu2 %v418_v6  ;;  %v395_v16 = vld [vmem:[%s2459_s7 + $0x498] sm:$0xff]  ;;  %v380_v17 = vld [vmem:[%s2459_s7 + $0x420] sm:$0xff]  ;;  %v382_v18 = vld [vmem:[%s2459_s7 + $0x430] sm:$0xff] }
  0x30   : > { %1068 = vmatpush.xpose.msra.mxu1 %v417_v7  ;;  %1108 = vmatpush.xpose.msra.mxu3 %v419_v8  ;;  %v381_v19 = vld [vmem:[%s2459_s7 + $0x428] sm:$0xff]  ;;  %v383_v20 = vld [vmem:[%s2459_s7 + $0x438] sm:$0xff]  ;;  %v368_v21 = vld [vmem:[%s2459_s7 + $0x3c0] sm:$0xff] }
  0x31   : > { %v370_v22 = vld [vmem:[%s2459_s7 + $0x3d0] sm:$0xff]  ;;  %v369_v23 = vld [vmem:[%s2459_s7 + $0x3c8] sm:$0xff]  ;;  %v371_v24 = vld [vmem:[%s2459_s7 + $0x3d8] sm:$0xff] }
  0x32   : > { %v356_v25 = vld [vmem:[%s2459_s7 + $0x360] sm:$0xff]  ;;  %v358_v26 = vld [vmem:[%s2459_s7 + $0x370] sm:$0xff]  ;;  %v357_v27 = vld [vmem:[%s2459_s7 + $0x368] sm:$0xff] }
  0x33   : > { %1049 = vmatpush.xpose.msra.mxu0 %v404_v9  ;;  %1089 = vmatpush.xpose.msra.mxu2 %v406_v10  ;;  %v359_v28 = vld [vmem:[%s2459_s7 + $0x378] sm:$0xff]  ;;  %v344_v29 = vld [vmem:[%s2459_s7 + $0x300] sm:$0xff]  ;;  %v346_v30 = vld [vmem:[%s2459_s7 + $0x310] sm:$0xff] }
  0x34   : > { %1069 = vmatpush.xpose.msra.mxu1 %v405_v11  ;;  %1109 = vmatpush.xpose.msra.mxu3 %v407_v12  ;;  %v345_v31 = vld [vmem:[%s2459_s7 + $0x308] sm:$0xff]  ;;  %v347_v32 = vld [vmem:[%s2459_s7 + $0x318] sm:$0xff]  ;;  %v332_v33 = vld [vmem:[%s2459_s7 + $0x2a0] sm:$0xff] }
  0x35   : > { %v334_v34 = vld [vmem:[%s2459_s7 + $0x2b0] sm:$0xff]  ;;  %v333_v35 = vld [vmem:[%s2459_s7 + $0x2a8] sm:$0xff]  ;;  %v335_v36 = vld [vmem:[%s2459_s7 + $0x2b8] sm:$0xff] }
  0x36   : > { %v320_v37 = vld [vmem:[%s2459_s7 + $0x240] sm:$0xff]  ;;  %v322_v38 = vld [vmem:[%s2459_s7 + $0x250] sm:$0xff]  ;;  %v321_v39 = vld [vmem:[%s2459_s7 + $0x248] sm:$0xff] }
  0x37   : > { %1050 = vmatpush.xpose.msra.mxu0 %v392_v13  ;;  %1090 = vmatpush.xpose.msra.mxu2 %v394_v14  ;;  %v323_v40 = vld [vmem:[%s2459_s7 + $0x258] sm:$0xff]  ;;  %v308_v41 = vld [vmem:[%s2459_s7 + $0x1e0] sm:$0xff]  ;;  %v310_v42 = vld [vmem:[%s2459_s7 + $0x1f0] sm:$0xff] }
  0x38   : > { %1070 = vmatpush.xpose.msra.mxu1 %v393_v15  ;;  %1110 = vmatpush.xpose.msra.mxu3 %v395_v16  ;;  %v309_v43 = vld [vmem:[%s2459_s7 + $0x1e8] sm:$0xff]  ;;  %v311_v44 = vld [vmem:[%s2459_s7 + $0x1f8] sm:$0xff]  ;;  %v296_v45 = vld [vmem:[%s2459_s7 + $0x180] sm:$0xff] }
  0x39   : > { %v298_v46 = vld [vmem:[%s2459_s7 + $0x190] sm:$0xff]  ;;  %v297_v47 = vld [vmem:[%s2459_s7 + $0x188] sm:$0xff]  ;;  %v299_v48 = vld [vmem:[%s2459_s7 + $0x198] sm:$0xff] }
  0x3a   : > { %v284_v49 = vld [vmem:[%s2459_s7 + $0x120] sm:$0xff]  ;;  %v286_v50 = vld [vmem:[%s2459_s7 + $0x130] sm:$0xff]  ;;  %v285_v51 = vld [vmem:[%s2459_s7 + $0x128] sm:$0xff] }
  0x3b   : > { %1051 = vmatpush.xpose.msra.mxu0 %v380_v17  ;;  %1091 = vmatpush.xpose.msra.mxu2 %v382_v18  ;;  %v287_v52 = vld [vmem:[%s2459_s7 + $0x138] sm:$0xff]  ;;  %v272_v53 = vld [vmem:[%s2459_s7 + $0xc0] sm:$0xff]  ;;  %v274_v54 = vld [vmem:[%s2459_s7 + $0xd0] sm:$0xff] }
  0x3c   : > { %1071 = vmatpush.xpose.msra.mxu1 %v381_v19  ;;  %1111 = vmatpush.xpose.msra.mxu3 %v383_v20  ;;  %v273_v55 = vld [vmem:[%s2459_s7 + $0xc8] sm:$0xff]  ;;  %v275_v56 = vld [vmem:[%s2459_s7 + $0xd8] sm:$0xff]  ;;  %v260_v57 = vld [vmem:[%s2459_s7 + $0x60] sm:$0xff] }
  0x3d   : > { %v262_v58 = vld [vmem:[%s2459_s7 + $0x70] sm:$0xff]  ;;  %v261_v59 = vld [vmem:[%s2459_s7 + $0x68] sm:$0xff]  ;;  %v263_v60 = vld [vmem:[%s2459_s7 + $0x78] sm:$0xff] }
  0x3e   : > { %v248_v61 = vld [vmem:[%s2459_s7] sm:$0xff]  ;;  %v250_v62 = vld [vmem:[%s2459_s7 + $0x10] sm:$0xff]  ;;  %v249_v1 = vld [vmem:[%s2459_s7 + $0x8] sm:$0xff] }
  0x3f   : > { %1052 = vmatpush.xpose.msra.mxu0 %v368_v21  ;;  %1092 = vmatpush.xpose.msra.mxu2 %v370_v22  ;;  %v432_v63 = vld [vmem:[%s2459_s7 + $0x5c0] sm:$0xff]  ;;  %v434_v0 = vld [vmem:[%s2459_s7 + $0x5d0] sm:$0xff]  ;;  %v251_v2 = vld [vmem:[%s2459_s7 + $0x18] sm:$0xff] }
  0x40   : > { %1072 = vmatpush.xpose.msra.mxu1 %v369_v23  ;;  %1112 = vmatpush.xpose.msra.mxu3 %v371_v24  ;;  %v433_v3 = vld [vmem:[%s2459_s7 + $0x5c8] sm:$0xff]  ;;  %v435_v4 = vld [vmem:[%s2459_s7 + $0x5d8] sm:$0xff]  ;;  %v420_v5 = vld [vmem:[%s2459_s7 + $0x560] sm:$0xff] }
  0x41   : > { %v422_v6 = vld [vmem:[%s2459_s7 + $0x570] sm:$0xff]  ;;  %v421_v7 = vld [vmem:[%s2459_s7 + $0x568] sm:$0xff]  ;;  %v423_v8 = vld [vmem:[%s2459_s7 + $0x578] sm:$0xff] }
  0x42   : > { %v408_v9 = vld [vmem:[%s2459_s7 + $0x500] sm:$0xff]  ;;  %v410_v10 = vld [vmem:[%s2459_s7 + $0x510] sm:$0xff]  ;;  %v409_v11 = vld [vmem:[%s2459_s7 + $0x508] sm:$0xff] }
  0x43   : > { %1053 = vmatpush.xpose.msra.mxu0 %v356_v25  ;;  %1093 = vmatpush.xpose.msra.mxu2 %v358_v26  ;;  %v411_v12 = vld [vmem:[%s2459_s7 + $0x518] sm:$0xff]  ;;  %v396_v13 = vld [vmem:[%s2459_s7 + $0x4a0] sm:$0xff]  ;;  %v398_v14 = vld [vmem:[%s2459_s7 + $0x4b0] sm:$0xff] }
  0x44   : > { %1073 = vmatpush.xpose.msra.mxu1 %v357_v27  ;;  %1113 = vmatpush.xpose.msra.mxu3 %v359_v28  ;;  %v397_v15 = vld [vmem:[%s2459_s7 + $0x4a8] sm:$0xff]  ;;  %v399_v16 = vld [vmem:[%s2459_s7 + $0x4b8] sm:$0xff]  ;;  %v384_v17 = vld [vmem:[%s2459_s7 + $0x440] sm:$0xff] }
  0x45   : > { %v386_v18 = vld [vmem:[%s2459_s7 + $0x450] sm:$0xff]  ;;  %v385_v19 = vld [vmem:[%s2459_s7 + $0x448] sm:$0xff]  ;;  %v387_v20 = vld [vmem:[%s2459_s7 + $0x458] sm:$0xff] }
  0x46   : > { %v372_v21 = vld [vmem:[%s2459_s7 + $0x3e0] sm:$0xff]  ;;  %v374_v22 = vld [vmem:[%s2459_s7 + $0x3f0] sm:$0xff]  ;;  %v373_v24 = vld [vmem:[%s2459_s7 + $0x3e8] sm:$0xff] }
  0x47   : > { %1054 = vmatpush.xpose.msra.mxu0 %v344_v29  ;;  %1094 = vmatpush.xpose.msra.mxu2 %v346_v30  ;;  %v245_v23 = vld [vmem:[%s2558_s26] sm:$0xff]  ;;  %v375_v25 = vld [vmem:[%s2459_s7 + $0x3f8] sm:$0xff]  ;;  %v360_v26 = vld [vmem:[%s2459_s7 + $0x380] sm:$0xff] }
  0x48   : > { %1074 = vmatpush.xpose.msra.mxu1 %v345_v31  ;;  %1114 = vmatpush.xpose.msra.mxu3 %v347_v32  ;;  %1019 = vst [vmem:[#allocation1] ss:$4 sm:$0xff] %v245_v23  ;;  %v362_v27 = vld [vmem:[%s2459_s7 + $0x390] sm:$0xff]  ;;  %v361_v28 = vld [vmem:[%s2459_s7 + $0x388] sm:$0xff]  ;;  %v363_v29 = vld [vmem:[%s2459_s7 + $0x398] sm:$0xff] }
  0x49   : > { %v348_v30 = vld [vmem:[%s2459_s7 + $0x320] sm:$0xff]  ;;  %v350_v31 = vld [vmem:[%s2459_s7 + $0x330] sm:$0xff]  ;;  %v415_v23 = vld [vmem:[%s2459_s7 + $0x538] sm:$0xff] }
  0x4b   : > { %1055 = vmatpush.xpose.msra.mxu0 %v332_v33  ;;  %1095 = vmatpush.xpose.msra.mxu2 %v334_v34  ;;  %v246_v33 = vld [vmem:[%s2558_s26 + $0x8] sm:$0xff]  ;;  %v349_v34 = vld [vmem:[%s2459_s7 + $0x328] sm:$0xff] }
  0x4c   : > { %1075 = vmatpush.xpose.msra.mxu1 %v333_v35  ;;  %1115 = vmatpush.xpose.msra.mxu3 %v335_v36  ;;  %v351_v35 = vld [vmem:[%s2459_s7 + $0x338] sm:$0xff]  ;;  %1021 = vst [vmem:[#allocation1 + $0x20] ss:$4 sm:$0xff] %v246_v33  ;;  %v376_v33 = vld [vmem:[%s2459_s7 + $0x400] sm:$0xff] }
  0x4f   : > { %1056 = vmatpush.xpose.msra.mxu0 %v320_v37  ;;  %1096 = vmatpush.xpose.msra.mxu2 %v322_v38  ;;  %v2571_v32 = vld.sshfl [vmem:[#allocation1 + $0x10] sm:$0xff pattern:$0x73625140]  ;;  %v2577_v36 = vld.sshfl [vmem:[#allocation1] sm:$0xff pattern:$0x73625140] }
  0x50   : > { %1076 = vmatpush.xpose.msra.mxu1 %v321_v39  ;;  %1116 = vmatpush.xpose.msra.mxu3 %v323_v40  ;;  %v2579_v37 = vld.sshfl [vmem:[#allocation1 + $0x18] sm:$0xff pattern:$0x73625140]  ;;  %v336_v38 = vld [vmem:[%s2459_s7 + $0x2c0] sm:$0xff]  ;;  %v338_v39 = vld [vmem:[%s2459_s7 + $0x2d0] sm:$0xff] }
  0x51   : > { %v247_v40 = vld [vmem:[%s2558_s26 + $0x10] sm:$0xff] }
  0x53   : > { %1057 = vmatpush.xpose.msra.mxu0 %v308_v41  ;;  %1097 = vmatpush.xpose.msra.mxu2 %v310_v42  ;;  %v2586_v41 = vld.sshfl [vmem:[#allocation1 + $0x8] sm:$0xff pattern:$0x73625140]  ;;  %v337_v42 = vld [vmem:[%s2459_s7 + $0x2c8] sm:$0xff] }
  0x54   : > { %1077 = vmatpush.xpose.msra.mxu1 %v309_v43  ;;  %1117 = vmatpush.xpose.msra.mxu3 %v311_v44  ;;  %v339_v43 = vld [vmem:[%s2459_s7 + $0x2d8] sm:$0xff]  ;;  %1030 = vst [vmem:[#allocation1] ss:$4 sm:$0xff] %v247_v40  ;;  %v324_v44 = vld [vmem:[%s2459_s7 + $0x260] sm:$0xff]  ;;  %v366_v40 = vld [vmem:[%s2459_s7 + $0x3b0] sm:$0xff] }
  0x57   : > { %1058 = vmatpush.xpose.msra.mxu0 %v296_v45  ;;  %1098 = vmatpush.xpose.msra.mxu2 %v298_v46  ;;  %v326_v45 = vld [vmem:[%s2459_s7 + $0x270] sm:$0xff]  ;;  %v325_v46 = vld [vmem:[%s2459_s7 + $0x268] sm:$0xff] }
  0x58   : > { %1078 = vmatpush.xpose.msra.mxu1 %v297_v47  ;;  %1118 = vmatpush.xpose.msra.mxu3 %v299_v48  ;;  %v327_v47 = vld [vmem:[%s2459_s7 + $0x278] sm:$0xff]  ;;  %v312_v48 = vld [vmem:[%s2459_s7 + $0x200] sm:$0xff] }
  0x5b   : > { %1059 = vmatpush.xpose.msra.mxu0 %v284_v49  ;;  %1099 = vmatpush.xpose.msra.mxu2 %v286_v50  ;;  %v314_v49 = vld [vmem:[%s2459_s7 + $0x210] sm:$0xff]  ;;  %v313_v50 = vld [vmem:[%s2459_s7 + $0x208] sm:$0xff] }
  0x5c   : > { %1079 = vmatpush.xpose.msra.mxu1 %v285_v51  ;;  %1119 = vmatpush.xpose.msra.mxu3 %v287_v52  ;;  %v315_v51 = vld [vmem:[%s2459_s7 + $0x218] sm:$0xff]  ;;  %v300_v52 = vld [vmem:[%s2459_s7 + $0x1a0] sm:$0xff] }
  0x5f   : > { %1060 = vmatpush.xpose.msra.mxu0 %v272_v53  ;;  %1100 = vmatpush.xpose.msra.mxu2 %v274_v54  ;;  %v302_v53 = vld [vmem:[%s2459_s7 + $0x1b0] sm:$0xff]  ;;  %v301_v54 = vld [vmem:[%s2459_s7 + $0x1a8] sm:$0xff] }
  0x60   : > { %1080 = vmatpush.xpose.msra.mxu1 %v273_v55  ;;  %1120 = vmatpush.xpose.msra.mxu3 %v275_v56  ;;  %v303_v55 = vld [vmem:[%s2459_s7 + $0x1b8] sm:$0xff]  ;;  %v288_v56 = vld [vmem:[%s2459_s7 + $0x140] sm:$0xff] }
  0x63   : > { %1061 = vmatpush.xpose.msra.mxu0 %v260_v57  ;;  %1101 = vmatpush.xpose.msra.mxu2 %v262_v58  ;;  %v290_v57 = vld [vmem:[%s2459_s7 + $0x150] sm:$0xff]  ;;  %v289_v58 = vld [vmem:[%s2459_s7 + $0x148] sm:$0xff] }
  0x64   : > { %1081 = vmatpush.xpose.msra.mxu1 %v261_v59  ;;  %1121 = vmatpush.xpose.msra.mxu3 %v263_v60  ;;  %v291_v59 = vld [vmem:[%s2459_s7 + $0x158] sm:$0xff]  ;;  %v276_v60 = vld [vmem:[%s2459_s7 + $0xe0] sm:$0xff] }
  0x67   : > { %1062 = vmatpush.xpose.msra.mxu0 %v248_v61  ;;  %1102 = vmatpush.xpose.msra.mxu2 %v250_v62  ;;  %v278_v61 = vld [vmem:[%s2459_s7 + $0xf0] sm:$0xff]  ;;  %v277_v62 = vld [vmem:[%s2459_s7 + $0xe8] sm:$0xff] }
  0x68   : > { %1082 = vmatpush.xpose.msra.mxu1 %v249_v1  ;;  %1122 = vmatpush.xpose.msra.mxu3 %v251_v2  ;;  %v266_v1 = vld [vmem:[%s2459_s7 + $0x90] sm:$0xff]  ;;  %v265_v2 = vld [vmem:[%s2459_s7 + $0x88] sm:$0xff] }
  0x6a   : > { %1103 = vmatmul.f32.vlgmr.msra.gmra.mxu2 %v2571_v32  ;;  %1063 = vmatmul.f32.vlgmr.msra.gmra.mxu0 %v2577_v36 }
  0x6b   : > { %1127 = vmatpush.xpose.msrb.mxu0 %v432_v63  ;;  %1167 = vmatpush.xpose.msrb.mxu2 %v434_v0  ;;  %v279_v63 = vld [vmem:[%s2459_s7 + $0xf8] sm:$0xff]  ;;  %v264_v0 = vld [vmem:[%s2459_s7 + $0x80] sm:$0xff] }
  0x6c   : > { %1147 = vmatpush.xpose.msrb.mxu1 %v433_v3  ;;  %1187 = vmatpush.xpose.msrb.mxu3 %v435_v4  ;;  %v267_v3 = vld [vmem:[%s2459_s7 + $0x98] sm:$0xff]  ;;  %v252_v4 = vld [vmem:[%s2459_s7 + $0x20] sm:$0xff] }
  0x6d   : > { %1123 = vmatmul.f32.vlgmr.msra.gmra.mxu3 %v2579_v37  ;;  %1083 = vmatmul.f32.vlgmr.msra.gmra.mxu1 %v2586_v41 }
  0x6f   : > { %1128 = vmatpush.xpose.msrb.mxu0 %v420_v5  ;;  %1168 = vmatpush.xpose.msrb.mxu2 %v422_v6  ;;  %v254_v5 = vld [vmem:[%s2459_s7 + $0x30] sm:$0xff]  ;;  %v436_v6 = vld [vmem:[%s2459_s7 + $0x5e0] sm:$0xff] }
  0x70   : > { %1148 = vmatpush.xpose.msrb.mxu1 %v421_v7  ;;  %1188 = vmatpush.xpose.msrb.mxu3 %v423_v8  ;;  %v438_v7 = vld [vmem:[%s2459_s7 + $0x5f0] sm:$0xff]  ;;  %v253_v8 = vld [vmem:[%s2459_s7 + $0x28] sm:$0xff] }
  0x73   : > { %1129 = vmatpush.xpose.msrb.mxu0 %v408_v9  ;;  %1169 = vmatpush.xpose.msrb.mxu2 %v410_v10  ;;  %v255_v9 = vld [vmem:[%s2459_s7 + $0x38] sm:$0xff]  ;;  %v437_v10 = vld [vmem:[%s2459_s7 + $0x5e8] sm:$0xff] }
  0x74   : > { %1149 = vmatpush.xpose.msrb.mxu1 %v409_v11  ;;  %1189 = vmatpush.xpose.msrb.mxu3 %v411_v12  ;;  %v439_v11 = vld [vmem:[%s2459_s7 + $0x5f8] sm:$0xff]  ;;  %v2623_v12 = vld.sshfl [vmem:[#allocation1 + $0x30] sm:$0xff pattern:$0x73625140] }
  0x77   : > { %1130 = vmatpush.xpose.msrb.mxu0 %v396_v13  ;;  %1170 = vmatpush.xpose.msrb.mxu2 %v398_v14  ;;  %v2625_v13 = vld.sshfl [vmem:[#allocation1 + $0x20] sm:$0xff pattern:$0x73625140]  ;;  %v424_v14 = vld [vmem:[%s2459_s7 + $0x580] sm:$0xff] }
  0x78   : > { %1150 = vmatpush.xpose.msrb.mxu1 %v397_v15  ;;  %1190 = vmatpush.xpose.msrb.mxu3 %v399_v16  ;;  %v426_v15 = vld [vmem:[%s2459_s7 + $0x590] sm:$0xff]  ;;  %v2629_v16 = vld.sshfl [vmem:[#allocation1 + $0x38] sm:$0xff pattern:$0x73625140] }
  0x7b   : > { %1131 = vmatpush.xpose.msrb.mxu0 %v384_v17  ;;  %1171 = vmatpush.xpose.msrb.mxu2 %v386_v18  ;;  %v2631_v17 = vld.sshfl [vmem:[#allocation1 + $0x28] sm:$0xff pattern:$0x73625140]  ;;  %v425_v18 = vld [vmem:[%s2459_s7 + $0x588] sm:$0xff] }
  0x7c   : > { %1151 = vmatpush.xpose.msrb.mxu1 %v385_v19  ;;  %1191 = vmatpush.xpose.msrb.mxu3 %v387_v20  ;;  %v427_v19 = vld [vmem:[%s2459_s7 + $0x598] sm:$0xff]  ;;  %v412_v20 = vld [vmem:[%s2459_s7 + $0x520] sm:$0xff] }
  0x7f   : > { %1132 = vmatpush.xpose.msrb.mxu0 %v372_v21  ;;  %1172 = vmatpush.xpose.msrb.mxu2 %v374_v22  ;;  %v414_v21 = vld [vmem:[%s2459_s7 + $0x530] sm:$0xff]  ;;  %v413_v22 = vld [vmem:[%s2459_s7 + $0x528] sm:$0xff] }
  0x80   : > { %1152 = vmatpush.xpose.msrb.mxu1 %v373_v24  ;;  %1192 = vmatpush.xpose.msrb.mxu3 %v375_v25  ;;  %v400_v24 = vld [vmem:[%s2459_s7 + $0x4c0] sm:$0xff]  ;;  %v402_v25 = vld [vmem:[%s2459_s7 + $0x4d0] sm:$0xff] }
  0x83   : > { %1133 = vmatpush.xpose.msrb.mxu0 %v360_v26  ;;  %1173 = vmatpush.xpose.msrb.mxu2 %v362_v27  ;;  %v401_v26 = vld [vmem:[%s2459_s7 + $0x4c8] sm:$0xff]  ;;  %v403_v27 = vld [vmem:[%s2459_s7 + $0x4d8] sm:$0xff] }
  0x84   : > { %1153 = vmatpush.xpose.msrb.mxu1 %v361_v28  ;;  %1193 = vmatpush.xpose.msrb.mxu3 %v363_v29  ;;  %v388_v28 = vld [vmem:[%s2459_s7 + $0x460] sm:$0xff]  ;;  %v390_v29 = vld [vmem:[%s2459_s7 + $0x470] sm:$0xff] }
  0x87   : > { %1134 = vmatpush.xpose.msrb.mxu0 %v348_v30  ;;  %1174 = vmatpush.xpose.msrb.mxu2 %v350_v31  ;;  %v389_v30 = vld [vmem:[%s2459_s7 + $0x468] sm:$0xff]  ;;  %v391_v31 = vld [vmem:[%s2459_s7 + $0x478] sm:$0xff] }
  0x88   : > { %1154 = vmatpush.xpose.msrb.mxu1 %v349_v34  ;;  %1194 = vmatpush.xpose.msrb.mxu3 %v351_v35  ;;  %v378_v34 = vld [vmem:[%s2459_s7 + $0x410] sm:$0xff]  ;;  %v377_v35 = vld [vmem:[%s2459_s7 + $0x408] sm:$0xff] }
  0x8b   : > { %1135 = vmatpush.xpose.msrb.mxu0 %v336_v38  ;;  %1175 = vmatpush.xpose.msrb.mxu2 %v338_v39  ;;  %v379_v38 = vld [vmem:[%s2459_s7 + $0x418] sm:$0xff]  ;;  %v364_v39 = vld [vmem:[%s2459_s7 + $0x3a0] sm:$0xff] }
  0x8c   : > { %1155 = vmatpush.xpose.msrb.mxu1 %v337_v42  ;;  %1195 = vmatpush.xpose.msrb.mxu3 %v339_v43  ;;  %v365_v42 = vld [vmem:[%s2459_s7 + $0x3a8] sm:$0xff]  ;;  %v367_v43 = vld [vmem:[%s2459_s7 + $0x3b8] sm:$0xff] }
  0x8f   : > { %1136 = vmatpush.xpose.msrb.mxu0 %v324_v44  ;;  %1176 = vmatpush.xpose.msrb.mxu2 %v326_v45  ;;  %v352_v44 = vld [vmem:[%s2459_s7 + $0x340] sm:$0xff]  ;;  %v354_v45 = vld [vmem:[%s2459_s7 + $0x350] sm:$0xff] }
  0x90   : > { %1156 = vmatpush.xpose.msrb.mxu1 %v325_v46  ;;  %1196 = vmatpush.xpose.msrb.mxu3 %v327_v47  ;;  %v353_v46 = vld [vmem:[%s2459_s7 + $0x348] sm:$0xff]  ;;  %v355_v47 = vld [vmem:[%s2459_s7 + $0x358] sm:$0xff] }
  0x93   : > { %1137 = vmatpush.xpose.msrb.mxu0 %v312_v48  ;;  %1177 = vmatpush.xpose.msrb.mxu2 %v314_v49  ;;  %v340_v48 = vld [vmem:[%s2459_s7 + $0x2e0] sm:$0xff]  ;;  %v342_v49 = vld [vmem:[%s2459_s7 + $0x2f0] sm:$0xff] }
  0x94   : > { %1157 = vmatpush.xpose.msrb.mxu1 %v313_v50  ;;  %1197 = vmatpush.xpose.msrb.mxu3 %v315_v51  ;;  %v341_v50 = vld [vmem:[%s2459_s7 + $0x2e8] sm:$0xff]  ;;  %v343_v51 = vld [vmem:[%s2459_s7 + $0x2f8] sm:$0xff] }
  0x97   : > { %1138 = vmatpush.xpose.msrb.mxu0 %v300_v52  ;;  %1178 = vmatpush.xpose.msrb.mxu2 %v302_v53  ;;  %v328_v52 = vld [vmem:[%s2459_s7 + $0x280] sm:$0xff]  ;;  %v330_v53 = vld [vmem:[%s2459_s7 + $0x290] sm:$0xff] }
  0x98   : > { %1158 = vmatpush.xpose.msrb.mxu1 %v301_v54  ;;  %1198 = vmatpush.xpose.msrb.mxu3 %v303_v55  ;;  %v329_v54 = vld [vmem:[%s2459_s7 + $0x288] sm:$0xff]  ;;  %v331_v55 = vld [vmem:[%s2459_s7 + $0x298] sm:$0xff] }
  0x9b   : > { %1139 = vmatpush.xpose.msrb.mxu0 %v288_v56  ;;  %1179 = vmatpush.xpose.msrb.mxu2 %v290_v57  ;;  %v316_v56 = vld [vmem:[%s2459_s7 + $0x220] sm:$0xff]  ;;  %v318_v57 = vld [vmem:[%s2459_s7 + $0x230] sm:$0xff] }
  0x9c   : > { %1159 = vmatpush.xpose.msrb.mxu1 %v289_v58  ;;  %1199 = vmatpush.xpose.msrb.mxu3 %v291_v59  ;;  %v317_v58 = vld [vmem:[%s2459_s7 + $0x228] sm:$0xff]  ;;  %v319_v59 = vld [vmem:[%s2459_s7 + $0x238] sm:$0xff] }
  0x9f   : > { %1140 = vmatpush.xpose.msrb.mxu0 %v276_v60  ;;  %1180 = vmatpush.xpose.msrb.mxu2 %v278_v61  ;;  %v304_v60 = vld [vmem:[%s2459_s7 + $0x1c0] sm:$0xff]  ;;  %v306_v61 = vld [vmem:[%s2459_s7 + $0x1d0] sm:$0xff] }
  0xa0   : > { %1160 = vmatpush.xpose.msrb.mxu1 %v277_v62  ;;  %1200 = vmatpush.xpose.msrb.mxu3 %v279_v63  ;;  %v305_v62 = vld [vmem:[%s2459_s7 + $0x1c8] sm:$0xff]  ;;  %v307_v63 = vld [vmem:[%s2459_s7 + $0x1d8] sm:$0xff] }
  0xa3   : > { %1141 = vmatpush.xpose.msrb.mxu0 %v264_v0  ;;  %1181 = vmatpush.xpose.msrb.mxu2 %v266_v1  ;;  %v292_v0 = vld [vmem:[%s2459_s7 + $0x160] sm:$0xff]  ;;  %v294_v1 = vld [vmem:[%s2459_s7 + $0x170] sm:$0xff] }
  0xa4   : > { %1161 = vmatpush.xpose.msrb.mxu1 %v265_v2  ;;  %1201 = vmatpush.xpose.msrb.mxu3 %v267_v3  ;;  %v293_v2 = vld [vmem:[%s2459_s7 + $0x168] sm:$0xff]  ;;  %v295_v3 = vld [vmem:[%s2459_s7 + $0x178] sm:$0xff] }
  0xa7   : > { %1142 = vmatpush.xpose.msrb.mxu0 %v252_v4  ;;  %1182 = vmatpush.xpose.msrb.mxu2 %v254_v5  ;;  %v280_v4 = vld [vmem:[%s2459_s7 + $0x100] sm:$0xff]  ;;  %v282_v5 = vld [vmem:[%s2459_s7 + $0x110] sm:$0xff] }
  0xa8   : > { %1162 = vmatpush.xpose.msrb.mxu1 %v253_v8  ;;  %1202 = vmatpush.xpose.msrb.mxu3 %v255_v9  ;;  %v268_v8 = vld [vmem:[%s2459_s7 + $0xa0] sm:$0xff]  ;;  %v270_v9 = vld [vmem:[%s2459_s7 + $0xb0] sm:$0xff] }
  0xaa   : > { %1183 = vmatmul.f32.vlgmr.msrb.gmra.mxu2 %v2623_v12  ;;  %1143 = vmatmul.f32.vlgmr.msrb.gmra.mxu0 %v2625_v13 }
  0xab   : > { %1207 = vmatpush.xpose.msra.mxu0 %v436_v6  ;;  %1247 = vmatpush.xpose.msra.mxu2 %v438_v7  ;;  %v281_v6 = vld [vmem:[%s2459_s7 + $0x108] sm:$0xff]  ;;  %v283_v7 = vld [vmem:[%s2459_s7 + $0x118] sm:$0xff] }
  0xac   : > { %1227 = vmatpush.xpose.msra.mxu1 %v437_v10  ;;  %1267 = vmatpush.xpose.msra.mxu3 %v439_v11  ;;  %v269_v10 = vld [vmem:[%s2459_s7 + $0xa8] sm:$0xff]  ;;  %v271_v11 = vld [vmem:[%s2459_s7 + $0xb8] sm:$0xff] }
  0xad   : > { %1203 = vmatmul.f32.vlgmr.msrb.gmra.mxu3 %v2629_v16  ;;  %1163 = vmatmul.f32.vlgmr.msrb.gmra.mxu1 %v2631_v17 }
  0xaf   : > { %1208 = vmatpush.xpose.msra.mxu0 %v424_v14  ;;  %1248 = vmatpush.xpose.msra.mxu2 %v426_v15  ;;  %v256_v14 = vld [vmem:[%s2459_s7 + $0x40] sm:$0xff]  ;;  %v258_v15 = vld [vmem:[%s2459_s7 + $0x50] sm:$0xff] }
  0xb0   : > { %1228 = vmatpush.xpose.msra.mxu1 %v425_v18  ;;  %1268 = vmatpush.xpose.msra.mxu3 %v427_v19  ;;  %v620_v18 = vld [vmem:[%s2459_s7 + $0xba0] sm:$0xff]  ;;  %v622_v19 = vld [vmem:[%s2459_s7 + $0xbb0] sm:$0xff] }
  0xb3   : > { %1209 = vmatpush.xpose.msra.mxu0 %v412_v20  ;;  %1249 = vmatpush.xpose.msra.mxu2 %v414_v21  ;;  %v257_v20 = vld [vmem:[%s2459_s7 + $0x48] sm:$0xff]  ;;  %v259_v21 = vld [vmem:[%s2459_s7 + $0x58] sm:$0xff] }
  0xb4   : > { %1229 = vmatpush.xpose.msra.mxu1 %v413_v22  ;;  %1269 = vmatpush.xpose.msra.mxu3 %v415_v23  ;;  %v2697_v22 = vld.sshfl [vmem:[#allocation1] sm:$0xff pattern:$0x73625140]  ;;  %v2699_v23 = vld.sshfl [vmem:[#allocation1 + $0x10] sm:$0xff pattern:$0x73625140] }
  0xb7   : > { %1210 = vmatpush.xpose.msra.mxu0 %v400_v24  ;;  %1250 = vmatpush.xpose.msra.mxu2 %v402_v25  ;;  %v621_v24 = vld [vmem:[%s2459_s7 + $0xba8] sm:$0xff]  ;;  %v623_v25 = vld [vmem:[%s2459_s7 + $0xbb8] sm:$0xff] }
  0xb8   : > { %1230 = vmatpush.xpose.msra.mxu1 %v401_v26  ;;  %1270 = vmatpush.xpose.msra.mxu3 %v403_v27  ;;  %v2703_v26 = vld.sshfl [vmem:[#allocation1 + $0x8] sm:$0xff pattern:$0x73625140]  ;;  %v2705_v27 = vld.sshfl [vmem:[#allocation1 + $0x18] sm:$0xff pattern:$0x73625140] }
  0xbb   : > { %1211 = vmatpush.xpose.msra.mxu0 %v388_v28  ;;  %1251 = vmatpush.xpose.msra.mxu2 %v390_v29  ;;  %v608_v28 = vld [vmem:[%s2459_s7 + $0xb40] sm:$0xff]  ;;  %v610_v29 = vld [vmem:[%s2459_s7 + $0xb50] sm:$0xff] }
  0xbc   : > { %1231 = vmatpush.xpose.msra.mxu1 %v389_v30  ;;  %1271 = vmatpush.xpose.msra.mxu3 %v391_v31  ;;  %v609_v30 = vld [vmem:[%s2459_s7 + $0xb48] sm:$0xff]  ;;  %v611_v31 = vld [vmem:[%s2459_s7 + $0xb58] sm:$0xff] }
  0xbf   : > { %1212 = vmatpush.xpose.msra.mxu0 %v376_v33  ;;  %1252 = vmatpush.xpose.msra.mxu2 %v378_v34  ;;  %v596_v33 = vld [vmem:[%s2459_s7 + $0xae0] sm:$0xff]  ;;  %v598_v34 = vld [vmem:[%s2459_s7 + $0xaf0] sm:$0xff] }
  0xc0   : > { %1232 = vmatpush.xpose.msra.mxu1 %v377_v35  ;;  %1272 = vmatpush.xpose.msra.mxu3 %v379_v38  ;;  %v597_v35 = vld [vmem:[%s2459_s7 + $0xae8] sm:$0xff]  ;;  %v599_v38 = vld [vmem:[%s2459_s7 + $0xaf8] sm:$0xff] }
  0xc3   : > { %1213 = vmatpush.xpose.msra.mxu0 %v364_v39  ;;  %1253 = vmatpush.xpose.msra.mxu2 %v366_v40  ;;  %v584_v39 = vld [vmem:[%s2459_s7 + $0xa80] sm:$0xff]  ;;  %v586_v40 = vld [vmem:[%s2459_s7 + $0xa90] sm:$0xff] }
  0xc4   : > { %1233 = vmatpush.xpose.msra.mxu1 %v365_v42  ;;  %1273 = vmatpush.xpose.msra.mxu3 %v367_v43  ;;  %v585_v42 = vld [vmem:[%s2459_s7 + $0xa88] sm:$0xff]  ;;  %v587_v43 = vld [vmem:[%s2459_s7 + $0xa98] sm:$0xff] }
  0xc7   : > { %1214 = vmatpush.xpose.msra.mxu0 %v352_v44  ;;  %1254 = vmatpush.xpose.msra.mxu2 %v354_v45  ;;  %v572_v44 = vld [vmem:[%s2459_s7 + $0xa20] sm:$0xff]  ;;  %v574_v45 = vld [vmem:[%s2459_s7 + $0xa30] sm:$0xff] }
  0xc8   : > { %1234 = vmatpush.xpose.msra.mxu1 %v353_v46  ;;  %1274 = vmatpush.xpose.msra.mxu3 %v355_v47  ;;  %v573_v46 = vld [vmem:[%s2459_s7 + $0xa28] sm:$0xff]  ;;  %v575_v47 = vld [vmem:[%s2459_s7 + $0xa38] sm:$0xff] }
  0xcb   : > { %1215 = vmatpush.xpose.msra.mxu0 %v340_v48  ;;  %1255 = vmatpush.xpose.msra.mxu2 %v342_v49  ;;  %v560_v48 = vld [vmem:[%s2459_s7 + $0x9c0] sm:$0xff]  ;;  %v562_v49 = vld [vmem:[%s2459_s7 + $0x9d0] sm:$0xff] }
  0xcc   : > { %1235 = vmatpush.xpose.msra.mxu1 %v341_v50  ;;  %1275 = vmatpush.xpose.msra.mxu3 %v343_v51  ;;  %v561_v50 = vld [vmem:[%s2459_s7 + $0x9c8] sm:$0xff]  ;;  %v563_v51 = vld [vmem:[%s2459_s7 + $0x9d8] sm:$0xff] }
  0xcf   : > { %1216 = vmatpush.xpose.msra.mxu0 %v328_v52  ;;  %1256 = vmatpush.xpose.msra.mxu2 %v330_v53  ;;  %v548_v52 = vld [vmem:[%s2459_s7 + $0x960] sm:$0xff]  ;;  %v550_v53 = vld [vmem:[%s2459_s7 + $0x970] sm:$0xff] }
  0xd0   : > { %1236 = vmatpush.xpose.msra.mxu1 %v329_v54  ;;  %1276 = vmatpush.xpose.msra.mxu3 %v331_v55  ;;  %v549_v54 = vld [vmem:[%s2459_s7 + $0x968] sm:$0xff]  ;;  %v551_v55 = vld [vmem:[%s2459_s7 + $0x978] sm:$0xff] }
  0xd3   : > { %1217 = vmatpush.xpose.msra.mxu0 %v316_v56  ;;  %1257 = vmatpush.xpose.msra.mxu2 %v318_v57  ;;  %v536_v56 = vld [vmem:[%s2459_s7 + $0x900] sm:$0xff]  ;;  %v538_v57 = vld [vmem:[%s2459_s7 + $0x910] sm:$0xff] }
  0xd4   : > { %1237 = vmatpush.xpose.msra.mxu1 %v317_v58  ;;  %1277 = vmatpush.xpose.msra.mxu3 %v319_v59  ;;  %v537_v58 = vld [vmem:[%s2459_s7 + $0x908] sm:$0xff]  ;;  %v539_v59 = vld [vmem:[%s2459_s7 + $0x918] sm:$0xff] }
  0xd7   : > { %1218 = vmatpush.xpose.msra.mxu0 %v304_v60  ;;  %1258 = vmatpush.xpose.msra.mxu2 %v306_v61  ;;  %v524_v60 = vld [vmem:[%s2459_s7 + $0x8a0] sm:$0xff]  ;;  %v526_v61 = vld [vmem:[%s2459_s7 + $0x8b0] sm:$0xff] }
  0xd8   : > { %1238 = vmatpush.xpose.msra.mxu1 %v305_v62  ;;  %1278 = vmatpush.xpose.msra.mxu3 %v307_v63  ;;  %v525_v62 = vld [vmem:[%s2459_s7 + $0x8a8] sm:$0xff]  ;;  %v527_v63 = vld [vmem:[%s2459_s7 + $0x8b8] sm:$0xff] }
  0xdb   : > { %1219 = vmatpush.xpose.msra.mxu0 %v292_v0  ;;  %1259 = vmatpush.xpose.msra.mxu2 %v294_v1  ;;  %v512_v0 = vld [vmem:[%s2459_s7 + $0x840] sm:$0xff]  ;;  %v514_v1 = vld [vmem:[%s2459_s7 + $0x850] sm:$0xff] }
  0xdc   : > { %1239 = vmatpush.xpose.msra.mxu1 %v293_v2  ;;  %1279 = vmatpush.xpose.msra.mxu3 %v295_v3 }
  0xdf   : > { %1220 = vmatpush.xpose.msra.mxu0 %v280_v4  ;;  %1260 = vmatpush.xpose.msra.mxu2 %v282_v5  ;;  %v513_v5 = vld [vmem:[%s2459_s7 + $0x848] sm:$0xff] }
  0xe0   : > { %1240 = vmatpush.xpose.msra.mxu1 %v281_v6  ;;  %1280 = vmatpush.xpose.msra.mxu3 %v283_v7  ;;  %v515_v6 = vld [vmem:[%s2459_s7 + $0x858] sm:$0xff] }
  0xe3   : > { %1221 = vmatpush.xpose.msra.mxu0 %v268_v8  ;;  %1261 = vmatpush.xpose.msra.mxu2 %v270_v9  ;;  %v500_v9 = vld [vmem:[%s2459_s7 + $0x7e0] sm:$0xff] }
  0xe4   : > { %1241 = vmatpush.xpose.msra.mxu1 %v269_v10  ;;  %1281 = vmatpush.xpose.msra.mxu3 %v271_v11  ;;  %v502_v10 = vld [vmem:[%s2459_s7 + $0x7f0] sm:$0xff] }
  0xe7   : > { %1222 = vmatpush.xpose.msra.mxu0 %v256_v14  ;;  %1262 = vmatpush.xpose.msra.mxu2 %v258_v15  ;;  %v1064_v2 = vpop.f32.mrf.mxu0  ;;  %v501_v15 = vld [vmem:[%s2459_s7 + $0x7e8] sm:$0xff] }
  0xe8   : > { %1242 = vmatpush.xpose.msra.mxu1 %v257_v20  ;;  %1282 = vmatpush.xpose.msra.mxu3 %v259_v21  ;;  %v490_v20 = vld [vmem:[%s2459_s7 + $0x790] sm:$0xff]  ;;  %v489_v21 = vld [vmem:[%s2459_s7 + $0x788] sm:$0xff] }
  0xea   : > { %1223 = vmatmul.f32.vlgmr.msra.gmra.mxu0 %v2697_v22  ;;  %1263 = vmatmul.f32.vlgmr.msra.gmra.mxu2 %v2699_v23  ;;  %v1084_v3 = vpop.f32.mrf.mxu1 }
  0xeb   : > { %1287 = vmatpush.xpose.msrb.mxu0 %v620_v18  ;;  %1327 = vmatpush.xpose.msrb.mxu2 %v622_v19  ;;  %v1085_v4 = vadd.f32 %v1084_v3, %v1064_v2  ;;  %v503_v18 = vld [vmem:[%s2459_s7 + $0x7f8] sm:$0xff]  ;;  %v488_v19 = vld [vmem:[%s2459_s7 + $0x780] sm:$0xff] }
  0xec   : > { %1307 = vmatpush.xpose.msrb.mxu1 %v621_v24  ;;  %1347 = vmatpush.xpose.msrb.mxu3 %v623_v25  ;;  %v491_v24 = vld [vmem:[%s2459_s7 + $0x798] sm:$0xff]  ;;  %v476_v25 = vld [vmem:[%s2459_s7 + $0x720] sm:$0xff] }
  0xed   : > { %1243 = vmatmul.f32.vlgmr.msra.gmra.mxu1 %v2703_v26  ;;  %1283 = vmatmul.f32.vlgmr.msra.gmra.mxu3 %v2705_v27  ;;  %v1104_v7 = vpop.f32.mrf.mxu2  ;;  %v591_v2 = vld [vmem:[%s2459_s7 + $0xab8] sm:$0xff] }
  0xee   : > { %v1105_v8 = vadd.f32 %v1104_v7, %v1085_v4 }
  0xef   : > { %1288 = vmatpush.xpose.msrb.mxu0 %v608_v28  ;;  %1328 = vmatpush.xpose.msrb.mxu2 %v610_v29  ;;  %v478_v28 = vld [vmem:[%s2459_s7 + $0x730] sm:$0xff]  ;;  %v477_v29 = vld [vmem:[%s2459_s7 + $0x728] sm:$0xff] }
  0xf0   : > { %1308 = vmatpush.xpose.msrb.mxu1 %v609_v30  ;;  %1348 = vmatpush.xpose.msrb.mxu3 %v611_v31  ;;  %v1124_v11 = vpop.f32.mrf.mxu3  ;;  %v479_v30 = vld [vmem:[%s2459_s7 + $0x738] sm:$0xff]  ;;  %v464_v31 = vld [vmem:[%s2459_s7 + $0x6c0] sm:$0xff] }
  0xf1   : > { %v2749_v14 = vadd.f32 %v1124_v11, %v1105_v8  ;;  %v564_v11 = vld [vmem:[%s2459_s7 + $0x9e0] sm:$0xff] }
  0xf3   : > { %1289 = vmatpush.xpose.msrb.mxu0 %v596_v33  ;;  %1329 = vmatpush.xpose.msrb.mxu2 %v598_v34  ;;  %v466_v33 = vld [vmem:[%s2459_s7 + $0x6d0] sm:$0xff]  ;;  %v465_v34 = vld [vmem:[%s2459_s7 + $0x6c8] sm:$0xff] }
  0xf4   : > { %1309 = vmatpush.xpose.msrb.mxu1 %v597_v35  ;;  %1349 = vmatpush.xpose.msrb.mxu3 %v599_v38  ;;  %v467_v35 = vld [vmem:[%s2459_s7 + $0x6d8] sm:$0xff]  ;;  %v452_v38 = vld [vmem:[%s2459_s7 + $0x660] sm:$0xff] }
  0xf7   : > { %1290 = vmatpush.xpose.msrb.mxu0 %v584_v39  ;;  %1330 = vmatpush.xpose.msrb.mxu2 %v586_v40  ;;  %v454_v39 = vld [vmem:[%s2459_s7 + $0x670] sm:$0xff]  ;;  %v453_v40 = vld [vmem:[%s2459_s7 + $0x668] sm:$0xff] }
  0xf8   : > { %1310 = vmatpush.xpose.msrb.mxu1 %v585_v42  ;;  %1350 = vmatpush.xpose.msrb.mxu3 %v587_v43  ;;  %v455_v42 = vld [vmem:[%s2459_s7 + $0x678] sm:$0xff]  ;;  %v440_v43 = vld [vmem:[%s2459_s7 + $0x600] sm:$0xff] }
  0xfb   : > { %1291 = vmatpush.xpose.msrb.mxu0 %v572_v44  ;;  %1331 = vmatpush.xpose.msrb.mxu2 %v574_v45  ;;  %v442_v44 = vld [vmem:[%s2459_s7 + $0x610] sm:$0xff]  ;;  %v624_v45 = vld [vmem:[%s2459_s7 + $0xbc0] sm:$0xff] }
  0xfc   : > { %1311 = vmatpush.xpose.msrb.mxu1 %v573_v46  ;;  %1351 = vmatpush.xpose.msrb.mxu3 %v575_v47  ;;  %v626_v46 = vld [vmem:[%s2459_s7 + $0xbd0] sm:$0xff]  ;;  %v441_v47 = vld [vmem:[%s2459_s7 + $0x608] sm:$0xff] }
  0xff   : > { %1292 = vmatpush.xpose.msrb.mxu0 %v560_v48  ;;  %1332 = vmatpush.xpose.msrb.mxu2 %v562_v49  ;;  %v443_v48 = vld [vmem:[%s2459_s7 + $0x618] sm:$0xff]  ;;  %v625_v49 = vld [vmem:[%s2459_s7 + $0xbc8] sm:$0xff] }
 0x100   : > { %1312 = vmatpush.xpose.msrb.mxu1 %v561_v50  ;;  %1352 = vmatpush.xpose.msrb.mxu3 %v563_v51  ;;  %v627_v50 = vld [vmem:[%s2459_s7 + $0xbd8] sm:$0xff]  ;;  %v612_v51 = vld [vmem:[%s2459_s7 + $0xb60] sm:$0xff] }
 0x103   : > { %1293 = vmatpush.xpose.msrb.mxu0 %v548_v52  ;;  %1333 = vmatpush.xpose.msrb.mxu2 %v550_v53  ;;  %v614_v52 = vld [vmem:[%s2459_s7 + $0xb70] sm:$0xff]  ;;  %v613_v53 = vld [vmem:[%s2459_s7 + $0xb68] sm:$0xff] }
 0x104   : > { %1313 = vmatpush.xpose.msrb.mxu1 %v549_v54  ;;  %1353 = vmatpush.xpose.msrb.mxu3 %v551_v55  ;;  %v615_v54 = vld [vmem:[%s2459_s7 + $0xb78] sm:$0xff]  ;;  %v600_v55 = vld [vmem:[%s2459_s7 + $0xb00] sm:$0xff] }
 0x107   : > { %1294 = vmatpush.xpose.msrb.mxu0 %v536_v56  ;;  %1334 = vmatpush.xpose.msrb.mxu2 %v538_v57  ;;  %v602_v56 = vld [vmem:[%s2459_s7 + $0xb10] sm:$0xff] }
 0x108   : > { %1314 = vmatpush.xpose.msrb.mxu1 %v537_v58  ;;  %1354 = vmatpush.xpose.msrb.mxu3 %v539_v59  ;;  %v601_v59 = vld [vmem:[%s2459_s7 + $0xb08] sm:$0xff] }
 0x10b   : > { %1295 = vmatpush.xpose.msrb.mxu0 %v524_v60  ;;  %1335 = vmatpush.xpose.msrb.mxu2 %v526_v61  ;;  %v603_v60 = vld [vmem:[%s2459_s7 + $0xb18] sm:$0xff] }
 0x10c   : > { %1315 = vmatpush.xpose.msrb.mxu1 %v525_v62  ;;  %1355 = vmatpush.xpose.msrb.mxu3 %v527_v63  ;;  %v588_v63 = vld [vmem:[%s2459_s7 + $0xaa0] sm:$0xff] }
 0x10f   : > { %1296 = vmatpush.xpose.msrb.mxu0 %v512_v0  ;;  %1336 = vmatpush.xpose.msrb.mxu2 %v514_v1  ;;  %v590_v0 = vld [vmem:[%s2459_s7 + $0xab0] sm:$0xff]  ;;  %v589_v1 = vld [vmem:[%s2459_s7 + $0xaa8] sm:$0xff] }
 0x110   : > { %1316 = vmatpush.xpose.msrb.mxu1 %v513_v5  ;;  %1356 = vmatpush.xpose.msrb.mxu3 %v515_v6  ;;  %v576_v5 = vld [vmem:[%s2459_s7 + $0xa40] sm:$0xff]  ;;  %v578_v6 = vld [vmem:[%s2459_s7 + $0xa50] sm:$0xff] }
 0x113   : > { %1297 = vmatpush.xpose.msrb.mxu0 %v500_v9  ;;  %1337 = vmatpush.xpose.msrb.mxu2 %v502_v10  ;;  %v577_v9 = vld [vmem:[%s2459_s7 + $0xa48] sm:$0xff]  ;;  %v579_v10 = vld [vmem:[%s2459_s7 + $0xa58] sm:$0xff] }
 0x114   : > { %1317 = vmatpush.xpose.msrb.mxu1 %v501_v15  ;;  %1357 = vmatpush.xpose.msrb.mxu3 %v503_v18  ;;  %v565_v15 = vld [vmem:[%s2459_s7 + $0x9e8] sm:$0xff]  ;;  %v567_v18 = vld [vmem:[%s2459_s7 + $0x9f8] sm:$0xff] }
 0x117   : > { %1298 = vmatpush.xpose.msrb.mxu0 %v488_v19  ;;  %1338 = vmatpush.xpose.msrb.mxu2 %v490_v20  ;;  %v552_v19 = vld [vmem:[%s2459_s7 + $0x980] sm:$0xff]  ;;  %v554_v20 = vld [vmem:[%s2459_s7 + $0x990] sm:$0xff] }
 0x118   : > { %1318 = vmatpush.xpose.msrb.mxu1 %v489_v21  ;;  %1358 = vmatpush.xpose.msrb.mxu3 %v491_v24  ;;  %v553_v21 = vld [vmem:[%s2459_s7 + $0x988] sm:$0xff]  ;;  %v555_v24 = vld [vmem:[%s2459_s7 + $0x998] sm:$0xff] }
 0x11b   : > { %1299 = vmatpush.xpose.msrb.mxu0 %v476_v25  ;;  %1339 = vmatpush.xpose.msrb.mxu2 %v478_v28  ;;  %v540_v25 = vld [vmem:[%s2459_s7 + $0x920] sm:$0xff]  ;;  %v542_v28 = vld [vmem:[%s2459_s7 + $0x930] sm:$0xff] }
 0x11c   : > { %1319 = vmatpush.xpose.msrb.mxu1 %v477_v29  ;;  %1359 = vmatpush.xpose.msrb.mxu3 %v479_v30  ;;  %v541_v29 = vld [vmem:[%s2459_s7 + $0x928] sm:$0xff]  ;;  %v543_v30 = vld [vmem:[%s2459_s7 + $0x938] sm:$0xff] }
 0x11f   : > { %1300 = vmatpush.xpose.msrb.mxu0 %v464_v31  ;;  %1340 = vmatpush.xpose.msrb.mxu2 %v466_v33  ;;  %v528_v31 = vld [vmem:[%s2459_s7 + $0x8c0] sm:$0xff]  ;;  %v530_v33 = vld [vmem:[%s2459_s7 + $0x8d0] sm:$0xff] }
 0x120   : > { %1320 = vmatpush.xpose.msrb.mxu1 %v465_v34  ;;  %1360 = vmatpush.xpose.msrb.mxu3 %v467_v35  ;;  %v529_v34 = vld [vmem:[%s2459_s7 + $0x8c8] sm:$0xff]  ;;  %v531_v35 = vld [vmem:[%s2459_s7 + $0x8d8] sm:$0xff] }
 0x123   : > { %1301 = vmatpush.xpose.msrb.mxu0 %v452_v38  ;;  %1341 = vmatpush.xpose.msrb.mxu2 %v454_v39  ;;  %v516_v38 = vld [vmem:[%s2459_s7 + $0x860] sm:$0xff]  ;;  %v518_v39 = vld [vmem:[%s2459_s7 + $0x870] sm:$0xff] }
 0x124   : > { %1321 = vmatpush.xpose.msrb.mxu1 %v453_v40  ;;  %1361 = vmatpush.xpose.msrb.mxu3 %v455_v42  ;;  %v517_v40 = vld [vmem:[%s2459_s7 + $0x868] sm:$0xff]  ;;  %v519_v42 = vld [vmem:[%s2459_s7 + $0x878] sm:$0xff] }
 0x127   : > { %1302 = vmatpush.xpose.msrb.mxu0 %v440_v43  ;;  %1342 = vmatpush.xpose.msrb.mxu2 %v442_v44  ;;  %v1144_v57 = vpop.f32.mrf.mxu0  ;;  %v504_v43 = vld [vmem:[%s2459_s7 + $0x800] sm:$0xff]  ;;  %v506_v44 = vld [vmem:[%s2459_s7 + $0x810] sm:$0xff] }
 0x128   : > { %1322 = vmatpush.xpose.msrb.mxu1 %v441_v47  ;;  %1362 = vmatpush.xpose.msrb.mxu3 %v443_v48  ;;  %v1145_v58 = vadd.f32 %v1144_v57, %v2749_v14  ;;  %v566_v14 = vld [vmem:[%s2459_s7 + $0x9f0] sm:$0xff]  ;;  %v492_v47 = vld [vmem:[%s2459_s7 + $0x7a0] sm:$0xff]  ;;  %v469_v57 = vld [vmem:[%s2459_s7 + $0x6e8] sm:$0xff] }
 0x129   : > { %v494_v48 = vld [vmem:[%s2459_s7 + $0x7b0] sm:$0xff] }
 0x12a   : > { %1343 = vmatmul.f32.vlgmr.msrb.gmra.mxu2 %v2571_v32  ;;  %1303 = vmatmul.f32.vlgmr.msrb.gmra.mxu0 %v2577_v36  ;;  %v1164_v61 = vpop.f32.mrf.mxu1 }
 0x12b   : > { %1367 = vmatpush.xpose.msra.mxu0 %v624_v45  ;;  %1407 = vmatpush.xpose.msra.mxu2 %v626_v46  ;;  %v1165_v62 = vadd.f32 %v1164_v61, %v1145_v58  ;;  %v505_v45 = vld [vmem:[%s2459_s7 + $0x808] sm:$0xff]  ;;  %v507_v46 = vld [vmem:[%s2459_s7 + $0x818] sm:$0xff] }
 0x12c   : > { %1387 = vmatpush.xpose.msra.mxu1 %v625_v49  ;;  %1427 = vmatpush.xpose.msra.mxu3 %v627_v50  ;;  %v493_v49 = vld [vmem:[%s2459_s7 + $0x7a8] sm:$0xff]  ;;  %v495_v50 = vld [vmem:[%s2459_s7 + $0x7b8] sm:$0xff] }
 0x12d   : > { %1363 = vmatmul.f32.vlgmr.msrb.gmra.mxu3 %v2579_v37  ;;  %1323 = vmatmul.f32.vlgmr.msrb.gmra.mxu1 %v2586_v41  ;;  %v1184_v3 = vpop.f32.mrf.mxu2  ;;  %v471_v58 = vld [vmem:[%s2459_s7 + $0x6f8] sm:$0xff]  ;;  %v457_v61 = vld [vmem:[%s2459_s7 + $0x688] sm:$0xff] }
 0x12e   : > { %v1185_v4 = vadd.f32 %v1184_v3, %v1165_v62  ;;  %v459_v62 = vld [vmem:[%s2459_s7 + $0x698] sm:$0xff]  ;;  %v445_v3 = vld [vmem:[%s2459_s7 + $0x628] sm:$0xff] }
 0x12f   : > { %1368 = vmatpush.xpose.msra.mxu0 %v612_v51  ;;  %1408 = vmatpush.xpose.msra.mxu2 %v614_v52  ;;  %v480_v51 = vld [vmem:[%s2459_s7 + $0x740] sm:$0xff]  ;;  %v482_v52 = vld [vmem:[%s2459_s7 + $0x750] sm:$0xff] }
 0x130   : > { %1388 = vmatpush.xpose.msra.mxu1 %v613_v53  ;;  %1428 = vmatpush.xpose.msra.mxu3 %v615_v54  ;;  %v1204_v7 = vpop.f32.mrf.mxu3  ;;  %v481_v53 = vld [vmem:[%s2459_s7 + $0x748] sm:$0xff]  ;;  %v483_v54 = vld [vmem:[%s2459_s7 + $0x758] sm:$0xff] }
 0x131   : > { %v2796_v8 = vadd.f32 %v1204_v7, %v1185_v4  ;;  %v447_v4 = vld [vmem:[%s2459_s7 + $0x638] sm:$0xff]  ;;  %v616_v7 = vld [vmem:[%s2459_s7 + $0xb80] sm:$0xff] }
 0x133   : > { %1369 = vmatpush.xpose.msra.mxu0 %v600_v55  ;;  %1409 = vmatpush.xpose.msra.mxu2 %v602_v56  ;;  %v468_v55 = vld [vmem:[%s2459_s7 + $0x6e0] sm:$0xff]  ;;  %v470_v56 = vld [vmem:[%s2459_s7 + $0x6f0] sm:$0xff] }
 0x134   : > { %1389 = vmatpush.xpose.msra.mxu1 %v601_v59  ;;  %1429 = vmatpush.xpose.msra.mxu3 %v603_v60  ;;  %v456_v59 = vld [vmem:[%s2459_s7 + $0x680] sm:$0xff]  ;;  %v458_v60 = vld [vmem:[%s2459_s7 + $0x690] sm:$0xff] }
 0x137   : > { %1370 = vmatpush.xpose.msra.mxu0 %v588_v63  ;;  %1410 = vmatpush.xpose.msra.mxu2 %v590_v0  ;;  %v444_v63 = vld [vmem:[%s2459_s7 + $0x620] sm:$0xff]  ;;  %v446_v0 = vld [vmem:[%s2459_s7 + $0x630] sm:$0xff] }
 0x138   : > { %1390 = vmatpush.xpose.msra.mxu1 %v589_v1  ;;  %1430 = vmatpush.xpose.msra.mxu3 %v591_v2  ;;  %v628_v1 = vld [vmem:[%s2459_s7 + $0xbe0] sm:$0xff]  ;;  %v630_v2 = vld [vmem:[%s2459_s7 + $0xbf0] sm:$0xff] }
 0x13b   : > { %1371 = vmatpush.xpose.msra.mxu0 %v576_v5  ;;  %1411 = vmatpush.xpose.msra.mxu2 %v578_v6  ;;  %v629_v5 = vld [vmem:[%s2459_s7 + $0xbe8] sm:$0xff]  ;;  %v631_v6 = vld [vmem:[%s2459_s7 + $0xbf8] sm:$0xff] }
 0x13c   : > { %1391 = vmatpush.xpose.msra.mxu1 %v577_v9  ;;  %1431 = vmatpush.xpose.msra.mxu3 %v579_v10  ;;  %v618_v9 = vld [vmem:[%s2459_s7 + $0xb90] sm:$0xff]  ;;  %v617_v10 = vld [vmem:[%s2459_s7 + $0xb88] sm:$0xff] }
 0x13f   : > { %1372 = vmatpush.xpose.msra.mxu0 %v564_v11  ;;  %1412 = vmatpush.xpose.msra.mxu2 %v566_v14  ;;  %v619_v11 = vld [vmem:[%s2459_s7 + $0xb98] sm:$0xff]  ;;  %v604_v14 = vld [vmem:[%s2459_s7 + $0xb20] sm:$0xff] }
 0x140   : > { %1392 = vmatpush.xpose.msra.mxu1 %v565_v15  ;;  %1432 = vmatpush.xpose.msra.mxu3 %v567_v18  ;;  %v606_v15 = vld [vmem:[%s2459_s7 + $0xb30] sm:$0xff]  ;;  %v607_v18 = vld [vmem:[%s2459_s7 + $0xb38] sm:$0xff] }
 0x143   : > { %1373 = vmatpush.xpose.msra.mxu0 %v552_v19  ;;  %1413 = vmatpush.xpose.msra.mxu2 %v554_v20  ;;  %v594_v19 = vld [vmem:[%s2459_s7 + $0xad0] sm:$0xff]  ;;  %v595_v20 = vld [vmem:[%s2459_s7 + $0xad8] sm:$0xff] }
 0x144   : > { %1393 = vmatpush.xpose.msra.mxu1 %v553_v21  ;;  %1433 = vmatpush.xpose.msra.mxu3 %v555_v24  ;;  %v582_v21 = vld [vmem:[%s2459_s7 + $0xa70] sm:$0xff]  ;;  %v581_v24 = vld [vmem:[%s2459_s7 + $0xa68] sm:$0xff] }
 0x147   : > { %1374 = vmatpush.xpose.msra.mxu0 %v540_v25  ;;  %1414 = vmatpush.xpose.msra.mxu2 %v542_v28  ;;  %v583_v25 = vld [vmem:[%s2459_s7 + $0xa78] sm:$0xff]  ;;  %v568_v28 = vld [vmem:[%s2459_s7 + $0xa00] sm:$0xff] }
 0x148   : > { %1394 = vmatpush.xpose.msra.mxu1 %v541_v29  ;;  %1434 = vmatpush.xpose.msra.mxu3 %v543_v30  ;;  %v570_v29 = vld [vmem:[%s2459_s7 + $0xa10] sm:$0xff]  ;;  %v569_v30 = vld [vmem:[%s2459_s7 + $0xa08] sm:$0xff] }
 0x14b   : > { %1375 = vmatpush.xpose.msra.mxu0 %v528_v31  ;;  %1415 = vmatpush.xpose.msra.mxu2 %v530_v33  ;;  %v571_v31 = vld [vmem:[%s2459_s7 + $0xa18] sm:$0xff]  ;;  %v556_v33 = vld [vmem:[%s2459_s7 + $0x9a0] sm:$0xff] }
 0x14c   : > { %1395 = vmatpush.xpose.msra.mxu1 %v529_v34  ;;  %1435 = vmatpush.xpose.msra.mxu3 %v531_v35  ;;  %v558_v34 = vld [vmem:[%s2459_s7 + $0x9b0] sm:$0xff]  ;;  %v557_v35 = vld [vmem:[%s2459_s7 + $0x9a8] sm:$0xff] }
 0x14f   : > { %1376 = vmatpush.xpose.msra.mxu0 %v516_v38  ;;  %1416 = vmatpush.xpose.msra.mxu2 %v518_v39  ;;  %v559_v38 = vld [vmem:[%s2459_s7 + $0x9b8] sm:$0xff]  ;;  %v544_v39 = vld [vmem:[%s2459_s7 + $0x940] sm:$0xff] }
 0x150   : > { %1396 = vmatpush.xpose.msra.mxu1 %v517_v40  ;;  %1436 = vmatpush.xpose.msra.mxu3 %v519_v42  ;;  %v546_v40 = vld [vmem:[%s2459_s7 + $0x950] sm:$0xff]  ;;  %v545_v42 = vld [vmem:[%s2459_s7 + $0x948] sm:$0xff] }
 0x153   : > { %1377 = vmatpush.xpose.msra.mxu0 %v504_v43  ;;  %1417 = vmatpush.xpose.msra.mxu2 %v506_v44  ;;  %v547_v43 = vld [vmem:[%s2459_s7 + $0x958] sm:$0xff]  ;;  %v532_v44 = vld [vmem:[%s2459_s7 + $0x8e0] sm:$0xff] }
 0x154   : > { %1397 = vmatpush.xpose.msra.mxu1 %v505_v45  ;;  %1437 = vmatpush.xpose.msra.mxu3 %v507_v46  ;;  %v534_v45 = vld [vmem:[%s2459_s7 + $0x8f0] sm:$0xff]  ;;  %v533_v46 = vld [vmem:[%s2459_s7 + $0x8e8] sm:$0xff] }
 0x157   : > { %1378 = vmatpush.xpose.msra.mxu0 %v492_v47  ;;  %1418 = vmatpush.xpose.msra.mxu2 %v494_v48  ;;  %v535_v47 = vld [vmem:[%s2459_s7 + $0x8f8] sm:$0xff]  ;;  %v520_v48 = vld [vmem:[%s2459_s7 + $0x880] sm:$0xff] }
 0x158   : > { %1398 = vmatpush.xpose.msra.mxu1 %v493_v49  ;;  %1438 = vmatpush.xpose.msra.mxu3 %v495_v50  ;;  %v522_v49 = vld [vmem:[%s2459_s7 + $0x890] sm:$0xff]  ;;  %v521_v50 = vld [vmem:[%s2459_s7 + $0x888] sm:$0xff] }
 0x15b   : > { %1379 = vmatpush.xpose.msra.mxu0 %v480_v51  ;;  %1419 = vmatpush.xpose.msra.mxu2 %v482_v52  ;;  %v523_v51 = vld [vmem:[%s2459_s7 + $0x898] sm:$0xff]  ;;  %v508_v52 = vld [vmem:[%s2459_s7 + $0x820] sm:$0xff] }
 0x15c   : > { %1399 = vmatpush.xpose.msra.mxu1 %v481_v53  ;;  %1439 = vmatpush.xpose.msra.mxu3 %v483_v54  ;;  %v510_v53 = vld [vmem:[%s2459_s7 + $0x830] sm:$0xff]  ;;  %v509_v54 = vld [vmem:[%s2459_s7 + $0x828] sm:$0xff] }
 0x15f   : > { %1380 = vmatpush.xpose.msra.mxu0 %v468_v55  ;;  %1420 = vmatpush.xpose.msra.mxu2 %v470_v56  ;;  %v511_v55 = vld [vmem:[%s2459_s7 + $0x838] sm:$0xff]  ;;  %v496_v56 = vld [vmem:[%s2459_s7 + $0x7c0] sm:$0xff] }
 0x160   : > { %1400 = vmatpush.xpose.msra.mxu1 %v469_v57  ;;  %1440 = vmatpush.xpose.msra.mxu3 %v471_v58  ;;  %v498_v57 = vld [vmem:[%s2459_s7 + $0x7d0] sm:$0xff]  ;;  %v497_v58 = vld [vmem:[%s2459_s7 + $0x7c8] sm:$0xff] }
 0x163   : > { %1381 = vmatpush.xpose.msra.mxu0 %v456_v59  ;;  %1421 = vmatpush.xpose.msra.mxu2 %v458_v60  ;;  %v499_v59 = vld [vmem:[%s2459_s7 + $0x7d8] sm:$0xff]  ;;  %v484_v60 = vld [vmem:[%s2459_s7 + $0x760] sm:$0xff] }
 0x164   : > { %1401 = vmatpush.xpose.msra.mxu1 %v457_v61  ;;  %1441 = vmatpush.xpose.msra.mxu3 %v459_v62  ;;  %v486_v61 = vld [vmem:[%s2459_s7 + $0x770] sm:$0xff]  ;;  %v485_v62 = vld [vmem:[%s2459_s7 + $0x768] sm:$0xff] }
 0x167   : > { %1382 = vmatpush.xpose.msra.mxu0 %v444_v63  ;;  %1422 = vmatpush.xpose.msra.mxu2 %v446_v0  ;;  %v487_v63 = vld [vmem:[%s2459_s7 + $0x778] sm:$0xff]  ;;  %v472_v0 = vld [vmem:[%s2459_s7 + $0x700] sm:$0xff] }
 0x168   : > { %1402 = vmatpush.xpose.msra.mxu1 %v445_v3  ;;  %1442 = vmatpush.xpose.msra.mxu3 %v447_v4  ;;  %v475_v3 = vld [vmem:[%s2459_s7 + $0x718] sm:$0xff]  ;;  %v460_v4 = vld [vmem:[%s2459_s7 + $0x6a0] sm:$0xff] }
 0x16a   : > { %1423 = vmatmul.f32.vlgmr.msra.gmra.mxu2 %v2623_v12  ;;  %1383 = vmatmul.f32.vlgmr.msra.gmra.mxu0 %v2625_v13  ;;  %v605_v12 = vld [vmem:[%s2459_s7 + $0xb28] sm:$0xff]  ;;  %v592_v13 = vld [vmem:[%s2459_s7 + $0xac0] sm:$0xff] }
 0x16b   : > { %1447 = vmatpush.xpose.msrb.mxu0 %v628_v1  ;;  %1487 = vmatpush.xpose.msrb.mxu2 %v630_v2  ;;  %v474_v1 = vld [vmem:[%s2459_s7 + $0x710] sm:$0xff]  ;;  %v473_v2 = vld [vmem:[%s2459_s7 + $0x708] sm:$0xff] }
 0x16c   : > { %1467 = vmatpush.xpose.msrb.mxu1 %v629_v5  ;;  %1507 = vmatpush.xpose.msrb.mxu3 %v631_v6  ;;  %v462_v5 = vld [vmem:[%s2459_s7 + $0x6b0] sm:$0xff]  ;;  %v461_v6 = vld [vmem:[%s2459_s7 + $0x6a8] sm:$0xff] }
 0x16d   : > { %1443 = vmatmul.f32.vlgmr.msra.gmra.mxu3 %v2629_v16  ;;  %1403 = vmatmul.f32.vlgmr.msra.gmra.mxu1 %v2631_v17  ;;  %v593_v16 = vld [vmem:[%s2459_s7 + $0xac8] sm:$0xff]  ;;  %v580_v17 = vld [vmem:[%s2459_s7 + $0xa60] sm:$0xff] }
 0x16f   : > { %1448 = vmatpush.xpose.msrb.mxu0 %v616_v7  ;;  %1488 = vmatpush.xpose.msrb.mxu2 %v618_v9  ;;  %v463_v7 = vld [vmem:[%s2459_s7 + $0x6b8] sm:$0xff]  ;;  %v448_v9 = vld [vmem:[%s2459_s7 + $0x640] sm:$0xff] }
 0x170   : > { %1468 = vmatpush.xpose.msrb.mxu1 %v617_v10  ;;  %1508 = vmatpush.xpose.msrb.mxu3 %v619_v11  ;;  %v450_v10 = vld [vmem:[%s2459_s7 + $0x650] sm:$0xff]  ;;  %v812_v11 = vld [vmem:[%s2459_s7 + $0x11a0] sm:$0xff] }
 0x173   : > { %1449 = vmatpush.xpose.msrb.mxu0 %v604_v14  ;;  %1489 = vmatpush.xpose.msrb.mxu2 %v606_v15  ;;  %v814_v14 = vld [vmem:[%s2459_s7 + $0x11b0] sm:$0xff]  ;;  %v449_v15 = vld [vmem:[%s2459_s7 + $0x648] sm:$0xff] }
 0x174   : > { %1469 = vmatpush.xpose.msrb.mxu1 %v605_v12  ;;  %1509 = vmatpush.xpose.msrb.mxu3 %v607_v18  ;;  %v451_v12 = vld [vmem:[%s2459_s7 + $0x658] sm:$0xff]  ;;  %v813_v18 = vld [vmem:[%s2459_s7 + $0x11a8] sm:$0xff] }
 0x177   : > { %1450 = vmatpush.xpose.msrb.mxu0 %v592_v13  ;;  %1490 = vmatpush.xpose.msrb.mxu2 %v594_v19  ;;  %v815_v13 = vld [vmem:[%s2459_s7 + $0x11b8] sm:$0xff]  ;;  %v800_v19 = vld [vmem:[%s2459_s7 + $0x1140] sm:$0xff] }
 0x178   : > { %1470 = vmatpush.xpose.msrb.mxu1 %v593_v16  ;;  %1510 = vmatpush.xpose.msrb.mxu3 %v595_v20  ;;  %v802_v16 = vld [vmem:[%s2459_s7 + $0x1150] sm:$0xff]  ;;  %v801_v20 = vld [vmem:[%s2459_s7 + $0x1148] sm:$0xff] }
 0x17b   : > { %1451 = vmatpush.xpose.msrb.mxu0 %v580_v17  ;;  %1491 = vmatpush.xpose.msrb.mxu2 %v582_v21  ;;  %v803_v17 = vld [vmem:[%s2459_s7 + $0x1158] sm:$0xff]  ;;  %v789_v21 = vld [vmem:[%s2459_s7 + $0x10e8] sm:$0xff] }
 0x17c   : > { %1471 = vmatpush.xpose.msrb.mxu1 %v581_v24  ;;  %1511 = vmatpush.xpose.msrb.mxu3 %v583_v25  ;;  %v791_v24 = vld [vmem:[%s2459_s7 + $0x10f8] sm:$0xff]  ;;  %v777_v25 = vld [vmem:[%s2459_s7 + $0x1088] sm:$0xff] }
 0x17f   : > { %1452 = vmatpush.xpose.msrb.mxu0 %v568_v28  ;;  %1492 = vmatpush.xpose.msrb.mxu2 %v570_v29  ;;  %v779_v28 = vld [vmem:[%s2459_s7 + $0x1098] sm:$0xff]  ;;  %v764_v29 = vld [vmem:[%s2459_s7 + $0x1020] sm:$0xff] }
 0x180   : > { %1472 = vmatpush.xpose.msrb.mxu1 %v569_v30  ;;  %1512 = vmatpush.xpose.msrb.mxu3 %v571_v31  ;;  %v766_v30 = vld [vmem:[%s2459_s7 + $0x1030] sm:$0xff]  ;;  %v765_v31 = vld [vmem:[%s2459_s7 + $0x1028] sm:$0xff] }
 0x183   : > { %1453 = vmatpush.xpose.msrb.mxu0 %v556_v33  ;;  %1493 = vmatpush.xpose.msrb.mxu2 %v558_v34  ;;  %v767_v33 = vld [vmem:[%s2459_s7 + $0x1038] sm:$0xff]  ;;  %v752_v34 = vld [vmem:[%s2459_s7 + $0xfc0] sm:$0xff] }
 0x184   : > { %1473 = vmatpush.xpose.msrb.mxu1 %v557_v35  ;;  %1513 = vmatpush.xpose.msrb.mxu3 %v559_v38  ;;  %v754_v35 = vld [vmem:[%s2459_s7 + $0xfd0] sm:$0xff]  ;;  %v753_v38 = vld [vmem:[%s2459_s7 + $0xfc8] sm:$0xff] }
 0x187   : > { %1454 = vmatpush.xpose.msrb.mxu0 %v544_v39  ;;  %1494 = vmatpush.xpose.msrb.mxu2 %v546_v40  ;;  %v755_v39 = vld [vmem:[%s2459_s7 + $0xfd8] sm:$0xff]  ;;  %v740_v40 = vld [vmem:[%s2459_s7 + $0xf60] sm:$0xff] }
 0x188   : > { %1474 = vmatpush.xpose.msrb.mxu1 %v545_v42  ;;  %1514 = vmatpush.xpose.msrb.mxu3 %v547_v43  ;;  %v742_v42 = vld [vmem:[%s2459_s7 + $0xf70] sm:$0xff]  ;;  %v741_v43 = vld [vmem:[%s2459_s7 + $0xf68] sm:$0xff] }
 0x18b   : > { %1455 = vmatpush.xpose.msrb.mxu0 %v532_v44  ;;  %1495 = vmatpush.xpose.msrb.mxu2 %v534_v45  ;;  %v743_v44 = vld [vmem:[%s2459_s7 + $0xf78] sm:$0xff]  ;;  %v728_v45 = vld [vmem:[%s2459_s7 + $0xf00] sm:$0xff] }
 0x18c   : > { %1475 = vmatpush.xpose.msrb.mxu1 %v533_v46  ;;  %1515 = vmatpush.xpose.msrb.mxu3 %v535_v47  ;;  %v730_v46 = vld [vmem:[%s2459_s7 + $0xf10] sm:$0xff]  ;;  %v729_v47 = vld [vmem:[%s2459_s7 + $0xf08] sm:$0xff] }
 0x18f   : > { %1456 = vmatpush.xpose.msrb.mxu0 %v520_v48  ;;  %1496 = vmatpush.xpose.msrb.mxu2 %v522_v49  ;;  %v731_v48 = vld [vmem:[%s2459_s7 + $0xf18] sm:$0xff]  ;;  %v716_v49 = vld [vmem:[%s2459_s7 + $0xea0] sm:$0xff] }
 0x190   : > { %1476 = vmatpush.xpose.msrb.mxu1 %v521_v50  ;;  %1516 = vmatpush.xpose.msrb.mxu3 %v523_v51  ;;  %v718_v50 = vld [vmem:[%s2459_s7 + $0xeb0] sm:$0xff]  ;;  %v717_v51 = vld [vmem:[%s2459_s7 + $0xea8] sm:$0xff] }
 0x193   : > { %1457 = vmatpush.xpose.msrb.mxu0 %v508_v52  ;;  %1497 = vmatpush.xpose.msrb.mxu2 %v510_v53  ;;  %v719_v52 = vld [vmem:[%s2459_s7 + $0xeb8] sm:$0xff]  ;;  %v704_v53 = vld [vmem:[%s2459_s7 + $0xe40] sm:$0xff] }
 0x194   : > { %1477 = vmatpush.xpose.msrb.mxu1 %v509_v54  ;;  %1517 = vmatpush.xpose.msrb.mxu3 %v511_v55  ;;  %v706_v54 = vld [vmem:[%s2459_s7 + $0xe50] sm:$0xff]  ;;  %v705_v55 = vld [vmem:[%s2459_s7 + $0xe48] sm:$0xff] }
 0x197   : > { %1458 = vmatpush.xpose.msrb.mxu0 %v496_v56  ;;  %1498 = vmatpush.xpose.msrb.mxu2 %v498_v57  ;;  %v707_v56 = vld [vmem:[%s2459_s7 + $0xe58] sm:$0xff]  ;;  %v692_v57 = vld [vmem:[%s2459_s7 + $0xde0] sm:$0xff] }
 0x198   : > { %1478 = vmatpush.xpose.msrb.mxu1 %v497_v58  ;;  %1518 = vmatpush.xpose.msrb.mxu3 %v499_v59  ;;  %v694_v58 = vld [vmem:[%s2459_s7 + $0xdf0] sm:$0xff]  ;;  %v693_v59 = vld [vmem:[%s2459_s7 + $0xde8] sm:$0xff] }
 0x19b   : > { %1459 = vmatpush.xpose.msrb.mxu0 %v484_v60  ;;  %1499 = vmatpush.xpose.msrb.mxu2 %v486_v61  ;;  %v695_v60 = vld [vmem:[%s2459_s7 + $0xdf8] sm:$0xff]  ;;  %v680_v61 = vld [vmem:[%s2459_s7 + $0xd80] sm:$0xff] }
 0x19c   : > { %1479 = vmatpush.xpose.msrb.mxu1 %v485_v62  ;;  %1519 = vmatpush.xpose.msrb.mxu3 %v487_v63  ;;  %v682_v62 = vld [vmem:[%s2459_s7 + $0xd90] sm:$0xff]  ;;  %v681_v63 = vld [vmem:[%s2459_s7 + $0xd88] sm:$0xff] }
 0x19f   : > { %1460 = vmatpush.xpose.msrb.mxu0 %v472_v0  ;;  %1500 = vmatpush.xpose.msrb.mxu2 %v474_v1  ;;  %v683_v0 = vld [vmem:[%s2459_s7 + $0xd98] sm:$0xff]  ;;  %v668_v1 = vld [vmem:[%s2459_s7 + $0xd20] sm:$0xff] }
 0x1a0   : > { %1480 = vmatpush.xpose.msrb.mxu1 %v473_v2  ;;  %1520 = vmatpush.xpose.msrb.mxu3 %v475_v3  ;;  %v670_v2 = vld [vmem:[%s2459_s7 + $0xd30] sm:$0xff]  ;;  %v669_v3 = vld [vmem:[%s2459_s7 + $0xd28] sm:$0xff] }
 0x1a3   : > { %1461 = vmatpush.xpose.msrb.mxu0 %v460_v4  ;;  %1501 = vmatpush.xpose.msrb.mxu2 %v462_v5  ;;  %v671_v4 = vld [vmem:[%s2459_s7 + $0xd38] sm:$0xff]  ;;  %v656_v5 = vld [vmem:[%s2459_s7 + $0xcc0] sm:$0xff] }
 0x1a4   : > { %1481 = vmatpush.xpose.msrb.mxu1 %v461_v6  ;;  %1521 = vmatpush.xpose.msrb.mxu3 %v463_v7  ;;  %v658_v6 = vld [vmem:[%s2459_s7 + $0xcd0] sm:$0xff]  ;;  %v657_v7 = vld [vmem:[%s2459_s7 + $0xcc8] sm:$0xff] }
 0x1a7   : > { %1462 = vmatpush.xpose.msrb.mxu0 %v448_v9  ;;  %1502 = vmatpush.xpose.msrb.mxu2 %v450_v10  ;;  %v659_v9 = vld [vmem:[%s2459_s7 + $0xcd8] sm:$0xff]  ;;  %v644_v10 = vld [vmem:[%s2459_s7 + $0xc60] sm:$0xff] }
 0x1a8   : > { %1482 = vmatpush.xpose.msrb.mxu1 %v449_v15  ;;  %1522 = vmatpush.xpose.msrb.mxu3 %v451_v12  ;;  %v647_v15 = vld [vmem:[%s2459_s7 + $0xc78] sm:$0xff]  ;;  %v632_v12 = vld [vmem:[%s2459_s7 + $0xc00] sm:$0xff] }
 0x1aa   : > { %1463 = vmatmul.f32.vlgmr.msrb.gmra.mxu0 %v2697_v22  ;;  %1503 = vmatmul.f32.vlgmr.msrb.gmra.mxu2 %v2699_v23  ;;  %v788_v22 = vld [vmem:[%s2459_s7 + $0x10e0] sm:$0xff]  ;;  %v790_v23 = vld [vmem:[%s2459_s7 + $0x10f0] sm:$0xff] }
 0x1ab   : > { %1527 = vmatpush.xpose.msra.mxu0 %v812_v11  ;;  %1567 = vmatpush.xpose.msra.mxu2 %v814_v14  ;;  %v646_v11 = vld [vmem:[%s2459_s7 + $0xc70] sm:$0xff]  ;;  %v645_v14 = vld [vmem:[%s2459_s7 + $0xc68] sm:$0xff] }
 0x1ac   : > { %1547 = vmatpush.xpose.msra.mxu1 %v813_v18  ;;  %1587 = vmatpush.xpose.msra.mxu3 %v815_v13  ;;  %v634_v18 = vld [vmem:[%s2459_s7 + $0xc10] sm:$0xff]  ;;  %v816_v13 = vld [vmem:[%s2459_s7 + $0x11c0] sm:$0xff] }
 0x1ad   : > { %1483 = vmatmul.f32.vlgmr.msrb.gmra.mxu1 %v2703_v26  ;;  %1523 = vmatmul.f32.vlgmr.msrb.gmra.mxu3 %v2705_v27  ;;  %v776_v26 = vld [vmem:[%s2459_s7 + $0x1080] sm:$0xff]  ;;  %v778_v27 = vld [vmem:[%s2459_s7 + $0x1090] sm:$0xff] }
 0x1af   : > { %1528 = vmatpush.xpose.msra.mxu0 %v800_v19  ;;  %1568 = vmatpush.xpose.msra.mxu2 %v802_v16  ;;  %v818_v19 = vld [vmem:[%s2459_s7 + $0x11d0] sm:$0xff]  ;;  %v633_v16 = vld [vmem:[%s2459_s7 + $0xc08] sm:$0xff] }
 0x1b0   : > { %1548 = vmatpush.xpose.msra.mxu1 %v801_v20  ;;  %1588 = vmatpush.xpose.msra.mxu3 %v803_v17  ;;  %v635_v20 = vld [vmem:[%s2459_s7 + $0xc18] sm:$0xff]  ;;  %v817_v17 = vld [vmem:[%s2459_s7 + $0x11c8] sm:$0xff] }
 0x1b3   : > { %1529 = vmatpush.xpose.msra.mxu0 %v788_v22  ;;  %1569 = vmatpush.xpose.msra.mxu2 %v790_v23  ;;  %v819_v22 = vld [vmem:[%s2459_s7 + $0x11d8] sm:$0xff]  ;;  %v804_v23 = vld [vmem:[%s2459_s7 + $0x1160] sm:$0xff] }
 0x1b4   : > { %1549 = vmatpush.xpose.msra.mxu1 %v789_v21  ;;  %1589 = vmatpush.xpose.msra.mxu3 %v791_v24  ;;  %v806_v21 = vld [vmem:[%s2459_s7 + $0x1170] sm:$0xff]  ;;  %v805_v24 = vld [vmem:[%s2459_s7 + $0x1168] sm:$0xff] }
 0x1b7   : > { %1530 = vmatpush.xpose.msra.mxu0 %v776_v26  ;;  %1570 = vmatpush.xpose.msra.mxu2 %v778_v27  ;;  %v807_v26 = vld [vmem:[%s2459_s7 + $0x1178] sm:$0xff]  ;;  %v792_v27 = vld [vmem:[%s2459_s7 + $0x1100] sm:$0xff] }
 0x1b8   : > { %1550 = vmatpush.xpose.msra.mxu1 %v777_v25  ;;  %1590 = vmatpush.xpose.msra.mxu3 %v779_v28  ;;  %v794_v25 = vld [vmem:[%s2459_s7 + $0x1110] sm:$0xff]  ;;  %v793_v28 = vld [vmem:[%s2459_s7 + $0x1108] sm:$0xff] }
 0x1bb   : > { %1531 = vmatpush.xpose.msra.mxu0 %v764_v29  ;;  %1571 = vmatpush.xpose.msra.mxu2 %v766_v30  ;;  %v795_v29 = vld [vmem:[%s2459_s7 + $0x1118] sm:$0xff]  ;;  %v780_v30 = vld [vmem:[%s2459_s7 + $0x10a0] sm:$0xff] }
 0x1bc   : > { %1551 = vmatpush.xpose.msra.mxu1 %v765_v31  ;;  %1591 = vmatpush.xpose.msra.mxu3 %v767_v33  ;;  %v782_v31 = vld [vmem:[%s2459_s7 + $0x10b0] sm:$0xff]  ;;  %v781_v33 = vld [vmem:[%s2459_s7 + $0x10a8] sm:$0xff] }
 0x1bf   : > { %1532 = vmatpush.xpose.msra.mxu0 %v752_v34  ;;  %1572 = vmatpush.xpose.msra.mxu2 %v754_v35  ;;  %v783_v34 = vld [vmem:[%s2459_s7 + $0x10b8] sm:$0xff]  ;;  %v768_v35 = vld [vmem:[%s2459_s7 + $0x1040] sm:$0xff] }
 0x1c0   : > { %1552 = vmatpush.xpose.msra.mxu1 %v753_v38  ;;  %1592 = vmatpush.xpose.msra.mxu3 %v755_v39  ;;  %v770_v38 = vld [vmem:[%s2459_s7 + $0x1050] sm:$0xff]  ;;  %v769_v39 = vld [vmem:[%s2459_s7 + $0x1048] sm:$0xff] }
 0x1c3   : > { %1533 = vmatpush.xpose.msra.mxu0 %v740_v40  ;;  %1573 = vmatpush.xpose.msra.mxu2 %v742_v42  ;;  %v771_v40 = vld [vmem:[%s2459_s7 + $0x1058] sm:$0xff]  ;;  %v756_v42 = vld [vmem:[%s2459_s7 + $0xfe0] sm:$0xff] }
 0x1c4   : > { %1553 = vmatpush.xpose.msra.mxu1 %v741_v43  ;;  %1593 = vmatpush.xpose.msra.mxu3 %v743_v44  ;;  %v758_v43 = vld [vmem:[%s2459_s7 + $0xff0] sm:$0xff]  ;;  %v757_v44 = vld [vmem:[%s2459_s7 + $0xfe8] sm:$0xff] }
 0x1c7   : > { %1534 = vmatpush.xpose.msra.mxu0 %v728_v45  ;;  %1574 = vmatpush.xpose.msra.mxu2 %v730_v46  ;;  %v759_v45 = vld [vmem:[%s2459_s7 + $0xff8] sm:$0xff]  ;;  %v744_v46 = vld [vmem:[%s2459_s7 + $0xf80] sm:$0xff] }
 0x1c8   : > { %1554 = vmatpush.xpose.msra.mxu1 %v729_v47  ;;  %1594 = vmatpush.xpose.msra.mxu3 %v731_v48  ;;  %v746_v47 = vld [vmem:[%s2459_s7 + $0xf90] sm:$0xff]  ;;  %v745_v48 = vld [vmem:[%s2459_s7 + $0xf88] sm:$0xff] }
 0x1cb   : > { %1535 = vmatpush.xpose.msra.mxu0 %v716_v49  ;;  %1575 = vmatpush.xpose.msra.mxu2 %v718_v50  ;;  %v747_v49 = vld [vmem:[%s2459_s7 + $0xf98] sm:$0xff]  ;;  %v732_v50 = vld [vmem:[%s2459_s7 + $0xf20] sm:$0xff] }
 0x1cc   : > { %1555 = vmatpush.xpose.msra.mxu1 %v717_v51  ;;  %1595 = vmatpush.xpose.msra.mxu3 %v719_v52  ;;  %v734_v51 = vld [vmem:[%s2459_s7 + $0xf30] sm:$0xff]  ;;  %v733_v52 = vld [vmem:[%s2459_s7 + $0xf28] sm:$0xff] }
 0x1cf   : > { %1536 = vmatpush.xpose.msra.mxu0 %v704_v53  ;;  %1576 = vmatpush.xpose.msra.mxu2 %v706_v54  ;;  %v735_v53 = vld [vmem:[%s2459_s7 + $0xf38] sm:$0xff]  ;;  %v720_v54 = vld [vmem:[%s2459_s7 + $0xec0] sm:$0xff] }
 0x1d0   : > { %1556 = vmatpush.xpose.msra.mxu1 %v705_v55  ;;  %1596 = vmatpush.xpose.msra.mxu3 %v707_v56  ;;  %v722_v55 = vld [vmem:[%s2459_s7 + $0xed0] sm:$0xff]  ;;  %v721_v56 = vld [vmem:[%s2459_s7 + $0xec8] sm:$0xff] }
 0x1d3   : > { %1537 = vmatpush.xpose.msra.mxu0 %v692_v57  ;;  %1577 = vmatpush.xpose.msra.mxu2 %v694_v58  ;;  %v723_v57 = vld [vmem:[%s2459_s7 + $0xed8] sm:$0xff]  ;;  %v708_v58 = vld [vmem:[%s2459_s7 + $0xe60] sm:$0xff] }
 0x1d4   : > { %1557 = vmatpush.xpose.msra.mxu1 %v693_v59  ;;  %1597 = vmatpush.xpose.msra.mxu3 %v695_v60  ;;  %v710_v59 = vld [vmem:[%s2459_s7 + $0xe70] sm:$0xff]  ;;  %v709_v60 = vld [vmem:[%s2459_s7 + $0xe68] sm:$0xff] }
 0x1d7   : > { %1538 = vmatpush.xpose.msra.mxu0 %v680_v61  ;;  %1578 = vmatpush.xpose.msra.mxu2 %v682_v62  ;;  %v711_v61 = vld [vmem:[%s2459_s7 + $0xe78] sm:$0xff]  ;;  %v696_v62 = vld [vmem:[%s2459_s7 + $0xe00] sm:$0xff] }
 0x1d8   : > { %1558 = vmatpush.xpose.msra.mxu1 %v681_v63  ;;  %1598 = vmatpush.xpose.msra.mxu3 %v683_v0  ;;  %v698_v63 = vld [vmem:[%s2459_s7 + $0xe10] sm:$0xff]  ;;  %v697_v0 = vld [vmem:[%s2459_s7 + $0xe08] sm:$0xff] }
 0x1db   : > { %1539 = vmatpush.xpose.msra.mxu0 %v668_v1  ;;  %1579 = vmatpush.xpose.msra.mxu2 %v670_v2  ;;  %v699_v1 = vld [vmem:[%s2459_s7 + $0xe18] sm:$0xff]  ;;  %v684_v2 = vld [vmem:[%s2459_s7 + $0xda0] sm:$0xff] }
 0x1dc   : > { %1559 = vmatpush.xpose.msra.mxu1 %v669_v3  ;;  %1599 = vmatpush.xpose.msra.mxu3 %v671_v4  ;;  %v686_v3 = vld [vmem:[%s2459_s7 + $0xdb0] sm:$0xff]  ;;  %v685_v4 = vld [vmem:[%s2459_s7 + $0xda8] sm:$0xff] }
 0x1df   : > { %1540 = vmatpush.xpose.msra.mxu0 %v656_v5  ;;  %1580 = vmatpush.xpose.msra.mxu2 %v658_v6  ;;  %v687_v5 = vld [vmem:[%s2459_s7 + $0xdb8] sm:$0xff]  ;;  %v672_v6 = vld [vmem:[%s2459_s7 + $0xd40] sm:$0xff] }
 0x1e0   : > { %1560 = vmatpush.xpose.msra.mxu1 %v657_v7  ;;  %1600 = vmatpush.xpose.msra.mxu3 %v659_v9  ;;  %v674_v7 = vld [vmem:[%s2459_s7 + $0xd50] sm:$0xff]  ;;  %v673_v9 = vld [vmem:[%s2459_s7 + $0xd48] sm:$0xff] }
 0x1e3   : > { %1541 = vmatpush.xpose.msra.mxu0 %v644_v10  ;;  %1581 = vmatpush.xpose.msra.mxu2 %v646_v11  ;;  %v675_v10 = vld [vmem:[%s2459_s7 + $0xd58] sm:$0xff]  ;;  %v660_v11 = vld [vmem:[%s2459_s7 + $0xce0] sm:$0xff] }
 0x1e4   : > { %1561 = vmatpush.xpose.msra.mxu1 %v645_v14  ;;  %1601 = vmatpush.xpose.msra.mxu3 %v647_v15  ;;  %v662_v14 = vld [vmem:[%s2459_s7 + $0xcf0] sm:$0xff]  ;;  %v661_v15 = vld [vmem:[%s2459_s7 + $0xce8] sm:$0xff] }
 0x1e7   : > { %1542 = vmatpush.xpose.msra.mxu0 %v632_v12  ;;  %1582 = vmatpush.xpose.msra.mxu2 %v634_v18  ;;  %v663_v12 = vld [vmem:[%s2459_s7 + $0xcf8] sm:$0xff]  ;;  %v648_v18 = vld [vmem:[%s2459_s7 + $0xc80] sm:$0xff] }
 0x1e8   : > { %1562 = vmatpush.xpose.msra.mxu1 %v633_v16  ;;  %1602 = vmatpush.xpose.msra.mxu3 %v635_v20  ;;  %v651_v16 = vld [vmem:[%s2459_s7 + $0xc98] sm:$0xff]  ;;  %v636_v20 = vld [vmem:[%s2459_s7 + $0xc20] sm:$0xff] }
 0x1ea   : > { %1583 = vmatmul.f32.vlgmr.msra.gmra.mxu2 %v2571_v32  ;;  %1543 = vmatmul.f32.vlgmr.msra.gmra.mxu0 %v2577_v36 }
 0x1eb   : > { %1607 = vmatpush.xpose.msrb.mxu0 %v816_v13  ;;  %1647 = vmatpush.xpose.msrb.mxu2 %v818_v19  ;;  %v650_v13 = vld [vmem:[%s2459_s7 + $0xc90] sm:$0xff]  ;;  %v649_v19 = vld [vmem:[%s2459_s7 + $0xc88] sm:$0xff] }
 0x1ec   : > { %1627 = vmatpush.xpose.msrb.mxu1 %v817_v17  ;;  %1667 = vmatpush.xpose.msrb.mxu3 %v819_v22  ;;  %v638_v17 = vld [vmem:[%s2459_s7 + $0xc30] sm:$0xff]  ;;  %v820_v22 = vld [vmem:[%s2459_s7 + $0x11e0] sm:$0xff] }
 0x1ed   : > { %1603 = vmatmul.f32.vlgmr.msra.gmra.mxu3 %v2579_v37  ;;  %1563 = vmatmul.f32.vlgmr.msra.gmra.mxu1 %v2586_v41 }
 0x1ef   : > { %1608 = vmatpush.xpose.msrb.mxu0 %v804_v23  ;;  %1648 = vmatpush.xpose.msrb.mxu2 %v806_v21  ;;  %v822_v23 = vld [vmem:[%s2459_s7 + $0x11f0] sm:$0xff]  ;;  %v637_v21 = vld [vmem:[%s2459_s7 + $0xc28] sm:$0xff] }
 0x1f0   : > { %1628 = vmatpush.xpose.msrb.mxu1 %v805_v24  ;;  %1668 = vmatpush.xpose.msrb.mxu3 %v807_v26  ;;  %v639_v24 = vld [vmem:[%s2459_s7 + $0xc38] sm:$0xff]  ;;  %v821_v26 = vld [vmem:[%s2459_s7 + $0x11e8] sm:$0xff] }
 0x1f3   : > { %1609 = vmatpush.xpose.msrb.mxu0 %v792_v27  ;;  %1649 = vmatpush.xpose.msrb.mxu2 %v794_v25  ;;  %v823_v27 = vld [vmem:[%s2459_s7 + $0x11f8] sm:$0xff]  ;;  %v808_v25 = vld [vmem:[%s2459_s7 + $0x1180] sm:$0xff] }
 0x1f4   : > { %1629 = vmatpush.xpose.msrb.mxu1 %v793_v28  ;;  %1669 = vmatpush.xpose.msrb.mxu3 %v795_v29  ;;  %v810_v28 = vld [vmem:[%s2459_s7 + $0x1190] sm:$0xff]  ;;  %v3054_v29 = vld.sshfl [vmem:[#allocation1 + $0x30] sm:$0xff pattern:$0x73625140] }
 0x1f7   : > { %1610 = vmatpush.xpose.msrb.mxu0 %v780_v30  ;;  %1650 = vmatpush.xpose.msrb.mxu2 %v782_v31  ;;  %v809_v30 = vld [vmem:[%s2459_s7 + $0x1188] sm:$0xff]  ;;  %v811_v31 = vld [vmem:[%s2459_s7 + $0x1198] sm:$0xff] }
 0x1f8   : > { %1630 = vmatpush.xpose.msrb.mxu1 %v781_v33  ;;  %1670 = vmatpush.xpose.msrb.mxu3 %v783_v34  ;;  %v3059_v33 = vld.sshfl [vmem:[#allocation1 + $0x20] sm:$0xff pattern:$0x73625140]  ;;  %v3062_v34 = vld.sshfl [vmem:[#allocation1 + $0x38] sm:$0xff pattern:$0x73625140] }
 0x1fb   : > { %1611 = vmatpush.xpose.msrb.mxu0 %v768_v35  ;;  %1651 = vmatpush.xpose.msrb.mxu2 %v770_v38  ;;  %v796_v35 = vld [vmem:[%s2459_s7 + $0x1120] sm:$0xff]  ;;  %v798_v38 = vld [vmem:[%s2459_s7 + $0x1130] sm:$0xff] }
 0x1fc   : > { %1631 = vmatpush.xpose.msrb.mxu1 %v769_v39  ;;  %1671 = vmatpush.xpose.msrb.mxu3 %v771_v40  ;;  %v3067_v39 = vld.sshfl [vmem:[#allocation1 + $0x28] sm:$0xff pattern:$0x73625140]  ;;  %v797_v40 = vld [vmem:[%s2459_s7 + $0x1128] sm:$0xff] }
 0x1ff   : > { %1612 = vmatpush.xpose.msrb.mxu0 %v756_v42  ;;  %1652 = vmatpush.xpose.msrb.mxu2 %v758_v43  ;;  %v799_v42 = vld [vmem:[%s2459_s7 + $0x1138] sm:$0xff]  ;;  %v784_v43 = vld [vmem:[%s2459_s7 + $0x10c0] sm:$0xff] }
 0x200   : > { %1632 = vmatpush.xpose.msrb.mxu1 %v757_v44  ;;  %1672 = vmatpush.xpose.msrb.mxu3 %v759_v45  ;;  %v786_v44 = vld [vmem:[%s2459_s7 + $0x10d0] sm:$0xff]  ;;  %v785_v45 = vld [vmem:[%s2459_s7 + $0x10c8] sm:$0xff] }
 0x203   : > { %1613 = vmatpush.xpose.msrb.mxu0 %v744_v46  ;;  %1653 = vmatpush.xpose.msrb.mxu2 %v746_v47  ;;  %v787_v46 = vld [vmem:[%s2459_s7 + $0x10d8] sm:$0xff]  ;;  %v772_v47 = vld [vmem:[%s2459_s7 + $0x1060] sm:$0xff] }
 0x204   : > { %1633 = vmatpush.xpose.msrb.mxu1 %v745_v48  ;;  %1673 = vmatpush.xpose.msrb.mxu3 %v747_v49  ;;  %v774_v48 = vld [vmem:[%s2459_s7 + $0x1070] sm:$0xff]  ;;  %v773_v49 = vld [vmem:[%s2459_s7 + $0x1068] sm:$0xff] }
 0x207   : > { %1614 = vmatpush.xpose.msrb.mxu0 %v732_v50  ;;  %1654 = vmatpush.xpose.msrb.mxu2 %v734_v51  ;;  %v775_v50 = vld [vmem:[%s2459_s7 + $0x1078] sm:$0xff]  ;;  %v760_v51 = vld [vmem:[%s2459_s7 + $0x1000] sm:$0xff] }
 0x208   : > { %1634 = vmatpush.xpose.msrb.mxu1 %v733_v52  ;;  %1674 = vmatpush.xpose.msrb.mxu3 %v735_v53  ;;  %v762_v52 = vld [vmem:[%s2459_s7 + $0x1010] sm:$0xff]  ;;  %v761_v53 = vld [vmem:[%s2459_s7 + $0x1008] sm:$0xff] }
 0x20b   : > { %1615 = vmatpush.xpose.msrb.mxu0 %v720_v54  ;;  %1655 = vmatpush.xpose.msrb.mxu2 %v722_v55  ;;  %v763_v54 = vld [vmem:[%s2459_s7 + $0x1018] sm:$0xff]  ;;  %v748_v55 = vld [vmem:[%s2459_s7 + $0xfa0] sm:$0xff] }
 0x20c   : > { %1635 = vmatpush.xpose.msrb.mxu1 %v721_v56  ;;  %1675 = vmatpush.xpose.msrb.mxu3 %v723_v57  ;;  %v750_v56 = vld [vmem:[%s2459_s7 + $0xfb0] sm:$0xff]  ;;  %v749_v57 = vld [vmem:[%s2459_s7 + $0xfa8] sm:$0xff] }
 0x20f   : > { %1616 = vmatpush.xpose.msrb.mxu0 %v708_v58  ;;  %1656 = vmatpush.xpose.msrb.mxu2 %v710_v59  ;;  %v751_v58 = vld [vmem:[%s2459_s7 + $0xfb8] sm:$0xff]  ;;  %v736_v59 = vld [vmem:[%s2459_s7 + $0xf40] sm:$0xff] }
 0x210   : > { %1636 = vmatpush.xpose.msrb.mxu1 %v709_v60  ;;  %1676 = vmatpush.xpose.msrb.mxu3 %v711_v61  ;;  %v738_v60 = vld [vmem:[%s2459_s7 + $0xf50] sm:$0xff]  ;;  %v737_v61 = vld [vmem:[%s2459_s7 + $0xf48] sm:$0xff] }
 0x213   : > { %1617 = vmatpush.xpose.msrb.mxu0 %v696_v62  ;;  %1657 = vmatpush.xpose.msrb.mxu2 %v698_v63  ;;  %v739_v62 = vld [vmem:[%s2459_s7 + $0xf58] sm:$0xff]  ;;  %v724_v63 = vld [vmem:[%s2459_s7 + $0xee0] sm:$0xff] }
 0x214   : > { %1637 = vmatpush.xpose.msrb.mxu1 %v697_v0  ;;  %1677 = vmatpush.xpose.msrb.mxu3 %v699_v1  ;;  %v726_v0 = vld [vmem:[%s2459_s7 + $0xef0] sm:$0xff]  ;;  %v725_v1 = vld [vmem:[%s2459_s7 + $0xee8] sm:$0xff] }
 0x217   : > { %1618 = vmatpush.xpose.msrb.mxu0 %v684_v2  ;;  %1658 = vmatpush.xpose.msrb.mxu2 %v686_v3  ;;  %v727_v2 = vld [vmem:[%s2459_s7 + $0xef8] sm:$0xff]  ;;  %v712_v3 = vld [vmem:[%s2459_s7 + $0xe80] sm:$0xff] }
 0x218   : > { %1638 = vmatpush.xpose.msrb.mxu1 %v685_v4  ;;  %1678 = vmatpush.xpose.msrb.mxu3 %v687_v5  ;;  %v714_v4 = vld [vmem:[%s2459_s7 + $0xe90] sm:$0xff]  ;;  %v713_v5 = vld [vmem:[%s2459_s7 + $0xe88] sm:$0xff] }
 0x21b   : > { %1619 = vmatpush.xpose.msrb.mxu0 %v672_v6  ;;  %1659 = vmatpush.xpose.msrb.mxu2 %v674_v7  ;;  %v715_v6 = vld [vmem:[%s2459_s7 + $0xe98] sm:$0xff]  ;;  %v700_v7 = vld [vmem:[%s2459_s7 + $0xe20] sm:$0xff] }
 0x21c   : > { %1639 = vmatpush.xpose.msrb.mxu1 %v673_v9  ;;  %1679 = vmatpush.xpose.msrb.mxu3 %v675_v10  ;;  %v702_v9 = vld [vmem:[%s2459_s7 + $0xe30] sm:$0xff]  ;;  %v701_v10 = vld [vmem:[%s2459_s7 + $0xe28] sm:$0xff] }
 0x21f   : > { %1620 = vmatpush.xpose.msrb.mxu0 %v660_v11  ;;  %1660 = vmatpush.xpose.msrb.mxu2 %v662_v14  ;;  %v703_v11 = vld [vmem:[%s2459_s7 + $0xe38] sm:$0xff]  ;;  %v688_v14 = vld [vmem:[%s2459_s7 + $0xdc0] sm:$0xff] }
 0x220   : > { %1640 = vmatpush.xpose.msrb.mxu1 %v661_v15  ;;  %1680 = vmatpush.xpose.msrb.mxu3 %v663_v12  ;;  %v690_v15 = vld [vmem:[%s2459_s7 + $0xdd0] sm:$0xff]  ;;  %v689_v12 = vld [vmem:[%s2459_s7 + $0xdc8] sm:$0xff] }
 0x223   : > { %1621 = vmatpush.xpose.msrb.mxu0 %v648_v18  ;;  %1661 = vmatpush.xpose.msrb.mxu2 %v650_v13  ;;  %v691_v18 = vld [vmem:[%s2459_s7 + $0xdd8] sm:$0xff]  ;;  %v676_v13 = vld [vmem:[%s2459_s7 + $0xd60] sm:$0xff] }
 0x224   : > { %1641 = vmatpush.xpose.msrb.mxu1 %v649_v19  ;;  %1681 = vmatpush.xpose.msrb.mxu3 %v651_v16  ;;  %v678_v19 = vld [vmem:[%s2459_s7 + $0xd70] sm:$0xff]  ;;  %v677_v16 = vld [vmem:[%s2459_s7 + $0xd68] sm:$0xff] }
 0x227   : > { %1622 = vmatpush.xpose.msrb.mxu0 %v636_v20  ;;  %1662 = vmatpush.xpose.msrb.mxu2 %v638_v17  ;;  %v679_v20 = vld [vmem:[%s2459_s7 + $0xd78] sm:$0xff]  ;;  %v664_v17 = vld [vmem:[%s2459_s7 + $0xd00] sm:$0xff] }
 0x228   : > { %1642 = vmatpush.xpose.msrb.mxu1 %v637_v21  ;;  %1682 = vmatpush.xpose.msrb.mxu3 %v639_v24  ;;  %v667_v21 = vld [vmem:[%s2459_s7 + $0xd18] sm:$0xff]  ;;  %v652_v24 = vld [vmem:[%s2459_s7 + $0xca0] sm:$0xff] }
 0x22a   : > { %1663 = vmatmul.f32.vlgmr.msrb.gmra.mxu2 %v3054_v29  ;;  %1623 = vmatmul.f32.vlgmr.msrb.gmra.mxu0 %v3059_v33 }
 0x22b   : > { %1687 = vmatpush.xpose.msra.mxu0 %v820_v22  ;;  %1727 = vmatpush.xpose.msra.mxu2 %v822_v23  ;;  %v666_v22 = vld [vmem:[%s2459_s7 + $0xd10] sm:$0xff]  ;;  %v665_v23 = vld [vmem:[%s2459_s7 + $0xd08] sm:$0xff] }
 0x22c   : > { %1707 = vmatpush.xpose.msra.mxu1 %v821_v26  ;;  %1747 = vmatpush.xpose.msra.mxu3 %v823_v27  ;;  %v654_v26 = vld [vmem:[%s2459_s7 + $0xcb0] sm:$0xff]  ;;  %v653_v27 = vld [vmem:[%s2459_s7 + $0xca8] sm:$0xff] }
 0x22d   : > { %1683 = vmatmul.f32.vlgmr.msrb.gmra.mxu3 %v3062_v34  ;;  %1643 = vmatmul.f32.vlgmr.msrb.gmra.mxu1 %v3067_v39 }
 0x22f   : > { %1688 = vmatpush.xpose.msra.mxu0 %v808_v25  ;;  %1728 = vmatpush.xpose.msra.mxu2 %v810_v28  ;;  %v655_v25 = vld [vmem:[%s2459_s7 + $0xcb8] sm:$0xff]  ;;  %v640_v28 = vld [vmem:[%s2459_s7 + $0xc40] sm:$0xff] }
 0x230   : > { %1708 = vmatpush.xpose.msra.mxu1 %v809_v30  ;;  %1748 = vmatpush.xpose.msra.mxu3 %v811_v31  ;;  %v642_v30 = vld [vmem:[%s2459_s7 + $0xc50] sm:$0xff]  ;;  %v1004_v31 = vld [vmem:[%s2459_s7 + $0x17a0] sm:$0xff] }
 0x233   : > { %1689 = vmatpush.xpose.msra.mxu0 %v796_v35  ;;  %1729 = vmatpush.xpose.msra.mxu2 %v798_v38  ;;  %v1006_v35 = vld [vmem:[%s2459_s7 + $0x17b0] sm:$0xff]  ;;  %v641_v38 = vld [vmem:[%s2459_s7 + $0xc48] sm:$0xff] }
 0x234   : > { %1709 = vmatpush.xpose.msra.mxu1 %v797_v40  ;;  %1749 = vmatpush.xpose.msra.mxu3 %v799_v42  ;;  %v643_v40 = vld [vmem:[%s2459_s7 + $0xc58] sm:$0xff]  ;;  %v1005_v42 = vld [vmem:[%s2459_s7 + $0x17a8] sm:$0xff] }
 0x237   : > { %1690 = vmatpush.xpose.msra.mxu0 %v784_v43  ;;  %1730 = vmatpush.xpose.msra.mxu2 %v786_v44  ;;  %v1007_v43 = vld [vmem:[%s2459_s7 + $0x17b8] sm:$0xff]  ;;  %v3128_v44 = vld.sshfl [vmem:[#allocation1] sm:$0xff pattern:$0x73625140] }
 0x238   : > { %1710 = vmatpush.xpose.msra.mxu1 %v785_v45  ;;  %1750 = vmatpush.xpose.msra.mxu3 %v787_v46  ;;  %v3131_v45 = vld.sshfl [vmem:[#allocation1 + $0x10] sm:$0xff pattern:$0x73625140] }
 0x239   : > { %v992_v46 = vld [vmem:[%s2459_s7 + $0x1740] sm:$0xff] }
 0x23b   : > { %1691 = vmatpush.xpose.msra.mxu0 %v772_v47  ;;  %1731 = vmatpush.xpose.msra.mxu2 %v774_v48  ;;  %v994_v47 = vld [vmem:[%s2459_s7 + $0x1750] sm:$0xff]  ;;  %v3136_v48 = vld.sshfl [vmem:[#allocation1 + $0x8] sm:$0xff pattern:$0x73625140] }
 0x23c   : > { %1711 = vmatpush.xpose.msra.mxu1 %v773_v49  ;;  %1751 = vmatpush.xpose.msra.mxu3 %v775_v50  ;;  %v3139_v49 = vld.sshfl [vmem:[#allocation1 + $0x18] sm:$0xff pattern:$0x73625140] }
 0x23d   : > { %v993_v50 = vld [vmem:[%s2459_s7 + $0x1748] sm:$0xff] }
 0x23f   : > { %1692 = vmatpush.xpose.msra.mxu0 %v760_v51  ;;  %1732 = vmatpush.xpose.msra.mxu2 %v762_v52  ;;  %v995_v51 = vld [vmem:[%s2459_s7 + $0x1758] sm:$0xff]  ;;  %v980_v52 = vld [vmem:[%s2459_s7 + $0x16e0] sm:$0xff] }
 0x240   : > { %1712 = vmatpush.xpose.msra.mxu1 %v761_v53  ;;  %1752 = vmatpush.xpose.msra.mxu3 %v763_v54  ;;  %v982_v53 = vld [vmem:[%s2459_s7 + $0x16f0] sm:$0xff]  ;;  %v981_v54 = vld [vmem:[%s2459_s7 + $0x16e8] sm:$0xff] }
 0x243   : > { %1693 = vmatpush.xpose.msra.mxu0 %v748_v55  ;;  %1733 = vmatpush.xpose.msra.mxu2 %v750_v56  ;;  %v983_v55 = vld [vmem:[%s2459_s7 + $0x16f8] sm:$0xff]  ;;  %v968_v56 = vld [vmem:[%s2459_s7 + $0x1680] sm:$0xff] }
 0x244   : > { %1713 = vmatpush.xpose.msra.mxu1 %v749_v57  ;;  %1753 = vmatpush.xpose.msra.mxu3 %v751_v58  ;;  %v970_v57 = vld [vmem:[%s2459_s7 + $0x1690] sm:$0xff]  ;;  %v969_v58 = vld [vmem:[%s2459_s7 + $0x1688] sm:$0xff] }
 0x247   : > { %1694 = vmatpush.xpose.msra.mxu0 %v736_v59  ;;  %1734 = vmatpush.xpose.msra.mxu2 %v738_v60  ;;  %v971_v59 = vld [vmem:[%s2459_s7 + $0x1698] sm:$0xff]  ;;  %v956_v60 = vld [vmem:[%s2459_s7 + $0x1620] sm:$0xff] }
 0x248   : > { %1714 = vmatpush.xpose.msra.mxu1 %v737_v61  ;;  %1754 = vmatpush.xpose.msra.mxu3 %v739_v62  ;;  %v958_v61 = vld [vmem:[%s2459_s7 + $0x1630] sm:$0xff]  ;;  %v957_v62 = vld [vmem:[%s2459_s7 + $0x1628] sm:$0xff] }
 0x24b   : > { %1695 = vmatpush.xpose.msra.mxu0 %v724_v63  ;;  %1735 = vmatpush.xpose.msra.mxu2 %v726_v0  ;;  %v959_v63 = vld [vmem:[%s2459_s7 + $0x1638] sm:$0xff]  ;;  %v944_v0 = vld [vmem:[%s2459_s7 + $0x15c0] sm:$0xff] }
 0x24c   : > { %1715 = vmatpush.xpose.msra.mxu1 %v725_v1  ;;  %1755 = vmatpush.xpose.msra.mxu3 %v727_v2  ;;  %v946_v1 = vld [vmem:[%s2459_s7 + $0x15d0] sm:$0xff]  ;;  %v945_v2 = vld [vmem:[%s2459_s7 + $0x15c8] sm:$0xff] }
 0x24f   : > { %1696 = vmatpush.xpose.msra.mxu0 %v712_v3  ;;  %1736 = vmatpush.xpose.msra.mxu2 %v714_v4  ;;  %v947_v3 = vld [vmem:[%s2459_s7 + $0x15d8] sm:$0xff]  ;;  %v932_v4 = vld [vmem:[%s2459_s7 + $0x1560] sm:$0xff] }
 0x250   : > { %1716 = vmatpush.xpose.msra.mxu1 %v713_v5  ;;  %1756 = vmatpush.xpose.msra.mxu3 %v715_v6  ;;  %v934_v5 = vld [vmem:[%s2459_s7 + $0x1570] sm:$0xff]  ;;  %v933_v6 = vld [vmem:[%s2459_s7 + $0x1568] sm:$0xff] }
 0x253   : > { %1697 = vmatpush.xpose.msra.mxu0 %v700_v7  ;;  %1737 = vmatpush.xpose.msra.mxu2 %v702_v9  ;;  %v935_v7 = vld [vmem:[%s2459_s7 + $0x1578] sm:$0xff]  ;;  %v920_v9 = vld [vmem:[%s2459_s7 + $0x1500] sm:$0xff] }
 0x254   : > { %1717 = vmatpush.xpose.msra.mxu1 %v701_v10  ;;  %1757 = vmatpush.xpose.msra.mxu3 %v703_v11  ;;  %v922_v10 = vld [vmem:[%s2459_s7 + $0x1510] sm:$0xff]  ;;  %v921_v11 = vld [vmem:[%s2459_s7 + $0x1508] sm:$0xff] }
 0x257   : > { %1698 = vmatpush.xpose.msra.mxu0 %v688_v14  ;;  %1738 = vmatpush.xpose.msra.mxu2 %v690_v15  ;;  %v923_v14 = vld [vmem:[%s2459_s7 + $0x1518] sm:$0xff]  ;;  %v908_v15 = vld [vmem:[%s2459_s7 + $0x14a0] sm:$0xff] }
 0x258   : > { %1718 = vmatpush.xpose.msra.mxu1 %v689_v12  ;;  %1758 = vmatpush.xpose.msra.mxu3 %v691_v18  ;;  %v910_v12 = vld [vmem:[%s2459_s7 + $0x14b0] sm:$0xff]  ;;  %v909_v18 = vld [vmem:[%s2459_s7 + $0x14a8] sm:$0xff] }
 0x25b   : > { %1699 = vmatpush.xpose.msra.mxu0 %v676_v13  ;;  %1739 = vmatpush.xpose.msra.mxu2 %v678_v19  ;;  %v911_v13 = vld [vmem:[%s2459_s7 + $0x14b8] sm:$0xff]  ;;  %v896_v19 = vld [vmem:[%s2459_s7 + $0x1440] sm:$0xff] }
 0x25c   : > { %1719 = vmatpush.xpose.msra.mxu1 %v677_v16  ;;  %1759 = vmatpush.xpose.msra.mxu3 %v679_v20  ;;  %v898_v16 = vld [vmem:[%s2459_s7 + $0x1450] sm:$0xff]  ;;  %v897_v20 = vld [vmem:[%s2459_s7 + $0x1448] sm:$0xff] }
 0x25f   : > { %1700 = vmatpush.xpose.msra.mxu0 %v664_v17  ;;  %1740 = vmatpush.xpose.msra.mxu2 %v666_v22  ;;  %v899_v17 = vld [vmem:[%s2459_s7 + $0x1458] sm:$0xff]  ;;  %v884_v22 = vld [vmem:[%s2459_s7 + $0x13e0] sm:$0xff] }
 0x260   : > { %1720 = vmatpush.xpose.msra.mxu1 %v665_v23  ;;  %1760 = vmatpush.xpose.msra.mxu3 %v667_v21  ;;  %v886_v23 = vld [vmem:[%s2459_s7 + $0x13f0] sm:$0xff]  ;;  %v885_v21 = vld [vmem:[%s2459_s7 + $0x13e8] sm:$0xff] }
 0x263   : > { %1701 = vmatpush.xpose.msra.mxu0 %v652_v24  ;;  %1741 = vmatpush.xpose.msra.mxu2 %v654_v26  ;;  %v887_v24 = vld [vmem:[%s2459_s7 + $0x13f8] sm:$0xff]  ;;  %v872_v26 = vld [vmem:[%s2459_s7 + $0x1380] sm:$0xff] }
 0x264   : > { %1721 = vmatpush.xpose.msra.mxu1 %v653_v27  ;;  %1761 = vmatpush.xpose.msra.mxu3 %v655_v25  ;;  %v874_v27 = vld [vmem:[%s2459_s7 + $0x1390] sm:$0xff]  ;;  %v873_v25 = vld [vmem:[%s2459_s7 + $0x1388] sm:$0xff] }
 0x267   : > { %1702 = vmatpush.xpose.msra.mxu0 %v640_v28  ;;  %1742 = vmatpush.xpose.msra.mxu2 %v642_v30  ;;  %v875_v28 = vld [vmem:[%s2459_s7 + $0x1398] sm:$0xff]  ;;  %v860_v30 = vld [vmem:[%s2459_s7 + $0x1320] sm:$0xff] }
 0x268   : > { %1722 = vmatpush.xpose.msra.mxu1 %v641_v38  ;;  %1762 = vmatpush.xpose.msra.mxu3 %v643_v40  ;;  %v863_v38 = vld [vmem:[%s2459_s7 + $0x1338] sm:$0xff]  ;;  %v848_v40 = vld [vmem:[%s2459_s7 + $0x12c0] sm:$0xff] }
 0x26a   : > { %1703 = vmatmul.f32.vlgmr.msra.gmra.mxu0 %v3128_v44  ;;  %1743 = vmatmul.f32.vlgmr.msra.gmra.mxu2 %v3131_v45 }
 0x26b   : > { %1767 = vmatpush.xpose.msrb.mxu0 %v1004_v31  ;;  %1807 = vmatpush.xpose.msrb.mxu2 %v1006_v35  ;;  %v862_v31 = vld [vmem:[%s2459_s7 + $0x1330] sm:$0xff]  ;;  %v861_v35 = vld [vmem:[%s2459_s7 + $0x1328] sm:$0xff] }
 0x26c   : > { %1787 = vmatpush.xpose.msrb.mxu1 %v1005_v42  ;;  %1827 = vmatpush.xpose.msrb.mxu3 %v1007_v43  ;;  %v850_v42 = vld [vmem:[%s2459_s7 + $0x12d0] sm:$0xff]  ;;  %v849_v43 = vld [vmem:[%s2459_s7 + $0x12c8] sm:$0xff] }
 0x26d   : > { %1723 = vmatmul.f32.vlgmr.msra.gmra.mxu1 %v3136_v48  ;;  %1763 = vmatmul.f32.vlgmr.msra.gmra.mxu3 %v3139_v49 }
 0x26f   : > { %1768 = vmatpush.xpose.msrb.mxu0 %v992_v46  ;;  %1808 = vmatpush.xpose.msrb.mxu2 %v994_v47  ;;  %v851_v46 = vld [vmem:[%s2459_s7 + $0x12d8] sm:$0xff]  ;;  %v836_v47 = vld [vmem:[%s2459_s7 + $0x1260] sm:$0xff] }
 0x270   : > { %1788 = vmatpush.xpose.msrb.mxu1 %v993_v50  ;;  %1828 = vmatpush.xpose.msrb.mxu3 %v995_v51  ;;  %v838_v50 = vld [vmem:[%s2459_s7 + $0x1270] sm:$0xff]  ;;  %v837_v51 = vld [vmem:[%s2459_s7 + $0x1268] sm:$0xff] }
 0x273   : > { %1769 = vmatpush.xpose.msrb.mxu0 %v980_v52  ;;  %1809 = vmatpush.xpose.msrb.mxu2 %v982_v53  ;;  %v839_v52 = vld [vmem:[%s2459_s7 + $0x1278] sm:$0xff]  ;;  %v824_v53 = vld [vmem:[%s2459_s7 + $0x1200] sm:$0xff] }
 0x274   : > { %1789 = vmatpush.xpose.msrb.mxu1 %v981_v54  ;;  %1829 = vmatpush.xpose.msrb.mxu3 %v983_v55  ;;  %v826_v54 = vld [vmem:[%s2459_s7 + $0x1210] sm:$0xff]  ;;  %v1008_v55 = vld [vmem:[%s2459_s7 + $0x17c0] sm:$0xff] }
 0x277   : > { %1770 = vmatpush.xpose.msrb.mxu0 %v968_v56  ;;  %1810 = vmatpush.xpose.msrb.mxu2 %v970_v57  ;;  %v1010_v56 = vld [vmem:[%s2459_s7 + $0x17d0] sm:$0xff]  ;;  %v825_v57 = vld [vmem:[%s2459_s7 + $0x1208] sm:$0xff] }
 0x278   : > { %1790 = vmatpush.xpose.msrb.mxu1 %v969_v58  ;;  %1830 = vmatpush.xpose.msrb.mxu3 %v971_v59  ;;  %v827_v58 = vld [vmem:[%s2459_s7 + $0x1218] sm:$0xff]  ;;  %v1009_v59 = vld [vmem:[%s2459_s7 + $0x17c8] sm:$0xff] }
 0x27b   : > { %1771 = vmatpush.xpose.msrb.mxu0 %v956_v60  ;;  %1811 = vmatpush.xpose.msrb.mxu2 %v958_v61  ;;  %v1011_v60 = vld [vmem:[%s2459_s7 + $0x17d8] sm:$0xff]  ;;  %v996_v61 = vld [vmem:[%s2459_s7 + $0x1760] sm:$0xff] }
 0x27c   : > { %1791 = vmatpush.xpose.msrb.mxu1 %v957_v62  ;;  %1831 = vmatpush.xpose.msrb.mxu3 %v959_v63  ;;  %v998_v62 = vld [vmem:[%s2459_s7 + $0x1770] sm:$0xff]  ;;  %v997_v63 = vld [vmem:[%s2459_s7 + $0x1768] sm:$0xff] }
 0x27f   : > { %1772 = vmatpush.xpose.msrb.mxu0 %v944_v0  ;;  %1812 = vmatpush.xpose.msrb.mxu2 %v946_v1  ;;  %v999_v0 = vld [vmem:[%s2459_s7 + $0x1778] sm:$0xff]  ;;  %v984_v1 = vld [vmem:[%s2459_s7 + $0x1700] sm:$0xff] }
 0x280   : > { %1792 = vmatpush.xpose.msrb.mxu1 %v945_v2  ;;  %1832 = vmatpush.xpose.msrb.mxu3 %v947_v3  ;;  %v986_v2 = vld [vmem:[%s2459_s7 + $0x1710] sm:$0xff]  ;;  %v985_v3 = vld [vmem:[%s2459_s7 + $0x1708] sm:$0xff] }
 0x283   : > { %1773 = vmatpush.xpose.msrb.mxu0 %v932_v4  ;;  %1813 = vmatpush.xpose.msrb.mxu2 %v934_v5  ;;  %v987_v4 = vld [vmem:[%s2459_s7 + $0x1718] sm:$0xff]  ;;  %v973_v5 = vld [vmem:[%s2459_s7 + $0x16a8] sm:$0xff] }
 0x284   : > { %1793 = vmatpush.xpose.msrb.mxu1 %v933_v6  ;;  %1833 = vmatpush.xpose.msrb.mxu3 %v935_v7  ;;  %v962_v6 = vld [vmem:[%s2459_s7 + $0x1650] sm:$0xff]  ;;  %v961_v7 = vld [vmem:[%s2459_s7 + $0x1648] sm:$0xff] }
 0x287   : > { %1774 = vmatpush.xpose.msrb.mxu0 %v920_v9  ;;  %1814 = vmatpush.xpose.msrb.mxu2 %v922_v10  ;;  %v963_v9 = vld [vmem:[%s2459_s7 + $0x1658] sm:$0xff]  ;;  %v948_v10 = vld [vmem:[%s2459_s7 + $0x15e0] sm:$0xff] }
 0x288   : > { %1794 = vmatpush.xpose.msrb.mxu1 %v921_v11  ;;  %1834 = vmatpush.xpose.msrb.mxu3 %v923_v14  ;;  %v950_v11 = vld [vmem:[%s2459_s7 + $0x15f0] sm:$0xff]  ;;  %v949_v14 = vld [vmem:[%s2459_s7 + $0x15e8] sm:$0xff] }
 0x28b   : > { %1775 = vmatpush.xpose.msrb.mxu0 %v908_v15  ;;  %1815 = vmatpush.xpose.msrb.mxu2 %v910_v12  ;;  %v951_v15 = vld [vmem:[%s2459_s7 + $0x15f8] sm:$0xff]  ;;  %v936_v12 = vld [vmem:[%s2459_s7 + $0x1580] sm:$0xff] }
 0x28c   : > { %1795 = vmatpush.xpose.msrb.mxu1 %v909_v18  ;;  %1835 = vmatpush.xpose.msrb.mxu3 %v911_v13  ;;  %v938_v18 = vld [vmem:[%s2459_s7 + $0x1590] sm:$0xff]  ;;  %v937_v13 = vld [vmem:[%s2459_s7 + $0x1588] sm:$0xff] }
 0x28f   : > { %1776 = vmatpush.xpose.msrb.mxu0 %v896_v19  ;;  %1816 = vmatpush.xpose.msrb.mxu2 %v898_v16  ;;  %v939_v19 = vld [vmem:[%s2459_s7 + $0x1598] sm:$0xff]  ;;  %v924_v16 = vld [vmem:[%s2459_s7 + $0x1520] sm:$0xff] }
 0x290   : > { %1796 = vmatpush.xpose.msrb.mxu1 %v897_v20  ;;  %1836 = vmatpush.xpose.msrb.mxu3 %v899_v17  ;;  %v926_v20 = vld [vmem:[%s2459_s7 + $0x1530] sm:$0xff]  ;;  %v925_v17 = vld [vmem:[%s2459_s7 + $0x1528] sm:$0xff] }
 0x293   : > { %1777 = vmatpush.xpose.msrb.mxu0 %v884_v22  ;;  %1817 = vmatpush.xpose.msrb.mxu2 %v886_v23  ;;  %v927_v22 = vld [vmem:[%s2459_s7 + $0x1538] sm:$0xff]  ;;  %v912_v23 = vld [vmem:[%s2459_s7 + $0x14c0] sm:$0xff] }
 0x294   : > { %1797 = vmatpush.xpose.msrb.mxu1 %v885_v21  ;;  %1837 = vmatpush.xpose.msrb.mxu3 %v887_v24  ;;  %v914_v21 = vld [vmem:[%s2459_s7 + $0x14d0] sm:$0xff]  ;;  %v913_v24 = vld [vmem:[%s2459_s7 + $0x14c8] sm:$0xff] }
 0x297   : > { %1778 = vmatpush.xpose.msrb.mxu0 %v872_v26  ;;  %1818 = vmatpush.xpose.msrb.mxu2 %v874_v27  ;;  %v915_v26 = vld [vmem:[%s2459_s7 + $0x14d8] sm:$0xff]  ;;  %v900_v27 = vld [vmem:[%s2459_s7 + $0x1460] sm:$0xff] }
 0x298   : > { %1798 = vmatpush.xpose.msrb.mxu1 %v873_v25  ;;  %1838 = vmatpush.xpose.msrb.mxu3 %v875_v28  ;;  %v902_v25 = vld [vmem:[%s2459_s7 + $0x1470] sm:$0xff]  ;;  %v901_v28 = vld [vmem:[%s2459_s7 + $0x1468] sm:$0xff] }
 0x29b   : > { %1779 = vmatpush.xpose.msrb.mxu0 %v860_v30  ;;  %1819 = vmatpush.xpose.msrb.mxu2 %v862_v31  ;;  %v903_v30 = vld [vmem:[%s2459_s7 + $0x1478] sm:$0xff]  ;;  %v888_v31 = vld [vmem:[%s2459_s7 + $0x1400] sm:$0xff] }
 0x29c   : > { %1799 = vmatpush.xpose.msrb.mxu1 %v861_v35  ;;  %1839 = vmatpush.xpose.msrb.mxu3 %v863_v38  ;;  %v890_v35 = vld [vmem:[%s2459_s7 + $0x1410] sm:$0xff]  ;;  %v889_v38 = vld [vmem:[%s2459_s7 + $0x1408] sm:$0xff] }
 0x29f   : > { %1780 = vmatpush.xpose.msrb.mxu0 %v848_v40  ;;  %1820 = vmatpush.xpose.msrb.mxu2 %v850_v42  ;;  %v891_v40 = vld [vmem:[%s2459_s7 + $0x1418] sm:$0xff]  ;;  %v876_v42 = vld [vmem:[%s2459_s7 + $0x13a0] sm:$0xff] }
 0x2a0   : > { %1800 = vmatpush.xpose.msrb.mxu1 %v849_v43  ;;  %1840 = vmatpush.xpose.msrb.mxu3 %v851_v46  ;;  %v878_v43 = vld [vmem:[%s2459_s7 + $0x13b0] sm:$0xff]  ;;  %v877_v46 = vld [vmem:[%s2459_s7 + $0x13a8] sm:$0xff] }
 0x2a3   : > { %1781 = vmatpush.xpose.msrb.mxu0 %v836_v47  ;;  %1821 = vmatpush.xpose.msrb.mxu2 %v838_v50  ;;  %v879_v47 = vld [vmem:[%s2459_s7 + $0x13b8] sm:$0xff]  ;;  %v864_v50 = vld [vmem:[%s2459_s7 + $0x1340] sm:$0xff] }
 0x2a4   : > { %1801 = vmatpush.xpose.msrb.mxu1 %v837_v51  ;;  %1841 = vmatpush.xpose.msrb.mxu3 %v839_v52  ;;  %v866_v51 = vld [vmem:[%s2459_s7 + $0x1350] sm:$0xff]  ;;  %v865_v52 = vld [vmem:[%s2459_s7 + $0x1348] sm:$0xff] }
 0x2a7   : > { %1782 = vmatpush.xpose.msrb.mxu0 %v824_v53  ;;  %1822 = vmatpush.xpose.msrb.mxu2 %v826_v54  ;;  %v867_v53 = vld [vmem:[%s2459_s7 + $0x1358] sm:$0xff]  ;;  %v852_v54 = vld [vmem:[%s2459_s7 + $0x12e0] sm:$0xff] }
 0x2a8   : > { %1802 = vmatpush.xpose.msrb.mxu1 %v825_v57  ;;  %1842 = vmatpush.xpose.msrb.mxu3 %v827_v58  ;;  %v855_v57 = vld [vmem:[%s2459_s7 + $0x12f8] sm:$0xff]  ;;  %v840_v58 = vld [vmem:[%s2459_s7 + $0x1280] sm:$0xff] }
 0x2aa   : > { %1823 = vmatmul.f32.vlgmr.msrb.gmra.mxu2 %v2571_v32  ;;  %1783 = vmatmul.f32.vlgmr.msrb.gmra.mxu0 %v2577_v36  ;;  %v972_v32 = vld [vmem:[%s2459_s7 + $0x16a0] sm:$0xff]  ;;  %v974_v36 = vld [vmem:[%s2459_s7 + $0x16b0] sm:$0xff] }
 0x2ab   : > { %1847 = vmatpush.xpose.msra.mxu0 %v1008_v55  ;;  %1887 = vmatpush.xpose.msra.mxu2 %v1010_v56  ;;  %v854_v55 = vld [vmem:[%s2459_s7 + $0x12f0] sm:$0xff]  ;;  %v853_v56 = vld [vmem:[%s2459_s7 + $0x12e8] sm:$0xff] }
 0x2ac   : > { %1867 = vmatpush.xpose.msra.mxu1 %v1009_v59  ;;  %1907 = vmatpush.xpose.msra.mxu3 %v1011_v60  ;;  %v842_v59 = vld [vmem:[%s2459_s7 + $0x1290] sm:$0xff]  ;;  %v841_v60 = vld [vmem:[%s2459_s7 + $0x1288] sm:$0xff] }
 0x2ad   : > { %1843 = vmatmul.f32.vlgmr.msrb.gmra.mxu3 %v2579_v37  ;;  %1803 = vmatmul.f32.vlgmr.msrb.gmra.mxu1 %v2586_v41  ;;  %v975_v37 = vld [vmem:[%s2459_s7 + $0x16b8] sm:$0xff]  ;;  %v960_v41 = vld [vmem:[%s2459_s7 + $0x1640] sm:$0xff] }
 0x2af   : > { %1848 = vmatpush.xpose.msra.mxu0 %v996_v61  ;;  %1888 = vmatpush.xpose.msra.mxu2 %v998_v62  ;;  %v843_v61 = vld [vmem:[%s2459_s7 + $0x1298] sm:$0xff]  ;;  %v828_v62 = vld [vmem:[%s2459_s7 + $0x1220] sm:$0xff] }
 0x2b0   : > { %1868 = vmatpush.xpose.msra.mxu1 %v997_v63  ;;  %1908 = vmatpush.xpose.msra.mxu3 %v999_v0  ;;  %v830_v63 = vld [vmem:[%s2459_s7 + $0x1230] sm:$0xff]  ;;  %v1012_v0 = vld [vmem:[%s2459_s7 + $0x17e0] sm:$0xff] }
 0x2b3   : > { %1849 = vmatpush.xpose.msra.mxu0 %v984_v1  ;;  %1889 = vmatpush.xpose.msra.mxu2 %v986_v2  ;;  %v1014_v1 = vld [vmem:[%s2459_s7 + $0x17f0] sm:$0xff]  ;;  %v829_v2 = vld [vmem:[%s2459_s7 + $0x1228] sm:$0xff] }
 0x2b4   : > { %1869 = vmatpush.xpose.msra.mxu1 %v985_v3  ;;  %1909 = vmatpush.xpose.msra.mxu3 %v987_v4  ;;  %v831_v3 = vld [vmem:[%s2459_s7 + $0x1238] sm:$0xff]  ;;  %v1013_v4 = vld [vmem:[%s2459_s7 + $0x17e8] sm:$0xff] }
 0x2b7   : > { %1850 = vmatpush.xpose.msra.mxu0 %v972_v32  ;;  %1890 = vmatpush.xpose.msra.mxu2 %v974_v36  ;;  %v1015_v32 = vld [vmem:[%s2459_s7 + $0x17f8] sm:$0xff]  ;;  %v1000_v36 = vld [vmem:[%s2459_s7 + $0x1780] sm:$0xff] }
 0x2b8   : > { %1870 = vmatpush.xpose.msra.mxu1 %v973_v5  ;;  %1910 = vmatpush.xpose.msra.mxu3 %v975_v37  ;;  %v1002_v5 = vld [vmem:[%s2459_s7 + $0x1790] sm:$0xff]  ;;  %v1001_v37 = vld [vmem:[%s2459_s7 + $0x1788] sm:$0xff] }
 0x2bb   : > { %1851 = vmatpush.xpose.msra.mxu0 %v960_v41  ;;  %1891 = vmatpush.xpose.msra.mxu2 %v962_v6  ;;  %v1003_v41 = vld [vmem:[%s2459_s7 + $0x1798] sm:$0xff]  ;;  %v988_v6 = vld [vmem:[%s2459_s7 + $0x1720] sm:$0xff] }
 0x2bc   : > { %1871 = vmatpush.xpose.msra.mxu1 %v961_v7  ;;  %1911 = vmatpush.xpose.msra.mxu3 %v963_v9  ;;  %v990_v7 = vld [vmem:[%s2459_s7 + $0x1730] sm:$0xff]  ;;  %v991_v9 = vld [vmem:[%s2459_s7 + $0x1738] sm:$0xff] }
 0x2bf   : > { %1852 = vmatpush.xpose.msra.mxu0 %v948_v10  ;;  %1892 = vmatpush.xpose.msra.mxu2 %v950_v11  ;;  %v978_v10 = vld [vmem:[%s2459_s7 + $0x16d0] sm:$0xff]  ;;  %v979_v11 = vld [vmem:[%s2459_s7 + $0x16d8] sm:$0xff] }
 0x2c0   : > { %1872 = vmatpush.xpose.msra.mxu1 %v949_v14  ;;  %1912 = vmatpush.xpose.msra.mxu3 %v951_v15  ;;  %v966_v14 = vld [vmem:[%s2459_s7 + $0x1670] sm:$0xff]  ;;  %v965_v15 = vld [vmem:[%s2459_s7 + $0x1668] sm:$0xff] }
 0x2c3   : > { %1853 = vmatpush.xpose.msra.mxu0 %v936_v12  ;;  %1893 = vmatpush.xpose.msra.mxu2 %v938_v18  ;;  %v967_v12 = vld [vmem:[%s2459_s7 + $0x1678] sm:$0xff]  ;;  %v952_v18 = vld [vmem:[%s2459_s7 + $0x1600] sm:$0xff] }
 0x2c4   : > { %1873 = vmatpush.xpose.msra.mxu1 %v937_v13  ;;  %1913 = vmatpush.xpose.msra.mxu3 %v939_v19  ;;  %v954_v13 = vld [vmem:[%s2459_s7 + $0x1610] sm:$0xff]  ;;  %v953_v19 = vld [vmem:[%s2459_s7 + $0x1608] sm:$0xff] }
 0x2c7   : > { %1854 = vmatpush.xpose.msra.mxu0 %v924_v16  ;;  %1894 = vmatpush.xpose.msra.mxu2 %v926_v20  ;;  %v955_v16 = vld [vmem:[%s2459_s7 + $0x1618] sm:$0xff]  ;;  %v940_v20 = vld [vmem:[%s2459_s7 + $0x15a0] sm:$0xff] }
 0x2c8   : > { %1874 = vmatpush.xpose.msra.mxu1 %v925_v17  ;;  %1914 = vmatpush.xpose.msra.mxu3 %v927_v22  ;;  %v942_v17 = vld [vmem:[%s2459_s7 + $0x15b0] sm:$0xff]  ;;  %v941_v22 = vld [vmem:[%s2459_s7 + $0x15a8] sm:$0xff] }
 0x2cb   : > { %1855 = vmatpush.xpose.msra.mxu0 %v912_v23  ;;  %1895 = vmatpush.xpose.msra.mxu2 %v914_v21  ;;  %v943_v23 = vld [vmem:[%s2459_s7 + $0x15b8] sm:$0xff]  ;;  %v928_v21 = vld [vmem:[%s2459_s7 + $0x1540] sm:$0xff] }
 0x2cc   : > { %1875 = vmatpush.xpose.msra.mxu1 %v913_v24  ;;  %1915 = vmatpush.xpose.msra.mxu3 %v915_v26  ;;  %v930_v24 = vld [vmem:[%s2459_s7 + $0x1550] sm:$0xff]  ;;  %v929_v26 = vld [vmem:[%s2459_s7 + $0x1548] sm:$0xff] }
 0x2cf   : > { %1856 = vmatpush.xpose.msra.mxu0 %v900_v27  ;;  %1896 = vmatpush.xpose.msra.mxu2 %v902_v25  ;;  %v931_v27 = vld [vmem:[%s2459_s7 + $0x1558] sm:$0xff]  ;;  %v916_v25 = vld [vmem:[%s2459_s7 + $0x14e0] sm:$0xff] }
 0x2d0   : > { %1876 = vmatpush.xpose.msra.mxu1 %v901_v28  ;;  %1916 = vmatpush.xpose.msra.mxu3 %v903_v30  ;;  %v918_v28 = vld [vmem:[%s2459_s7 + $0x14f0] sm:$0xff]  ;;  %v917_v30 = vld [vmem:[%s2459_s7 + $0x14e8] sm:$0xff] }
 0x2d3   : > { %1857 = vmatpush.xpose.msra.mxu0 %v888_v31  ;;  %1897 = vmatpush.xpose.msra.mxu2 %v890_v35  ;;  %v919_v31 = vld [vmem:[%s2459_s7 + $0x14f8] sm:$0xff]  ;;  %v904_v35 = vld [vmem:[%s2459_s7 + $0x1480] sm:$0xff] }
 0x2d4   : > { %1877 = vmatpush.xpose.msra.mxu1 %v889_v38  ;;  %1917 = vmatpush.xpose.msra.mxu3 %v891_v40  ;;  %v906_v38 = vld [vmem:[%s2459_s7 + $0x1490] sm:$0xff]  ;;  %v905_v40 = vld [vmem:[%s2459_s7 + $0x1488] sm:$0xff] }
 0x2d7   : > { %1858 = vmatpush.xpose.msra.mxu0 %v876_v42  ;;  %1898 = vmatpush.xpose.msra.mxu2 %v878_v43  ;;  %v907_v42 = vld [vmem:[%s2459_s7 + $0x1498] sm:$0xff]  ;;  %v892_v43 = vld [vmem:[%s2459_s7 + $0x1420] sm:$0xff] }
 0x2d8   : > { %1878 = vmatpush.xpose.msra.mxu1 %v877_v46  ;;  %1918 = vmatpush.xpose.msra.mxu3 %v879_v47  ;;  %v894_v46 = vld [vmem:[%s2459_s7 + $0x1430] sm:$0xff]  ;;  %v893_v47 = vld [vmem:[%s2459_s7 + $0x1428] sm:$0xff] }
 0x2db   : > { %1859 = vmatpush.xpose.msra.mxu0 %v864_v50  ;;  %1899 = vmatpush.xpose.msra.mxu2 %v866_v51  ;;  %v895_v50 = vld [vmem:[%s2459_s7 + $0x1438] sm:$0xff]  ;;  %v880_v51 = vld [vmem:[%s2459_s7 + $0x13c0] sm:$0xff] }
 0x2dc   : > { %1879 = vmatpush.xpose.msra.mxu1 %v865_v52  ;;  %1919 = vmatpush.xpose.msra.mxu3 %v867_v53  ;;  %v882_v52 = vld [vmem:[%s2459_s7 + $0x13d0] sm:$0xff]  ;;  %v881_v53 = vld [vmem:[%s2459_s7 + $0x13c8] sm:$0xff] }
 0x2df   : > { %1860 = vmatpush.xpose.msra.mxu0 %v852_v54  ;;  %1900 = vmatpush.xpose.msra.mxu2 %v854_v55  ;;  %v883_v54 = vld [vmem:[%s2459_s7 + $0x13d8] sm:$0xff]  ;;  %v868_v55 = vld [vmem:[%s2459_s7 + $0x1360] sm:$0xff] }
 0x2e0   : > { %1880 = vmatpush.xpose.msra.mxu1 %v853_v56  ;;  %1920 = vmatpush.xpose.msra.mxu3 %v855_v57  ;;  %v870_v56 = vld [vmem:[%s2459_s7 + $0x1370] sm:$0xff]  ;;  %v869_v57 = vld [vmem:[%s2459_s7 + $0x1368] sm:$0xff] }
 0x2e3   : > { %1861 = vmatpush.xpose.msra.mxu0 %v840_v58  ;;  %1901 = vmatpush.xpose.msra.mxu2 %v842_v59  ;;  %v871_v58 = vld [vmem:[%s2459_s7 + $0x1378] sm:$0xff]  ;;  %v856_v59 = vld [vmem:[%s2459_s7 + $0x1300] sm:$0xff] }
 0x2e4   : > { %1881 = vmatpush.xpose.msra.mxu1 %v841_v60  ;;  %1921 = vmatpush.xpose.msra.mxu3 %v843_v61  ;;  %v858_v60 = vld [vmem:[%s2459_s7 + $0x1310] sm:$0xff]  ;;  %v857_v61 = vld [vmem:[%s2459_s7 + $0x1308] sm:$0xff] }
 0x2e7   : > { %1862 = vmatpush.xpose.msra.mxu0 %v828_v62  ;;  %1902 = vmatpush.xpose.msra.mxu2 %v830_v63  ;;  %v859_v62 = vld [vmem:[%s2459_s7 + $0x1318] sm:$0xff]  ;;  %v844_v63 = vld [vmem:[%s2459_s7 + $0x12a0] sm:$0xff] }
 0x2e8   : > { %1882 = vmatpush.xpose.msra.mxu1 %v829_v2  ;;  %1922 = vmatpush.xpose.msra.mxu3 %v831_v3  ;;  %v847_v2 = vld [vmem:[%s2459_s7 + $0x12b8] sm:$0xff]  ;;  %v832_v3 = vld [vmem:[%s2459_s7 + $0x1240] sm:$0xff] }
 0x2ea   : > { %1903 = vmatmul.f32.vlgmr.msra.gmra.mxu2 %v3054_v29  ;;  %1863 = vmatmul.f32.vlgmr.msra.gmra.mxu0 %v3059_v33  ;;  %v989_v29 = vld [vmem:[%s2459_s7 + $0x1728] sm:$0xff]  ;;  %v976_v33 = vld [vmem:[%s2459_s7 + $0x16c0] sm:$0xff] }
 0x2eb   : > { %1927 = vmatpush.xpose.msrb.mxu0 %v1012_v0  ;;  %1967 = vmatpush.xpose.msrb.mxu2 %v1014_v1  ;;  %v846_v0 = vld [vmem:[%s2459_s7 + $0x12b0] sm:$0xff]  ;;  %v845_v1 = vld [vmem:[%s2459_s7 + $0x12a8] sm:$0xff] }
 0x2ec   : > { %1947 = vmatpush.xpose.msrb.mxu1 %v1013_v4  ;;  %1987 = vmatpush.xpose.msrb.mxu3 %v1015_v32  ;;  %v834_v4 = vld [vmem:[%s2459_s7 + $0x1250] sm:$0xff]  ;;  %v833_v32 = vld [vmem:[%s2459_s7 + $0x1248] sm:$0xff] }
 0x2ed   : > { %1923 = vmatmul.f32.vlgmr.msra.gmra.mxu3 %v3062_v34  ;;  %1883 = vmatmul.f32.vlgmr.msra.gmra.mxu1 %v3067_v39  ;;  %v977_v34 = vld [vmem:[%s2459_s7 + $0x16c8] sm:$0xff]  ;;  %v964_v39 = vld [vmem:[%s2459_s7 + $0x1660] sm:$0xff] }
 0x2ef   : > { %1928 = vmatpush.xpose.msrb.mxu0 %v1000_v36  ;;  %1968 = vmatpush.xpose.msrb.mxu2 %v1002_v5  ;;  %v835_v36 = vld [vmem:[%s2459_s7 + $0x1258] sm:$0xff]  ;;  %v3340_v5 = vpop.f32.mrf.mxu1 }
 0x2f0   : > { %1948 = vmatpush.xpose.msrb.mxu1 %v1001_v37  ;;  %1988 = vmatpush.xpose.msrb.mxu3 %v1003_v41  ;;  %v1224_v37 = vpop.f32.mrf.mxu0  ;;  %v3342_v41 = vpop.f32.mrf.mxu2 }
 0x2f3   : > { %1929 = vmatpush.xpose.msrb.mxu0 %v988_v6  ;;  %1969 = vmatpush.xpose.msrb.mxu2 %v990_v7  ;;  %v3344_v6 = vpop.f32.mrf.mxu3 }
 0x2f4   : > { %1949 = vmatpush.xpose.msrb.mxu1 %v989_v29  ;;  %1989 = vmatpush.xpose.msrb.mxu3 %v991_v9 }
 0x2f7   : > { %1930 = vmatpush.xpose.msrb.mxu0 %v976_v33  ;;  %1970 = vmatpush.xpose.msrb.mxu2 %v978_v10  ;;  %v1324_v7 = vpop.f32.mrf.mxu1 }
 0x2f8   : > { %1950 = vmatpush.xpose.msrb.mxu1 %v977_v34  ;;  %1990 = vmatpush.xpose.msrb.mxu3 %v979_v11  ;;  %v1304_v29 = vpop.f32.mrf.mxu0  ;;  %v1344_v9 = vpop.f32.mrf.mxu2 }
 0x2fb   : > { %1931 = vmatpush.xpose.msrb.mxu0 %v964_v39  ;;  %1971 = vmatpush.xpose.msrb.mxu2 %v966_v14  ;;  %v1364_v33 = vpop.f32.mrf.mxu3 }
 0x2fc   : > { %1951 = vmatpush.xpose.msrb.mxu1 %v965_v15  ;;  %1991 = vmatpush.xpose.msrb.mxu3 %v967_v12 }
 0x2ff   : > { %1932 = vmatpush.xpose.msrb.mxu0 %v952_v18  ;;  %1972 = vmatpush.xpose.msrb.mxu2 %v954_v13  ;;  %v1404_v10 = vpop.f32.mrf.mxu1 }
 0x300   : > { %1952 = vmatpush.xpose.msrb.mxu1 %v953_v19  ;;  %1992 = vmatpush.xpose.msrb.mxu3 %v955_v16  ;;  %v1384_v34 = vpop.f32.mrf.mxu0 }
 0x303   : > { %1933 = vmatpush.xpose.msrb.mxu0 %v940_v20  ;;  %1973 = vmatpush.xpose.msrb.mxu2 %v942_v17  ;;  %v1444_v11 = vpop.f32.mrf.mxu3 }
 0x304   : > { %1953 = vmatpush.xpose.msrb.mxu1 %v941_v22  ;;  %1993 = vmatpush.xpose.msrb.mxu3 %v943_v23 }
 0x307   : > { %1934 = vmatpush.xpose.msrb.mxu0 %v928_v21  ;;  %1974 = vmatpush.xpose.msrb.mxu2 %v930_v24  ;;  %v1325_v21 = vadd.f32 %v1324_v7, %v1304_v29 }
 0x308   : > { %1954 = vmatpush.xpose.msrb.mxu1 %v929_v26  ;;  %1994 = vmatpush.xpose.msrb.mxu3 %v931_v27  ;;  %v1464_v39 = vpop.f32.mrf.mxu0 }
 0x30b   : > { %1935 = vmatpush.xpose.msrb.mxu0 %v916_v25  ;;  %1975 = vmatpush.xpose.msrb.mxu2 %v918_v28  ;;  %v1524_v14 = vpop.f32.mrf.mxu3  ;;  %v1345_v25 = vadd.f32 %v1344_v9, %v1325_v21 }
 0x30c   : > { %1955 = vmatpush.xpose.msrb.mxu1 %v917_v30  ;;  %1995 = vmatpush.xpose.msrb.mxu3 %v919_v31 }
 0x30f   : > { %1936 = vmatpush.xpose.msrb.mxu0 %v904_v35  ;;  %1976 = vmatpush.xpose.msrb.mxu2 %v906_v38  ;;  %v1365_v38 = vadd.f32 %v1364_v33, %v1345_v25 }
 0x310   : > { %1956 = vmatpush.xpose.msrb.mxu1 %v905_v40  ;;  %1996 = vmatpush.xpose.msrb.mxu3 %v907_v42  ;;  %v1544_v15 = vpop.f32.mrf.mxu0 }
 0x313   : > { %1937 = vmatpush.xpose.msrb.mxu0 %v892_v43  ;;  %1977 = vmatpush.xpose.msrb.mxu2 %v894_v46  ;;  %v1604_v18 = vpop.f32.mrf.mxu3  ;;  %v1385_v46 = vadd.f32 %v1384_v34, %v1365_v38 }
 0x314   : > { %1957 = vmatpush.xpose.msrb.mxu1 %v893_v47  ;;  %1997 = vmatpush.xpose.msrb.mxu3 %v895_v50 }
 0x317   : > { %1938 = vmatpush.xpose.msrb.mxu0 %v880_v51  ;;  %1978 = vmatpush.xpose.msrb.mxu2 %v882_v52  ;;  %v1405_v52 = vadd.f32 %v1404_v10, %v1385_v46 }
 0x318   : > { %1958 = vmatpush.xpose.msrb.mxu1 %v881_v53  ;;  %1998 = vmatpush.xpose.msrb.mxu3 %v883_v54  ;;  %v1624_v19 = vpop.f32.mrf.mxu0 }
 0x31b   : > { %1939 = vmatpush.xpose.msrb.mxu0 %v868_v55  ;;  %1979 = vmatpush.xpose.msrb.mxu2 %v870_v56  ;;  %v1684_v20 = vpop.f32.mrf.mxu3 }
 0x31c   : > { %1959 = vmatpush.xpose.msrb.mxu1 %v869_v57  ;;  %1999 = vmatpush.xpose.msrb.mxu3 %v871_v58 }
 0x31f   : > { %1940 = vmatpush.xpose.msrb.mxu0 %v856_v59  ;;  %1980 = vmatpush.xpose.msrb.mxu2 %v858_v60 }
 0x320   : > { %1960 = vmatpush.xpose.msrb.mxu1 %v857_v61  ;;  %2000 = vmatpush.xpose.msrb.mxu3 %v859_v62  ;;  %v1704_v22 = vpop.f32.mrf.mxu0 }
 0x323   : > { %1941 = vmatpush.xpose.msrb.mxu0 %v844_v63  ;;  %1981 = vmatpush.xpose.msrb.mxu2 %v846_v0  ;;  %v1764_v26 = vpop.f32.mrf.mxu3 }
 0x324   : > { %1961 = vmatpush.xpose.msrb.mxu1 %v845_v1  ;;  %2001 = vmatpush.xpose.msrb.mxu3 %v847_v2 }
 0x327   : > { %1942 = vmatpush.xpose.msrb.mxu0 %v832_v3  ;;  %1982 = vmatpush.xpose.msrb.mxu2 %v834_v4 }
 0x328   : > { %1962 = vmatpush.xpose.msrb.mxu1 %v833_v32  ;;  %2002 = vmatpush.xpose.msrb.mxu3 %v835_v36  ;;  %v1784_v28 = vpop.f32.mrf.mxu0  ;;  %v1225_v32 = vadd.f32 %v1224_v37, %v2796_v8 }
 0x32a   : > { %1943 = vmatmul.f32.vlgmr.msrb.gmra.mxu0 %v3128_v44  ;;  %1983 = vmatmul.f32.vlgmr.msrb.gmra.mxu2 %v3131_v45  ;;  %v1424_v44 = vpop.f32.mrf.mxu2  ;;  %v1484_v45 = vpop.f32.mrf.mxu1  ;;  %v1245_v10 = vadd.f32 %v3340_v5, %v1225_v32 }
 0x32b   : > { %1963 = vmatmul.f32.vlgmr.msrb.gmra.mxu1 %v3136_v48  ;;  %2003 = vmatmul.f32.vlgmr.msrb.gmra.mxu3 %v3139_v49  ;;  %v1425_v56 = vadd.f32 %v1424_v44, %v1405_v52 }
 0x32d   : > { %v1445_v60 = vadd.f32 %v1444_v11, %v1425_v56 }
 0x32f   : > { %v1465_v61 = vadd.f32 %v1464_v39, %v1445_v60  ;;  %v1265_v39 = vadd.f32 %v3342_v41, %v1245_v10 }
 0x330   : > { %v1844_v43 = vpop.f32.mrf.mxu3 }
 0x331   : > { %v1485_v2 = vadd.f32 %v1484_v45, %v1465_v61  ;;  %v1285_v8 = vadd.f32 %v3344_v6, %v1265_v39 }
 0x332   : > { %v1504_v48 = vpop.f32.mrf.mxu2  ;;  %v1564_v49 = vpop.f32.mrf.mxu1 }
 0x333   : > { %v1565_v24 = vadd.f32 %v1564_v49, %v1544_v15  ;;  %v1505_v36 = vadd.f32 %v1504_v48, %v1485_v2 }
 0x335   : > { %v1525_v34 = vadd.f32 %v1524_v14, %v1505_v36 }
 0x337   : > { %v2011_v45 = vrot.slane %v1525_v34, 6 }
 0x339   : > { %v2015_v5 = vsel %vm2014_vm0, %v1285_v8, %v2011_v45 }
 0x33a   : > { %v1584_v12 = vpop.f32.mrf.mxu2  ;;  %v1644_v13 = vpop.f32.mrf.mxu1 }
 0x33b   : > { %v1585_v30 = vadd.f32 %v1584_v12, %v1565_v24 }
 0x33d   : > { %v1605_v40 = vadd.f32 %v1604_v18, %v1585_v30 }
 0x33f   : > { %v1625_v47 = vadd.f32 %v1624_v19, %v1605_v40 }
 0x341   : > { %v1645_v53 = vadd.f32 %v1644_v13, %v1625_v47  ;;  %v241_v13 = vld [vmem:[#allocation2] sm:$0xff] }
 0x342   : > { %v1664_v16 = vpop.f32.mrf.mxu2  ;;  %v1724_v17 = vpop.f32.mrf.mxu1 }
 0x343   : > { %v1665_v57 = vadd.f32 %v1664_v16, %v1645_v53 }
 0x345   : > { %v1685_v62 = vadd.f32 %v1684_v20, %v1665_v57 }
 0x347   : > { %v1705_v1 = vadd.f32 %v1704_v22, %v1685_v62 }
 0x349   : > { %v1725_v7 = vadd.f32 %v1724_v17, %v1705_v1 }
 0x34a   : > { %v1744_v23 = vpop.f32.mrf.mxu2  ;;  %v1804_v27 = vpop.f32.mrf.mxu1 }
 0x34b   : > { %v1805_v31 = vadd.f32 %v1804_v27, %v1784_v28  ;;  %v1745_v33 = vadd.f32 %v1744_v23, %v1725_v7 }
 0x34d   : > { %v1765_v49 = vadd.f32 %v1764_v26, %v1745_v33 }
 0x34f   : > { %v2012_v37 = vrot.slane %v1765_v49, 4 }
 0x352   : > { %v1824_v35 = vpop.f32.mrf.mxu2 }
 0x353   : > { %v1825_v42 = vadd.f32 %v1824_v35, %v1805_v31 }
 0x355   : > { %v1845_v50 = vadd.f32 %v1844_v43, %v1825_v42 }
 0x367   : > { %v1864_v51 = vpop.f32.mrf.mxu0 }
 0x368   : > { %v1865_v54 = vadd.f32 %v1864_v51, %v1845_v50 }
 0x36a   : > { %v1884_v55 = vpop.f32.mrf.mxu1 }
 0x36b   : > { %v1885_v58 = vadd.f32 %v1884_v55, %v1865_v54 }
 0x36d   : > { %v1904_v59 = vpop.f32.mrf.mxu2 }
 0x36e   : > { %v1905_v63 = vadd.f32 %v1904_v59, %v1885_v58 }
 0x370   : > { %v1924_v0 = vpop.f32.mrf.mxu3 }
 0x371   : > { %v1925_v3 = vadd.f32 %v1924_v0, %v1905_v63 }
 0x3a7   : > { %v1944_v4 = vpop.f32.mrf.mxu0 }
 0x3a8   : > { %v1945_v29 = vadd.f32 %v1944_v4, %v1925_v3  ;;  %v1964_v9 = vpop.f32.mrf.mxu1 }
 0x3aa   : > { %v1965_v44 = vadd.f32 %v1964_v9, %v1945_v29 }
 0x3ad   : > { %v1984_v11 = vpop.f32.mrf.mxu2 }
 0x3ae   : > { %v1985_v15 = vadd.f32 %v1984_v11, %v1965_v44  ;;  %v2004_v12 = vpop.f32.mrf.mxu3 }
 0x3b0   : > { %v2005_v18 = vadd.f32 %v2004_v12, %v1985_v15 }
 0x3b2   : > { %v2013_v48 = vrot.slane %v2005_v18, 2 }
 0x3b4   : > { %v2017_v14 = vsel %vm2016_vm1, %v2012_v37, %v2013_v48  ;;  %2026 = sbr.rel (%p2143_p2) target bundleno = 965 (0x3c5), region = 48 }
 0x3b5   : > { %v2019_v19 = vsel %vm2018_vm2, %v2015_v5, %v2017_v14 }
 0x3b6   : > { %v2021_v41 = vadd.f32 %v2019_v19, %v241_v13 }
 0x3b8   : > { %2022 = vst [vmem:[#allocation2] sm:$0xff] %v2021_v41 }
 0x3b9   : > { %v2028_v16 = vld [vmem:[#allocation5] sm:$0xf] }
 0x3ba   : > { %v2030_v20 = vperm.slane %v2028_v16, 0  ;;  %v2031_v17 = vperm.slane %v2028_v16, 1  ;;  %v2032_v22 = vperm.slane %v2028_v16, 2  ;;  %v2033_v6 = vperm.slane %v2028_v16, 3 }
 0x3bc   : > { %v2034_v23 = vrot.slane %v2031_v17, 6  ;;  %v2035_v21 = vrot.slane %v2032_v22, 4  ;;  %v2036_v24 = vrot.slane %v2033_v6, 2 }
 0x3be   : > { %v2037_v27 = vsel %vm2014_vm0, %v2030_v20, %v2034_v23  ;;  %v2038_v25 = vsel %vm2016_vm1, %v2035_v21, %v2036_v24 }
 0x3bf   : > { %v2027_v26 = vld [vmem:[#allocation2] sm:$0xff]  ;;  %v2039_v28 = vsel %vm2018_vm2, %v2037_v27, %v2038_v25 }
 0x3c0   : > { %v2041_v30 = vadd.f32 %v2039_v28, %v2027_v26 }
 0x3c2   : > { %v2042_v31 = vmax.f32 %v2041_v30, 0.0 }
 0x3c4   : > { %2043 = vst [vmem:[%s3381_s3] sm:$0xff] %v2042_v31 }
 0x3c5 PF: > { %s17_s17 = sadd.s32 1, %s2344_s17   ;;  %s3387_s12 = smov %s2328_s13 }
 0x3c6   : > { %p14_p3 = scmp.ge.s32.totalorder %s17_s17, 4   ;;  %s3388_s13 = smov %s2332_s14 }
 0x3c7   : > { %s3389_s14 = smov %s2452_s21  ;;  %s3390_s15 = smov %s2340_s16 }
 0x3c8   : > { %s3391_s16 = smov %s3393_s30  ;;  %16 = sbr.rel (!%p14_p3) target bundleno = 5 (0x5), region = 87 }
 0x3cd   :  { %2066 = vsyncpa [#allocation4], 1 }
 0x3ce   :  { %2068 = vsyncpa [#allocation4 + $0x1], 1 }
 0x3cf   :  { %2069 = vsyncpa [#allocation6], 1 }

</bundles_post_ra>
